<compile_context>
chip_gen: v5e
topology: v5e:2x2
jax: 0.10.0
libtpu: 0.0.40
codegen_flags: <defaults>
</compile_context>

<pallas_src>
import math
import functools

import jax
import jax.numpy as jnp
from jax.experimental import pallas as pl
from jax.experimental.pallas import tpu as pltpu

BN_EPS = 1e-5
ACT_DTYPE = jnp.bfloat16      # inter-kernel activation dtype


def _parallel():
    return pltpu.CompilerParams(dimension_semantics=("parallel",))


# ---------------------------------------------------------------------------
# Kernels (one per network stage, gridded over batch)
# ---------------------------------------------------------------------------

def _head_kernel(p_ref, w_ref, s_ref, b_ref, o_ref):
    """im2col'd 7x7/s2 head conv as a single matmul, fused BN + ReLU epilogue."""
    y = jnp.dot(p_ref[0], w_ref[...], preferred_element_type=jnp.float32)
    y = jnp.maximum(y * s_ref[...] + b_ref[...], 0.0)
    o_ref[0] = y.astype(o_ref.dtype)


def _maxpool_kernel(t_ref, o_ref, *, taps):
    """3x3/s2 max pool: glue pre-gathered the stride-2 taps, kernel reduces."""
    acc = t_ref[0, 0].astype(jnp.float32)
    for t in range(1, taps):
        acc = jnp.maximum(acc, t_ref[0, t].astype(jnp.float32))
    o_ref[0] = acc.astype(o_ref.dtype)


def _bottleneck_kernel(x_ref, s1_ref, b1_ref, w1_ref, s2_ref, b2_ref, w2_ref,
                       f1x_ref, f1n_ref, f1b_ref, f2w_ref, f2b_ref,
                       o_ref, pad_scr, new_scr, *, H, W):
    """Fused SEDenseBottleneck for one sample:
       BN1+ReLU -> 1x1 conv -> BN2+ReLU -> 3x3 conv (pad 1) -> virtual concat
       -> SE (GAP -> fc1+ReLU -> fc2 -> sigmoid) -> channel scaling."""
    Wp = W + 2
    M = H * W
    M2 = (H + 2) * Wp
    cin = x_ref.shape[-1]
    gr = w2_ref.shape[-1]

    x = x_ref[0].astype(jnp.float32)                                  # (M, Cin)

    # bn1 + relu + conv1(1x1) + bn2 + relu around one MXU matmul
    h = jnp.maximum(x * s1_ref[...] + b1_ref[...], 0.0)
    h = jnp.dot(h.astype(jnp.bfloat16), w1_ref[...],
                preferred_element_type=jnp.float32)
    h = jnp.maximum(h * s2_ref[...] + b2_ref[...], 0.0)               # (M, planes)

    # zero-padded (pad=1) copy of h, flattened row-major into a VMEM scratch
    pad_scr[...] = jnp.zeros_like(pad_scr)
    for i in range(H):
        pad_scr[pl.ds((i + 1) * Wp + 1, W), :] = h[i * W:(i + 1) * W, :]
    padded = pad_scr[...].astype(jnp.bfloat16)   # single cast, hoisted out of the tap loop

    # 3x3 conv = 9 tap-shifted matmuls accumulated into one f32 accumulator
    acc = jnp.zeros((M2, gr), jnp.float32)
    for ki in range(3):
        for kj in range(3):
            off = ki * Wp + kj
            acc = acc + jnp.dot(padded[off:off + M2, :], w2_ref[ki * 3 + kj],
                                preferred_element_type=jnp.float32)
    # keep only valid output rows (output (ho,wo) lives at padded-flat ho*Wp+wo)
    for ho in range(H):
        new_scr[pl.ds(ho * W, W), :] = acc[ho * Wp:ho * Wp + W, :]
    new = new_scr[...]                                                # (M, gr)

    # SE on the (virtual) concat [x, new]
    inv_m = 1.0 / M
    gap_x = jnp.sum(x, axis=0, keepdims=True) * inv_m                 # (1, Cin)
    gap_n = jnp.sum(new, axis=0, keepdims=True) * inv_m               # (1, gr)
    hse = (jnp.dot(gap_x.astype(jnp.bfloat16), f1x_ref[...],
                   preferred_element_type=jnp.float32)
           + jnp.dot(gap_n.astype(jnp.bfloat16), f1n_ref[...],
                     preferred_element_type=jnp.float32)
           + f1b_ref[...])
    hse = jnp.maximum(hse, 0.0)
    s = jnp.dot(hse.astype(jnp.bfloat16), f2w_ref[...],
                preferred_element_type=jnp.float32) + f2b_ref[...]
    s = jax.nn.sigmoid(s)                                             # (1, Cin+gr)

    # scaled concat written straight into the two channel ranges of the output
    o_ref[0, :, :cin] = (x * s[:, :cin]).astype(o_ref.dtype)
    o_ref[0, :, cin:] = (new * s[:, cin:]).astype(o_ref.dtype)


def _transition_kernel(x_ref, s_ref, b_ref, w_ref, o_ref, pool_scr, *, H, W):
    """Fused Transition: BN+ReLU -> 2x2/s2 avg pool -> 1x1 conv.
       (avg pool commutes with the 1x1 conv, so pool first: 4x fewer rows.)
       x_ref packs horizontally adjacent pixel pairs along the channel axis."""
    C = w_ref.shape[0]
    W2 = W // 2
    a = x_ref[0].astype(jnp.float32)                       # (H*W2, 2C)
    a = jnp.maximum(a * s_ref[...] + b_ref[...], 0.0)      # per-pixel BN + ReLU
    hp = (a[:, :C] + a[:, C:]) * 0.5                       # horizontal 2-average
    for ho in range(H // 2):                               # vertical 2-average
        top = hp[(2 * ho) * W2:(2 * ho) * W2 + W2, :]
        bot = hp[(2 * ho + 1) * W2:(2 * ho + 1) * W2 + W2, :]
        pool_scr[pl.ds(ho * W2, W2), :] = (top + bot) * 0.5
    y = jnp.dot(pool_scr[...].astype(jnp.bfloat16), w_ref[...],
                preferred_element_type=jnp.float32)
    o_ref[0] = y.astype(o_ref.dtype)


def _final_kernel(x_ref, s_ref, b_ref, w_ref, fb_ref, o_ref):
    """Fused final BN (affine) -> global average pool -> linear classifier."""
    x = x_ref[...].astype(jnp.float32)                  # (N, HW, C)
    gap = jnp.sum(x, axis=1) * (1.0 / x.shape[1])       # (N, C)
    gap = gap * s_ref[...] + b_ref[...]                 # BN affine commutes with GAP
    o_ref[...] = jnp.dot(gap.astype(jnp.bfloat16), w_ref[...],
                         preferred_element_type=jnp.float32) + fb_ref[...]


# ---------------------------------------------------------------------------
# Wrappers
# ---------------------------------------------------------------------------

def head_conv(x_nhwc, w, scale, bias, *, stride=2, pad=3):
    """7x7/s2 conv + BN + ReLU via stride-2 im2col + one Pallas matmul."""
    n, h, wd, cin = x_nhwc.shape
    kh, kw, _, cout = w.shape
    ho = (h + 2 * pad - kh) // stride + 1
    wo = (wd + 2 * pad - kw) // stride + 1
    xp = jnp.pad(x_nhwc, ((0, 0), (pad, pad), (pad, pad), (0, 0)))
    taps = [xp[:, ki:ki + stride * (ho - 1) + 1:stride,
               kj:kj + stride * (wo - 1) + 1:stride, :]
            for ki in range(kh) for kj in range(kw)]
    patches = jnp.concatenate(taps, axis=-1)                 # (N, Ho, Wo, kh*kw*Cin)
    m, kdim = ho * wo, kh * kw * cin
    patches = patches.reshape(n, m, kdim).astype(jnp.bfloat16)
    wt = w.reshape(kdim, cout)
    out = pl.pallas_call(
        _head_kernel,
        grid=(n,),
        in_specs=[pl.BlockSpec((1, m, kdim), lambda i: (i, 0, 0)),
                  pl.BlockSpec((kdim, cout), lambda i: (0, 0)),
                  pl.BlockSpec((1, cout), lambda i: (0, 0)),
                  pl.BlockSpec((1, cout), lambda i: (0, 0))],
        out_specs=pl.BlockSpec((1, m, cout), lambda i: (i, 0, 0)),
        out_shape=jax.ShapeDtypeStruct((n, m, cout), ACT_DTYPE),
        compiler_params=_parallel(),
    )(patches, wt, scale.reshape(1, cout), bias.reshape(1, cout))
    return out, ho, wo


def maxpool_3x3_s2(x, h, w):
    """3x3 / stride-2 / pad-1 max pool on (N, H*W, C) activations."""
    n, _, c = x.shape
    ho, wo = (h + 1) // 2, (w + 1) // 2
    # post-ReLU activations are >= 0, so zero padding == -inf padding for max
    xp = jnp.pad(x.reshape(n, h, w, c), ((0, 0), (1, 1), (1, 1), (0, 0)))
    taps = [xp[:, di:di + 2 * (ho - 1) + 1:2, dj:dj + 2 * (wo - 1) + 1:2, :]
            for di in range(3) for dj in range(3)]
    t = jnp.stack(taps, axis=1).reshape(n, 9, ho * wo, c)
    out = pl.pallas_call(
        functools.partial(_maxpool_kernel, taps=9),
        grid=(n,),
        in_specs=[pl.BlockSpec((1, 9, ho * wo, c), lambda i: (i, 0, 0, 0))],
        out_specs=pl.BlockSpec((1, ho * wo, c), lambda i: (i, 0, 0)),
        out_shape=jax.ShapeDtypeStruct((n, ho * wo, c), ACT_DTYPE),
        compiler_params=_parallel(),
    )(t)
    return out, ho, wo


def bottleneck(p, x, h, w):
    n, m, cin = x.shape
    assert m == h * w
    planes = p["w1"].shape[1]
    gr = p["w2"].shape[-1]
    cout = cin + gr
    hidden = p["fc2_w"].shape[0]
    wp = w + 2
    m2 = (h + 2) * wp
    tail = 2 * wp + 2
    kern = functools.partial(_bottleneck_kernel, H=h, W=w)
    return pl.pallas_call(
        kern,
        grid=(n,),
        in_specs=[
            pl.BlockSpec((1, m, cin), lambda i: (i, 0, 0)),
            pl.BlockSpec((1, cin), lambda i: (0, 0)),
            pl.BlockSpec((1, cin), lambda i: (0, 0)),
            pl.BlockSpec((cin, planes), lambda i: (0, 0)),
            pl.BlockSpec((1, planes), lambda i: (0, 0)),
            pl.BlockSpec((1, planes), lambda i: (0, 0)),
            pl.BlockSpec((9, planes, gr), lambda i: (0, 0, 0)),
            pl.BlockSpec((cin, hidden), lambda i: (0, 0)),
            pl.BlockSpec((gr, hidden), lambda i: (0, 0)),
            pl.BlockSpec((1, hidden), lambda i: (0, 0)),
            pl.BlockSpec((hidden, cout), lambda i: (0, 0)),
            pl.BlockSpec((1, cout), lambda i: (0, 0)),
        ],
        out_specs=pl.BlockSpec((1, m, cout), lambda i: (i, 0, 0)),
        out_shape=jax.ShapeDtypeStruct((n, m, cout), ACT_DTYPE),
        scratch_shapes=[pltpu.VMEM((m2 + tail, planes), jnp.float32),
                        pltpu.VMEM((m, gr), jnp.float32)],
        compiler_params=_parallel(),
    )(x,
      p["bn1"]["scale"].reshape(1, cin), p["bn1"]["bias"].reshape(1, cin),
      p["w1"],
      p["bn2"]["scale"].reshape(1, planes), p["bn2"]["bias"].reshape(1, planes),
      p["w2"],
      p["fc1_w"][:cin], p["fc1_w"][cin:], p["fc1_b"].reshape(1, hidden),
      p["fc2_w"], p["fc2_b"].reshape(1, cout))


def transition(p, x, h, w):
    n, m, c = x.shape
    outc = p["w"].shape[1]
    ho, wo = h // 2, w // 2
    mo = ho * wo
    x2 = x.reshape(n, m // 2, 2 * c)      # free reshape: pack horizontal pixel pairs
    s2 = jnp.concatenate([p["bn"]["scale"], p["bn"]["scale"]]).reshape(1, 2 * c)
    b2 = jnp.concatenate([p["bn"]["bias"], p["bn"]["bias"]]).reshape(1, 2 * c)
    kern = functools.partial(_transition_kernel, H=h, W=w)
    out = pl.pallas_call(
        kern,
        grid=(n,),
        in_specs=[
            pl.BlockSpec((1, m // 2, 2 * c), lambda i: (i, 0, 0)),
            pl.BlockSpec((1, 2 * c), lambda i: (0, 0)),
            pl.BlockSpec((1, 2 * c), lambda i: (0, 0)),
            pl.BlockSpec((c, outc), lambda i: (0, 0)),
        ],
        out_specs=pl.BlockSpec((1, mo, outc), lambda i: (i, 0, 0)),
        out_shape=jax.ShapeDtypeStruct((n, mo, outc), ACT_DTYPE),
        scratch_shapes=[pltpu.VMEM((mo, c), jnp.float32)],
        compiler_params=_parallel(),
    )(x2, s2, b2, p["w"])
    return out, ho, wo


def final_head(x, bn, fc_w, fc_b):
    n, _, c = x.shape
    ncls = fc_w.shape[1]
    return pl.pallas_call(
        _final_kernel,
        out_shape=jax.ShapeDtypeStruct((n, ncls), jnp.float32),
    )(x, bn["scale"].reshape(1, c), bn["bias"].reshape(1, c),
      fc_w, fc_b.reshape(1, ncls))


# ---------------------------------------------------------------------------
# Parameter initialization (shapes / distributions follow the PyTorch module)
# ---------------------------------------------------------------------------

def conv_init(key, kh, kw, cin, cout):
    std = math.sqrt(2.0 / (kh * kw * cout))
    w = jax.random.normal(key, (kh, kw, cin, cout), jnp.float32) * std
    return w.astype(jnp.bfloat16)


def conv1x1_init(key, cin, cout):
    std = math.sqrt(2.0 / cout)
    w = jax.random.normal(key, (cin, cout), jnp.float32) * std
    return w.astype(jnp.bfloat16)


def bn_init(c):
    # inference-mode BN with gamma=1, beta=0, running_mean=0, running_var=1
    scale = jnp.full((c,), 1.0 / math.sqrt(1.0 + BN_EPS), jnp.float32)
    bias = jnp.zeros((c,), jnp.float32)
    return {"scale": scale, "bias": bias}


def linear_init(key, cin, cout):
    w = (jax.random.normal(key, (cin, cout), jnp.float32) * 1e-4).astype(jnp.bfloat16)
    b = jnp.zeros((cout,), jnp.float32)
    return w, b


def init_sedensenet(key, growthRate=8, layers=(1, 1, 1, 1), num_classes=10,
                    increasingRate=1, compressionRate=2):
    keys = iter(jax.random.split(key, 256))
    params = {}
    headplanes = growthRate * increasingRate ** 2
    inplanes = headplanes * 2
    params["conv1"] = conv_init(next(keys), 7, 7, 3, headplanes * 2)
    params["bn1"] = bn_init(headplanes * 2)

    dense, trans = [], []
    gr = growthRate
    for si, nblocks in enumerate(layers):
        blocks = []
        for _ in range(nblocks):
            planes = 4 * gr
            outp = inplanes + gr
            hidden = outp // 16
            bp = {
                "bn1": bn_init(inplanes),
                "w1": conv1x1_init(next(keys), inplanes, planes),
                "bn2": bn_init(planes),
                "w2": conv_init(next(keys), 3, 3, planes, gr).reshape(9, planes, gr),
            }
            bp["fc1_w"], bp["fc1_b"] = linear_init(next(keys), outp, hidden)
            bp["fc2_w"], bp["fc2_b"] = linear_init(next(keys), hidden, outp)
            blocks.append(bp)
            inplanes = outp
        dense.append(blocks)
        if si < 3:
            outc = int(math.floor(inplanes // compressionRate))
            trans.append({"bn": bn_init(inplanes),
                          "w": conv1x1_init(next(keys), inplanes, outc)})
            inplanes = outc
            gr *= increasingRate

    params["dense"] = dense
    params["trans"] = trans
    params["bn"] = bn_init(inplanes)
    params["fc_w"], params["fc_b"] = linear_init(next(keys), inplanes, num_classes)
    return params


# ---------------------------------------------------------------------------
# Forward pass
# ---------------------------------------------------------------------------

def sedensenet_forward(params, x_nchw):
    # layout: transpose the PyTorch NCHW input to NHWC for all kernels
    x = jnp.transpose(x_nchw, (0, 2, 3, 1)).astype(jnp.float32)
    x, h, w = head_conv(x, params["conv1"],
                        params["bn1"]["scale"], params["bn1"]["bias"])
    x, h, w = maxpool_3x3_s2(x, h, w)
    for si in range(4):
        for bp in params["dense"][si]:
            # TODO(synk): dropout (dropRate>0) not implemented; dropRate=0 -> no-op.
            x = bottleneck(bp, x, h, w)
        if si < 3:
            x, h, w = transition(params["trans"][si], x, h, w)
    return final_head(x, params["bn"], params["fc_w"], params["fc_b"])


# ---------------------------------------------------------------------------

if __name__ == "__main__":
    key = jax.random.PRNGKey(0)
    pkey, xkey = jax.random.split(key)

    params = init_sedensenet(pkey, growthRate=8, layers=(1, 1, 1, 1),
                             num_classes=10, increasingRate=1, compressionRate=2)
    x = jax.random.normal(xkey, (2, 3, 32, 32), jnp.float32)   # NCHW, like PyTorch

    fwd = jax.jit(sedensenet_forward)
    logits = fwd(params, x)
    jax.block_until_ready(logits)

    assert logits.shape == (2, 10)
    assert bool(jnp.all(jnp.isfinite(logits)))
    print("KERNEL_OK")
</pallas_src>

<mosaic_0001>
module attributes {stable_mosaic.version = 11 : i64} {
  func.func @_head_kernel(%arg0: i32, %arg1: memref<1x256x147xbf16, #tpu.memory_space<vmem>>, %arg2: memref<147x16xbf16, #tpu.memory_space<vmem>>, %arg3: memref<1x16xf32, #tpu.memory_space<vmem>>, %arg4: memref<1x16xf32, #tpu.memory_space<vmem>>, %arg5: memref<1x256x16xbf16, #tpu.memory_space<vmem>>) attributes {dimension_semantics = [#tpu.dimension_semantics<parallel>], iteration_bounds = array<i64: 2>, scalar_prefetch = 0 : i64, scratch_operands = 0 : i64, tpu.core_type = #tpu.core_type<tc>, window_params = [{transform_indices = @transform_0, window_bounds = array<i64: 1, 256, 147>}, {pipeline_mode = #tpu.pipeline_mode<synchronous>, transform_indices = @transform_1, window_bounds = array<i64: 147, 16>}, {pipeline_mode = #tpu.pipeline_mode<synchronous>, transform_indices = @transform_2, window_bounds = array<i64: 1, 16>}, {pipeline_mode = #tpu.pipeline_mode<synchronous>, transform_indices = @transform_3, window_bounds = array<i64: 1, 16>}, {transform_indices = @transform_4, window_bounds = array<i64: 1, 256, 16>}]} {
    %c0 = arith.constant 0 : index
    %c0_0 = arith.constant 0 : index
    %c0_1 = arith.constant 0 : index
    %0 = vector.load %arg1[%c0, %c0_0, %c0_1] : memref<1x256x147xbf16, #tpu.memory_space<vmem>>, vector<1x256x147xbf16>
    %1 = vector.shape_cast %0 : vector<1x256x147xbf16> to vector<256x147xbf16>
    %c0_2 = arith.constant 0 : index
    %c0_3 = arith.constant 0 : index
    %2 = vector.load %arg2[%c0_2, %c0_3] : memref<147x16xbf16, #tpu.memory_space<vmem>>, vector<147x16xbf16>
    %cst = arith.constant dense<0.000000e+00> : vector<256x16xf32>
    %3 = tpu.matmul %1, %2, %cst {dimension_numbers = #tpu.dot_dimension_numbers<[1], [0], [0], [1], [0, 0, 1, 1], [], []>} : vector<256x147xbf16>, vector<147x16xbf16>, vector<256x16xf32> -> vector<256x16xf32>
    %c0_4 = arith.constant 0 : index
    %c0_5 = arith.constant 0 : index
    %4 = vector.load %arg3[%c0_4, %c0_5] : memref<1x16xf32, #tpu.memory_space<vmem>>, vector<1x16xf32>
    %5 = vector.broadcast %4 : vector<1x16xf32> to vector<256x16xf32>
    %6 = arith.mulf %3, %5 : vector<256x16xf32>
    %c0_6 = arith.constant 0 : index
    %c0_7 = arith.constant 0 : index
    %7 = vector.load %arg4[%c0_6, %c0_7] : memref<1x16xf32, #tpu.memory_space<vmem>>, vector<1x16xf32>
    %8 = vector.broadcast %7 : vector<1x16xf32> to vector<256x16xf32>
    %9 = arith.addf %6, %8 : vector<256x16xf32>
    %cst_8 = arith.constant 0.000000e+00 : f32
    %10 = vector.broadcast %cst_8 : f32 to vector<256x16xf32>
    %11 = arith.maximumf %9, %10 : vector<256x16xf32>
    %12 = arith.truncf %11 : vector<256x16xf32> to vector<256x16xbf16>
    %c0_9 = arith.constant 0 : index
    %c0_10 = arith.constant 0 : index
    %c0_11 = arith.constant 0 : index
    %13 = vector.load %arg5[%c0_9, %c0_10, %c0_11] : memref<1x256x16xbf16, #tpu.memory_space<vmem>>, vector<1x256x16xbf16>
    %14 = vector.shape_cast %13 : vector<1x256x16xbf16> to vector<256x16xbf16>
    %15 = vector.shape_cast %12 : vector<256x16xbf16> to vector<1x256x16xbf16>
    tpu.vector_store %arg5[%c0_9, %c0_10, %c0_11], %15 {strides = array<i32>} : memref<1x256x16xbf16, #tpu.memory_space<vmem>>, vector<1x256x16xbf16>,
    return
  }
  func.func @transform_0(%arg0: i32) -> (i32, i32, i32) {
    %c0_i32 = arith.constant 0 : i32
    %c0_i32_0 = arith.constant 0 : i32
    %c0_i32_1 = arith.constant 0 : i32
    return %arg0, %c0_i32, %c0_i32_0 : i32, i32, i32
  }
  func.func @transform_1(%arg0: i32) -> (i32, i32) {
    %c0_i32 = arith.constant 0 : i32
    %c0_i32_0 = arith.constant 0 : i32
    %c0_i32_1 = arith.constant 0 : i32
    return %c0_i32, %c0_i32_0 : i32, i32
  }
  func.func @transform_2(%arg0: i32) -> (i32, i32) {
    %c0_i32 = arith.constant 0 : i32
    %c0_i32_0 = arith.constant 0 : i32
    %c0_i32_1 = arith.constant 0 : i32
    return %c0_i32, %c0_i32_0 : i32, i32
  }
  func.func @transform_3(%arg0: i32) -> (i32, i32) {
    %c0_i32 = arith.constant 0 : i32
    %c0_i32_0 = arith.constant 0 : i32
    %c0_i32_1 = arith.constant 0 : i32
    return %c0_i32, %c0_i32_0 : i32, i32
  }
  func.func @transform_4(%arg0: i32) -> (i32, i32, i32) {
    %c0_i32 = arith.constant 0 : i32
    %c0_i32_0 = arith.constant 0 : i32
    %c0_i32_1 = arith.constant 0 : i32
    return %arg0, %c0_i32, %c0_i32_0 : i32, i32, i32
  }
}

module attributes {stable_mosaic.version = 11 : i64} {
  func.func @_maxpool_kernel(%arg0: i32, %arg1: memref<1x9x64x16xbf16, #tpu.memory_space<vmem>>, %arg2: memref<1x64x16xbf16, #tpu.memory_space<vmem>>) attributes {dimension_semantics = [#tpu.dimension_semantics<parallel>], iteration_bounds = array<i64: 2>, scalar_prefetch = 0 : i64, scratch_operands = 0 : i64, tpu.core_type = #tpu.core_type<tc>, window_params = [{transform_indices = @transform_0, window_bounds = array<i64: 1, 9, 64, 16>}, {transform_indices = @transform_1, window_bounds = array<i64: 1, 64, 16>}]} {
    %c0 = arith.constant 0 : index
    %c0_0 = arith.constant 0 : index
    %c0_1 = arith.constant 0 : index
    %c0_2 = arith.constant 0 : index
    %0 = vector.load %arg1[%c0, %c0_0, %c0_1, %c0_2] : memref<1x9x64x16xbf16, #tpu.memory_space<vmem>>, vector<1x1x64x16xbf16>
    %1 = vector.shape_cast %0 : vector<1x1x64x16xbf16> to vector<64x16xbf16>
    %2 = arith.extf %1 : vector<64x16xbf16> to vector<64x16xf32>
    %c0_3 = arith.constant 0 : index
    %c1 = arith.constant 1 : index
    %c0_4 = arith.constant 0 : index
    %c0_5 = arith.constant 0 : index
    %3 = vector.load %arg1[%c0_3, %c1, %c0_4, %c0_5] : memref<1x9x64x16xbf16, #tpu.memory_space<vmem>>, vector<1x1x64x16xbf16>
    %4 = vector.shape_cast %3 : vector<1x1x64x16xbf16> to vector<64x16xbf16>
    %5 = arith.extf %4 : vector<64x16xbf16> to vector<64x16xf32>
    %6 = arith.maximumf %2, %5 : vector<64x16xf32>
    %c0_6 = arith.constant 0 : index
    %c2 = arith.constant 2 : index
    %c0_7 = arith.constant 0 : index
    %c0_8 = arith.constant 0 : index
    %7 = vector.load %arg1[%c0_6, %c2, %c0_7, %c0_8] : memref<1x9x64x16xbf16, #tpu.memory_space<vmem>>, vector<1x1x64x16xbf16>
    %8 = vector.shape_cast %7 : vector<1x1x64x16xbf16> to vector<64x16xbf16>
    %9 = arith.extf %8 : vector<64x16xbf16> to vector<64x16xf32>
    %10 = arith.maximumf %6, %9 : vector<64x16xf32>
    %c0_9 = arith.constant 0 : index
    %c3 = arith.constant 3 : index
    %c0_10 = arith.constant 0 : index
    %c0_11 = arith.constant 0 : index
    %11 = vector.load %arg1[%c0_9, %c3, %c0_10, %c0_11] : memref<1x9x64x16xbf16, #tpu.memory_space<vmem>>, vector<1x1x64x16xbf16>
    %12 = vector.shape_cast %11 : vector<1x1x64x16xbf16> to vector<64x16xbf16>
    %13 = arith.extf %12 : vector<64x16xbf16> to vector<64x16xf32>
    %14 = arith.maximumf %10, %13 : vector<64x16xf32>
    %c0_12 = arith.constant 0 : index
    %c4 = arith.constant 4 : index
    %c0_13 = arith.constant 0 : index
    %c0_14 = arith.constant 0 : index
    %15 = vector.load %arg1[%c0_12, %c4, %c0_13, %c0_14] : memref<1x9x64x16xbf16, #tpu.memory_space<vmem>>, vector<1x1x64x16xbf16>
    %16 = vector.shape_cast %15 : vector<1x1x64x16xbf16> to vector<64x16xbf16>
    %17 = arith.extf %16 : vector<64x16xbf16> to vector<64x16xf32>
    %18 = arith.maximumf %14, %17 : vector<64x16xf32>
    %c0_15 = arith.constant 0 : index
    %c5 = arith.constant 5 : index
    %c0_16 = arith.constant 0 : index
    %c0_17 = arith.constant 0 : index
    %19 = vector.load %arg1[%c0_15, %c5, %c0_16, %c0_17] : memref<1x9x64x16xbf16, #tpu.memory_space<vmem>>, vector<1x1x64x16xbf16>
    %20 = vector.shape_cast %19 : vector<1x1x64x16xbf16> to vector<64x16xbf16>
    %21 = arith.extf %20 : vector<64x16xbf16> to vector<64x16xf32>
    %22 = arith.maximumf %18, %21 : vector<64x16xf32>
    %c0_18 = arith.constant 0 : index
    %c6 = arith.constant 6 : index
    %c0_19 = arith.constant 0 : index
    %c0_20 = arith.constant 0 : index
    %23 = vector.load %arg1[%c0_18, %c6, %c0_19, %c0_20] : memref<1x9x64x16xbf16, #tpu.memory_space<vmem>>, vector<1x1x64x16xbf16>
    %24 = vector.shape_cast %23 : vector<1x1x64x16xbf16> to vector<64x16xbf16>
    %25 = arith.extf %24 : vector<64x16xbf16> to vector<64x16xf32>
    %26 = arith.maximumf %22, %25 : vector<64x16xf32>
    %c0_21 = arith.constant 0 : index
    %c7 = arith.constant 7 : index
    %c0_22 = arith.constant 0 : index
    %c0_23 = arith.constant 0 : index
    %27 = vector.load %arg1[%c0_21, %c7, %c0_22, %c0_23] : memref<1x9x64x16xbf16, #tpu.memory_space<vmem>>, vector<1x1x64x16xbf16>
    %28 = vector.shape_cast %27 : vector<1x1x64x16xbf16> to vector<64x16xbf16>
    %29 = arith.extf %28 : vector<64x16xbf16> to vector<64x16xf32>
    %30 = arith.maximumf %26, %29 : vector<64x16xf32>
    %c0_24 = arith.constant 0 : index
    %c8 = arith.constant 8 : index
    %c0_25 = arith.constant 0 : index
    %c0_26 = arith.constant 0 : index
    %31 = vector.load %arg1[%c0_24, %c8, %c0_25, %c0_26] : memref<1x9x64x16xbf16, #tpu.memory_space<vmem>>, vector<1x1x64x16xbf16>
    %32 = vector.shape_cast %31 : vector<1x1x64x16xbf16> to vector<64x16xbf16>
    %33 = arith.extf %32 : vector<64x16xbf16> to vector<64x16xf32>
    %34 = arith.maximumf %30, %33 : vector<64x16xf32>
    %35 = arith.truncf %34 : vector<64x16xf32> to vector<64x16xbf16>
    %c0_27 = arith.constant 0 : index
    %c0_28 = arith.constant 0 : index
    %c0_29 = arith.constant 0 : index
    %36 = vector.load %arg2[%c0_27, %c0_28, %c0_29] : memref<1x64x16xbf16, #tpu.memory_space<vmem>>, vector<1x64x16xbf16>
    %37 = vector.shape_cast %36 : vector<1x64x16xbf16> to vector<64x16xbf16>
    %38 = vector.shape_cast %35 : vector<64x16xbf16> to vector<1x64x16xbf16>
    tpu.vector_store %arg2[%c0_27, %c0_28, %c0_29], %38 {strides = array<i32>} : memref<1x64x16xbf16, #tpu.memory_space<vmem>>, vector<1x64x16xbf16>,
    return
  }
  func.func @transform_0(%arg0: i32) -> (i32, i32, i32, i32) {
    %c0_i32 = arith.constant 0 : i32
    %c0_i32_0 = arith.constant 0 : i32
    %c0_i32_1 = arith.constant 0 : i32
    %c0_i32_2 = arith.constant 0 : i32
    return %arg0, %c0_i32, %c0_i32_0, %c0_i32_1 : i32, i32, i32, i32
  }
  func.func @transform_1(%arg0: i32) -> (i32, i32, i32) {
    %c0_i32 = arith.constant 0 : i32
    %c0_i32_0 = arith.constant 0 : i32
    %c0_i32_1 = arith.constant 0 : i32
    return %arg0, %c0_i32, %c0_i32_0 : i32, i32, i32
  }
}

module attributes {stable_mosaic.version = 11 : i64} {
  func.func @_bottleneck_kernel(%arg0: i32, %arg1: memref<1x64x16xbf16, #tpu.memory_space<vmem>>, %arg2: memref<1x16xf32, #tpu.memory_space<vmem>>, %arg3: memref<1x16xf32, #tpu.memory_space<vmem>>, %arg4: memref<16x32xbf16, #tpu.memory_space<vmem>>, %arg5: memref<1x32xf32, #tpu.memory_space<vmem>>, %arg6: memref<1x32xf32, #tpu.memory_space<vmem>>, %arg7: memref<9x32x8xbf16, #tpu.memory_space<vmem>>, %arg8: memref<16x1xbf16, #tpu.memory_space<vmem>>, %arg9: memref<8x1xbf16, #tpu.memory_space<vmem>>, %arg10: memref<1x1xf32, #tpu.memory_space<vmem>>, %arg11: memref<1x24xbf16, #tpu.memory_space<vmem>>, %arg12: memref<1x24xf32, #tpu.memory_space<vmem>>, %arg13: memref<1x64x24xbf16, #tpu.memory_space<vmem>>, %arg14: memref<122x32xf32, #tpu.memory_space<vmem>>, %arg15: memref<64x8xf32, #tpu.memory_space<vmem>>) attributes {dimension_semantics = [#tpu.dimension_semantics<parallel>], iteration_bounds = array<i64: 2>, scalar_prefetch = 0 : i64, scratch_operands = 2 : i64, tpu.core_type = #tpu.core_type<tc>, window_params = [{transform_indices = @transform_0, window_bounds = array<i64: 1, 64, 16>}, {pipeline_mode = #tpu.pipeline_mode<synchronous>, transform_indices = @transform_1, window_bounds = array<i64: 1, 16>}, {pipeline_mode = #tpu.pipeline_mode<synchronous>, transform_indices = @transform_2, window_bounds = array<i64: 1, 16>}, {pipeline_mode = #tpu.pipeline_mode<synchronous>, transform_indices = @transform_3, window_bounds = array<i64: 16, 32>}, {pipeline_mode = #tpu.pipeline_mode<synchronous>, transform_indices = @transform_4, window_bounds = array<i64: 1, 32>}, {pipeline_mode = #tpu.pipeline_mode<synchronous>, transform_indices = @transform_5, window_bounds = array<i64: 1, 32>}, {pipeline_mode = #tpu.pipeline_mode<synchronous>, transform_indices = @transform_6, window_bounds = array<i64: 9, 32, 8>}, {pipeline_mode = #tpu.pipeline_mode<synchronous>, transform_indices = @transform_7, window_bounds = array<i64: 16, 1>}, {pipeline_mode = #tpu.pipeline_mode<synchronous>, transform_indices = @transform_8, window_bounds = array<i64: 8, 1>}, {pipeline_mode = #tpu.pipeline_mode<synchronous>, transform_indices = @transform_9, window_bounds = array<i64: 1, 1>}, {pipeline_mode = #tpu.pipeline_mode<synchronous>, transform_indices = @transform_10, window_bounds = array<i64: 1, 24>}, {pipeline_mode = #tpu.pipeline_mode<synchronous>, transform_indices = @transform_11, window_bounds = array<i64: 1, 24>}, {transform_indices = @transform_12, window_bounds = array<i64: 1, 64, 24>}]} {
    %c0 = arith.constant 0 : index
    %c0_0 = arith.constant 0 : index
    %c0_1 = arith.constant 0 : index
    %0 = vector.load %arg1[%c0, %c0_0, %c0_1] : memref<1x64x16xbf16, #tpu.memory_space<vmem>>, vector<1x64x16xbf16>
    %1 = vector.shape_cast %0 : vector<1x64x16xbf16> to vector<64x16xbf16>
    %2 = arith.extf %1 : vector<64x16xbf16> to vector<64x16xf32>
    %c0_2 = arith.constant 0 : index
    %c0_3 = arith.constant 0 : index
    %3 = vector.load %arg2[%c0_2, %c0_3] : memref<1x16xf32, #tpu.memory_space<vmem>>, vector<1x16xf32>
    %4 = vector.broadcast %3 : vector<1x16xf32> to vector<64x16xf32>
    %5 = arith.mulf %2, %4 : vector<64x16xf32>
    %c0_4 = arith.constant 0 : index
    %c0_5 = arith.constant 0 : index
    %6 = vector.load %arg3[%c0_4, %c0_5] : memref<1x16xf32, #tpu.memory_space<vmem>>, vector<1x16xf32>
    %7 = vector.broadcast %6 : vector<1x16xf32> to vector<64x16xf32>
    %8 = arith.addf %5, %7 : vector<64x16xf32>
    %cst = arith.constant 0.000000e+00 : f32
    %9 = vector.broadcast %cst : f32 to vector<64x16xf32>
    %10 = arith.maximumf %8, %9 : vector<64x16xf32>
    %11 = arith.truncf %10 : vector<64x16xf32> to vector<64x16xbf16>
    %c0_6 = arith.constant 0 : index
    %c0_7 = arith.constant 0 : index
    %12 = vector.load %arg4[%c0_6, %c0_7] : memref<16x32xbf16, #tpu.memory_space<vmem>>, vector<16x32xbf16>
    %cst_8 = arith.constant dense<0.000000e+00> : vector<64x32xf32>
    %13 = tpu.matmul %11, %12, %cst_8 {dimension_numbers = #tpu.dot_dimension_numbers<[1], [0], [0], [1], [0, 0, 1, 1], [], []>} : vector<64x16xbf16>, vector<16x32xbf16>, vector<64x32xf32> -> vector<64x32xf32>
    %c0_9 = arith.constant 0 : index
    %c0_10 = arith.constant 0 : index
    %14 = vector.load %arg5[%c0_9, %c0_10] : memref<1x32xf32, #tpu.memory_space<vmem>>, vector<1x32xf32>
    %15 = vector.broadcast %14 : vector<1x32xf32> to vector<64x32xf32>
    %16 = arith.mulf %13, %15 : vector<64x32xf32>
    %c0_11 = arith.constant 0 : index
    %c0_12 = arith.constant 0 : index
    %17 = vector.load %arg6[%c0_11, %c0_12] : memref<1x32xf32, #tpu.memory_space<vmem>>, vector<1x32xf32>
    %18 = vector.broadcast %17 : vector<1x32xf32> to vector<64x32xf32>
    %19 = arith.addf %16, %18 : vector<64x32xf32>
    %cst_13 = arith.constant 0.000000e+00 : f32
    %20 = vector.broadcast %cst_13 : f32 to vector<64x32xf32>
    %21 = arith.maximumf %19, %20 : vector<64x32xf32>
    %cst_14 = arith.constant 0.000000e+00 : f32
    %22 = vector.broadcast %cst_14 : f32 to vector<122x32xf32>
    %c0_15 = arith.constant 0 : index
    %c0_16 = arith.constant 0 : index
    %23 = vector.load %arg14[%c0_15, %c0_16] : memref<122x32xf32, #tpu.memory_space<vmem>>, vector<122x32xf32>
    tpu.vector_store %arg14[%c0_15, %c0_16], %22 {strides = array<i32>} : memref<122x32xf32, #tpu.memory_space<vmem>>, vector<122x32xf32>,
    %24 = vector.extract_strided_slice %21 {offsets = [0, 0], sizes = [8, 32], strides = [1, 1]} : vector<64x32xf32> to vector<8x32xf32>
    %c11 = arith.constant 11 : index
    %c0_17 = arith.constant 0 : index
    %25 = vector.load %arg14[%c11, %c0_17] : memref<122x32xf32, #tpu.memory_space<vmem>>, vector<8x32xf32>
    tpu.vector_store %arg14[%c11, %c0_17], %24 {strides = array<i32>} : memref<122x32xf32, #tpu.memory_space<vmem>>, vector<8x32xf32>,
    %26 = vector.extract_strided_slice %21 {offsets = [8, 0], sizes = [8, 32], strides = [1, 1]} : vector<64x32xf32> to vector<8x32xf32>
    %c21 = arith.constant 21 : index
    %c0_18 = arith.constant 0 : index
    %27 = vector.load %arg14[%c21, %c0_18] : memref<122x32xf32, #tpu.memory_space<vmem>>, vector<8x32xf32>
    tpu.vector_store %arg14[%c21, %c0_18], %26 {strides = array<i32>} : memref<122x32xf32, #tpu.memory_space<vmem>>, vector<8x32xf32>,
    %28 = vector.extract_strided_slice %21 {offsets = [16, 0], sizes = [8, 32], strides = [1, 1]} : vector<64x32xf32> to vector<8x32xf32>
    %c31 = arith.constant 31 : index
    %c0_19 = arith.constant 0 : index
    %29 = vector.load %arg14[%c31, %c0_19] : memref<122x32xf32, #tpu.memory_space<vmem>>, vector<8x32xf32>
    tpu.vector_store %arg14[%c31, %c0_19], %28 {strides = array<i32>} : memref<122x32xf32, #tpu.memory_space<vmem>>, vector<8x32xf32>,
    %30 = vector.extract_strided_slice %21 {offsets = [24, 0], sizes = [8, 32], strides = [1, 1]} : vector<64x32xf32> to vector<8x32xf32>
    %c41 = arith.constant 41 : index
    %c0_20 = arith.constant 0 : index
    %31 = vector.load %arg14[%c41, %c0_20] : memref<122x32xf32, #tpu.memory_space<vmem>>, vector<8x32xf32>
    tpu.vector_store %arg14[%c41, %c0_20], %30 {strides = array<i32>} : memref<122x32xf32, #tpu.memory_space<vmem>>, vector<8x32xf32>,
    %32 = vector.extract_strided_slice %21 {offsets = [32, 0], sizes = [8, 32], strides = [1, 1]} : vector<64x32xf32> to vector<8x32xf32>
    %c51 = arith.constant 51 : index
    %c0_21 = arith.constant 0 : index
    %33 = vector.load %arg14[%c51, %c0_21] : memref<122x32xf32, #tpu.memory_space<vmem>>, vector<8x32xf32>
    tpu.vector_store %arg14[%c51, %c0_21], %32 {strides = array<i32>} : memref<122x32xf32, #tpu.memory_space<vmem>>, vector<8x32xf32>,
    %34 = vector.extract_strided_slice %21 {offsets = [40, 0], sizes = [8, 32], strides = [1, 1]} : vector<64x32xf32> to vector<8x32xf32>
    %c61 = arith.constant 61 : index
    %c0_22 = arith.constant 0 : index
    %35 = vector.load %arg14[%c61, %c0_22] : memref<122x32xf32, #tpu.memory_space<vmem>>, vector<8x32xf32>
    tpu.vector_store %arg14[%c61, %c0_22], %34 {strides = array<i32>} : memref<122x32xf32, #tpu.memory_space<vmem>>, vector<8x32xf32>,
    %36 = vector.extract_strided_slice %21 {offsets = [48, 0], sizes = [8, 32], strides = [1, 1]} : vector<64x32xf32> to vector<8x32xf32>
    %c71 = arith.constant 71 : index
    %c0_23 = arith.constant 0 : index
    %37 = vector.load %arg14[%c71, %c0_23] : memref<122x32xf32, #tpu.memory_space<vmem>>, vector<8x32xf32>
    tpu.vector_store %arg14[%c71, %c0_23], %36 {strides = array<i32>} : memref<122x32xf32, #tpu.memory_space<vmem>>, vector<8x32xf32>,
    %38 = vector.extract_strided_slice %21 {offsets = [56, 0], sizes = [8, 32], strides = [1, 1]} : vector<64x32xf32> to vector<8x32xf32>
    %c81 = arith.constant 81 : index
    %c0_24 = arith.constant 0 : index
    %39 = vector.load %arg14[%c81, %c0_24] : memref<122x32xf32, #tpu.memory_space<vmem>>, vector<8x32xf32>
    tpu.vector_store %arg14[%c81, %c0_24], %38 {strides = array<i32>} : memref<122x32xf32, #tpu.memory_space<vmem>>, vector<8x32xf32>,
    %c0_25 = arith.constant 0 : index
    %c0_26 = arith.constant 0 : index
    %40 = vector.load %arg14[%c0_25, %c0_26] : memref<122x32xf32, #tpu.memory_space<vmem>>, vector<122x32xf32>
    %41 = arith.truncf %40 : vector<122x32xf32> to vector<122x32xbf16>
    %cst_27 = arith.constant 0.000000e+00 : f32
    %42 = vector.broadcast %cst_27 : f32 to vector<100x8xf32>
    %43 = vector.extract_strided_slice %41 {offsets = [0, 0], sizes = [100, 32], strides = [1, 1]} : vector<122x32xbf16> to vector<100x32xbf16>
    %c0_28 = arith.constant 0 : index
    %c0_29 = arith.constant 0 : index
    %c0_30 = arith.constant 0 : index
    %44 = vector.load %arg7[%c0_28, %c0_29, %c0_30] : memref<9x32x8xbf16, #tpu.memory_space<vmem>>, vector<1x32x8xbf16>
    %45 = vector.shape_cast %44 : vector<1x32x8xbf16> to vector<32x8xbf16>
    %cst_31 = arith.constant dense<0.000000e+00> : vector<100x8xf32>
    %46 = tpu.matmul %43, %45, %cst_31 {dimension_numbers = #tpu.dot_dimension_numbers<[1], [0], [0], [1], [0, 0, 1, 1], [], []>} : vector<100x32xbf16>, vector<32x8xbf16>, vector<100x8xf32> -> vector<100x8xf32>
    %47 = arith.addf %42, %46 : vector<100x8xf32>
    %48 = vector.extract_strided_slice %41 {offsets = [1, 0], sizes = [100, 32], strides = [1, 1]} : vector<122x32xbf16> to vector<100x32xbf16>
    %c1 = arith.constant 1 : index
    %c0_32 = arith.constant 0 : index
    %c0_33 = arith.constant 0 : index
    %49 = vector.load %arg7[%c1, %c0_32, %c0_33] : memref<9x32x8xbf16, #tpu.memory_space<vmem>>, vector<1x32x8xbf16>
    %50 = vector.shape_cast %49 : vector<1x32x8xbf16> to vector<32x8xbf16>
    %cst_34 = arith.constant dense<0.000000e+00> : vector<100x8xf32>
    %51 = tpu.matmul %48, %50, %cst_34 {dimension_numbers = #tpu.dot_dimension_numbers<[1], [0], [0], [1], [0, 0, 1, 1], [], []>} : vector<100x32xbf16>, vector<32x8xbf16>, vector<100x8xf32> -> vector<100x8xf32>
    %52 = arith.addf %47, %51 : vector<100x8xf32>
    %53 = vector.extract_strided_slice %41 {offsets = [2, 0], sizes = [100, 32], strides = [1, 1]} : vector<122x32xbf16> to vector<100x32xbf16>
    %c2 = arith.constant 2 : index
    %c0_35 = arith.constant 0 : index
    %c0_36 = arith.constant 0 : index
    %54 = vector.load %arg7[%c2, %c0_35, %c0_36] : memref<9x32x8xbf16, #tpu.memory_space<vmem>>, vector<1x32x8xbf16>
    %55 = vector.shape_cast %54 : vector<1x32x8xbf16> to vector<32x8xbf16>
    %cst_37 = arith.constant dense<0.000000e+00> : vector<100x8xf32>
    %56 = tpu.matmul %53, %55, %cst_37 {dimension_numbers = #tpu.dot_dimension_numbers<[1], [0], [0], [1], [0, 0, 1, 1], [], []>} : vector<100x32xbf16>, vector<32x8xbf16>, vector<100x8xf32> -> vector<100x8xf32>
    %57 = arith.addf %52, %56 : vector<100x8xf32>
    %58 = vector.extract_strided_slice %41 {offsets = [10, 0], sizes = [100, 32], strides = [1, 1]} : vector<122x32xbf16> to vector<100x32xbf16>
    %c3 = arith.constant 3 : index
    %c0_38 = arith.constant 0 : index
    %c0_39 = arith.constant 0 : index
    %59 = vector.load %arg7[%c3, %c0_38, %c0_39] : memref<9x32x8xbf16, #tpu.memory_space<vmem>>, vector<1x32x8xbf16>
    %60 = vector.shape_cast %59 : vector<1x32x8xbf16> to vector<32x8xbf16>
    %cst_40 = arith.constant dense<0.000000e+00> : vector<100x8xf32>
    %61 = tpu.matmul %58, %60, %cst_40 {dimension_numbers = #tpu.dot_dimension_numbers<[1], [0], [0], [1], [0, 0, 1, 1], [], []>} : vector<100x32xbf16>, vector<32x8xbf16>, vector<100x8xf32> -> vector<100x8xf32>
    %62 = arith.addf %57, %61 : vector<100x8xf32>
    %63 = vector.extract_strided_slice %41 {offsets = [11, 0], sizes = [100, 32], strides = [1, 1]} : vector<122x32xbf16> to vector<100x32xbf16>
    %c4 = arith.constant 4 : index
    %c0_41 = arith.constant 0 : index
    %c0_42 = arith.constant 0 : index
    %64 = vector.load %arg7[%c4, %c0_41, %c0_42] : memref<9x32x8xbf16, #tpu.memory_space<vmem>>, vector<1x32x8xbf16>
    %65 = vector.shape_cast %64 : vector<1x32x8xbf16> to vector<32x8xbf16>
    %cst_43 = arith.constant dense<0.000000e+00> : vector<100x8xf32>
    %66 = tpu.matmul %63, %65, %cst_43 {dimension_numbers = #tpu.dot_dimension_numbers<[1], [0], [0], [1], [0, 0, 1, 1], [], []>} : vector<100x32xbf16>, vector<32x8xbf16>, vector<100x8xf32> -> vector<100x8xf32>
    %67 = arith.addf %62, %66 : vector<100x8xf32>
    %68 = vector.extract_strided_slice %41 {offsets = [12, 0], sizes = [100, 32], strides = [1, 1]} : vector<122x32xbf16> to vector<100x32xbf16>
    %c5 = arith.constant 5 : index
    %c0_44 = arith.constant 0 : index
    %c0_45 = arith.constant 0 : index
    %69 = vector.load %arg7[%c5, %c0_44, %c0_45] : memref<9x32x8xbf16, #tpu.memory_space<vmem>>, vector<1x32x8xbf16>
    %70 = vector.shape_cast %69 : vector<1x32x8xbf16> to vector<32x8xbf16>
    %cst_46 = arith.constant dense<0.000000e+00> : vector<100x8xf32>
    %71 = tpu.matmul %68, %70, %cst_46 {dimension_numbers = #tpu.dot_dimension_numbers<[1], [0], [0], [1], [0, 0, 1, 1], [], []>} : vector<100x32xbf16>, vector<32x8xbf16>, vector<100x8xf32> -> vector<100x8xf32>
    %72 = arith.addf %67, %71 : vector<100x8xf32>
    %73 = vector.extract_strided_slice %41 {offsets = [20, 0], sizes = [100, 32], strides = [1, 1]} : vector<122x32xbf16> to vector<100x32xbf16>
    %c6 = arith.constant 6 : index
    %c0_47 = arith.constant 0 : index
    %c0_48 = arith.constant 0 : index
    %74 = vector.load %arg7[%c6, %c0_47, %c0_48] : memref<9x32x8xbf16, #tpu.memory_space<vmem>>, vector<1x32x8xbf16>
    %75 = vector.shape_cast %74 : vector<1x32x8xbf16> to vector<32x8xbf16>
    %cst_49 = arith.constant dense<0.000000e+00> : vector<100x8xf32>
    %76 = tpu.matmul %73, %75, %cst_49 {dimension_numbers = #tpu.dot_dimension_numbers<[1], [0], [0], [1], [0, 0, 1, 1], [], []>} : vector<100x32xbf16>, vector<32x8xbf16>, vector<100x8xf32> -> vector<100x8xf32>
    %77 = arith.addf %72, %76 : vector<100x8xf32>
    %78 = vector.extract_strided_slice %41 {offsets = [21, 0], sizes = [100, 32], strides = [1, 1]} : vector<122x32xbf16> to vector<100x32xbf16>
    %c7 = arith.constant 7 : index
    %c0_50 = arith.constant 0 : index
    %c0_51 = arith.constant 0 : index
    %79 = vector.load %arg7[%c7, %c0_50, %c0_51] : memref<9x32x8xbf16, #tpu.memory_space<vmem>>, vector<1x32x8xbf16>
    %80 = vector.shape_cast %79 : vector<1x32x8xbf16> to vector<32x8xbf16>
    %cst_52 = arith.constant dense<0.000000e+00> : vector<100x8xf32>
    %81 = tpu.matmul %78, %80, %cst_52 {dimension_numbers = #tpu.dot_dimension_numbers<[1], [0], [0], [1], [0, 0, 1, 1], [], []>} : vector<100x32xbf16>, vector<32x8xbf16>, vector<100x8xf32> -> vector<100x8xf32>
    %82 = arith.addf %77, %81 : vector<100x8xf32>
    %83 = vector.extract_strided_slice %41 {offsets = [22, 0], sizes = [100, 32], strides = [1, 1]} : vector<122x32xbf16> to vector<100x32xbf16>
    %c8 = arith.constant 8 : index
    %c0_53 = arith.constant 0 : index
    %c0_54 = arith.constant 0 : index
    %84 = vector.load %arg7[%c8, %c0_53, %c0_54] : memref<9x32x8xbf16, #tpu.memory_space<vmem>>, vector<1x32x8xbf16>
    %85 = vector.shape_cast %84 : vector<1x32x8xbf16> to vector<32x8xbf16>
    %cst_55 = arith.constant dense<0.000000e+00> : vector<100x8xf32>
    %86 = tpu.matmul %83, %85, %cst_55 {dimension_numbers = #tpu.dot_dimension_numbers<[1], [0], [0], [1], [0, 0, 1, 1], [], []>} : vector<100x32xbf16>, vector<32x8xbf16>, vector<100x8xf32> -> vector<100x8xf32>
    %87 = arith.addf %82, %86 : vector<100x8xf32>
    %88 = vector.extract_strided_slice %87 {offsets = [0, 0], sizes = [8, 8], strides = [1, 1]} : vector<100x8xf32> to vector<8x8xf32>
    %c0_56 = arith.constant 0 : index
    %c0_57 = arith.constant 0 : index
    %89 = vector.load %arg15[%c0_56, %c0_57] : memref<64x8xf32, #tpu.memory_space<vmem>>, vector<8x8xf32>
    tpu.vector_store %arg15[%c0_56, %c0_57], %88 {strides = array<i32>} : memref<64x8xf32, #tpu.memory_space<vmem>>, vector<8x8xf32>,
    %90 = vector.extract_strided_slice %87 {offsets = [10, 0], sizes = [8, 8], strides = [1, 1]} : vector<100x8xf32> to vector<8x8xf32>
    %c8_58 = arith.constant 8 : index
    %c0_59 = arith.constant 0 : index
    %91 = vector.load %arg15[%c8_58, %c0_59] : memref<64x8xf32, #tpu.memory_space<vmem>>, vector<8x8xf32>
    tpu.vector_store %arg15[%c8_58, %c0_59], %90 {strides = array<i32>} : memref<64x8xf32, #tpu.memory_space<vmem>>, vector<8x8xf32>,
    %92 = vector.extract_strided_slice %87 {offsets = [20, 0], sizes = [8, 8], strides = [1, 1]} : vector<100x8xf32> to vector<8x8xf32>
    %c16 = arith.constant 16 : index
    %c0_60 = arith.constant 0 : index
    %93 = vector.load %arg15[%c16, %c0_60] : memref<64x8xf32, #tpu.memory_space<vmem>>, vector<8x8xf32>
    tpu.vector_store %arg15[%c16, %c0_60], %92 {strides = array<i32>} : memref<64x8xf32, #tpu.memory_space<vmem>>, vector<8x8xf32>,
    %94 = vector.extract_strided_slice %87 {offsets = [30, 0], sizes = [8, 8], strides = [1, 1]} : vector<100x8xf32> to vector<8x8xf32>
    %c24 = arith.constant 24 : index
    %c0_61 = arith.constant 0 : index
    %95 = vector.load %arg15[%c24, %c0_61] : memref<64x8xf32, #tpu.memory_space<vmem>>, vector<8x8xf32>
    tpu.vector_store %arg15[%c24, %c0_61], %94 {strides = array<i32>} : memref<64x8xf32, #tpu.memory_space<vmem>>, vector<8x8xf32>,
    %96 = vector.extract_strided_slice %87 {offsets = [40, 0], sizes = [8, 8], strides = [1, 1]} : vector<100x8xf32> to vector<8x8xf32>
    %c32 = arith.constant 32 : index
    %c0_62 = arith.constant 0 : index
    %97 = vector.load %arg15[%c32, %c0_62] : memref<64x8xf32, #tpu.memory_space<vmem>>, vector<8x8xf32>
    tpu.vector_store %arg15[%c32, %c0_62], %96 {strides = array<i32>} : memref<64x8xf32, #tpu.memory_space<vmem>>, vector<8x8xf32>,
    %98 = vector.extract_strided_slice %87 {offsets = [50, 0], sizes = [8, 8], strides = [1, 1]} : vector<100x8xf32> to vector<8x8xf32>
    %c40 = arith.constant 40 : index
    %c0_63 = arith.constant 0 : index
    %99 = vector.load %arg15[%c40, %c0_63] : memref<64x8xf32, #tpu.memory_space<vmem>>, vector<8x8xf32>
    tpu.vector_store %arg15[%c40, %c0_63], %98 {strides = array<i32>} : memref<64x8xf32, #tpu.memory_space<vmem>>, vector<8x8xf32>,
    %100 = vector.extract_strided_slice %87 {offsets = [60, 0], sizes = [8, 8], strides = [1, 1]} : vector<100x8xf32> to vector<8x8xf32>
    %c48 = arith.constant 48 : index
    %c0_64 = arith.constant 0 : index
    %101 = vector.load %arg15[%c48, %c0_64] : memref<64x8xf32, #tpu.memory_space<vmem>>, vector<8x8xf32>
    tpu.vector_store %arg15[%c48, %c0_64], %100 {strides = array<i32>} : memref<64x8xf32, #tpu.memory_space<vmem>>, vector<8x8xf32>,
    %102 = vector.extract_strided_slice %87 {offsets = [70, 0], sizes = [8, 8], strides = [1, 1]} : vector<100x8xf32> to vector<8x8xf32>
    %c56 = arith.constant 56 : index
    %c0_65 = arith.constant 0 : index
    %103 = vector.load %arg15[%c56, %c0_65] : memref<64x8xf32, #tpu.memory_space<vmem>>, vector<8x8xf32>
    tpu.vector_store %arg15[%c56, %c0_65], %102 {strides = array<i32>} : memref<64x8xf32, #tpu.memory_space<vmem>>, vector<8x8xf32>,
    %c0_66 = arith.constant 0 : index
    %c0_67 = arith.constant 0 : index
    %104 = vector.load %arg15[%c0_66, %c0_67] : memref<64x8xf32, #tpu.memory_space<vmem>>, vector<64x8xf32>
    %cst_68 = arith.constant dense<0.000000e+00> : vector<16xf32>
    %105 = vector.multi_reduction <add>, %2, %cst_68 [0] : vector<64x16xf32> to vector<16xf32>
    %106 = vector.shape_cast %105 : vector<16xf32> to vector<1x16xf32>
    %cst_69 = arith.constant 1.562500e-02 : f32
    %107 = vector.broadcast %cst_69 : f32 to vector<1x16xf32>
    %108 = arith.mulf %106, %107 : vector<1x16xf32>
    %cst_70 = arith.constant dense<0.000000e+00> : vector<8xf32>
    %109 = vector.multi_reduction <add>, %104, %cst_70 [0] : vector<64x8xf32> to vector<8xf32>
    %110 = vector.shape_cast %109 : vector<8xf32> to vector<1x8xf32>
    %cst_71 = arith.constant 1.562500e-02 : f32
    %111 = vector.broadcast %cst_71 : f32 to vector<1x8xf32>
    %112 = arith.mulf %110, %111 : vector<1x8xf32>
    %113 = arith.truncf %108 : vector<1x16xf32> to vector<1x16xbf16>
    %c0_72 = arith.constant 0 : index
    %c0_73 = arith.constant 0 : index
    %114 = vector.load %arg8[%c0_72, %c0_73] : memref<16x1xbf16, #tpu.memory_space<vmem>>, vector<16x1xbf16>
    %cst_74 = arith.constant dense<0.000000e+00> : vector<1x1xf32>
    %115 = tpu.matmul %113, %114, %cst_74 {dimension_numbers = #tpu.dot_dimension_numbers<[1], [0], [0], [1], [0, 0, 1, 1], [], []>} : vector<1x16xbf16>, vector<16x1xbf16>, vector<1x1xf32> -> vector<1x1xf32>
    %116 = arith.truncf %112 : vector<1x8xf32> to vector<1x8xbf16>
    %c0_75 = arith.constant 0 : index
    %c0_76 = arith.constant 0 : index
    %117 = vector.load %arg9[%c0_75, %c0_76] : memref<8x1xbf16, #tpu.memory_space<vmem>>, vector<8x1xbf16>
    %cst_77 = arith.constant dense<0.000000e+00> : vector<1x1xf32>
    %118 = tpu.matmul %116, %117, %cst_77 {dimension_numbers = #tpu.dot_dimension_numbers<[1], [0], [0], [1], [0, 0, 1, 1], [], []>} : vector<1x8xbf16>, vector<8x1xbf16>, vector<1x1xf32> -> vector<1x1xf32>
    %119 = arith.addf %115, %118 : vector<1x1xf32>
    %c0_78 = arith.constant 0 : index
    %c0_79 = arith.constant 0 : index
    %120 = vector.load %arg10[%c0_78, %c0_79] : memref<1x1xf32, #tpu.memory_space<vmem>>, vector<1x1xf32>
    %121 = arith.addf %119, %120 : vector<1x1xf32>
    %cst_80 = arith.constant 0.000000e+00 : f32
    %122 = vector.broadcast %cst_80 : f32 to vector<1x1xf32>
    %123 = arith.maximumf %121, %122 : vector<1x1xf32>
    %124 = arith.truncf %123 : vector<1x1xf32> to vector<1x1xbf16>
    %c0_81 = arith.constant 0 : index
    %c0_82 = arith.constant 0 : index
    %125 = vector.load %arg11[%c0_81, %c0_82] : memref<1x24xbf16, #tpu.memory_space<vmem>>, vector<1x24xbf16>
    %cst_83 = arith.constant dense<0.000000e+00> : vector<1x24xf32>
    %126 = tpu.matmul %124, %125, %cst_83 {dimension_numbers = #tpu.dot_dimension_numbers<[1], [0], [0], [1], [0, 0, 1, 1], [], []>} : vector<1x1xbf16>, vector<1x24xbf16>, vector<1x24xf32> -> vector<1x24xf32>
    %c0_84 = arith.constant 0 : index
    %c0_85 = arith.constant 0 : index
    %127 = vector.load %arg12[%c0_84, %c0_85] : memref<1x24xf32, #tpu.memory_space<vmem>>, vector<1x24xf32>
    %128 = arith.addf %126, %127 : vector<1x24xf32>
    %129 = arith.negf %128 : vector<1x24xf32>
    %130 = math.exp %129 : vector<1x24xf32>
    %cst_86 = arith.constant 1.000000e+00 : f32
    %131 = vector.broadcast %cst_86 : f32 to vector<1x24xf32>
    %132 = arith.addf %131, %130 : vector<1x24xf32>
    %133 = arith.divf %131, %132 : vector<1x24xf32>
    %134 = vector.extract_strided_slice %133 {offsets = [0, 0], sizes = [1, 16], strides = [1, 1]} : vector<1x24xf32> to vector<1x16xf32>
    %135 = vector.broadcast %134 : vector<1x16xf32> to vector<64x16xf32>
    %136 = arith.mulf %2, %135 : vector<64x16xf32>
    %137 = arith.truncf %136 : vector<64x16xf32> to vector<64x16xbf16>
    %c0_87 = arith.constant 0 : index
    %c0_88 = arith.constant 0 : index
    %c0_89 = arith.constant 0 : index
    %138 = vector.load %arg13[%c0_87, %c0_88, %c0_89] : memref<1x64x24xbf16, #tpu.memory_space<vmem>>, vector<1x64x16xbf16>
    %139 = vector.shape_cast %138 : vector<1x64x16xbf16> to vector<64x16xbf16>
    %140 = vector.shape_cast %137 : vector<64x16xbf16> to vector<1x64x16xbf16>
    tpu.vector_store %arg13[%c0_87, %c0_88, %c0_89], %140 {strides = array<i32>} : memref<1x64x24xbf16, #tpu.memory_space<vmem>>, vector<1x64x16xbf16>,
    %141 = vector.extract_strided_slice %133 {offsets = [0, 16], sizes = [1, 8], strides = [1, 1]} : vector<1x24xf32> to vector<1x8xf32>
    %142 = vector.broadcast %141 : vector<1x8xf32> to vector<64x8xf32>
    %143 = arith.mulf %104, %142 : vector<64x8xf32>
    %144 = arith.truncf %143 : vector<64x8xf32> to vector<64x8xbf16>
    %c0_90 = arith.constant 0 : index
    %c0_91 = arith.constant 0 : index
    %c16_92 = arith.constant 16 : index
    %145 = vector.load %arg13[%c0_90, %c0_91, %c16_92] : memref<1x64x24xbf16, #tpu.memory_space<vmem>>, vector<1x64x8xbf16>
    %146 = vector.shape_cast %145 : vector<1x64x8xbf16> to vector<64x8xbf16>
    %147 = vector.shape_cast %144 : vector<64x8xbf16> to vector<1x64x8xbf16>
    tpu.vector_store %arg13[%c0_90, %c0_91, %c16_92], %147 {strides = array<i32>} : memref<1x64x24xbf16, #tpu.memory_space<vmem>>, vector<1x64x8xbf16>,
    return
  }
  func.func @transform_0(%arg0: i32) -> (i32, i32, i32) {
    %c0_i32 = arith.constant 0 : i32
    %c0_i32_0 = arith.constant 0 : i32
    %c0_i32_1 = arith.constant 0 : i32
    return %arg0, %c0_i32, %c0_i32_0 : i32, i32, i32
  }
  func.func @transform_1(%arg0: i32) -> (i32, i32) {
    %c0_i32 = arith.constant 0 : i32
    %c0_i32_0 = arith.constant 0 : i32
    %c0_i32_1 = arith.constant 0 : i32
    return %c0_i32, %c0_i32_0 : i32, i32
  }
  func.func @transform_2(%arg0: i32) -> (i32, i32) {
    %c0_i32 = arith.constant 0 : i32
    %c0_i32_0 = arith.constant 0 : i32
    %c0_i32_1 = arith.constant 0 : i32
    return %c0_i32, %c0_i32_0 : i32, i32
  }
  func.func @transform_3(%arg0: i32) -> (i32, i32) {
    %c0_i32 = arith.constant 0 : i32
    %c0_i32_0 = arith.constant 0 : i32
    %c0_i32_1 = arith.constant 0 : i32
    return %c0_i32, %c0_i32_0 : i32, i32
  }
  func.func @transform_4(%arg0: i32) -> (i32, i32) {
    %c0_i32 = arith.constant 0 : i32
    %c0_i32_0 = arith.constant 0 : i32
    %c0_i32_1 = arith.constant 0 : i32
    return %c0_i32, %c0_i32_0 : i32, i32
  }
  func.func @transform_5(%arg0: i32) -> (i32, i32) {
    %c0_i32 = arith.constant 0 : i32
    %c0_i32_0 = arith.constant 0 : i32
    %c0_i32_1 = arith.constant 0 : i32
    return %c0_i32, %c0_i32_0 : i32, i32
  }
  func.func @transform_6(%arg0: i32) -> (i32, i32, i32) {
    %c0_i32 = arith.constant 0 : i32
    %c0_i32_0 = arith.constant 0 : i32
    %c0_i32_1 = arith.constant 0 : i32
    %c0_i32_2 = arith.constant 0 : i32
    return %c0_i32, %c0_i32_0, %c0_i32_1 : i32, i32, i32
  }
  func.func @transform_7(%arg0: i32) -> (i32, i32) {
    %c0_i32 = arith.constant 0 : i32
    %c0_i32_0 = arith.constant 0 : i32
    %c0_i32_1 = arith.constant 0 : i32
    return %c0_i32, %c0_i32_0 : i32, i32
  }
  func.func @transform_8(%arg0: i32) -> (i32, i32) {
    %c0_i32 = arith.constant 0 : i32
    %c0_i32_0 = arith.constant 0 : i32
    %c0_i32_1 = arith.constant 0 : i32
    return %c0_i32, %c0_i32_0 : i32, i32
  }
  func.func @transform_9(%arg0: i32) -> (i32, i32) {
    %c0_i32 = arith.constant 0 : i32
    %c0_i32_0 = arith.constant 0 : i32
    %c0_i32_1 = arith.constant 0 : i32
    return %c0_i32, %c0_i32_0 : i32, i32
  }
  func.func @transform_10(%arg0: i32) -> (i32, i32) {
    %c0_i32 = arith.constant 0 : i32
    %c0_i32_0 = arith.constant 0 : i32
    %c0_i32_1 = arith.constant 0 : i32
    return %c0_i32, %c0_i32_0 : i32, i32
  }
  func.func @transform_11(%arg0: i32) -> (i32, i32) {
    %c0_i32 = arith.constant 0 : i32
    %c0_i32_0 = arith.constant 0 : i32
    %c0_i32_1 = arith.constant 0 : i32
    return %c0_i32, %c0_i32_0 : i32, i32
  }
  func.func @transform_12(%arg0: i32) -> (i32, i32, i32) {
    %c0_i32 = arith.constant 0 : i32
    %c0_i32_0 = arith.constant 0 : i32
    %c0_i32_1 = arith.constant 0 : i32
    return %arg0, %c0_i32, %c0_i32_0 : i32, i32, i32
  }
}

module attributes {stable_mosaic.version = 11 : i64} {
  func.func @_transition_kernel(%arg0: i32, %arg1: memref<1x32x48xbf16, #tpu.memory_space<vmem>>, %arg2: memref<1x48xf32, #tpu.memory_space<vmem>>, %arg3: memref<1x48xf32, #tpu.memory_space<vmem>>, %arg4: memref<24x12xbf16, #tpu.memory_space<vmem>>, %arg5: memref<1x16x12xbf16, #tpu.memory_space<vmem>>, %arg6: memref<16x24xf32, #tpu.memory_space<vmem>>) attributes {dimension_semantics = [#tpu.dimension_semantics<parallel>], iteration_bounds = array<i64: 2>, scalar_prefetch = 0 : i64, scratch_operands = 1 : i64, tpu.core_type = #tpu.core_type<tc>, window_params = [{transform_indices = @transform_0, window_bounds = array<i64: 1, 32, 48>}, {pipeline_mode = #tpu.pipeline_mode<synchronous>, transform_indices = @transform_1, window_bounds = array<i64: 1, 48>}, {pipeline_mode = #tpu.pipeline_mode<synchronous>, transform_indices = @transform_2, window_bounds = array<i64: 1, 48>}, {pipeline_mode = #tpu.pipeline_mode<synchronous>, transform_indices = @transform_3, window_bounds = array<i64: 24, 12>}, {transform_indices = @transform_4, window_bounds = array<i64: 1, 16, 12>}]} {
    %c0 = arith.constant 0 : index
    %c0_0 = arith.constant 0 : index
    %c0_1 = arith.constant 0 : index
    %0 = vector.load %arg1[%c0, %c0_0, %c0_1] : memref<1x32x48xbf16, #tpu.memory_space<vmem>>, vector<1x32x48xbf16>
    %1 = vector.shape_cast %0 : vector<1x32x48xbf16> to vector<32x48xbf16>
    %2 = arith.extf %1 : vector<32x48xbf16> to vector<32x48xf32>
    %c0_2 = arith.constant 0 : index
    %c0_3 = arith.constant 0 : index
    %3 = vector.load %arg2[%c0_2, %c0_3] : memref<1x48xf32, #tpu.memory_space<vmem>>, vector<1x48xf32>
    %4 = vector.broadcast %3 : vector<1x48xf32> to vector<32x48xf32>
    %5 = arith.mulf %2, %4 : vector<32x48xf32>
    %c0_4 = arith.constant 0 : index
    %c0_5 = arith.constant 0 : index
    %6 = vector.load %arg3[%c0_4, %c0_5] : memref<1x48xf32, #tpu.memory_space<vmem>>, vector<1x48xf32>
    %7 = vector.broadcast %6 : vector<1x48xf32> to vector<32x48xf32>
    %8 = arith.addf %5, %7 : vector<32x48xf32>
    %cst = arith.constant 0.000000e+00 : f32
    %9 = vector.broadcast %cst : f32 to vector<32x48xf32>
    %10 = arith.maximumf %8, %9 : vector<32x48xf32>
    %11 = vector.extract_strided_slice %10 {offsets = [0, 0], sizes = [32, 24], strides = [1, 1]} : vector<32x48xf32> to vector<32x24xf32>
    %12 = vector.extract_strided_slice %10 {offsets = [0, 24], sizes = [32, 24], strides = [1, 1]} : vector<32x48xf32> to vector<32x24xf32>
    %13 = arith.addf %11, %12 : vector<32x24xf32>
    %cst_6 = arith.constant 5.000000e-01 : f32
    %14 = vector.broadcast %cst_6 : f32 to vector<32x24xf32>
    %15 = arith.mulf %13, %14 : vector<32x24xf32>
    %16 = vector.extract_strided_slice %15 {offsets = [0, 0], sizes = [4, 24], strides = [1, 1]} : vector<32x24xf32> to vector<4x24xf32>
    %17 = vector.extract_strided_slice %15 {offsets = [4, 0], sizes = [4, 24], strides = [1, 1]} : vector<32x24xf32> to vector<4x24xf32>
    %18 = arith.addf %16, %17 : vector<4x24xf32>
    %cst_7 = arith.constant 5.000000e-01 : f32
    %19 = vector.broadcast %cst_7 : f32 to vector<4x24xf32>
    %20 = arith.mulf %18, %19 : vector<4x24xf32>
    %c0_8 = arith.constant 0 : index
    %c0_9 = arith.constant 0 : index
    %21 = vector.load %arg6[%c0_8, %c0_9] : memref<16x24xf32, #tpu.memory_space<vmem>>, vector<4x24xf32>
    tpu.vector_store %arg6[%c0_8, %c0_9], %20 {strides = array<i32>} : memref<16x24xf32, #tpu.memory_space<vmem>>, vector<4x24xf32>,
    %22 = vector.extract_strided_slice %15 {offsets = [8, 0], sizes = [4, 24], strides = [1, 1]} : vector<32x24xf32> to vector<4x24xf32>
    %23 = vector.extract_strided_slice %15 {offsets = [12, 0], sizes = [4, 24], strides = [1, 1]} : vector<32x24xf32> to vector<4x24xf32>
    %24 = arith.addf %22, %23 : vector<4x24xf32>
    %cst_10 = arith.constant 5.000000e-01 : f32
    %25 = vector.broadcast %cst_10 : f32 to vector<4x24xf32>
    %26 = arith.mulf %24, %25 : vector<4x24xf32>
    %c4 = arith.constant 4 : index
    %c0_11 = arith.constant 0 : index
    %27 = vector.load %arg6[%c4, %c0_11] : memref<16x24xf32, #tpu.memory_space<vmem>>, vector<4x24xf32>
    tpu.vector_store %arg6[%c4, %c0_11], %26 {strides = array<i32>} : memref<16x24xf32, #tpu.memory_space<vmem>>, vector<4x24xf32>,
    %28 = vector.extract_strided_slice %15 {offsets = [16, 0], sizes = [4, 24], strides = [1, 1]} : vector<32x24xf32> to vector<4x24xf32>
    %29 = vector.extract_strided_slice %15 {offsets = [20, 0], sizes = [4, 24], strides = [1, 1]} : vector<32x24xf32> to vector<4x24xf32>
    %30 = arith.addf %28, %29 : vector<4x24xf32>
    %cst_12 = arith.constant 5.000000e-01 : f32
    %31 = vector.broadcast %cst_12 : f32 to vector<4x24xf32>
    %32 = arith.mulf %30, %31 : vector<4x24xf32>
    %c8 = arith.constant 8 : index
    %c0_13 = arith.constant 0 : index
    %33 = vector.load %arg6[%c8, %c0_13] : memref<16x24xf32, #tpu.memory_space<vmem>>, vector<4x24xf32>
    tpu.vector_store %arg6[%c8, %c0_13], %32 {strides = array<i32>} : memref<16x24xf32, #tpu.memory_space<vmem>>, vector<4x24xf32>,
    %34 = vector.extract_strided_slice %15 {offsets = [24, 0], sizes = [4, 24], strides = [1, 1]} : vector<32x24xf32> to vector<4x24xf32>
    %35 = vector.extract_strided_slice %15 {offsets = [28, 0], sizes = [4, 24], strides = [1, 1]} : vector<32x24xf32> to vector<4x24xf32>
    %36 = arith.addf %34, %35 : vector<4x24xf32>
    %cst_14 = arith.constant 5.000000e-01 : f32
    %37 = vector.broadcast %cst_14 : f32 to vector<4x24xf32>
    %38 = arith.mulf %36, %37 : vector<4x24xf32>
    %c12 = arith.constant 12 : index
    %c0_15 = arith.constant 0 : index
    %39 = vector.load %arg6[%c12, %c0_15] : memref<16x24xf32, #tpu.memory_space<vmem>>, vector<4x24xf32>
    tpu.vector_store %arg6[%c12, %c0_15], %38 {strides = array<i32>} : memref<16x24xf32, #tpu.memory_space<vmem>>, vector<4x24xf32>,
    %c0_16 = arith.constant 0 : index
    %c0_17 = arith.constant 0 : index
    %40 = vector.load %arg6[%c0_16, %c0_17] : memref<16x24xf32, #tpu.memory_space<vmem>>, vector<16x24xf32>
    %41 = arith.truncf %40 : vector<16x24xf32> to vector<16x24xbf16>
    %c0_18 = arith.constant 0 : index
    %c0_19 = arith.constant 0 : index
    %42 = vector.load %arg4[%c0_18, %c0_19] : memref<24x12xbf16, #tpu.memory_space<vmem>>, vector<24x12xbf16>
    %cst_20 = arith.constant dense<0.000000e+00> : vector<16x12xf32>
    %43 = tpu.matmul %41, %42, %cst_20 {dimension_numbers = #tpu.dot_dimension_numbers<[1], [0], [0], [1], [0, 0, 1, 1], [], []>} : vector<16x24xbf16>, vector<24x12xbf16>, vector<16x12xf32> -> vector<16x12xf32>
    %44 = arith.truncf %43 : vector<16x12xf32> to vector<16x12xbf16>
    %c0_21 = arith.constant 0 : index
    %c0_22 = arith.constant 0 : index
    %c0_23 = arith.constant 0 : index
    %45 = vector.load %arg5[%c0_21, %c0_22, %c0_23] : memref<1x16x12xbf16, #tpu.memory_space<vmem>>, vector<1x16x12xbf16>
    %46 = vector.shape_cast %45 : vector<1x16x12xbf16> to vector<16x12xbf16>
    %47 = vector.shape_cast %44 : vector<16x12xbf16> to vector<1x16x12xbf16>
    tpu.vector_store %arg5[%c0_21, %c0_22, %c0_23], %47 {strides = array<i32>} : memref<1x16x12xbf16, #tpu.memory_space<vmem>>, vector<1x16x12xbf16>,
    return
  }
  func.func @transform_0(%arg0: i32) -> (i32, i32, i32) {
    %c0_i32 = arith.constant 0 : i32
    %c0_i32_0 = arith.constant 0 : i32
    %c0_i32_1 = arith.constant 0 : i32
    return %arg0, %c0_i32, %c0_i32_0 : i32, i32, i32
  }
  func.func @transform_1(%arg0: i32) -> (i32, i32) {
    %c0_i32 = arith.constant 0 : i32
    %c0_i32_0 = arith.constant 0 : i32
    %c0_i32_1 = arith.constant 0 : i32
    return %c0_i32, %c0_i32_0 : i32, i32
  }
  func.func @transform_2(%arg0: i32) -> (i32, i32) {
    %c0_i32 = arith.constant 0 : i32
    %c0_i32_0 = arith.constant 0 : i32
    %c0_i32_1 = arith.constant 0 : i32
    return %c0_i32, %c0_i32_0 : i32, i32
  }
  func.func @transform_3(%arg0: i32) -> (i32, i32) {
    %c0_i32 = arith.constant 0 : i32
    %c0_i32_0 = arith.constant 0 : i32
    %c0_i32_1 = arith.constant 0 : i32
    return %c0_i32, %c0_i32_0 : i32, i32
  }
  func.func @transform_4(%arg0: i32) -> (i32, i32, i32) {
    %c0_i32 = arith.constant 0 : i32
    %c0_i32_0 = arith.constant 0 : i32
    %c0_i32_1 = arith.constant 0 : i32
    return %arg0, %c0_i32, %c0_i32_0 : i32, i32, i32
  }
}

module attributes {stable_mosaic.version = 11 : i64} {
  func.func @_bottleneck_kernel(%arg0: i32, %arg1: memref<1x16x12xbf16, #tpu.memory_space<vmem>>, %arg2: memref<1x12xf32, #tpu.memory_space<vmem>>, %arg3: memref<1x12xf32, #tpu.memory_space<vmem>>, %arg4: memref<12x32xbf16, #tpu.memory_space<vmem>>, %arg5: memref<1x32xf32, #tpu.memory_space<vmem>>, %arg6: memref<1x32xf32, #tpu.memory_space<vmem>>, %arg7: memref<9x32x8xbf16, #tpu.memory_space<vmem>>, %arg8: memref<12x1xbf16, #tpu.memory_space<vmem>>, %arg9: memref<8x1xbf16, #tpu.memory_space<vmem>>, %arg10: memref<1x1xf32, #tpu.memory_space<vmem>>, %arg11: memref<1x20xbf16, #tpu.memory_space<vmem>>, %arg12: memref<1x20xf32, #tpu.memory_space<vmem>>, %arg13: memref<1x16x20xbf16, #tpu.memory_space<vmem>>, %arg14: memref<50x32xf32, #tpu.memory_space<vmem>>, %arg15: memref<16x8xf32, #tpu.memory_space<vmem>>) attributes {dimension_semantics = [#tpu.dimension_semantics<parallel>], iteration_bounds = array<i64: 2>, scalar_prefetch = 0 : i64, scratch_operands = 2 : i64, tpu.core_type = #tpu.core_type<tc>, window_params = [{transform_indices = @transform_0, window_bounds = array<i64: 1, 16, 12>}, {pipeline_mode = #tpu.pipeline_mode<synchronous>, transform_indices = @transform_1, window_bounds = array<i64: 1, 12>}, {pipeline_mode = #tpu.pipeline_mode<synchronous>, transform_indices = @transform_2, window_bounds = array<i64: 1, 12>}, {pipeline_mode = #tpu.pipeline_mode<synchronous>, transform_indices = @transform_3, window_bounds = array<i64: 12, 32>}, {pipeline_mode = #tpu.pipeline_mode<synchronous>, transform_indices = @transform_4, window_bounds = array<i64: 1, 32>}, {pipeline_mode = #tpu.pipeline_mode<synchronous>, transform_indices = @transform_5, window_bounds = array<i64: 1, 32>}, {pipeline_mode = #tpu.pipeline_mode<synchronous>, transform_indices = @transform_6, window_bounds = array<i64: 9, 32, 8>}, {pipeline_mode = #tpu.pipeline_mode<synchronous>, transform_indices = @transform_7, window_bounds = array<i64: 12, 1>}, {pipeline_mode = #tpu.pipeline_mode<synchronous>, transform_indices = @transform_8, window_bounds = array<i64: 8, 1>}, {pipeline_mode = #tpu.pipeline_mode<synchronous>, transform_indices = @transform_9, window_bounds = array<i64: 1, 1>}, {pipeline_mode = #tpu.pipeline_mode<synchronous>, transform_indices = @transform_10, window_bounds = array<i64: 1, 20>}, {pipeline_mode = #tpu.pipeline_mode<synchronous>, transform_indices = @transform_11, window_bounds = array<i64: 1, 20>}, {transform_indices = @transform_12, window_bounds = array<i64: 1, 16, 20>}]} {
    %c0 = arith.constant 0 : index
    %c0_0 = arith.constant 0 : index
    %c0_1 = arith.constant 0 : index
    %0 = vector.load %arg1[%c0, %c0_0, %c0_1] : memref<1x16x12xbf16, #tpu.memory_space<vmem>>, vector<1x16x12xbf16>
    %1 = vector.shape_cast %0 : vector<1x16x12xbf16> to vector<16x12xbf16>
    %2 = arith.extf %1 : vector<16x12xbf16> to vector<16x12xf32>
    %c0_2 = arith.constant 0 : index
    %c0_3 = arith.constant 0 : index
    %3 = vector.load %arg2[%c0_2, %c0_3] : memref<1x12xf32, #tpu.memory_space<vmem>>, vector<1x12xf32>
    %4 = vector.broadcast %3 : vector<1x12xf32> to vector<16x12xf32>
    %5 = arith.mulf %2, %4 : vector<16x12xf32>
    %c0_4 = arith.constant 0 : index
    %c0_5 = arith.constant 0 : index
    %6 = vector.load %arg3[%c0_4, %c0_5] : memref<1x12xf32, #tpu.memory_space<vmem>>, vector<1x12xf32>
    %7 = vector.broadcast %6 : vector<1x12xf32> to vector<16x12xf32>
    %8 = arith.addf %5, %7 : vector<16x12xf32>
    %cst = arith.constant 0.000000e+00 : f32
    %9 = vector.broadcast %cst : f32 to vector<16x12xf32>
    %10 = arith.maximumf %8, %9 : vector<16x12xf32>
    %11 = arith.truncf %10 : vector<16x12xf32> to vector<16x12xbf16>
    %c0_6 = arith.constant 0 : index
    %c0_7 = arith.constant 0 : index
    %12 = vector.load %arg4[%c0_6, %c0_7] : memref<12x32xbf16, #tpu.memory_space<vmem>>, vector<12x32xbf16>
    %cst_8 = arith.constant dense<0.000000e+00> : vector<16x32xf32>
    %13 = tpu.matmul %11, %12, %cst_8 {dimension_numbers = #tpu.dot_dimension_numbers<[1], [0], [0], [1], [0, 0, 1, 1], [], []>} : vector<16x12xbf16>, vector<12x32xbf16>, vector<16x32xf32> -> vector<16x32xf32>
    %c0_9 = arith.constant 0 : index
    %c0_10 = arith.constant 0 : index
    %14 = vector.load %arg5[%c0_9, %c0_10] : memref<1x32xf32, #tpu.memory_space<vmem>>, vector<1x32xf32>
    %15 = vector.broadcast %14 : vector<1x32xf32> to vector<16x32xf32>
    %16 = arith.mulf %13, %15 : vector<16x32xf32>
    %c0_11 = arith.constant 0 : index
    %c0_12 = arith.constant 0 : index
    %17 = vector.load %arg6[%c0_11, %c0_12] : memref<1x32xf32, #tpu.memory_space<vmem>>, vector<1x32xf32>
    %18 = vector.broadcast %17 : vector<1x32xf32> to vector<16x32xf32>
    %19 = arith.addf %16, %18 : vector<16x32xf32>
    %cst_13 = arith.constant 0.000000e+00 : f32
    %20 = vector.broadcast %cst_13 : f32 to vector<16x32xf32>
    %21 = arith.maximumf %19, %20 : vector<16x32xf32>
    %cst_14 = arith.constant 0.000000e+00 : f32
    %22 = vector.broadcast %cst_14 : f32 to vector<50x32xf32>
    %c0_15 = arith.constant 0 : index
    %c0_16 = arith.constant 0 : index
    %23 = vector.load %arg14[%c0_15, %c0_16] : memref<50x32xf32, #tpu.memory_space<vmem>>, vector<50x32xf32>
    tpu.vector_store %arg14[%c0_15, %c0_16], %22 {strides = array<i32>} : memref<50x32xf32, #tpu.memory_space<vmem>>, vector<50x32xf32>,
    %24 = vector.extract_strided_slice %21 {offsets = [0, 0], sizes = [4, 32], strides = [1, 1]} : vector<16x32xf32> to vector<4x32xf32>
    %c7 = arith.constant 7 : index
    %c0_17 = arith.constant 0 : index
    %25 = vector.load %arg14[%c7, %c0_17] : memref<50x32xf32, #tpu.memory_space<vmem>>, vector<4x32xf32>
    tpu.vector_store %arg14[%c7, %c0_17], %24 {strides = array<i32>} : memref<50x32xf32, #tpu.memory_space<vmem>>, vector<4x32xf32>,
    %26 = vector.extract_strided_slice %21 {offsets = [4, 0], sizes = [4, 32], strides = [1, 1]} : vector<16x32xf32> to vector<4x32xf32>
    %c13 = arith.constant 13 : index
    %c0_18 = arith.constant 0 : index
    %27 = vector.load %arg14[%c13, %c0_18] : memref<50x32xf32, #tpu.memory_space<vmem>>, vector<4x32xf32>
    tpu.vector_store %arg14[%c13, %c0_18], %26 {strides = array<i32>} : memref<50x32xf32, #tpu.memory_space<vmem>>, vector<4x32xf32>,
    %28 = vector.extract_strided_slice %21 {offsets = [8, 0], sizes = [4, 32], strides = [1, 1]} : vector<16x32xf32> to vector<4x32xf32>
    %c19 = arith.constant 19 : index
    %c0_19 = arith.constant 0 : index
    %29 = vector.load %arg14[%c19, %c0_19] : memref<50x32xf32, #tpu.memory_space<vmem>>, vector<4x32xf32>
    tpu.vector_store %arg14[%c19, %c0_19], %28 {strides = array<i32>} : memref<50x32xf32, #tpu.memory_space<vmem>>, vector<4x32xf32>,
    %30 = vector.extract_strided_slice %21 {offsets = [12, 0], sizes = [4, 32], strides = [1, 1]} : vector<16x32xf32> to vector<4x32xf32>
    %c25 = arith.constant 25 : index
    %c0_20 = arith.constant 0 : index
    %31 = vector.load %arg14[%c25, %c0_20] : memref<50x32xf32, #tpu.memory_space<vmem>>, vector<4x32xf32>
    tpu.vector_store %arg14[%c25, %c0_20], %30 {strides = array<i32>} : memref<50x32xf32, #tpu.memory_space<vmem>>, vector<4x32xf32>,
    %c0_21 = arith.constant 0 : index
    %c0_22 = arith.constant 0 : index
    %32 = vector.load %arg14[%c0_21, %c0_22] : memref<50x32xf32, #tpu.memory_space<vmem>>, vector<50x32xf32>
    %33 = arith.truncf %32 : vector<50x32xf32> to vector<50x32xbf16>
    %cst_23 = arith.constant 0.000000e+00 : f32
    %34 = vector.broadcast %cst_23 : f32 to vector<36x8xf32>
    %35 = vector.extract_strided_slice %33 {offsets = [0, 0], sizes = [36, 32], strides = [1, 1]} : vector<50x32xbf16> to vector<36x32xbf16>
    %c0_24 = arith.constant 0 : index
    %c0_25 = arith.constant 0 : index
    %c0_26 = arith.constant 0 : index
    %36 = vector.load %arg7[%c0_24, %c0_25, %c0_26] : memref<9x32x8xbf16, #tpu.memory_space<vmem>>, vector<1x32x8xbf16>
    %37 = vector.shape_cast %36 : vector<1x32x8xbf16> to vector<32x8xbf16>
    %cst_27 = arith.constant dense<0.000000e+00> : vector<36x8xf32>
    %38 = tpu.matmul %35, %37, %cst_27 {dimension_numbers = #tpu.dot_dimension_numbers<[1], [0], [0], [1], [0, 0, 1, 1], [], []>} : vector<36x32xbf16>, vector<32x8xbf16>, vector<36x8xf32> -> vector<36x8xf32>
    %39 = arith.addf %34, %38 : vector<36x8xf32>
    %40 = vector.extract_strided_slice %33 {offsets = [1, 0], sizes = [36, 32], strides = [1, 1]} : vector<50x32xbf16> to vector<36x32xbf16>
    %c1 = arith.constant 1 : index
    %c0_28 = arith.constant 0 : index
    %c0_29 = arith.constant 0 : index
    %41 = vector.load %arg7[%c1, %c0_28, %c0_29] : memref<9x32x8xbf16, #tpu.memory_space<vmem>>, vector<1x32x8xbf16>
    %42 = vector.shape_cast %41 : vector<1x32x8xbf16> to vector<32x8xbf16>
    %cst_30 = arith.constant dense<0.000000e+00> : vector<36x8xf32>
    %43 = tpu.matmul %40, %42, %cst_30 {dimension_numbers = #tpu.dot_dimension_numbers<[1], [0], [0], [1], [0, 0, 1, 1], [], []>} : vector<36x32xbf16>, vector<32x8xbf16>, vector<36x8xf32> -> vector<36x8xf32>
    %44 = arith.addf %39, %43 : vector<36x8xf32>
    %45 = vector.extract_strided_slice %33 {offsets = [2, 0], sizes = [36, 32], strides = [1, 1]} : vector<50x32xbf16> to vector<36x32xbf16>
    %c2 = arith.constant 2 : index
    %c0_31 = arith.constant 0 : index
    %c0_32 = arith.constant 0 : index
    %46 = vector.load %arg7[%c2, %c0_31, %c0_32] : memref<9x32x8xbf16, #tpu.memory_space<vmem>>, vector<1x32x8xbf16>
    %47 = vector.shape_cast %46 : vector<1x32x8xbf16> to vector<32x8xbf16>
    %cst_33 = arith.constant dense<0.000000e+00> : vector<36x8xf32>
    %48 = tpu.matmul %45, %47, %cst_33 {dimension_numbers = #tpu.dot_dimension_numbers<[1], [0], [0], [1], [0, 0, 1, 1], [], []>} : vector<36x32xbf16>, vector<32x8xbf16>, vector<36x8xf32> -> vector<36x8xf32>
    %49 = arith.addf %44, %48 : vector<36x8xf32>
    %50 = vector.extract_strided_slice %33 {offsets = [6, 0], sizes = [36, 32], strides = [1, 1]} : vector<50x32xbf16> to vector<36x32xbf16>
    %c3 = arith.constant 3 : index
    %c0_34 = arith.constant 0 : index
    %c0_35 = arith.constant 0 : index
    %51 = vector.load %arg7[%c3, %c0_34, %c0_35] : memref<9x32x8xbf16, #tpu.memory_space<vmem>>, vector<1x32x8xbf16>
    %52 = vector.shape_cast %51 : vector<1x32x8xbf16> to vector<32x8xbf16>
    %cst_36 = arith.constant dense<0.000000e+00> : vector<36x8xf32>
    %53 = tpu.matmul %50, %52, %cst_36 {dimension_numbers = #tpu.dot_dimension_numbers<[1], [0], [0], [1], [0, 0, 1, 1], [], []>} : vector<36x32xbf16>, vector<32x8xbf16>, vector<36x8xf32> -> vector<36x8xf32>
    %54 = arith.addf %49, %53 : vector<36x8xf32>
    %55 = vector.extract_strided_slice %33 {offsets = [7, 0], sizes = [36, 32], strides = [1, 1]} : vector<50x32xbf16> to vector<36x32xbf16>
    %c4 = arith.constant 4 : index
    %c0_37 = arith.constant 0 : index
    %c0_38 = arith.constant 0 : index
    %56 = vector.load %arg7[%c4, %c0_37, %c0_38] : memref<9x32x8xbf16, #tpu.memory_space<vmem>>, vector<1x32x8xbf16>
    %57 = vector.shape_cast %56 : vector<1x32x8xbf16> to vector<32x8xbf16>
    %cst_39 = arith.constant dense<0.000000e+00> : vector<36x8xf32>
    %58 = tpu.matmul %55, %57, %cst_39 {dimension_numbers = #tpu.dot_dimension_numbers<[1], [0], [0], [1], [0, 0, 1, 1], [], []>} : vector<36x32xbf16>, vector<32x8xbf16>, vector<36x8xf32> -> vector<36x8xf32>
    %59 = arith.addf %54, %58 : vector<36x8xf32>
    %60 = vector.extract_strided_slice %33 {offsets = [8, 0], sizes = [36, 32], strides = [1, 1]} : vector<50x32xbf16> to vector<36x32xbf16>
    %c5 = arith.constant 5 : index
    %c0_40 = arith.constant 0 : index
    %c0_41 = arith.constant 0 : index
    %61 = vector.load %arg7[%c5, %c0_40, %c0_41] : memref<9x32x8xbf16, #tpu.memory_space<vmem>>, vector<1x32x8xbf16>
    %62 = vector.shape_cast %61 : vector<1x32x8xbf16> to vector<32x8xbf16>
    %cst_42 = arith.constant dense<0.000000e+00> : vector<36x8xf32>
    %63 = tpu.matmul %60, %62, %cst_42 {dimension_numbers = #tpu.dot_dimension_numbers<[1], [0], [0], [1], [0, 0, 1, 1], [], []>} : vector<36x32xbf16>, vector<32x8xbf16>, vector<36x8xf32> -> vector<36x8xf32>
    %64 = arith.addf %59, %63 : vector<36x8xf32>
    %65 = vector.extract_strided_slice %33 {offsets = [12, 0], sizes = [36, 32], strides = [1, 1]} : vector<50x32xbf16> to vector<36x32xbf16>
    %c6 = arith.constant 6 : index
    %c0_43 = arith.constant 0 : index
    %c0_44 = arith.constant 0 : index
    %66 = vector.load %arg7[%c6, %c0_43, %c0_44] : memref<9x32x8xbf16, #tpu.memory_space<vmem>>, vector<1x32x8xbf16>
    %67 = vector.shape_cast %66 : vector<1x32x8xbf16> to vector<32x8xbf16>
    %cst_45 = arith.constant dense<0.000000e+00> : vector<36x8xf32>
    %68 = tpu.matmul %65, %67, %cst_45 {dimension_numbers = #tpu.dot_dimension_numbers<[1], [0], [0], [1], [0, 0, 1, 1], [], []>} : vector<36x32xbf16>, vector<32x8xbf16>, vector<36x8xf32> -> vector<36x8xf32>
    %69 = arith.addf %64, %68 : vector<36x8xf32>
    %70 = vector.extract_strided_slice %33 {offsets = [13, 0], sizes = [36, 32], strides = [1, 1]} : vector<50x32xbf16> to vector<36x32xbf16>
    %c7_46 = arith.constant 7 : index
    %c0_47 = arith.constant 0 : index
    %c0_48 = arith.constant 0 : index
    %71 = vector.load %arg7[%c7_46, %c0_47, %c0_48] : memref<9x32x8xbf16, #tpu.memory_space<vmem>>, vector<1x32x8xbf16>
    %72 = vector.shape_cast %71 : vector<1x32x8xbf16> to vector<32x8xbf16>
    %cst_49 = arith.constant dense<0.000000e+00> : vector<36x8xf32>
    %73 = tpu.matmul %70, %72, %cst_49 {dimension_numbers = #tpu.dot_dimension_numbers<[1], [0], [0], [1], [0, 0, 1, 1], [], []>} : vector<36x32xbf16>, vector<32x8xbf16>, vector<36x8xf32> -> vector<36x8xf32>
    %74 = arith.addf %69, %73 : vector<36x8xf32>
    %75 = vector.extract_strided_slice %33 {offsets = [14, 0], sizes = [36, 32], strides = [1, 1]} : vector<50x32xbf16> to vector<36x32xbf16>
    %c8 = arith.constant 8 : index
    %c0_50 = arith.constant 0 : index
    %c0_51 = arith.constant 0 : index
    %76 = vector.load %arg7[%c8, %c0_50, %c0_51] : memref<9x32x8xbf16, #tpu.memory_space<vmem>>, vector<1x32x8xbf16>
    %77 = vector.shape_cast %76 : vector<1x32x8xbf16> to vector<32x8xbf16>
    %cst_52 = arith.constant dense<0.000000e+00> : vector<36x8xf32>
    %78 = tpu.matmul %75, %77, %cst_52 {dimension_numbers = #tpu.dot_dimension_numbers<[1], [0], [0], [1], [0, 0, 1, 1], [], []>} : vector<36x32xbf16>, vector<32x8xbf16>, vector<36x8xf32> -> vector<36x8xf32>
    %79 = arith.addf %74, %78 : vector<36x8xf32>
    %80 = vector.extract_strided_slice %79 {offsets = [0, 0], sizes = [4, 8], strides = [1, 1]} : vector<36x8xf32> to vector<4x8xf32>
    %c0_53 = arith.constant 0 : index
    %c0_54 = arith.constant 0 : index
    %81 = vector.load %arg15[%c0_53, %c0_54] : memref<16x8xf32, #tpu.memory_space<vmem>>, vector<4x8xf32>
    tpu.vector_store %arg15[%c0_53, %c0_54], %80 {strides = array<i32>} : memref<16x8xf32, #tpu.memory_space<vmem>>, vector<4x8xf32>,
    %82 = vector.extract_strided_slice %79 {offsets = [6, 0], sizes = [4, 8], strides = [1, 1]} : vector<36x8xf32> to vector<4x8xf32>
    %c4_55 = arith.constant 4 : index
    %c0_56 = arith.constant 0 : index
    %83 = vector.load %arg15[%c4_55, %c0_56] : memref<16x8xf32, #tpu.memory_space<vmem>>, vector<4x8xf32>
    tpu.vector_store %arg15[%c4_55, %c0_56], %82 {strides = array<i32>} : memref<16x8xf32, #tpu.memory_space<vmem>>, vector<4x8xf32>,
    %84 = vector.extract_strided_slice %79 {offsets = [12, 0], sizes = [4, 8], strides = [1, 1]} : vector<36x8xf32> to vector<4x8xf32>
    %c8_57 = arith.constant 8 : index
    %c0_58 = arith.constant 0 : index
    %85 = vector.load %arg15[%c8_57, %c0_58] : memref<16x8xf32, #tpu.memory_space<vmem>>, vector<4x8xf32>
    tpu.vector_store %arg15[%c8_57, %c0_58], %84 {strides = array<i32>} : memref<16x8xf32, #tpu.memory_space<vmem>>, vector<4x8xf32>,
    %86 = vector.extract_strided_slice %79 {offsets = [18, 0], sizes = [4, 8], strides = [1, 1]} : vector<36x8xf32> to vector<4x8xf32>
    %c12 = arith.constant 12 : index
    %c0_59 = arith.constant 0 : index
    %87 = vector.load %arg15[%c12, %c0_59] : memref<16x8xf32, #tpu.memory_space<vmem>>, vector<4x8xf32>
    tpu.vector_store %arg15[%c12, %c0_59], %86 {strides = array<i32>} : memref<16x8xf32, #tpu.memory_space<vmem>>, vector<4x8xf32>,
    %c0_60 = arith.constant 0 : index
    %c0_61 = arith.constant 0 : index
    %88 = vector.load %arg15[%c0_60, %c0_61] : memref<16x8xf32, #tpu.memory_space<vmem>>, vector<16x8xf32>
    %cst_62 = arith.constant dense<0.000000e+00> : vector<12xf32>
    %89 = vector.multi_reduction <add>, %2, %cst_62 [0] : vector<16x12xf32> to vector<12xf32>
    %90 = vector.shape_cast %89 : vector<12xf32> to vector<1x12xf32>
    %cst_63 = arith.constant 6.250000e-02 : f32
    %91 = vector.broadcast %cst_63 : f32 to vector<1x12xf32>
    %92 = arith.mulf %90, %91 : vector<1x12xf32>
    %cst_64 = arith.constant dense<0.000000e+00> : vector<8xf32>
    %93 = vector.multi_reduction <add>, %88, %cst_64 [0] : vector<16x8xf32> to vector<8xf32>
    %94 = vector.shape_cast %93 : vector<8xf32> to vector<1x8xf32>
    %cst_65 = arith.constant 6.250000e-02 : f32
    %95 = vector.broadcast %cst_65 : f32 to vector<1x8xf32>
    %96 = arith.mulf %94, %95 : vector<1x8xf32>
    %97 = arith.truncf %92 : vector<1x12xf32> to vector<1x12xbf16>
    %c0_66 = arith.constant 0 : index
    %c0_67 = arith.constant 0 : index
    %98 = vector.load %arg8[%c0_66, %c0_67] : memref<12x1xbf16, #tpu.memory_space<vmem>>, vector<12x1xbf16>
    %cst_68 = arith.constant dense<0.000000e+00> : vector<1x1xf32>
    %99 = tpu.matmul %97, %98, %cst_68 {dimension_numbers = #tpu.dot_dimension_numbers<[1], [0], [0], [1], [0, 0, 1, 1], [], []>} : vector<1x12xbf16>, vector<12x1xbf16>, vector<1x1xf32> -> vector<1x1xf32>
    %100 = arith.truncf %96 : vector<1x8xf32> to vector<1x8xbf16>
    %c0_69 = arith.constant 0 : index
    %c0_70 = arith.constant 0 : index
    %101 = vector.load %arg9[%c0_69, %c0_70] : memref<8x1xbf16, #tpu.memory_space<vmem>>, vector<8x1xbf16>
    %cst_71 = arith.constant dense<0.000000e+00> : vector<1x1xf32>
    %102 = tpu.matmul %100, %101, %cst_71 {dimension_numbers = #tpu.dot_dimension_numbers<[1], [0], [0], [1], [0, 0, 1, 1], [], []>} : vector<1x8xbf16>, vector<8x1xbf16>, vector<1x1xf32> -> vector<1x1xf32>
    %103 = arith.addf %99, %102 : vector<1x1xf32>
    %c0_72 = arith.constant 0 : index
    %c0_73 = arith.constant 0 : index
    %104 = vector.load %arg10[%c0_72, %c0_73] : memref<1x1xf32, #tpu.memory_space<vmem>>, vector<1x1xf32>
    %105 = arith.addf %103, %104 : vector<1x1xf32>
    %cst_74 = arith.constant 0.000000e+00 : f32
    %106 = vector.broadcast %cst_74 : f32 to vector<1x1xf32>
    %107 = arith.maximumf %105, %106 : vector<1x1xf32>
    %108 = arith.truncf %107 : vector<1x1xf32> to vector<1x1xbf16>
    %c0_75 = arith.constant 0 : index
    %c0_76 = arith.constant 0 : index
    %109 = vector.load %arg11[%c0_75, %c0_76] : memref<1x20xbf16, #tpu.memory_space<vmem>>, vector<1x20xbf16>
    %cst_77 = arith.constant dense<0.000000e+00> : vector<1x20xf32>
    %110 = tpu.matmul %108, %109, %cst_77 {dimension_numbers = #tpu.dot_dimension_numbers<[1], [0], [0], [1], [0, 0, 1, 1], [], []>} : vector<1x1xbf16>, vector<1x20xbf16>, vector<1x20xf32> -> vector<1x20xf32>
    %c0_78 = arith.constant 0 : index
    %c0_79 = arith.constant 0 : index
    %111 = vector.load %arg12[%c0_78, %c0_79] : memref<1x20xf32, #tpu.memory_space<vmem>>, vector<1x20xf32>
    %112 = arith.addf %110, %111 : vector<1x20xf32>
    %113 = arith.negf %112 : vector<1x20xf32>
    %114 = math.exp %113 : vector<1x20xf32>
    %cst_80 = arith.constant 1.000000e+00 : f32
    %115 = vector.broadcast %cst_80 : f32 to vector<1x20xf32>
    %116 = arith.addf %115, %114 : vector<1x20xf32>
    %117 = arith.divf %115, %116 : vector<1x20xf32>
    %118 = vector.extract_strided_slice %117 {offsets = [0, 0], sizes = [1, 12], strides = [1, 1]} : vector<1x20xf32> to vector<1x12xf32>
    %119 = vector.broadcast %118 : vector<1x12xf32> to vector<16x12xf32>
    %120 = arith.mulf %2, %119 : vector<16x12xf32>
    %121 = arith.truncf %120 : vector<16x12xf32> to vector<16x12xbf16>
    %c0_81 = arith.constant 0 : index
    %c0_82 = arith.constant 0 : index
    %c0_83 = arith.constant 0 : index
    %122 = vector.load %arg13[%c0_81, %c0_82, %c0_83] : memref<1x16x20xbf16, #tpu.memory_space<vmem>>, vector<1x16x12xbf16>
    %123 = vector.shape_cast %122 : vector<1x16x12xbf16> to vector<16x12xbf16>
    %124 = vector.shape_cast %121 : vector<16x12xbf16> to vector<1x16x12xbf16>
    tpu.vector_store %arg13[%c0_81, %c0_82, %c0_83], %124 {strides = array<i32>} : memref<1x16x20xbf16, #tpu.memory_space<vmem>>, vector<1x16x12xbf16>,
    %125 = vector.extract_strided_slice %117 {offsets = [0, 12], sizes = [1, 8], strides = [1, 1]} : vector<1x20xf32> to vector<1x8xf32>
    %126 = vector.broadcast %125 : vector<1x8xf32> to vector<16x8xf32>
    %127 = arith.mulf %88, %126 : vector<16x8xf32>
    %128 = arith.truncf %127 : vector<16x8xf32> to vector<16x8xbf16>
    %c0_84 = arith.constant 0 : index
    %c0_85 = arith.constant 0 : index
    %c12_86 = arith.constant 12 : index
    %129 = vector.load %arg13[%c0_84, %c0_85, %c12_86] : memref<1x16x20xbf16, #tpu.memory_space<vmem>>, vector<1x16x8xbf16>
    %130 = vector.shape_cast %129 : vector<1x16x8xbf16> to vector<16x8xbf16>
    %131 = vector.shape_cast %128 : vector<16x8xbf16> to vector<1x16x8xbf16>
    tpu.vector_store %arg13[%c0_84, %c0_85, %c12_86], %131 {strides = array<i32>} : memref<1x16x20xbf16, #tpu.memory_space<vmem>>, vector<1x16x8xbf16>,
    return
  }
  func.func @transform_0(%arg0: i32) -> (i32, i32, i32) {
    %c0_i32 = arith.constant 0 : i32
    %c0_i32_0 = arith.constant 0 : i32
    %c0_i32_1 = arith.constant 0 : i32
    return %arg0, %c0_i32, %c0_i32_0 : i32, i32, i32
  }
  func.func @transform_1(%arg0: i32) -> (i32, i32) {
    %c0_i32 = arith.constant 0 : i32
    %c0_i32_0 = arith.constant 0 : i32
    %c0_i32_1 = arith.constant 0 : i32
    return %c0_i32, %c0_i32_0 : i32, i32
  }
  func.func @transform_2(%arg0: i32) -> (i32, i32) {
    %c0_i32 = arith.constant 0 : i32
    %c0_i32_0 = arith.constant 0 : i32
    %c0_i32_1 = arith.constant 0 : i32
    return %c0_i32, %c0_i32_0 : i32, i32
  }
  func.func @transform_3(%arg0: i32) -> (i32, i32) {
    %c0_i32 = arith.constant 0 : i32
    %c0_i32_0 = arith.constant 0 : i32
    %c0_i32_1 = arith.constant 0 : i32
    return %c0_i32, %c0_i32_0 : i32, i32
  }
  func.func @transform_4(%arg0: i32) -> (i32, i32) {
    %c0_i32 = arith.constant 0 : i32
    %c0_i32_0 = arith.constant 0 : i32
    %c0_i32_1 = arith.constant 0 : i32
    return %c0_i32, %c0_i32_0 : i32, i32
  }
  func.func @transform_5(%arg0: i32) -> (i32, i32) {
    %c0_i32 = arith.constant 0 : i32
    %c0_i32_0 = arith.constant 0 : i32
    %c0_i32_1 = arith.constant 0 : i32
    return %c0_i32, %c0_i32_0 : i32, i32
  }
  func.func @transform_6(%arg0: i32) -> (i32, i32, i32) {
    %c0_i32 = arith.constant 0 : i32
    %c0_i32_0 = arith.constant 0 : i32
    %c0_i32_1 = arith.constant 0 : i32
    %c0_i32_2 = arith.constant 0 : i32
    return %c0_i32, %c0_i32_0, %c0_i32_1 : i32, i32, i32
  }
  func.func @transform_7(%arg0: i32) -> (i32, i32) {
    %c0_i32 = arith.constant 0 : i32
    %c0_i32_0 = arith.constant 0 : i32
    %c0_i32_1 = arith.constant 0 : i32
    return %c0_i32, %c0_i32_0 : i32, i32
  }
  func.func @transform_8(%arg0: i32) -> (i32, i32) {
    %c0_i32 = arith.constant 0 : i32
    %c0_i32_0 = arith.constant 0 : i32
    %c0_i32_1 = arith.constant 0 : i32
    return %c0_i32, %c0_i32_0 : i32, i32
  }
  func.func @transform_9(%arg0: i32) -> (i32, i32) {
    %c0_i32 = arith.constant 0 : i32
    %c0_i32_0 = arith.constant 0 : i32
    %c0_i32_1 = arith.constant 0 : i32
    return %c0_i32, %c0_i32_0 : i32, i32
  }
  func.func @transform_10(%arg0: i32) -> (i32, i32) {
    %c0_i32 = arith.constant 0 : i32
    %c0_i32_0 = arith.constant 0 : i32
    %c0_i32_1 = arith.constant 0 : i32
    return %c0_i32, %c0_i32_0 : i32, i32
  }
  func.func @transform_11(%arg0: i32) -> (i32, i32) {
    %c0_i32 = arith.constant 0 : i32
    %c0_i32_0 = arith.constant 0 : i32
    %c0_i32_1 = arith.constant 0 : i32
    return %c0_i32, %c0_i32_0 : i32, i32
  }
  func.func @transform_12(%arg0: i32) -> (i32, i32, i32) {
    %c0_i32 = arith.constant 0 : i32
    %c0_i32_0 = arith.constant 0 : i32
    %c0_i32_1 = arith.constant 0 : i32
    return %arg0, %c0_i32, %c0_i32_0 : i32, i32, i32
  }
}

module attributes {stable_mosaic.version = 11 : i64} {
  func.func @_transition_kernel(%arg0: i32, %arg1: memref<1x8x40xbf16, #tpu.memory_space<vmem>>, %arg2: memref<1x40xf32, #tpu.memory_space<vmem>>, %arg3: memref<1x40xf32, #tpu.memory_space<vmem>>, %arg4: memref<20x10xbf16, #tpu.memory_space<vmem>>, %arg5: memref<1x4x10xbf16, #tpu.memory_space<vmem>>, %arg6: memref<4x20xf32, #tpu.memory_space<vmem>>) attributes {dimension_semantics = [#tpu.dimension_semantics<parallel>], iteration_bounds = array<i64: 2>, scalar_prefetch = 0 : i64, scratch_operands = 1 : i64, tpu.core_type = #tpu.core_type<tc>, window_params = [{transform_indices = @transform_0, window_bounds = array<i64: 1, 8, 40>}, {pipeline_mode = #tpu.pipeline_mode<synchronous>, transform_indices = @transform_1, window_bounds = array<i64: 1, 40>}, {pipeline_mode = #tpu.pipeline_mode<synchronous>, transform_indices = @transform_2, window_bounds = array<i64: 1, 40>}, {pipeline_mode = #tpu.pipeline_mode<synchronous>, transform_indices = @transform_3, window_bounds = array<i64: 20, 10>}, {transform_indices = @transform_4, window_bounds = array<i64: 1, 4, 10>}]} {
    %c0 = arith.constant 0 : index
    %c0_0 = arith.constant 0 : index
    %c0_1 = arith.constant 0 : index
    %0 = vector.load %arg1[%c0, %c0_0, %c0_1] : memref<1x8x40xbf16, #tpu.memory_space<vmem>>, vector<1x8x40xbf16>
    %1 = vector.shape_cast %0 : vector<1x8x40xbf16> to vector<8x40xbf16>
    %2 = arith.extf %1 : vector<8x40xbf16> to vector<8x40xf32>
    %c0_2 = arith.constant 0 : index
    %c0_3 = arith.constant 0 : index
    %3 = vector.load %arg2[%c0_2, %c0_3] : memref<1x40xf32, #tpu.memory_space<vmem>>, vector<1x40xf32>
    %4 = vector.broadcast %3 : vector<1x40xf32> to vector<8x40xf32>
    %5 = arith.mulf %2, %4 : vector<8x40xf32>
    %c0_4 = arith.constant 0 : index
    %c0_5 = arith.constant 0 : index
    %6 = vector.load %arg3[%c0_4, %c0_5] : memref<1x40xf32, #tpu.memory_space<vmem>>, vector<1x40xf32>
    %7 = vector.broadcast %6 : vector<1x40xf32> to vector<8x40xf32>
    %8 = arith.addf %5, %7 : vector<8x40xf32>
    %cst = arith.constant 0.000000e+00 : f32
    %9 = vector.broadcast %cst : f32 to vector<8x40xf32>
    %10 = arith.maximumf %8, %9 : vector<8x40xf32>
    %11 = vector.extract_strided_slice %10 {offsets = [0, 0], sizes = [8, 20], strides = [1, 1]} : vector<8x40xf32> to vector<8x20xf32>
    %12 = vector.extract_strided_slice %10 {offsets = [0, 20], sizes = [8, 20], strides = [1, 1]} : vector<8x40xf32> to vector<8x20xf32>
    %13 = arith.addf %11, %12 : vector<8x20xf32>
    %cst_6 = arith.constant 5.000000e-01 : f32
    %14 = vector.broadcast %cst_6 : f32 to vector<8x20xf32>
    %15 = arith.mulf %13, %14 : vector<8x20xf32>
    %16 = vector.extract_strided_slice %15 {offsets = [0, 0], sizes = [2, 20], strides = [1, 1]} : vector<8x20xf32> to vector<2x20xf32>
    %17 = vector.extract_strided_slice %15 {offsets = [2, 0], sizes = [2, 20], strides = [1, 1]} : vector<8x20xf32> to vector<2x20xf32>
    %18 = arith.addf %16, %17 : vector<2x20xf32>
    %cst_7 = arith.constant 5.000000e-01 : f32
    %19 = vector.broadcast %cst_7 : f32 to vector<2x20xf32>
    %20 = arith.mulf %18, %19 : vector<2x20xf32>
    %c0_8 = arith.constant 0 : index
    %c0_9 = arith.constant 0 : index
    %21 = vector.load %arg6[%c0_8, %c0_9] : memref<4x20xf32, #tpu.memory_space<vmem>>, vector<2x20xf32>
    tpu.vector_store %arg6[%c0_8, %c0_9], %20 {strides = array<i32>} : memref<4x20xf32, #tpu.memory_space<vmem>>, vector<2x20xf32>,
    %22 = vector.extract_strided_slice %15 {offsets = [4, 0], sizes = [2, 20], strides = [1, 1]} : vector<8x20xf32> to vector<2x20xf32>
    %23 = vector.extract_strided_slice %15 {offsets = [6, 0], sizes = [2, 20], strides = [1, 1]} : vector<8x20xf32> to vector<2x20xf32>
    %24 = arith.addf %22, %23 : vector<2x20xf32>
    %cst_10 = arith.constant 5.000000e-01 : f32
    %25 = vector.broadcast %cst_10 : f32 to vector<2x20xf32>
    %26 = arith.mulf %24, %25 : vector<2x20xf32>
    %c2 = arith.constant 2 : index
    %c0_11 = arith.constant 0 : index
    %27 = vector.load %arg6[%c2, %c0_11] : memref<4x20xf32, #tpu.memory_space<vmem>>, vector<2x20xf32>
    tpu.vector_store %arg6[%c2, %c0_11], %26 {strides = array<i32>} : memref<4x20xf32, #tpu.memory_space<vmem>>, vector<2x20xf32>,
    %c0_12 = arith.constant 0 : index
    %c0_13 = arith.constant 0 : index
    %28 = vector.load %arg6[%c0_12, %c0_13] : memref<4x20xf32, #tpu.memory_space<vmem>>, vector<4x20xf32>
    %29 = arith.truncf %28 : vector<4x20xf32> to vector<4x20xbf16>
    %c0_14 = arith.constant 0 : index
    %c0_15 = arith.constant 0 : index
    %30 = vector.load %arg4[%c0_14, %c0_15] : memref<20x10xbf16, #tpu.memory_space<vmem>>, vector<20x10xbf16>
    %cst_16 = arith.constant dense<0.000000e+00> : vector<4x10xf32>
    %31 = tpu.matmul %29, %30, %cst_16 {dimension_numbers = #tpu.dot_dimension_numbers<[1], [0], [0], [1], [0, 0, 1, 1], [], []>} : vector<4x20xbf16>, vector<20x10xbf16>, vector<4x10xf32> -> vector<4x10xf32>
    %32 = arith.truncf %31 : vector<4x10xf32> to vector<4x10xbf16>
    %c0_17 = arith.constant 0 : index
    %c0_18 = arith.constant 0 : index
    %c0_19 = arith.constant 0 : index
    %33 = vector.load %arg5[%c0_17, %c0_18, %c0_19] : memref<1x4x10xbf16, #tpu.memory_space<vmem>>, vector<1x4x10xbf16>
    %34 = vector.shape_cast %33 : vector<1x4x10xbf16> to vector<4x10xbf16>
    %35 = vector.shape_cast %32 : vector<4x10xbf16> to vector<1x4x10xbf16>
    tpu.vector_store %arg5[%c0_17, %c0_18, %c0_19], %35 {strides = array<i32>} : memref<1x4x10xbf16, #tpu.memory_space<vmem>>, vector<1x4x10xbf16>,
    return
  }
  func.func @transform_0(%arg0: i32) -> (i32, i32, i32) {
    %c0_i32 = arith.constant 0 : i32
    %c0_i32_0 = arith.constant 0 : i32
    %c0_i32_1 = arith.constant 0 : i32
    return %arg0, %c0_i32, %c0_i32_0 : i32, i32, i32
  }
  func.func @transform_1(%arg0: i32) -> (i32, i32) {
    %c0_i32 = arith.constant 0 : i32
    %c0_i32_0 = arith.constant 0 : i32
    %c0_i32_1 = arith.constant 0 : i32
    return %c0_i32, %c0_i32_0 : i32, i32
  }
  func.func @transform_2(%arg0: i32) -> (i32, i32) {
    %c0_i32 = arith.constant 0 : i32
    %c0_i32_0 = arith.constant 0 : i32
    %c0_i32_1 = arith.constant 0 : i32
    return %c0_i32, %c0_i32_0 : i32, i32
  }
  func.func @transform_3(%arg0: i32) -> (i32, i32) {
    %c0_i32 = arith.constant 0 : i32
    %c0_i32_0 = arith.constant 0 : i32
    %c0_i32_1 = arith.constant 0 : i32
    return %c0_i32, %c0_i32_0 : i32, i32
  }
  func.func @transform_4(%arg0: i32) -> (i32, i32, i32) {
    %c0_i32 = arith.constant 0 : i32
    %c0_i32_0 = arith.constant 0 : i32
    %c0_i32_1 = arith.constant 0 : i32
    return %arg0, %c0_i32, %c0_i32_0 : i32, i32, i32
  }
}

module attributes {stable_mosaic.version = 11 : i64} {
  func.func @_bottleneck_kernel(%arg0: i32, %arg1: memref<1x4x10xbf16, #tpu.memory_space<vmem>>, %arg2: memref<1x10xf32, #tpu.memory_space<vmem>>, %arg3: memref<1x10xf32, #tpu.memory_space<vmem>>, %arg4: memref<10x32xbf16, #tpu.memory_space<vmem>>, %arg5: memref<1x32xf32, #tpu.memory_space<vmem>>, %arg6: memref<1x32xf32, #tpu.memory_space<vmem>>, %arg7: memref<9x32x8xbf16, #tpu.memory_space<vmem>>, %arg8: memref<10x1xbf16, #tpu.memory_space<vmem>>, %arg9: memref<8x1xbf16, #tpu.memory_space<vmem>>, %arg10: memref<1x1xf32, #tpu.memory_space<vmem>>, %arg11: memref<1x18xbf16, #tpu.memory_space<vmem>>, %arg12: memref<1x18xf32, #tpu.memory_space<vmem>>, %arg13: memref<1x4x18xbf16, #tpu.memory_space<vmem>>, %arg14: memref<26x32xf32, #tpu.memory_space<vmem>>, %arg15: memref<4x8xf32, #tpu.memory_space<vmem>>) attributes {dimension_semantics = [#tpu.dimension_semantics<parallel>], iteration_bounds = array<i64: 2>, scalar_prefetch = 0 : i64, scratch_operands = 2 : i64, tpu.core_type = #tpu.core_type<tc>, window_params = [{transform_indices = @transform_0, window_bounds = array<i64: 1, 4, 10>}, {pipeline_mode = #tpu.pipeline_mode<synchronous>, transform_indices = @transform_1, window_bounds = array<i64: 1, 10>}, {pipeline_mode = #tpu.pipeline_mode<synchronous>, transform_indices = @transform_2, window_bounds = array<i64: 1, 10>}, {pipeline_mode = #tpu.pipeline_mode<synchronous>, transform_indices = @transform_3, window_bounds = array<i64: 10, 32>}, {pipeline_mode = #tpu.pipeline_mode<synchronous>, transform_indices = @transform_4, window_bounds = array<i64: 1, 32>}, {pipeline_mode = #tpu.pipeline_mode<synchronous>, transform_indices = @transform_5, window_bounds = array<i64: 1, 32>}, {pipeline_mode = #tpu.pipeline_mode<synchronous>, transform_indices = @transform_6, window_bounds = array<i64: 9, 32, 8>}, {pipeline_mode = #tpu.pipeline_mode<synchronous>, transform_indices = @transform_7, window_bounds = array<i64: 10, 1>}, {pipeline_mode = #tpu.pipeline_mode<synchronous>, transform_indices = @transform_8, window_bounds = array<i64: 8, 1>}, {pipeline_mode = #tpu.pipeline_mode<synchronous>, transform_indices = @transform_9, window_bounds = array<i64: 1, 1>}, {pipeline_mode = #tpu.pipeline_mode<synchronous>, transform_indices = @transform_10, window_bounds = array<i64: 1, 18>}, {pipeline_mode = #tpu.pipeline_mode<synchronous>, transform_indices = @transform_11, window_bounds = array<i64: 1, 18>}, {transform_indices = @transform_12, window_bounds = array<i64: 1, 4, 18>}]} {
    %c0 = arith.constant 0 : index
    %c0_0 = arith.constant 0 : index
    %c0_1 = arith.constant 0 : index
    %0 = vector.load %arg1[%c0, %c0_0, %c0_1] : memref<1x4x10xbf16, #tpu.memory_space<vmem>>, vector<1x4x10xbf16>
    %1 = vector.shape_cast %0 : vector<1x4x10xbf16> to vector<4x10xbf16>
    %2 = arith.extf %1 : vector<4x10xbf16> to vector<4x10xf32>
    %c0_2 = arith.constant 0 : index
    %c0_3 = arith.constant 0 : index
    %3 = vector.load %arg2[%c0_2, %c0_3] : memref<1x10xf32, #tpu.memory_space<vmem>>, vector<1x10xf32>
    %4 = vector.broadcast %3 : vector<1x10xf32> to vector<4x10xf32>
    %5 = arith.mulf %2, %4 : vector<4x10xf32>
    %c0_4 = arith.constant 0 : index
    %c0_5 = arith.constant 0 : index
    %6 = vector.load %arg3[%c0_4, %c0_5] : memref<1x10xf32, #tpu.memory_space<vmem>>, vector<1x10xf32>
    %7 = vector.broadcast %6 : vector<1x10xf32> to vector<4x10xf32>
    %8 = arith.addf %5, %7 : vector<4x10xf32>
    %cst = arith.constant 0.000000e+00 : f32
    %9 = vector.broadcast %cst : f32 to vector<4x10xf32>
    %10 = arith.maximumf %8, %9 : vector<4x10xf32>
    %11 = arith.truncf %10 : vector<4x10xf32> to vector<4x10xbf16>
    %c0_6 = arith.constant 0 : index
    %c0_7 = arith.constant 0 : index
    %12 = vector.load %arg4[%c0_6, %c0_7] : memref<10x32xbf16, #tpu.memory_space<vmem>>, vector<10x32xbf16>
    %cst_8 = arith.constant dense<0.000000e+00> : vector<4x32xf32>
    %13 = tpu.matmul %11, %12, %cst_8 {dimension_numbers = #tpu.dot_dimension_numbers<[1], [0], [0], [1], [0, 0, 1, 1], [], []>} : vector<4x10xbf16>, vector<10x32xbf16>, vector<4x32xf32> -> vector<4x32xf32>
    %c0_9 = arith.constant 0 : index
    %c0_10 = arith.constant 0 : index
    %14 = vector.load %arg5[%c0_9, %c0_10] : memref<1x32xf32, #tpu.memory_space<vmem>>, vector<1x32xf32>
    %15 = vector.broadcast %14 : vector<1x32xf32> to vector<4x32xf32>
    %16 = arith.mulf %13, %15 : vector<4x32xf32>
    %c0_11 = arith.constant 0 : index
    %c0_12 = arith.constant 0 : index
    %17 = vector.load %arg6[%c0_11, %c0_12] : memref<1x32xf32, #tpu.memory_space<vmem>>, vector<1x32xf32>
    %18 = vector.broadcast %17 : vector<1x32xf32> to vector<4x32xf32>
    %19 = arith.addf %16, %18 : vector<4x32xf32>
    %cst_13 = arith.constant 0.000000e+00 : f32
    %20 = vector.broadcast %cst_13 : f32 to vector<4x32xf32>
    %21 = arith.maximumf %19, %20 : vector<4x32xf32>
    %cst_14 = arith.constant 0.000000e+00 : f32
    %22 = vector.broadcast %cst_14 : f32 to vector<26x32xf32>
    %c0_15 = arith.constant 0 : index
    %c0_16 = arith.constant 0 : index
    %23 = vector.load %arg14[%c0_15, %c0_16] : memref<26x32xf32, #tpu.memory_space<vmem>>, vector<26x32xf32>
    tpu.vector_store %arg14[%c0_15, %c0_16], %22 {strides = array<i32>} : memref<26x32xf32, #tpu.memory_space<vmem>>, vector<26x32xf32>,
    %24 = vector.extract_strided_slice %21 {offsets = [0, 0], sizes = [2, 32], strides = [1, 1]} : vector<4x32xf32> to vector<2x32xf32>
    %c5 = arith.constant 5 : index
    %c0_17 = arith.constant 0 : index
    %25 = vector.load %arg14[%c5, %c0_17] : memref<26x32xf32, #tpu.memory_space<vmem>>, vector<2x32xf32>
    tpu.vector_store %arg14[%c5, %c0_17], %24 {strides = array<i32>} : memref<26x32xf32, #tpu.memory_space<vmem>>, vector<2x32xf32>,
    %26 = vector.extract_strided_slice %21 {offsets = [2, 0], sizes = [2, 32], strides = [1, 1]} : vector<4x32xf32> to vector<2x32xf32>
    %c9 = arith.constant 9 : index
    %c0_18 = arith.constant 0 : index
    %27 = vector.load %arg14[%c9, %c0_18] : memref<26x32xf32, #tpu.memory_space<vmem>>, vector<2x32xf32>
    tpu.vector_store %arg14[%c9, %c0_18], %26 {strides = array<i32>} : memref<26x32xf32, #tpu.memory_space<vmem>>, vector<2x32xf32>,
    %c0_19 = arith.constant 0 : index
    %c0_20 = arith.constant 0 : index
    %28 = vector.load %arg14[%c0_19, %c0_20] : memref<26x32xf32, #tpu.memory_space<vmem>>, vector<26x32xf32>
    %29 = arith.truncf %28 : vector<26x32xf32> to vector<26x32xbf16>
    %cst_21 = arith.constant 0.000000e+00 : f32
    %30 = vector.broadcast %cst_21 : f32 to vector<16x8xf32>
    %31 = vector.extract_strided_slice %29 {offsets = [0, 0], sizes = [16, 32], strides = [1, 1]} : vector<26x32xbf16> to vector<16x32xbf16>
    %c0_22 = arith.constant 0 : index
    %c0_23 = arith.constant 0 : index
    %c0_24 = arith.constant 0 : index
    %32 = vector.load %arg7[%c0_22, %c0_23, %c0_24] : memref<9x32x8xbf16, #tpu.memory_space<vmem>>, vector<1x32x8xbf16>
    %33 = vector.shape_cast %32 : vector<1x32x8xbf16> to vector<32x8xbf16>
    %cst_25 = arith.constant dense<0.000000e+00> : vector<16x8xf32>
    %34 = tpu.matmul %31, %33, %cst_25 {dimension_numbers = #tpu.dot_dimension_numbers<[1], [0], [0], [1], [0, 0, 1, 1], [], []>} : vector<16x32xbf16>, vector<32x8xbf16>, vector<16x8xf32> -> vector<16x8xf32>
    %35 = arith.addf %30, %34 : vector<16x8xf32>
    %36 = vector.extract_strided_slice %29 {offsets = [1, 0], sizes = [16, 32], strides = [1, 1]} : vector<26x32xbf16> to vector<16x32xbf16>
    %c1 = arith.constant 1 : index
    %c0_26 = arith.constant 0 : index
    %c0_27 = arith.constant 0 : index
    %37 = vector.load %arg7[%c1, %c0_26, %c0_27] : memref<9x32x8xbf16, #tpu.memory_space<vmem>>, vector<1x32x8xbf16>
    %38 = vector.shape_cast %37 : vector<1x32x8xbf16> to vector<32x8xbf16>
    %cst_28 = arith.constant dense<0.000000e+00> : vector<16x8xf32>
    %39 = tpu.matmul %36, %38, %cst_28 {dimension_numbers = #tpu.dot_dimension_numbers<[1], [0], [0], [1], [0, 0, 1, 1], [], []>} : vector<16x32xbf16>, vector<32x8xbf16>, vector<16x8xf32> -> vector<16x8xf32>
    %40 = arith.addf %35, %39 : vector<16x8xf32>
    %41 = vector.extract_strided_slice %29 {offsets = [2, 0], sizes = [16, 32], strides = [1, 1]} : vector<26x32xbf16> to vector<16x32xbf16>
    %c2 = arith.constant 2 : index
    %c0_29 = arith.constant 0 : index
    %c0_30 = arith.constant 0 : index
    %42 = vector.load %arg7[%c2, %c0_29, %c0_30] : memref<9x32x8xbf16, #tpu.memory_space<vmem>>, vector<1x32x8xbf16>
    %43 = vector.shape_cast %42 : vector<1x32x8xbf16> to vector<32x8xbf16>
    %cst_31 = arith.constant dense<0.000000e+00> : vector<16x8xf32>
    %44 = tpu.matmul %41, %43, %cst_31 {dimension_numbers = #tpu.dot_dimension_numbers<[1], [0], [0], [1], [0, 0, 1, 1], [], []>} : vector<16x32xbf16>, vector<32x8xbf16>, vector<16x8xf32> -> vector<16x8xf32>
    %45 = arith.addf %40, %44 : vector<16x8xf32>
    %46 = vector.extract_strided_slice %29 {offsets = [4, 0], sizes = [16, 32], strides = [1, 1]} : vector<26x32xbf16> to vector<16x32xbf16>
    %c3 = arith.constant 3 : index
    %c0_32 = arith.constant 0 : index
    %c0_33 = arith.constant 0 : index
    %47 = vector.load %arg7[%c3, %c0_32, %c0_33] : memref<9x32x8xbf16, #tpu.memory_space<vmem>>, vector<1x32x8xbf16>
    %48 = vector.shape_cast %47 : vector<1x32x8xbf16> to vector<32x8xbf16>
    %cst_34 = arith.constant dense<0.000000e+00> : vector<16x8xf32>
    %49 = tpu.matmul %46, %48, %cst_34 {dimension_numbers = #tpu.dot_dimension_numbers<[1], [0], [0], [1], [0, 0, 1, 1], [], []>} : vector<16x32xbf16>, vector<32x8xbf16>, vector<16x8xf32> -> vector<16x8xf32>
    %50 = arith.addf %45, %49 : vector<16x8xf32>
    %51 = vector.extract_strided_slice %29 {offsets = [5, 0], sizes = [16, 32], strides = [1, 1]} : vector<26x32xbf16> to vector<16x32xbf16>
    %c4 = arith.constant 4 : index
    %c0_35 = arith.constant 0 : index
    %c0_36 = arith.constant 0 : index
    %52 = vector.load %arg7[%c4, %c0_35, %c0_36] : memref<9x32x8xbf16, #tpu.memory_space<vmem>>, vector<1x32x8xbf16>
    %53 = vector.shape_cast %52 : vector<1x32x8xbf16> to vector<32x8xbf16>
    %cst_37 = arith.constant dense<0.000000e+00> : vector<16x8xf32>
    %54 = tpu.matmul %51, %53, %cst_37 {dimension_numbers = #tpu.dot_dimension_numbers<[1], [0], [0], [1], [0, 0, 1, 1], [], []>} : vector<16x32xbf16>, vector<32x8xbf16>, vector<16x8xf32> -> vector<16x8xf32>
    %55 = arith.addf %50, %54 : vector<16x8xf32>
    %56 = vector.extract_strided_slice %29 {offsets = [6, 0], sizes = [16, 32], strides = [1, 1]} : vector<26x32xbf16> to vector<16x32xbf16>
    %c5_38 = arith.constant 5 : index
    %c0_39 = arith.constant 0 : index
    %c0_40 = arith.constant 0 : index
    %57 = vector.load %arg7[%c5_38, %c0_39, %c0_40] : memref<9x32x8xbf16, #tpu.memory_space<vmem>>, vector<1x32x8xbf16>
    %58 = vector.shape_cast %57 : vector<1x32x8xbf16> to vector<32x8xbf16>
    %cst_41 = arith.constant dense<0.000000e+00> : vector<16x8xf32>
    %59 = tpu.matmul %56, %58, %cst_41 {dimension_numbers = #tpu.dot_dimension_numbers<[1], [0], [0], [1], [0, 0, 1, 1], [], []>} : vector<16x32xbf16>, vector<32x8xbf16>, vector<16x8xf32> -> vector<16x8xf32>
    %60 = arith.addf %55, %59 : vector<16x8xf32>
    %61 = vector.extract_strided_slice %29 {offsets = [8, 0], sizes = [16, 32], strides = [1, 1]} : vector<26x32xbf16> to vector<16x32xbf16>
    %c6 = arith.constant 6 : index
    %c0_42 = arith.constant 0 : index
    %c0_43 = arith.constant 0 : index
    %62 = vector.load %arg7[%c6, %c0_42, %c0_43] : memref<9x32x8xbf16, #tpu.memory_space<vmem>>, vector<1x32x8xbf16>
    %63 = vector.shape_cast %62 : vector<1x32x8xbf16> to vector<32x8xbf16>
    %cst_44 = arith.constant dense<0.000000e+00> : vector<16x8xf32>
    %64 = tpu.matmul %61, %63, %cst_44 {dimension_numbers = #tpu.dot_dimension_numbers<[1], [0], [0], [1], [0, 0, 1, 1], [], []>} : vector<16x32xbf16>, vector<32x8xbf16>, vector<16x8xf32> -> vector<16x8xf32>
    %65 = arith.addf %60, %64 : vector<16x8xf32>
    %66 = vector.extract_strided_slice %29 {offsets = [9, 0], sizes = [16, 32], strides = [1, 1]} : vector<26x32xbf16> to vector<16x32xbf16>
    %c7 = arith.constant 7 : index
    %c0_45 = arith.constant 0 : index
    %c0_46 = arith.constant 0 : index
    %67 = vector.load %arg7[%c7, %c0_45, %c0_46] : memref<9x32x8xbf16, #tpu.memory_space<vmem>>, vector<1x32x8xbf16>
    %68 = vector.shape_cast %67 : vector<1x32x8xbf16> to vector<32x8xbf16>
    %cst_47 = arith.constant dense<0.000000e+00> : vector<16x8xf32>
    %69 = tpu.matmul %66, %68, %cst_47 {dimension_numbers = #tpu.dot_dimension_numbers<[1], [0], [0], [1], [0, 0, 1, 1], [], []>} : vector<16x32xbf16>, vector<32x8xbf16>, vector<16x8xf32> -> vector<16x8xf32>
    %70 = arith.addf %65, %69 : vector<16x8xf32>
    %71 = vector.extract_strided_slice %29 {offsets = [10, 0], sizes = [16, 32], strides = [1, 1]} : vector<26x32xbf16> to vector<16x32xbf16>
    %c8 = arith.constant 8 : index
    %c0_48 = arith.constant 0 : index
    %c0_49 = arith.constant 0 : index
    %72 = vector.load %arg7[%c8, %c0_48, %c0_49] : memref<9x32x8xbf16, #tpu.memory_space<vmem>>, vector<1x32x8xbf16>
    %73 = vector.shape_cast %72 : vector<1x32x8xbf16> to vector<32x8xbf16>
    %cst_50 = arith.constant dense<0.000000e+00> : vector<16x8xf32>
    %74 = tpu.matmul %71, %73, %cst_50 {dimension_numbers = #tpu.dot_dimension_numbers<[1], [0], [0], [1], [0, 0, 1, 1], [], []>} : vector<16x32xbf16>, vector<32x8xbf16>, vector<16x8xf32> -> vector<16x8xf32>
    %75 = arith.addf %70, %74 : vector<16x8xf32>
    %76 = vector.extract_strided_slice %75 {offsets = [0, 0], sizes = [2, 8], strides = [1, 1]} : vector<16x8xf32> to vector<2x8xf32>
    %c0_51 = arith.constant 0 : index
    %c0_52 = arith.constant 0 : index
    %77 = vector.load %arg15[%c0_51, %c0_52] : memref<4x8xf32, #tpu.memory_space<vmem>>, vector<2x8xf32>
    tpu.vector_store %arg15[%c0_51, %c0_52], %76 {strides = array<i32>} : memref<4x8xf32, #tpu.memory_space<vmem>>, vector<2x8xf32>,
    %78 = vector.extract_strided_slice %75 {offsets = [4, 0], sizes = [2, 8], strides = [1, 1]} : vector<16x8xf32> to vector<2x8xf32>
    %c2_53 = arith.constant 2 : index
    %c0_54 = arith.constant 0 : index
    %79 = vector.load %arg15[%c2_53, %c0_54] : memref<4x8xf32, #tpu.memory_space<vmem>>, vector<2x8xf32>
    tpu.vector_store %arg15[%c2_53, %c0_54], %78 {strides = array<i32>} : memref<4x8xf32, #tpu.memory_space<vmem>>, vector<2x8xf32>,
    %c0_55 = arith.constant 0 : index
    %c0_56 = arith.constant 0 : index
    %80 = vector.load %arg15[%c0_55, %c0_56] : memref<4x8xf32, #tpu.memory_space<vmem>>, vector<4x8xf32>
    %cst_57 = arith.constant dense<0.000000e+00> : vector<10xf32>
    %81 = vector.multi_reduction <add>, %2, %cst_57 [0] : vector<4x10xf32> to vector<10xf32>
    %82 = vector.shape_cast %81 : vector<10xf32> to vector<1x10xf32>
    %cst_58 = arith.constant 2.500000e-01 : f32
    %83 = vector.broadcast %cst_58 : f32 to vector<1x10xf32>
    %84 = arith.mulf %82, %83 : vector<1x10xf32>
    %cst_59 = arith.constant dense<0.000000e+00> : vector<8xf32>
    %85 = vector.multi_reduction <add>, %80, %cst_59 [0] : vector<4x8xf32> to vector<8xf32>
    %86 = vector.shape_cast %85 : vector<8xf32> to vector<1x8xf32>
    %cst_60 = arith.constant 2.500000e-01 : f32
    %87 = vector.broadcast %cst_60 : f32 to vector<1x8xf32>
    %88 = arith.mulf %86, %87 : vector<1x8xf32>
    %89 = arith.truncf %84 : vector<1x10xf32> to vector<1x10xbf16>
    %c0_61 = arith.constant 0 : index
    %c0_62 = arith.constant 0 : index
    %90 = vector.load %arg8[%c0_61, %c0_62] : memref<10x1xbf16, #tpu.memory_space<vmem>>, vector<10x1xbf16>
    %cst_63 = arith.constant dense<0.000000e+00> : vector<1x1xf32>
    %91 = tpu.matmul %89, %90, %cst_63 {dimension_numbers = #tpu.dot_dimension_numbers<[1], [0], [0], [1], [0, 0, 1, 1], [], []>} : vector<1x10xbf16>, vector<10x1xbf16>, vector<1x1xf32> -> vector<1x1xf32>
    %92 = arith.truncf %88 : vector<1x8xf32> to vector<1x8xbf16>
    %c0_64 = arith.constant 0 : index
    %c0_65 = arith.constant 0 : index
    %93 = vector.load %arg9[%c0_64, %c0_65] : memref<8x1xbf16, #tpu.memory_space<vmem>>, vector<8x1xbf16>
    %cst_66 = arith.constant dense<0.000000e+00> : vector<1x1xf32>
    %94 = tpu.matmul %92, %93, %cst_66 {dimension_numbers = #tpu.dot_dimension_numbers<[1], [0], [0], [1], [0, 0, 1, 1], [], []>} : vector<1x8xbf16>, vector<8x1xbf16>, vector<1x1xf32> -> vector<1x1xf32>
    %95 = arith.addf %91, %94 : vector<1x1xf32>
    %c0_67 = arith.constant 0 : index
    %c0_68 = arith.constant 0 : index
    %96 = vector.load %arg10[%c0_67, %c0_68] : memref<1x1xf32, #tpu.memory_space<vmem>>, vector<1x1xf32>
    %97 = arith.addf %95, %96 : vector<1x1xf32>
    %cst_69 = arith.constant 0.000000e+00 : f32
    %98 = vector.broadcast %cst_69 : f32 to vector<1x1xf32>
    %99 = arith.maximumf %97, %98 : vector<1x1xf32>
    %100 = arith.truncf %99 : vector<1x1xf32> to vector<1x1xbf16>
    %c0_70 = arith.constant 0 : index
    %c0_71 = arith.constant 0 : index
    %101 = vector.load %arg11[%c0_70, %c0_71] : memref<1x18xbf16, #tpu.memory_space<vmem>>, vector<1x18xbf16>
    %cst_72 = arith.constant dense<0.000000e+00> : vector<1x18xf32>
    %102 = tpu.matmul %100, %101, %cst_72 {dimension_numbers = #tpu.dot_dimension_numbers<[1], [0], [0], [1], [0, 0, 1, 1], [], []>} : vector<1x1xbf16>, vector<1x18xbf16>, vector<1x18xf32> -> vector<1x18xf32>
    %c0_73 = arith.constant 0 : index
    %c0_74 = arith.constant 0 : index
    %103 = vector.load %arg12[%c0_73, %c0_74] : memref<1x18xf32, #tpu.memory_space<vmem>>, vector<1x18xf32>
    %104 = arith.addf %102, %103 : vector<1x18xf32>
    %105 = arith.negf %104 : vector<1x18xf32>
    %106 = math.exp %105 : vector<1x18xf32>
    %cst_75 = arith.constant 1.000000e+00 : f32
    %107 = vector.broadcast %cst_75 : f32 to vector<1x18xf32>
    %108 = arith.addf %107, %106 : vector<1x18xf32>
    %109 = arith.divf %107, %108 : vector<1x18xf32>
    %110 = vector.extract_strided_slice %109 {offsets = [0, 0], sizes = [1, 10], strides = [1, 1]} : vector<1x18xf32> to vector<1x10xf32>
    %111 = vector.broadcast %110 : vector<1x10xf32> to vector<4x10xf32>
    %112 = arith.mulf %2, %111 : vector<4x10xf32>
    %113 = arith.truncf %112 : vector<4x10xf32> to vector<4x10xbf16>
    %c0_76 = arith.constant 0 : index
    %c0_77 = arith.constant 0 : index
    %c0_78 = arith.constant 0 : index
    %114 = vector.load %arg13[%c0_76, %c0_77, %c0_78] : memref<1x4x18xbf16, #tpu.memory_space<vmem>>, vector<1x4x10xbf16>
    %115 = vector.shape_cast %114 : vector<1x4x10xbf16> to vector<4x10xbf16>
    %116 = vector.shape_cast %113 : vector<4x10xbf16> to vector<1x4x10xbf16>
    tpu.vector_store %arg13[%c0_76, %c0_77, %c0_78], %116 {strides = array<i32>} : memref<1x4x18xbf16, #tpu.memory_space<vmem>>, vector<1x4x10xbf16>,
    %117 = vector.extract_strided_slice %109 {offsets = [0, 10], sizes = [1, 8], strides = [1, 1]} : vector<1x18xf32> to vector<1x8xf32>
    %118 = vector.broadcast %117 : vector<1x8xf32> to vector<4x8xf32>
    %119 = arith.mulf %80, %118 : vector<4x8xf32>
    %120 = arith.truncf %119 : vector<4x8xf32> to vector<4x8xbf16>
    %c0_79 = arith.constant 0 : index
    %c0_80 = arith.constant 0 : index
    %c10 = arith.constant 10 : index
    %121 = vector.load %arg13[%c0_79, %c0_80, %c10] : memref<1x4x18xbf16, #tpu.memory_space<vmem>>, vector<1x4x8xbf16>
    %122 = vector.shape_cast %121 : vector<1x4x8xbf16> to vector<4x8xbf16>
    %123 = vector.shape_cast %120 : vector<4x8xbf16> to vector<1x4x8xbf16>
    tpu.vector_store %arg13[%c0_79, %c0_80, %c10], %123 {strides = array<i32>} : memref<1x4x18xbf16, #tpu.memory_space<vmem>>, vector<1x4x8xbf16>,
    return
  }
  func.func @transform_0(%arg0: i32) -> (i32, i32, i32) {
    %c0_i32 = arith.constant 0 : i32
    %c0_i32_0 = arith.constant 0 : i32
    %c0_i32_1 = arith.constant 0 : i32
    return %arg0, %c0_i32, %c0_i32_0 : i32, i32, i32
  }
  func.func @transform_1(%arg0: i32) -> (i32, i32) {
    %c0_i32 = arith.constant 0 : i32
    %c0_i32_0 = arith.constant 0 : i32
    %c0_i32_1 = arith.constant 0 : i32
    return %c0_i32, %c0_i32_0 : i32, i32
  }
  func.func @transform_2(%arg0: i32) -> (i32, i32) {
    %c0_i32 = arith.constant 0 : i32
    %c0_i32_0 = arith.constant 0 : i32
    %c0_i32_1 = arith.constant 0 : i32
    return %c0_i32, %c0_i32_0 : i32, i32
  }
  func.func @transform_3(%arg0: i32) -> (i32, i32) {
    %c0_i32 = arith.constant 0 : i32
    %c0_i32_0 = arith.constant 0 : i32
    %c0_i32_1 = arith.constant 0 : i32
    return %c0_i32, %c0_i32_0 : i32, i32
  }
  func.func @transform_4(%arg0: i32) -> (i32, i32) {
    %c0_i32 = arith.constant 0 : i32
    %c0_i32_0 = arith.constant 0 : i32
    %c0_i32_1 = arith.constant 0 : i32
    return %c0_i32, %c0_i32_0 : i32, i32
  }
  func.func @transform_5(%arg0: i32) -> (i32, i32) {
    %c0_i32 = arith.constant 0 : i32
    %c0_i32_0 = arith.constant 0 : i32
    %c0_i32_1 = arith.constant 0 : i32
    return %c0_i32, %c0_i32_0 : i32, i32
  }
  func.func @transform_6(%arg0: i32) -> (i32, i32, i32) {
    %c0_i32 = arith.constant 0 : i32
    %c0_i32_0 = arith.constant 0 : i32
    %c0_i32_1 = arith.constant 0 : i32
    %c0_i32_2 = arith.constant 0 : i32
    return %c0_i32, %c0_i32_0, %c0_i32_1 : i32, i32, i32
  }
  func.func @transform_7(%arg0: i32) -> (i32, i32) {
    %c0_i32 = arith.constant 0 : i32
    %c0_i32_0 = arith.constant 0 : i32
    %c0_i32_1 = arith.constant 0 : i32
    return %c0_i32, %c0_i32_0 : i32, i32
  }
  func.func @transform_8(%arg0: i32) -> (i32, i32) {
    %c0_i32 = arith.constant 0 : i32
    %c0_i32_0 = arith.constant 0 : i32
    %c0_i32_1 = arith.constant 0 : i32
    return %c0_i32, %c0_i32_0 : i32, i32
  }
  func.func @transform_9(%arg0: i32) -> (i32, i32) {
    %c0_i32 = arith.constant 0 : i32
    %c0_i32_0 = arith.constant 0 : i32
    %c0_i32_1 = arith.constant 0 : i32
    return %c0_i32, %c0_i32_0 : i32, i32
  }
  func.func @transform_10(%arg0: i32) -> (i32, i32) {
    %c0_i32 = arith.constant 0 : i32
    %c0_i32_0 = arith.constant 0 : i32
    %c0_i32_1 = arith.constant 0 : i32
    return %c0_i32, %c0_i32_0 : i32, i32
  }
  func.func @transform_11(%arg0: i32) -> (i32, i32) {
    %c0_i32 = arith.constant 0 : i32
    %c0_i32_0 = arith.constant 0 : i32
    %c0_i32_1 = arith.constant 0 : i32
    return %c0_i32, %c0_i32_0 : i32, i32
  }
  func.func @transform_12(%arg0: i32) -> (i32, i32, i32) {
    %c0_i32 = arith.constant 0 : i32
    %c0_i32_0 = arith.constant 0 : i32
    %c0_i32_1 = arith.constant 0 : i32
    return %arg0, %c0_i32, %c0_i32_0 : i32, i32, i32
  }
}

module attributes {stable_mosaic.version = 11 : i64} {
  func.func @_transition_kernel(%arg0: i32, %arg1: memref<1x2x36xbf16, #tpu.memory_space<vmem>>, %arg2: memref<1x36xf32, #tpu.memory_space<vmem>>, %arg3: memref<1x36xf32, #tpu.memory_space<vmem>>, %arg4: memref<18x9xbf16, #tpu.memory_space<vmem>>, %arg5: memref<1x1x9xbf16, #tpu.memory_space<vmem>>, %arg6: memref<1x18xf32, #tpu.memory_space<vmem>>) attributes {dimension_semantics = [#tpu.dimension_semantics<parallel>], iteration_bounds = array<i64: 2>, scalar_prefetch = 0 : i64, scratch_operands = 1 : i64, tpu.core_type = #tpu.core_type<tc>, window_params = [{transform_indices = @transform_0, window_bounds = array<i64: 1, 2, 36>}, {pipeline_mode = #tpu.pipeline_mode<synchronous>, transform_indices = @transform_1, window_bounds = array<i64: 1, 36>}, {pipeline_mode = #tpu.pipeline_mode<synchronous>, transform_indices = @transform_2, window_bounds = array<i64: 1, 36>}, {pipeline_mode = #tpu.pipeline_mode<synchronous>, transform_indices = @transform_3, window_bounds = array<i64: 18, 9>}, {transform_indices = @transform_4, window_bounds = array<i64: 1, 1, 9>}]} {
    %c0 = arith.constant 0 : index
    %c0_0 = arith.constant 0 : index
    %c0_1 = arith.constant 0 : index
    %0 = vector.load %arg1[%c0, %c0_0, %c0_1] : memref<1x2x36xbf16, #tpu.memory_space<vmem>>, vector<1x2x36xbf16>
    %1 = vector.shape_cast %0 : vector<1x2x36xbf16> to vector<2x36xbf16>
    %2 = arith.extf %1 : vector<2x36xbf16> to vector<2x36xf32>
    %c0_2 = arith.constant 0 : index
    %c0_3 = arith.constant 0 : index
    %3 = vector.load %arg2[%c0_2, %c0_3] : memref<1x36xf32, #tpu.memory_space<vmem>>, vector<1x36xf32>
    %4 = vector.broadcast %3 : vector<1x36xf32> to vector<2x36xf32>
    %5 = arith.mulf %2, %4 : vector<2x36xf32>
    %c0_4 = arith.constant 0 : index
    %c0_5 = arith.constant 0 : index
    %6 = vector.load %arg3[%c0_4, %c0_5] : memref<1x36xf32, #tpu.memory_space<vmem>>, vector<1x36xf32>
    %7 = vector.broadcast %6 : vector<1x36xf32> to vector<2x36xf32>
    %8 = arith.addf %5, %7 : vector<2x36xf32>
    %cst = arith.constant 0.000000e+00 : f32
    %9 = vector.broadcast %cst : f32 to vector<2x36xf32>
    %10 = arith.maximumf %8, %9 : vector<2x36xf32>
    %11 = vector.extract_strided_slice %10 {offsets = [0, 0], sizes = [2, 18], strides = [1, 1]} : vector<2x36xf32> to vector<2x18xf32>
    %12 = vector.extract_strided_slice %10 {offsets = [0, 18], sizes = [2, 18], strides = [1, 1]} : vector<2x36xf32> to vector<2x18xf32>
    %13 = arith.addf %11, %12 : vector<2x18xf32>
    %cst_6 = arith.constant 5.000000e-01 : f32
    %14 = vector.broadcast %cst_6 : f32 to vector<2x18xf32>
    %15 = arith.mulf %13, %14 : vector<2x18xf32>
    %16 = vector.extract_strided_slice %15 {offsets = [0, 0], sizes = [1, 18], strides = [1, 1]} : vector<2x18xf32> to vector<1x18xf32>
    %17 = vector.extract_strided_slice %15 {offsets = [1, 0], sizes = [1, 18], strides = [1, 1]} : vector<2x18xf32> to vector<1x18xf32>
    %18 = arith.addf %16, %17 : vector<1x18xf32>
    %cst_7 = arith.constant 5.000000e-01 : f32
    %19 = vector.broadcast %cst_7 : f32 to vector<1x18xf32>
    %20 = arith.mulf %18, %19 : vector<1x18xf32>
    %c0_8 = arith.constant 0 : index
    %c0_9 = arith.constant 0 : index
    %21 = vector.load %arg6[%c0_8, %c0_9] : memref<1x18xf32, #tpu.memory_space<vmem>>, vector<1x18xf32>
    tpu.vector_store %arg6[%c0_8, %c0_9], %20 {strides = array<i32>} : memref<1x18xf32, #tpu.memory_space<vmem>>, vector<1x18xf32>,
    %c0_10 = arith.constant 0 : index
    %c0_11 = arith.constant 0 : index
    %22 = vector.load %arg6[%c0_10, %c0_11] : memref<1x18xf32, #tpu.memory_space<vmem>>, vector<1x18xf32>
    %23 = arith.truncf %22 : vector<1x18xf32> to vector<1x18xbf16>
    %c0_12 = arith.constant 0 : index
    %c0_13 = arith.constant 0 : index
    %24 = vector.load %arg4[%c0_12, %c0_13] : memref<18x9xbf16, #tpu.memory_space<vmem>>, vector<18x9xbf16>
    %cst_14 = arith.constant dense<0.000000e+00> : vector<1x9xf32>
    %25 = tpu.matmul %23, %24, %cst_14 {dimension_numbers = #tpu.dot_dimension_numbers<[1], [0], [0], [1], [0, 0, 1, 1], [], []>} : vector<1x18xbf16>, vector<18x9xbf16>, vector<1x9xf32> -> vector<1x9xf32>
    %26 = arith.truncf %25 : vector<1x9xf32> to vector<1x9xbf16>
    %c0_15 = arith.constant 0 : index
    %c0_16 = arith.constant 0 : index
    %c0_17 = arith.constant 0 : index
    %27 = vector.load %arg5[%c0_15, %c0_16, %c0_17] : memref<1x1x9xbf16, #tpu.memory_space<vmem>>, vector<1x1x9xbf16>
    %28 = vector.shape_cast %27 : vector<1x1x9xbf16> to vector<1x9xbf16>
    %29 = vector.shape_cast %26 : vector<1x9xbf16> to vector<1x1x9xbf16>
    tpu.vector_store %arg5[%c0_15, %c0_16, %c0_17], %29 {strides = array<i32>} : memref<1x1x9xbf16, #tpu.memory_space<vmem>>, vector<1x1x9xbf16>,
    return
  }
  func.func @transform_0(%arg0: i32) -> (i32, i32, i32) {
    %c0_i32 = arith.constant 0 : i32
    %c0_i32_0 = arith.constant 0 : i32
    %c0_i32_1 = arith.constant 0 : i32
    return %arg0, %c0_i32, %c0_i32_0 : i32, i32, i32
  }
  func.func @transform_1(%arg0: i32) -> (i32, i32) {
    %c0_i32 = arith.constant 0 : i32
    %c0_i32_0 = arith.constant 0 : i32
    %c0_i32_1 = arith.constant 0 : i32
    return %c0_i32, %c0_i32_0 : i32, i32
  }
  func.func @transform_2(%arg0: i32) -> (i32, i32) {
    %c0_i32 = arith.constant 0 : i32
    %c0_i32_0 = arith.constant 0 : i32
    %c0_i32_1 = arith.constant 0 : i32
    return %c0_i32, %c0_i32_0 : i32, i32
  }
  func.func @transform_3(%arg0: i32) -> (i32, i32) {
    %c0_i32 = arith.constant 0 : i32
    %c0_i32_0 = arith.constant 0 : i32
    %c0_i32_1 = arith.constant 0 : i32
    return %c0_i32, %c0_i32_0 : i32, i32
  }
  func.func @transform_4(%arg0: i32) -> (i32, i32, i32) {
    %c0_i32 = arith.constant 0 : i32
    %c0_i32_0 = arith.constant 0 : i32
    %c0_i32_1 = arith.constant 0 : i32
    return %arg0, %c0_i32, %c0_i32_0 : i32, i32, i32
  }
}

module attributes {stable_mosaic.version = 11 : i64} {
  func.func @_bottleneck_kernel(%arg0: i32, %arg1: memref<1x1x9xbf16, #tpu.memory_space<vmem>>, %arg2: memref<1x9xf32, #tpu.memory_space<vmem>>, %arg3: memref<1x9xf32, #tpu.memory_space<vmem>>, %arg4: memref<9x32xbf16, #tpu.memory_space<vmem>>, %arg5: memref<1x32xf32, #tpu.memory_space<vmem>>, %arg6: memref<1x32xf32, #tpu.memory_space<vmem>>, %arg7: memref<9x32x8xbf16, #tpu.memory_space<vmem>>, %arg8: memref<9x1xbf16, #tpu.memory_space<vmem>>, %arg9: memref<8x1xbf16, #tpu.memory_space<vmem>>, %arg10: memref<1x1xf32, #tpu.memory_space<vmem>>, %arg11: memref<1x17xbf16, #tpu.memory_space<vmem>>, %arg12: memref<1x17xf32, #tpu.memory_space<vmem>>, %arg13: memref<1x1x17xbf16, #tpu.memory_space<vmem>>, %arg14: memref<17x32xf32, #tpu.memory_space<vmem>>, %arg15: memref<1x8xf32, #tpu.memory_space<vmem>>) attributes {dimension_semantics = [#tpu.dimension_semantics<parallel>], iteration_bounds = array<i64: 2>, scalar_prefetch = 0 : i64, scratch_operands = 2 : i64, tpu.core_type = #tpu.core_type<tc>, window_params = [{transform_indices = @transform_0, window_bounds = array<i64: 1, 1, 9>}, {pipeline_mode = #tpu.pipeline_mode<synchronous>, transform_indices = @transform_1, window_bounds = array<i64: 1, 9>}, {pipeline_mode = #tpu.pipeline_mode<synchronous>, transform_indices = @transform_2, window_bounds = array<i64: 1, 9>}, {pipeline_mode = #tpu.pipeline_mode<synchronous>, transform_indices = @transform_3, window_bounds = array<i64: 9, 32>}, {pipeline_mode = #tpu.pipeline_mode<synchronous>, transform_indices = @transform_4, window_bounds = array<i64: 1, 32>}, {pipeline_mode = #tpu.pipeline_mode<synchronous>, transform_indices = @transform_5, window_bounds = array<i64: 1, 32>}, {pipeline_mode = #tpu.pipeline_mode<synchronous>, transform_indices = @transform_6, window_bounds = array<i64: 9, 32, 8>}, {pipeline_mode = #tpu.pipeline_mode<synchronous>, transform_indices = @transform_7, window_bounds = array<i64: 9, 1>}, {pipeline_mode = #tpu.pipeline_mode<synchronous>, transform_indices = @transform_8, window_bounds = array<i64: 8, 1>}, {pipeline_mode = #tpu.pipeline_mode<synchronous>, transform_indices = @transform_9, window_bounds = array<i64: 1, 1>}, {pipeline_mode = #tpu.pipeline_mode<synchronous>, transform_indices = @transform_10, window_bounds = array<i64: 1, 17>}, {pipeline_mode = #tpu.pipeline_mode<synchronous>, transform_indices = @transform_11, window_bounds = array<i64: 1, 17>}, {transform_indices = @transform_12, window_bounds = array<i64: 1, 1, 17>}]} {
    %c0 = arith.constant 0 : index
    %c0_0 = arith.constant 0 : index
    %c0_1 = arith.constant 0 : index
    %0 = vector.load %arg1[%c0, %c0_0, %c0_1] : memref<1x1x9xbf16, #tpu.memory_space<vmem>>, vector<1x1x9xbf16>
    %1 = vector.shape_cast %0 : vector<1x1x9xbf16> to vector<1x9xbf16>
    %2 = arith.extf %1 : vector<1x9xbf16> to vector<1x9xf32>
    %c0_2 = arith.constant 0 : index
    %c0_3 = arith.constant 0 : index
    %3 = vector.load %arg2[%c0_2, %c0_3] : memref<1x9xf32, #tpu.memory_space<vmem>>, vector<1x9xf32>
    %4 = arith.mulf %2, %3 : vector<1x9xf32>
    %c0_4 = arith.constant 0 : index
    %c0_5 = arith.constant 0 : index
    %5 = vector.load %arg3[%c0_4, %c0_5] : memref<1x9xf32, #tpu.memory_space<vmem>>, vector<1x9xf32>
    %6 = arith.addf %4, %5 : vector<1x9xf32>
    %cst = arith.constant 0.000000e+00 : f32
    %7 = vector.broadcast %cst : f32 to vector<1x9xf32>
    %8 = arith.maximumf %6, %7 : vector<1x9xf32>
    %9 = arith.truncf %8 : vector<1x9xf32> to vector<1x9xbf16>
    %c0_6 = arith.constant 0 : index
    %c0_7 = arith.constant 0 : index
    %10 = vector.load %arg4[%c0_6, %c0_7] : memref<9x32xbf16, #tpu.memory_space<vmem>>, vector<9x32xbf16>
    %cst_8 = arith.constant dense<0.000000e+00> : vector<1x32xf32>
    %11 = tpu.matmul %9, %10, %cst_8 {dimension_numbers = #tpu.dot_dimension_numbers<[1], [0], [0], [1], [0, 0, 1, 1], [], []>} : vector<1x9xbf16>, vector<9x32xbf16>, vector<1x32xf32> -> vector<1x32xf32>
    %c0_9 = arith.constant 0 : index
    %c0_10 = arith.constant 0 : index
    %12 = vector.load %arg5[%c0_9, %c0_10] : memref<1x32xf32, #tpu.memory_space<vmem>>, vector<1x32xf32>
    %13 = arith.mulf %11, %12 : vector<1x32xf32>
    %c0_11 = arith.constant 0 : index
    %c0_12 = arith.constant 0 : index
    %14 = vector.load %arg6[%c0_11, %c0_12] : memref<1x32xf32, #tpu.memory_space<vmem>>, vector<1x32xf32>
    %15 = arith.addf %13, %14 : vector<1x32xf32>
    %cst_13 = arith.constant 0.000000e+00 : f32
    %16 = vector.broadcast %cst_13 : f32 to vector<1x32xf32>
    %17 = arith.maximumf %15, %16 : vector<1x32xf32>
    %cst_14 = arith.constant 0.000000e+00 : f32
    %18 = vector.broadcast %cst_14 : f32 to vector<17x32xf32>
    %c0_15 = arith.constant 0 : index
    %c0_16 = arith.constant 0 : index
    %19 = vector.load %arg14[%c0_15, %c0_16] : memref<17x32xf32, #tpu.memory_space<vmem>>, vector<17x32xf32>
    tpu.vector_store %arg14[%c0_15, %c0_16], %18 {strides = array<i32>} : memref<17x32xf32, #tpu.memory_space<vmem>>, vector<17x32xf32>,
    %c4 = arith.constant 4 : index
    %c0_17 = arith.constant 0 : index
    %20 = vector.load %arg14[%c4, %c0_17] : memref<17x32xf32, #tpu.memory_space<vmem>>, vector<1x32xf32>
    tpu.vector_store %arg14[%c4, %c0_17], %17 {strides = array<i32>} : memref<17x32xf32, #tpu.memory_space<vmem>>, vector<1x32xf32>,
    %c0_18 = arith.constant 0 : index
    %c0_19 = arith.constant 0 : index
    %21 = vector.load %arg14[%c0_18, %c0_19] : memref<17x32xf32, #tpu.memory_space<vmem>>, vector<17x32xf32>
    %22 = arith.truncf %21 : vector<17x32xf32> to vector<17x32xbf16>
    %cst_20 = arith.constant 0.000000e+00 : f32
    %23 = vector.broadcast %cst_20 : f32 to vector<9x8xf32>
    %24 = vector.extract_strided_slice %22 {offsets = [0, 0], sizes = [9, 32], strides = [1, 1]} : vector<17x32xbf16> to vector<9x32xbf16>
    %c0_21 = arith.constant 0 : index
    %c0_22 = arith.constant 0 : index
    %c0_23 = arith.constant 0 : index
    %25 = vector.load %arg7[%c0_21, %c0_22, %c0_23] : memref<9x32x8xbf16, #tpu.memory_space<vmem>>, vector<1x32x8xbf16>
    %26 = vector.shape_cast %25 : vector<1x32x8xbf16> to vector<32x8xbf16>
    %cst_24 = arith.constant dense<0.000000e+00> : vector<9x8xf32>
    %27 = tpu.matmul %24, %26, %cst_24 {dimension_numbers = #tpu.dot_dimension_numbers<[1], [0], [0], [1], [0, 0, 1, 1], [], []>} : vector<9x32xbf16>, vector<32x8xbf16>, vector<9x8xf32> -> vector<9x8xf32>
    %28 = arith.addf %23, %27 : vector<9x8xf32>
    %29 = vector.extract_strided_slice %22 {offsets = [1, 0], sizes = [9, 32], strides = [1, 1]} : vector<17x32xbf16> to vector<9x32xbf16>
    %c1 = arith.constant 1 : index
    %c0_25 = arith.constant 0 : index
    %c0_26 = arith.constant 0 : index
    %30 = vector.load %arg7[%c1, %c0_25, %c0_26] : memref<9x32x8xbf16, #tpu.memory_space<vmem>>, vector<1x32x8xbf16>
    %31 = vector.shape_cast %30 : vector<1x32x8xbf16> to vector<32x8xbf16>
    %cst_27 = arith.constant dense<0.000000e+00> : vector<9x8xf32>
    %32 = tpu.matmul %29, %31, %cst_27 {dimension_numbers = #tpu.dot_dimension_numbers<[1], [0], [0], [1], [0, 0, 1, 1], [], []>} : vector<9x32xbf16>, vector<32x8xbf16>, vector<9x8xf32> -> vector<9x8xf32>
    %33 = arith.addf %28, %32 : vector<9x8xf32>
    %34 = vector.extract_strided_slice %22 {offsets = [2, 0], sizes = [9, 32], strides = [1, 1]} : vector<17x32xbf16> to vector<9x32xbf16>
    %c2 = arith.constant 2 : index
    %c0_28 = arith.constant 0 : index
    %c0_29 = arith.constant 0 : index
    %35 = vector.load %arg7[%c2, %c0_28, %c0_29] : memref<9x32x8xbf16, #tpu.memory_space<vmem>>, vector<1x32x8xbf16>
    %36 = vector.shape_cast %35 : vector<1x32x8xbf16> to vector<32x8xbf16>
    %cst_30 = arith.constant dense<0.000000e+00> : vector<9x8xf32>
    %37 = tpu.matmul %34, %36, %cst_30 {dimension_numbers = #tpu.dot_dimension_numbers<[1], [0], [0], [1], [0, 0, 1, 1], [], []>} : vector<9x32xbf16>, vector<32x8xbf16>, vector<9x8xf32> -> vector<9x8xf32>
    %38 = arith.addf %33, %37 : vector<9x8xf32>
    %39 = vector.extract_strided_slice %22 {offsets = [3, 0], sizes = [9, 32], strides = [1, 1]} : vector<17x32xbf16> to vector<9x32xbf16>
    %c3 = arith.constant 3 : index
    %c0_31 = arith.constant 0 : index
    %c0_32 = arith.constant 0 : index
    %40 = vector.load %arg7[%c3, %c0_31, %c0_32] : memref<9x32x8xbf16, #tpu.memory_space<vmem>>, vector<1x32x8xbf16>
    %41 = vector.shape_cast %40 : vector<1x32x8xbf16> to vector<32x8xbf16>
    %cst_33 = arith.constant dense<0.000000e+00> : vector<9x8xf32>
    %42 = tpu.matmul %39, %41, %cst_33 {dimension_numbers = #tpu.dot_dimension_numbers<[1], [0], [0], [1], [0, 0, 1, 1], [], []>} : vector<9x32xbf16>, vector<32x8xbf16>, vector<9x8xf32> -> vector<9x8xf32>
    %43 = arith.addf %38, %42 : vector<9x8xf32>
    %44 = vector.extract_strided_slice %22 {offsets = [4, 0], sizes = [9, 32], strides = [1, 1]} : vector<17x32xbf16> to vector<9x32xbf16>
    %c4_34 = arith.constant 4 : index
    %c0_35 = arith.constant 0 : index
    %c0_36 = arith.constant 0 : index
    %45 = vector.load %arg7[%c4_34, %c0_35, %c0_36] : memref<9x32x8xbf16, #tpu.memory_space<vmem>>, vector<1x32x8xbf16>
    %46 = vector.shape_cast %45 : vector<1x32x8xbf16> to vector<32x8xbf16>
    %cst_37 = arith.constant dense<0.000000e+00> : vector<9x8xf32>
    %47 = tpu.matmul %44, %46, %cst_37 {dimension_numbers = #tpu.dot_dimension_numbers<[1], [0], [0], [1], [0, 0, 1, 1], [], []>} : vector<9x32xbf16>, vector<32x8xbf16>, vector<9x8xf32> -> vector<9x8xf32>
    %48 = arith.addf %43, %47 : vector<9x8xf32>
    %49 = vector.extract_strided_slice %22 {offsets = [5, 0], sizes = [9, 32], strides = [1, 1]} : vector<17x32xbf16> to vector<9x32xbf16>
    %c5 = arith.constant 5 : index
    %c0_38 = arith.constant 0 : index
    %c0_39 = arith.constant 0 : index
    %50 = vector.load %arg7[%c5, %c0_38, %c0_39] : memref<9x32x8xbf16, #tpu.memory_space<vmem>>, vector<1x32x8xbf16>
    %51 = vector.shape_cast %50 : vector<1x32x8xbf16> to vector<32x8xbf16>
    %cst_40 = arith.constant dense<0.000000e+00> : vector<9x8xf32>
    %52 = tpu.matmul %49, %51, %cst_40 {dimension_numbers = #tpu.dot_dimension_numbers<[1], [0], [0], [1], [0, 0, 1, 1], [], []>} : vector<9x32xbf16>, vector<32x8xbf16>, vector<9x8xf32> -> vector<9x8xf32>
    %53 = arith.addf %48, %52 : vector<9x8xf32>
    %54 = vector.extract_strided_slice %22 {offsets = [6, 0], sizes = [9, 32], strides = [1, 1]} : vector<17x32xbf16> to vector<9x32xbf16>
    %c6 = arith.constant 6 : index
    %c0_41 = arith.constant 0 : index
    %c0_42 = arith.constant 0 : index
    %55 = vector.load %arg7[%c6, %c0_41, %c0_42] : memref<9x32x8xbf16, #tpu.memory_space<vmem>>, vector<1x32x8xbf16>
    %56 = vector.shape_cast %55 : vector<1x32x8xbf16> to vector<32x8xbf16>
    %cst_43 = arith.constant dense<0.000000e+00> : vector<9x8xf32>
    %57 = tpu.matmul %54, %56, %cst_43 {dimension_numbers = #tpu.dot_dimension_numbers<[1], [0], [0], [1], [0, 0, 1, 1], [], []>} : vector<9x32xbf16>, vector<32x8xbf16>, vector<9x8xf32> -> vector<9x8xf32>
    %58 = arith.addf %53, %57 : vector<9x8xf32>
    %59 = vector.extract_strided_slice %22 {offsets = [7, 0], sizes = [9, 32], strides = [1, 1]} : vector<17x32xbf16> to vector<9x32xbf16>
    %c7 = arith.constant 7 : index
    %c0_44 = arith.constant 0 : index
    %c0_45 = arith.constant 0 : index
    %60 = vector.load %arg7[%c7, %c0_44, %c0_45] : memref<9x32x8xbf16, #tpu.memory_space<vmem>>, vector<1x32x8xbf16>
    %61 = vector.shape_cast %60 : vector<1x32x8xbf16> to vector<32x8xbf16>
    %cst_46 = arith.constant dense<0.000000e+00> : vector<9x8xf32>
    %62 = tpu.matmul %59, %61, %cst_46 {dimension_numbers = #tpu.dot_dimension_numbers<[1], [0], [0], [1], [0, 0, 1, 1], [], []>} : vector<9x32xbf16>, vector<32x8xbf16>, vector<9x8xf32> -> vector<9x8xf32>
    %63 = arith.addf %58, %62 : vector<9x8xf32>
    %64 = vector.extract_strided_slice %22 {offsets = [8, 0], sizes = [9, 32], strides = [1, 1]} : vector<17x32xbf16> to vector<9x32xbf16>
    %c8 = arith.constant 8 : index
    %c0_47 = arith.constant 0 : index
    %c0_48 = arith.constant 0 : index
    %65 = vector.load %arg7[%c8, %c0_47, %c0_48] : memref<9x32x8xbf16, #tpu.memory_space<vmem>>, vector<1x32x8xbf16>
    %66 = vector.shape_cast %65 : vector<1x32x8xbf16> to vector<32x8xbf16>
    %cst_49 = arith.constant dense<0.000000e+00> : vector<9x8xf32>
    %67 = tpu.matmul %64, %66, %cst_49 {dimension_numbers = #tpu.dot_dimension_numbers<[1], [0], [0], [1], [0, 0, 1, 1], [], []>} : vector<9x32xbf16>, vector<32x8xbf16>, vector<9x8xf32> -> vector<9x8xf32>
    %68 = arith.addf %63, %67 : vector<9x8xf32>
    %69 = vector.extract_strided_slice %68 {offsets = [0, 0], sizes = [1, 8], strides = [1, 1]} : vector<9x8xf32> to vector<1x8xf32>
    %c0_50 = arith.constant 0 : index
    %c0_51 = arith.constant 0 : index
    %70 = vector.load %arg15[%c0_50, %c0_51] : memref<1x8xf32, #tpu.memory_space<vmem>>, vector<1x8xf32>
    tpu.vector_store %arg15[%c0_50, %c0_51], %69 {strides = array<i32>} : memref<1x8xf32, #tpu.memory_space<vmem>>, vector<1x8xf32>,
    %c0_52 = arith.constant 0 : index
    %c0_53 = arith.constant 0 : index
    %71 = vector.load %arg15[%c0_52, %c0_53] : memref<1x8xf32, #tpu.memory_space<vmem>>, vector<1x8xf32>
    %cst_54 = arith.constant dense<0.000000e+00> : vector<9xf32>
    %72 = vector.multi_reduction <add>, %2, %cst_54 [0] : vector<1x9xf32> to vector<9xf32>
    %73 = vector.shape_cast %72 : vector<9xf32> to vector<1x9xf32>
    %cst_55 = arith.constant 1.000000e+00 : f32
    %74 = vector.broadcast %cst_55 : f32 to vector<1x9xf32>
    %75 = arith.mulf %73, %74 : vector<1x9xf32>
    %cst_56 = arith.constant dense<0.000000e+00> : vector<8xf32>
    %76 = vector.multi_reduction <add>, %71, %cst_56 [0] : vector<1x8xf32> to vector<8xf32>
    %77 = vector.shape_cast %76 : vector<8xf32> to vector<1x8xf32>
    %cst_57 = arith.constant 1.000000e+00 : f32
    %78 = vector.broadcast %cst_57 : f32 to vector<1x8xf32>
    %79 = arith.mulf %77, %78 : vector<1x8xf32>
    %80 = arith.truncf %75 : vector<1x9xf32> to vector<1x9xbf16>
    %c0_58 = arith.constant 0 : index
    %c0_59 = arith.constant 0 : index
    %81 = vector.load %arg8[%c0_58, %c0_59] : memref<9x1xbf16, #tpu.memory_space<vmem>>, vector<9x1xbf16>
    %cst_60 = arith.constant dense<0.000000e+00> : vector<1x1xf32>
    %82 = tpu.matmul %80, %81, %cst_60 {dimension_numbers = #tpu.dot_dimension_numbers<[1], [0], [0], [1], [0, 0, 1, 1], [], []>} : vector<1x9xbf16>, vector<9x1xbf16>, vector<1x1xf32> -> vector<1x1xf32>
    %83 = arith.truncf %79 : vector<1x8xf32> to vector<1x8xbf16>
    %c0_61 = arith.constant 0 : index
    %c0_62 = arith.constant 0 : index
    %84 = vector.load %arg9[%c0_61, %c0_62] : memref<8x1xbf16, #tpu.memory_space<vmem>>, vector<8x1xbf16>
    %cst_63 = arith.constant dense<0.000000e+00> : vector<1x1xf32>
    %85 = tpu.matmul %83, %84, %cst_63 {dimension_numbers = #tpu.dot_dimension_numbers<[1], [0], [0], [1], [0, 0, 1, 1], [], []>} : vector<1x8xbf16>, vector<8x1xbf16>, vector<1x1xf32> -> vector<1x1xf32>
    %86 = arith.addf %82, %85 : vector<1x1xf32>
    %c0_64 = arith.constant 0 : index
    %c0_65 = arith.constant 0 : index
    %87 = vector.load %arg10[%c0_64, %c0_65] : memref<1x1xf32, #tpu.memory_space<vmem>>, vector<1x1xf32>
    %88 = arith.addf %86, %87 : vector<1x1xf32>
    %cst_66 = arith.constant 0.000000e+00 : f32
    %89 = vector.broadcast %cst_66 : f32 to vector<1x1xf32>
    %90 = arith.maximumf %88, %89 : vector<1x1xf32>
    %91 = arith.truncf %90 : vector<1x1xf32> to vector<1x1xbf16>
    %c0_67 = arith.constant 0 : index
    %c0_68 = arith.constant 0 : index
    %92 = vector.load %arg11[%c0_67, %c0_68] : memref<1x17xbf16, #tpu.memory_space<vmem>>, vector<1x17xbf16>
    %cst_69 = arith.constant dense<0.000000e+00> : vector<1x17xf32>
    %93 = tpu.matmul %91, %92, %cst_69 {dimension_numbers = #tpu.dot_dimension_numbers<[1], [0], [0], [1], [0, 0, 1, 1], [], []>} : vector<1x1xbf16>, vector<1x17xbf16>, vector<1x17xf32> -> vector<1x17xf32>
    %c0_70 = arith.constant 0 : index
    %c0_71 = arith.constant 0 : index
    %94 = vector.load %arg12[%c0_70, %c0_71] : memref<1x17xf32, #tpu.memory_space<vmem>>, vector<1x17xf32>
    %95 = arith.addf %93, %94 : vector<1x17xf32>
    %96 = arith.negf %95 : vector<1x17xf32>
    %97 = math.exp %96 : vector<1x17xf32>
    %cst_72 = arith.constant 1.000000e+00 : f32
    %98 = vector.broadcast %cst_72 : f32 to vector<1x17xf32>
    %99 = arith.addf %98, %97 : vector<1x17xf32>
    %100 = arith.divf %98, %99 : vector<1x17xf32>
    %101 = vector.extract_strided_slice %100 {offsets = [0, 0], sizes = [1, 9], strides = [1, 1]} : vector<1x17xf32> to vector<1x9xf32>
    %102 = arith.mulf %2, %101 : vector<1x9xf32>
    %103 = arith.truncf %102 : vector<1x9xf32> to vector<1x9xbf16>
    %c0_73 = arith.constant 0 : index
    %c0_74 = arith.constant 0 : index
    %c0_75 = arith.constant 0 : index
    %104 = vector.load %arg13[%c0_73, %c0_74, %c0_75] : memref<1x1x17xbf16, #tpu.memory_space<vmem>>, vector<1x1x9xbf16>
    %105 = vector.shape_cast %104 : vector<1x1x9xbf16> to vector<1x9xbf16>
    %106 = vector.shape_cast %103 : vector<1x9xbf16> to vector<1x1x9xbf16>
    tpu.vector_store %arg13[%c0_73, %c0_74, %c0_75], %106 {strides = array<i32>} : memref<1x1x17xbf16, #tpu.memory_space<vmem>>, vector<1x1x9xbf16>,
    %107 = vector.extract_strided_slice %100 {offsets = [0, 9], sizes = [1, 8], strides = [1, 1]} : vector<1x17xf32> to vector<1x8xf32>
    %108 = arith.mulf %71, %107 : vector<1x8xf32>
    %109 = arith.truncf %108 : vector<1x8xf32> to vector<1x8xbf16>
    %c0_76 = arith.constant 0 : index
    %c0_77 = arith.constant 0 : index
    %c9 = arith.constant 9 : index
    %110 = vector.load %arg13[%c0_76, %c0_77, %c9] : memref<1x1x17xbf16, #tpu.memory_space<vmem>>, vector<1x1x8xbf16>
    %111 = vector.shape_cast %110 : vector<1x1x8xbf16> to vector<1x8xbf16>
    %112 = vector.shape_cast %109 : vector<1x8xbf16> to vector<1x1x8xbf16>
    tpu.vector_store %arg13[%c0_76, %c0_77, %c9], %112 {strides = array<i32>} : memref<1x1x17xbf16, #tpu.memory_space<vmem>>, vector<1x1x8xbf16>,
    return
  }
  func.func @transform_0(%arg0: i32) -> (i32, i32, i32) {
    %c0_i32 = arith.constant 0 : i32
    %c0_i32_0 = arith.constant 0 : i32
    %c0_i32_1 = arith.constant 0 : i32
    return %arg0, %c0_i32, %c0_i32_0 : i32, i32, i32
  }
  func.func @transform_1(%arg0: i32) -> (i32, i32) {
    %c0_i32 = arith.constant 0 : i32
    %c0_i32_0 = arith.constant 0 : i32
    %c0_i32_1 = arith.constant 0 : i32
    return %c0_i32, %c0_i32_0 : i32, i32
  }
  func.func @transform_2(%arg0: i32) -> (i32, i32) {
    %c0_i32 = arith.constant 0 : i32
    %c0_i32_0 = arith.constant 0 : i32
    %c0_i32_1 = arith.constant 0 : i32
    return %c0_i32, %c0_i32_0 : i32, i32
  }
  func.func @transform_3(%arg0: i32) -> (i32, i32) {
    %c0_i32 = arith.constant 0 : i32
    %c0_i32_0 = arith.constant 0 : i32
    %c0_i32_1 = arith.constant 0 : i32
    return %c0_i32, %c0_i32_0 : i32, i32
  }
  func.func @transform_4(%arg0: i32) -> (i32, i32) {
    %c0_i32 = arith.constant 0 : i32
    %c0_i32_0 = arith.constant 0 : i32
    %c0_i32_1 = arith.constant 0 : i32
    return %c0_i32, %c0_i32_0 : i32, i32
  }
  func.func @transform_5(%arg0: i32) -> (i32, i32) {
    %c0_i32 = arith.constant 0 : i32
    %c0_i32_0 = arith.constant 0 : i32
    %c0_i32_1 = arith.constant 0 : i32
    return %c0_i32, %c0_i32_0 : i32, i32
  }
  func.func @transform_6(%arg0: i32) -> (i32, i32, i32) {
    %c0_i32 = arith.constant 0 : i32
    %c0_i32_0 = arith.constant 0 : i32
    %c0_i32_1 = arith.constant 0 : i32
    %c0_i32_2 = arith.constant 0 : i32
    return %c0_i32, %c0_i32_0, %c0_i32_1 : i32, i32, i32
  }
  func.func @transform_7(%arg0: i32) -> (i32, i32) {
    %c0_i32 = arith.constant 0 : i32
    %c0_i32_0 = arith.constant 0 : i32
    %c0_i32_1 = arith.constant 0 : i32
    return %c0_i32, %c0_i32_0 : i32, i32
  }
  func.func @transform_8(%arg0: i32) -> (i32, i32) {
    %c0_i32 = arith.constant 0 : i32
    %c0_i32_0 = arith.constant 0 : i32
    %c0_i32_1 = arith.constant 0 : i32
    return %c0_i32, %c0_i32_0 : i32, i32
  }
  func.func @transform_9(%arg0: i32) -> (i32, i32) {
    %c0_i32 = arith.constant 0 : i32
    %c0_i32_0 = arith.constant 0 : i32
    %c0_i32_1 = arith.constant 0 : i32
    return %c0_i32, %c0_i32_0 : i32, i32
  }
  func.func @transform_10(%arg0: i32) -> (i32, i32) {
    %c0_i32 = arith.constant 0 : i32
    %c0_i32_0 = arith.constant 0 : i32
    %c0_i32_1 = arith.constant 0 : i32
    return %c0_i32, %c0_i32_0 : i32, i32
  }
  func.func @transform_11(%arg0: i32) -> (i32, i32) {
    %c0_i32 = arith.constant 0 : i32
    %c0_i32_0 = arith.constant 0 : i32
    %c0_i32_1 = arith.constant 0 : i32
    return %c0_i32, %c0_i32_0 : i32, i32
  }
  func.func @transform_12(%arg0: i32) -> (i32, i32, i32) {
    %c0_i32 = arith.constant 0 : i32
    %c0_i32_0 = arith.constant 0 : i32
    %c0_i32_1 = arith.constant 0 : i32
    return %arg0, %c0_i32, %c0_i32_0 : i32, i32, i32
  }
}

module attributes {stable_mosaic.version = 11 : i64} {
  func.func @_final_kernel(%arg0: memref<2x1x17xbf16, #tpu.memory_space<vmem>>, %arg1: memref<1x17xf32, #tpu.memory_space<vmem>>, %arg2: memref<1x17xf32, #tpu.memory_space<vmem>>, %arg3: memref<17x10xbf16, #tpu.memory_space<vmem>>, %arg4: memref<1x10xf32, #tpu.memory_space<vmem>>, %arg5: memref<2x10xf32, #tpu.memory_space<vmem>>) attributes {dimension_semantics = [], scalar_prefetch = 0 : i64, scratch_operands = 0 : i64, tpu.core_type = #tpu.core_type<tc>} {
    %c0 = arith.constant 0 : index
    %c0_0 = arith.constant 0 : index
    %c0_1 = arith.constant 0 : index
    %0 = vector.load %arg0[%c0, %c0_0, %c0_1] : memref<2x1x17xbf16, #tpu.memory_space<vmem>>, vector<2x1x17xbf16>
    %1 = arith.extf %0 : vector<2x1x17xbf16> to vector<2x1x17xf32>
    %cst = arith.constant dense<0.000000e+00> : vector<2x17xf32>
    %2 = vector.multi_reduction <add>, %1, %cst [1] : vector<2x1x17xf32> to vector<2x17xf32>
    %cst_2 = arith.constant 1.000000e+00 : f32
    %3 = vector.broadcast %cst_2 : f32 to vector<2x17xf32>
    %4 = arith.mulf %2, %3 : vector<2x17xf32>
    %c0_3 = arith.constant 0 : index
    %c0_4 = arith.constant 0 : index
    %5 = vector.load %arg1[%c0_3, %c0_4] : memref<1x17xf32, #tpu.memory_space<vmem>>, vector<1x17xf32>
    %6 = vector.broadcast %5 : vector<1x17xf32> to vector<2x17xf32>
    %7 = arith.mulf %4, %6 : vector<2x17xf32>
    %c0_5 = arith.constant 0 : index
    %c0_6 = arith.constant 0 : index
    %8 = vector.load %arg2[%c0_5, %c0_6] : memref<1x17xf32, #tpu.memory_space<vmem>>, vector<1x17xf32>
    %9 = vector.broadcast %8 : vector<1x17xf32> to vector<2x17xf32>
    %10 = arith.addf %7, %9 : vector<2x17xf32>
    %11 = arith.truncf %10 : vector<2x17xf32> to vector<2x17xbf16>
    %c0_7 = arith.constant 0 : index
    %c0_8 = arith.constant 0 : index
    %12 = vector.load %arg3[%c0_7, %c0_8] : memref<17x10xbf16, #tpu.memory_space<vmem>>, vector<17x10xbf16>
    %cst_9 = arith.constant dense<0.000000e+00> : vector<2x10xf32>
    %13 = tpu.matmul %11, %12, %cst_9 {dimension_numbers = #tpu.dot_dimension_numbers<[1], [0], [0], [1], [0, 0, 1, 1], [], []>} : vector<2x17xbf16>, vector<17x10xbf16>, vector<2x10xf32> -> vector<2x10xf32>
    %c0_10 = arith.constant 0 : index
    %c0_11 = arith.constant 0 : index
    %14 = vector.load %arg4[%c0_10, %c0_11] : memref<1x10xf32, #tpu.memory_space<vmem>>, vector<1x10xf32>
    %15 = vector.broadcast %14 : vector<1x10xf32> to vector<2x10xf32>
    %16 = arith.addf %13, %15 : vector<2x10xf32>
    %c0_12 = arith.constant 0 : index
    %c0_13 = arith.constant 0 : index
    %17 = vector.load %arg5[%c0_12, %c0_13] : memref<2x10xf32, #tpu.memory_space<vmem>>, vector<2x10xf32>
    tpu.vector_store %arg5[%c0_12, %c0_13], %16 {strides = array<i32>} : memref<2x10xf32, #tpu.memory_space<vmem>>, vector<2x10xf32>,
    return
  }
}

</mosaic_0001>

<bundles_post_ra>
// kernel: sedensenet_forward.10
= control target key start
LH: loop header
LB: loop body
LE: loop exit
PB: predicated region body
PF: predicated region fallthrough
CT: control target
= control target key end

     0   :  { %s1198_s15 = smov 0   ;;  %s1477_s0 = inlined_call_operand.vmem [shape: bf16[2,256,147], index: 0, kind: input, shape index: {}]   ;;  %s1478_s1 = inlined_call_operand.vmem [shape: bf16[147,16], index: 1, kind: input, shape index: {}]   ;;  %s1479_s2 = inlined_call_operand.vmem [shape: f32[1,16], index: 2, kind: input, shape index: {}]   ;;  %s1480_s3 = inlined_call_operand.vmem [shape: f32[1,16], index: 3, kind: input, shape index: {}]   ;;  %s1481_s4 = inlined_call_operand.vmem [shape: bf16[2,256,16], index: 4, kind: output, shape index: {}]  }
   0x1 LB: > { %s909_s16 = sadd.s32 4294967295, %s1170_s15   ;;  %p913_p0 = scmp.ge.s32.totalorder %s1170_s15, 1  ;;  %s1170_s15 = sphi %s1198_s15, %s14_s15  }
   0x2   : > { %p162_p1 = scmp.lt.s32.totalorder %s1170_s15, 3 }
   0x4   : > { %p163_p2 = pnand %p913_p0, %p162_p1 }
   0x5   : > { %p188_p3 = scmp.lt.s32.totalorder (!%p163_p2), %s909_s16, 1 }
   0x6   : > { %166 = sbr.rel (%p163_p2) target bundleno = 306 (0x132), region = 36 }
   0xb   : > { %v1141_v0 = vld [vmem:[%s1478_s1 + $0x38] sm:$0xff]  ;;  %v249_v1 = vld [vmem:[%s1478_s1 + $0x48] sm:$0x3]  ;;  %vm500_vm0 = vcmask 1040384   ;;  %vm501_vm1 = vcmask 1041408   ;;  %v1140_v3 = vld [vmem:[%s1478_s1 + $0x30] sm:$0xff] }
   0xc   : > { %v431_v2 = vunpack.c.l.b16 %v249_v1  ;;  %507 = vmatpush.bf16.msra.mxu0 %v1141_v0  ;;  %1143 = vmatpush.bf16.msra.mxu2 %v1141_v0  ;;  %v1172_v4 = vmov 65535   ;;  %s1483_s16 = smov (!%p188_p3, %s909_s16), 1  ;;  %v1139_v9 = vld [vmem:[%s1478_s1 + $0x28] sm:$0xff]  ;;  %v1142_v10 = vld [vmem:[%s1478_s1 + $0x40] sm:$0xff]  ;;  %vm451_vm2 = vcmask 154624   ;;  %v1137_v18 = vld [vmem:[%s1478_s1 + $0x18] sm:$0xff] }
   0xd   : > { %v502_v5 = vsel %vm500_vm0, 4294967295, %v1172_v4  ;;  %s1100_s23 = sshll.u32 %s1483_s16, 8  ;;  %v1138_v15 = vld [vmem:[%s1478_s1 + $0x20] sm:$0xff]  ;;  %v1136_v19 = vld [vmem:[%s1478_s1 + $0x10] sm:$0xff]  ;;  %v1135_v20 = vld [vmem:[%s1478_s1 + $0x8] sm:$0xff]  ;;  %s1101_s21 = sshll.u32 %s1483_s16, 7 }
   0xe   : > { %v441_v6 = vpack.c.b16 %v431_v2, %v431_v2  ;;  %v503_v7 = vsel %vm501_vm1, %v502_v5, 0  ;;  %s1224_s28 = scalar_lea.vmem %s1477_s0, %s1100_s23  ;;  %v1134_v26 = vld [vmem:[%s1478_s1] sm:$0xff]  ;;  %s1342_s24 = scalar_lea.vmem %s1481_s4, %s1101_s21  ;;  %vm821_vm3 = vcmask 125952  }
   0xf   : > { %v1102_v11 = vld [vmem:[%s1224_s28 + $0x4] sm:$0xf]  ;;  %v922_v12 = vld [vmem:[%s1224_s28 + $0x8] sm:$0xf0]  ;;  %v1120_v13 = vld [vmem:[%s1224_s28 + $0x94] sm:$0xf] }
  0x10   : > { %v505_v8 = vand.u32 %v503_v7, %v441_v6  ;;  %508 = vmatpush.bf16.msra.mxu0 %v1140_v3  ;;  %1144 = vmatpush.bf16.msra.mxu2 %v1140_v3  ;;  %v925_v14 = vor.u32 %v1102_v11, %v922_v12  ;;  %v994_v16 = vld [vmem:[%s1224_s28 + $0x98] sm:$0xf0]  ;;  %v1104_v21 = vld [vmem:[%s1224_s28 + $0x14] sm:$0xf]  ;;  %v1122_v23 = vld [vmem:[%s1224_s28 + $0xa4] sm:$0xf] }
  0x11   : > { %v997_v17 = vor.u32 %v1120_v13, %v994_v16  ;;  %v930_v22 = vld [vmem:[%s1224_s28 + $0x18] sm:$0xf0]  ;;  %v1002_v24 = vld [vmem:[%s1224_s28 + $0xa8] sm:$0xf0]  ;;  %v920_v27 = vld [vmem:[%s1224_s28] sm:$0xf] }
  0x12   : > { %602 = vmatpush.bf16.msra.mxu1 %v505_v8  ;;  %1151 = vmatpush.bf16.msra.mxu3 %v505_v8  ;;  %v933_v25 = vor.u32 %v1104_v21, %v930_v22  ;;  %v1103_v28 = vld [vmem:[%s1224_s28 + $0x4] sm:$0xf0]  ;;  %v984_v29 = vld [vmem:[%s1224_s28 + $0x80] sm:$0xf]  ;;  %v1005_v31 = vor.u32 %v1122_v23, %v1002_v24  ;;  %v1106_v34 = vld [vmem:[%s1224_s28 + $0x24] sm:$0xf] }
  0x13   : > { %v1119_v30 = vld [vmem:[%s1224_s28 + $0x84] sm:$0xf0]  ;;  %v921_v32 = vor.u32 %v1103_v28, %v920_v27  ;;  %v938_v35 = vld [vmem:[%s1224_s28 + $0x28] sm:$0xf0]  ;;  %v1124_v36 = vld [vmem:[%s1224_s28 + $0xb4] sm:$0xf] }
  0x14   : > { %509 = vmatpush.bf16.msra.mxu0 %v1139_v9  ;;  %1145 = vmatpush.bf16.msra.mxu2 %v1139_v9  ;;  %v985_v33 = vor.u32 %v1119_v30, %v984_v29  ;;  %v1010_v37 = vld [vmem:[%s1224_s28 + $0xb8] sm:$0xf0]  ;;  %v941_v38 = vor.u32 %v1106_v34, %v938_v35  ;;  %v928_v39 = vld [vmem:[%s1224_s28 + $0x10] sm:$0xf]  ;;  %v1105_v40 = vld [vmem:[%s1224_s28 + $0x14] sm:$0xf0] }
  0x15   : > { %v992_v41 = vld [vmem:[%s1224_s28 + $0x90] sm:$0xf]  ;;  %v1121_v42 = vld [vmem:[%s1224_s28 + $0x94] sm:$0xf0]  ;;  %v1013_v43 = vor.u32 %v1124_v36, %v1010_v37  ;;  %v929_v44 = vor.u32 %v1105_v40, %v928_v39  ;;  %v1108_v46 = vld [vmem:[%s1224_s28 + $0x34] sm:$0xf] }
  0x16   : > { %603 = vmatpush.bf16.msra.mxu1 %v1142_v10  ;;  %1152 = vmatpush.bf16.msra.mxu3 %v1142_v10  ;;  %v993_v45 = vor.u32 %v1121_v42, %v992_v41  ;;  %v946_v47 = vld [vmem:[%s1224_s28 + $0x38] sm:$0xf0]  ;;  %v1126_v48 = vld [vmem:[%s1224_s28 + $0xc4] sm:$0xf]  ;;  %v1018_v49 = vld [vmem:[%s1224_s28 + $0xc8] sm:$0xf0] }
  0x17   : > { %v949_v50 = vor.u32 %v1108_v46, %v946_v47  ;;  %v936_v51 = vld [vmem:[%s1224_s28 + $0x20] sm:$0xf]  ;;  %v1107_v52 = vld [vmem:[%s1224_s28 + $0x24] sm:$0xf0]  ;;  %v1021_v55 = vor.u32 %v1126_v48, %v1018_v49  ;;  %v1110_v58 = vld [vmem:[%s1224_s28 + $0x44] sm:$0xf] }
  0x18   : > { %510 = vmatpush.bf16.msra.mxu0 %v1138_v15  ;;  %1146 = vmatpush.bf16.msra.mxu2 %v1138_v15  ;;  %v1000_v53 = vld [vmem:[%s1224_s28 + $0xa0] sm:$0xf]  ;;  %v1123_v54 = vld [vmem:[%s1224_s28 + $0xa4] sm:$0xf0]  ;;  %v937_v56 = vor.u32 %v1107_v52, %v936_v51  ;;  %v954_v59 = vld [vmem:[%s1224_s28 + $0x48] sm:$0xf0] }
  0x19   : > { %1082 = vmatmul.msk.bf16.vlgmr.msra.gmra.mxu1 %vm451_vm2, %v925_v14  ;;  %1091 = vmatmul.msk.bf16.vlgmr.msra.gmra.mxu3 %vm451_vm2, %v997_v17  ;;  %v1001_v57 = vor.u32 %v1123_v54, %v1000_v53  ;;  %v1128_v60 = vld [vmem:[%s1224_s28 + $0xd4] sm:$0xf]  ;;  %v1026_v61 = vld [vmem:[%s1224_s28 + $0xd8] sm:$0xf0]  ;;  %v957_v62 = vor.u32 %v1110_v58, %v954_v59  ;;  %v944_v63 = vld [vmem:[%s1224_s28 + $0x30] sm:$0xf] }
  0x1a   : > { %v1109_v0 = vld [vmem:[%s1224_s28 + $0x34] sm:$0xf0]  ;;  %v1008_v1 = vld [vmem:[%s1224_s28 + $0xb0] sm:$0xf]  ;;  %v1029_v3 = vor.u32 %v1128_v60, %v1026_v61  ;;  %v1112_v6 = vld [vmem:[%s1224_s28 + $0x54] sm:$0xf] }
  0x1b   : > { %v1125_v2 = vld [vmem:[%s1224_s28 + $0xb4] sm:$0xf0]  ;;  %v945_v4 = vor.u32 %v1109_v0, %v944_v63  ;;  %v962_v7 = vld [vmem:[%s1224_s28 + $0x58] sm:$0xf0]  ;;  %v1130_v8 = vld [vmem:[%s1224_s28 + $0xe4] sm:$0xf] }
  0x1c   : > { %511 = vmatpush.bf16.msra.mxu0 %v1137_v18  ;;  %1147 = vmatpush.bf16.msra.mxu2 %v1137_v18  ;;  %v1009_v5 = vor.u32 %v1125_v2, %v1008_v1  ;;  %v1034_v9 = vld [vmem:[%s1224_s28 + $0xe8] sm:$0xf0]  ;;  %v965_v10 = vor.u32 %v1112_v6, %v962_v7  ;;  %v952_v11 = vld [vmem:[%s1224_s28 + $0x40] sm:$0xf]  ;;  %v1111_v12 = vld [vmem:[%s1224_s28 + $0x44] sm:$0xf0] }
  0x1d   : > { %v1016_v13 = vld [vmem:[%s1224_s28 + $0xc0] sm:$0xf]  ;;  %v1127_v14 = vld [vmem:[%s1224_s28 + $0xc4] sm:$0xf0]  ;;  %v1037_v15 = vor.u32 %v1130_v8, %v1034_v9  ;;  %v953_v16 = vor.u32 %v1111_v12, %v952_v11  ;;  %v1114_v18 = vld [vmem:[%s1224_s28 + $0x64] sm:$0xf] }
  0x1e   : > { %v1017_v17 = vor.u32 %v1127_v14, %v1016_v13  ;;  %v1042_v21 = vld [vmem:[%s1224_s28 + $0xf8] sm:$0xf0]  ;;  %v960_v23 = vld [vmem:[%s1224_s28 + $0x50] sm:$0xf]  ;;  %v1113_v24 = vld [vmem:[%s1224_s28 + $0x54] sm:$0xf0] }
  0x1f   : > { %v961_v28 = vor.u32 %v1113_v24, %v960_v23  ;;  %v1116_v30 = vld [vmem:[%s1224_s28 + $0x74] sm:$0xf]  ;;  %v1115_v34 = vld [vmem:[%s1224_s28 + $0x64] sm:$0xf0]  ;;  %v1032_v35 = vld [vmem:[%s1224_s28 + $0xe0] sm:$0xf] }
  0x20   : > { %512 = vmatpush.bf16.msra.mxu0 %v1136_v19  ;;  %1148 = vmatpush.bf16.msra.mxu2 %v1136_v19  ;;  %v970_v19 = vld [vmem:[%s1224_s28 + $0x68] sm:$0xf0]  ;;  %v1131_v36 = vld [vmem:[%s1224_s28 + $0xe4] sm:$0xf0]  ;;  %v1118_v39 = vld [vmem:[%s1224_s28 + $0x84] sm:$0xf] }
  0x21   : > { %v973_v22 = vor.u32 %v1114_v18, %v970_v19  ;;  %v986_v40 = vld [vmem:[%s1224_s28 + $0x88] sm:$0xf0]  ;;  %v976_v42 = vld [vmem:[%s1224_s28 + $0x70] sm:$0xf]  ;;  %v1133_v46 = vld [vmem:[%s1224_s28 + $0xf4] sm:$0xf0] }
  0x22   : > { %v989_v41 = vor.u32 %v1118_v39, %v986_v40  ;;  %v1327_v52 = vld [vmem:[%s1479_s2] ss:$0 sm:$0xff] }
  0x24   : > { %513 = vmatpush.bf16.msra.mxu0 %v1135_v20  ;;  %1149 = vmatpush.bf16.msra.mxu2 %v1135_v20  ;;  %v1132_v20 = vld [vmem:[%s1224_s28 + $0xf4] sm:$0xf] }
  0x25   : > { %v1045_v27 = vor.u32 %v1132_v20, %v1042_v21 }
  0x28   : > { %514 = vmatpush.bf16.msra.mxu0 %v1134_v26  ;;  %1150 = vmatpush.bf16.msra.mxu2 %v1134_v26  ;;  %v1129_v26 = vld [vmem:[%s1224_s28 + $0xd4] sm:$0xf0] }
  0x29   : > { %1083 = vmatmul.msk.bf16.gmra.mxu1 %vm451_vm2, %v933_v25  ;;  %1092 = vmatmul.msk.bf16.gmra.mxu3 %vm451_vm2, %v1005_v31  ;;  %v1024_v25 = vld [vmem:[%s1224_s28 + $0xd0] sm:$0xf]  ;;  %v978_v31 = vld [vmem:[%s1224_s28 + $0x78] sm:$0xf0] }
  0x2a   : > { %v1025_v29 = vor.u32 %v1129_v26, %v1024_v25 }
  0x2b   : > { %515 = vmatmul.bf16.vlgmr.msra.gmra.mxu0 %v921_v32  ;;  %555 = vmatmul.bf16.vlgmr.msra.gmra.mxu2 %v985_v33  ;;  %v981_v32 = vor.u32 %v1116_v30, %v978_v31  ;;  %v968_v33 = vld [vmem:[%s1224_s28 + $0x60] sm:$0xf] }
  0x2c   : > { %v969_v37 = vor.u32 %v1115_v34, %v968_v33 }
  0x39   : > { %1084 = vmatmul.msk.bf16.gmra.mxu1 %vm451_vm2, %v941_v38  ;;  %1093 = vmatmul.msk.bf16.gmra.mxu3 %vm451_vm2, %v1013_v43  ;;  %v1033_v38 = vor.u32 %v1131_v36, %v1032_v35  ;;  %v1117_v43 = vld [vmem:[%s1224_s28 + $0x74] sm:$0xf0] }
  0x3a   : > { %v977_v47 = vor.u32 %v1117_v43, %v976_v42 }
  0x3b   : > { %520 = vmatmul.bf16.gmra.mxu0 %v929_v44  ;;  %560 = vmatmul.bf16.gmra.mxu2 %v993_v45  ;;  %v1040_v45 = vld [vmem:[%s1224_s28 + $0xf0] sm:$0xf] }
  0x3c   : > { %v1041_v48 = vor.u32 %v1133_v46, %v1040_v45 }
  0x49   : > { %1085 = vmatmul.msk.bf16.gmra.mxu1 %vm451_vm2, %v949_v50  ;;  %1094 = vmatmul.msk.bf16.gmra.mxu3 %vm451_vm2, %v1021_v55  ;;  %v1332_v55 = vld [vmem:[%s1480_s3] ss:$0 sm:$0xff] }
  0x4b   : > { %525 = vmatmul.bf16.gmra.mxu0 %v937_v56  ;;  %565 = vmatmul.bf16.gmra.mxu2 %v1001_v57 }
  0x59   : > { %1086 = vmatmul.msk.bf16.gmra.mxu1 %vm451_vm2, %v957_v62  ;;  %1095 = vmatmul.msk.bf16.gmra.mxu3 %vm451_vm2, %v1029_v3 }
  0x5b   : > { %530 = vmatmul.bf16.gmra.mxu0 %v945_v4  ;;  %570 = vmatmul.bf16.gmra.mxu2 %v1009_v5 }
  0x69   : > { %1087 = vmatmul.msk.bf16.gmra.mxu1 %vm451_vm2, %v965_v10  ;;  %1096 = vmatmul.msk.bf16.gmra.mxu3 %vm451_vm2, %v1037_v15 }
  0x6b   : > { %535 = vmatmul.bf16.gmra.mxu0 %v953_v16  ;;  %575 = vmatmul.bf16.gmra.mxu2 %v1017_v17 }
  0x79   : > { %1088 = vmatmul.msk.bf16.gmra.mxu1 %vm451_vm2, %v973_v22  ;;  %1097 = vmatmul.msk.bf16.gmra.mxu3 %vm451_vm2, %v1045_v27 }
  0x7b   : > { %540 = vmatmul.bf16.gmra.mxu0 %v961_v28  ;;  %580 = vmatmul.bf16.gmra.mxu2 %v1025_v29 }
  0x89   : > { %1089 = vmatmul.msk.bf16.gmra.mxu1 %vm451_vm2, %v981_v32 }
  0x8b   : > { %545 = vmatmul.bf16.gmra.mxu0 %v969_v37  ;;  %585 = vmatmul.bf16.gmra.mxu2 %v1033_v38 }
  0x96   : > { %v605_v44 = vpop.f32.mrf.mxu1 }
  0x99   : > { %1090 = vmatmul.msk.bf16.gmra.mxu1 %vm451_vm2, %v989_v41 }
  0x9b   : > { %550 = vmatmul.bf16.gmra.mxu0 %v977_v47  ;;  %590 = vmatmul.bf16.gmra.mxu2 %v1041_v48 }
  0x9c   : > { %v650_v51 = vpop.f32.mrf.mxu3 }
  0x9e   : > { %v607_v49 = vpop.f32.mrf.mxu1 }
  0xa4   : > { %v652_v61 = vpop.f32.mrf.mxu3 }
  0xa6   : > { %v610_v50 = vpop.f32.mrf.mxu1 }
  0xa8   : > { %v516_v53 = vpop.f32.mrf.mxu0 }
  0xa9   : > { %v606_v54 = vadd.f32 %v605_v44, %v516_v53 }
  0xab   : > { %v689_v56 = vmul.f32 %v1327_v52, %v606_v54 }
  0xac   : > { %v655_v9 = vpop.f32.mrf.mxu3 }
  0xad   : > { %v725_v57 = vadd.f32 %v1332_v55, %v689_v56 }
  0xae   : > { %v612_v58 = vpop.f32.mrf.mxu1  ;;  %v1337_v60 = vpop.f32.mrf.mxu2 }
  0xaf   : > { %v757_v59 = vmax.f32 %v725_v57, 0.0 }
  0xb0   : > { %v518_v62 = vpop.f32.mrf.mxu0 }
  0xb1   : > { %v789_v63 = vpack.c.bf16 %v757_v59, %v757_v59  ;;  %v608_v0 = vadd.f32 %v607_v49, %v518_v62 }
  0xb3   : > { %822 = vst.msk [vmem:[%s1342_s24] sm:$0xf] %vm821_vm3, %v789_v63  ;;  %v690_v1 = vmul.f32 %v1327_v52, %v608_v0 }
  0xb4   : > { %v657_v21 = vpop.f32.mrf.mxu3 }
  0xb5   : > { %v726_v2 = vadd.f32 %v1332_v55, %v690_v1 }
  0xb6   : > { %v615_v3 = vpop.f32.mrf.mxu1  ;;  %v1348_v5 = vpop.f32.mrf.mxu2 }
  0xb7   : > { %v758_v4 = vmax.f32 %v726_v2, 0.0 }
  0xb8   : > { %v521_v6 = vpop.f32.mrf.mxu0 }
  0xb9   : > { %v790_v7 = vpack.c.bf16 %v758_v4, %v758_v4  ;;  %v611_v8 = vadd.f32 %v610_v50, %v521_v6 }
  0xbb   : > { %823 = vst.msk [vmem:[%s1342_s24 + $0x4] sm:$0xf] %vm821_vm3, %v790_v7  ;;  %v691_v10 = vmul.f32 %v1327_v52, %v611_v8 }
  0xbc   : > { %v660_v38 = vpop.f32.mrf.mxu3 }
  0xbd   : > { %v727_v11 = vadd.f32 %v1332_v55, %v691_v10 }
  0xbe   : > { %v617_v12 = vpop.f32.mrf.mxu1  ;;  %v561_v14 = vpop.f32.mrf.mxu2 }
  0xbf   : > { %v759_v13 = vmax.f32 %v727_v11, 0.0  ;;  %v651_v15 = vadd.f32 %v650_v51, %v561_v14 }
  0xc0   : > { %v523_v16 = vpop.f32.mrf.mxu0 }
  0xc1   : > { %v791_v17 = vpack.c.bf16 %v759_v13, %v759_v13  ;;  %v613_v18 = vadd.f32 %v612_v58, %v523_v16  ;;  %v707_v19 = vmul.f32 %v1327_v52, %v651_v15 }
  0xc3   : > { %824 = vst.msk [vmem:[%s1342_s24 + $0x8] sm:$0xf] %vm821_vm3, %v791_v17  ;;  %v692_v20 = vmul.f32 %v1327_v52, %v613_v18  ;;  %v743_v22 = vadd.f32 %v1332_v55, %v707_v19 }
  0xc4   : > { %v662_v57 = vpop.f32.mrf.mxu3 }
  0xc5   : > { %v728_v23 = vadd.f32 %v1332_v55, %v692_v20  ;;  %v775_v25 = vmax.f32 %v743_v22, 0.0 }
  0xc6   : > { %v620_v24 = vpop.f32.mrf.mxu1  ;;  %v563_v27 = vpop.f32.mrf.mxu2 }
  0xc7   : > { %v760_v26 = vmax.f32 %v728_v23, 0.0  ;;  %v807_v28 = vpack.c.bf16 %v775_v25, %v775_v25  ;;  %v653_v29 = vadd.f32 %v652_v61, %v563_v27 }
  0xc8   : > { %v526_v30 = vpop.f32.mrf.mxu0 }
  0xc9   : > { %v792_v31 = vpack.c.bf16 %v760_v26, %v760_v26  ;;  %v616_v32 = vadd.f32 %v615_v3, %v526_v30  ;;  %840 = vst.msk [vmem:[%s1342_s24 + $0x48] sm:$0xf] %vm821_vm3, %v807_v28  ;;  %v708_v33 = vmul.f32 %v1327_v52, %v653_v29 }
  0xcb   : > { %825 = vst.msk [vmem:[%s1342_s24 + $0xc] sm:$0xf] %vm821_vm3, %v792_v31  ;;  %v693_v34 = vmul.f32 %v1327_v52, %v616_v32  ;;  %v744_v35 = vadd.f32 %v1332_v55, %v708_v33 }
  0xcc   : > { %v665_v14 = vpop.f32.mrf.mxu3 }
  0xcd   : > { %v729_v36 = vadd.f32 %v1332_v55, %v693_v34  ;;  %v776_v39 = vmax.f32 %v744_v35, 0.0 }
  0xce   : > { %v622_v37 = vpop.f32.mrf.mxu1  ;;  %v566_v41 = vpop.f32.mrf.mxu2 }
  0xcf   : > { %v761_v40 = vmax.f32 %v729_v36, 0.0  ;;  %v808_v42 = vpack.c.bf16 %v776_v39, %v776_v39  ;;  %v656_v43 = vadd.f32 %v655_v9, %v566_v41 }
  0xd0   : > { %v528_v44 = vpop.f32.mrf.mxu0 }
  0xd1   : > { %v793_v45 = vpack.c.bf16 %v761_v40, %v761_v40  ;;  %v618_v46 = vadd.f32 %v617_v12, %v528_v44  ;;  %841 = vst.msk [vmem:[%s1342_s24 + $0x4c] sm:$0xf] %vm821_vm3, %v808_v42  ;;  %v709_v47 = vmul.f32 %v1327_v52, %v656_v43 }
  0xd3   : > { %826 = vst.msk [vmem:[%s1342_s24 + $0x10] sm:$0xf] %vm821_vm3, %v793_v45  ;;  %v694_v48 = vmul.f32 %v1327_v52, %v618_v46  ;;  %v745_v49 = vadd.f32 %v1332_v55, %v709_v47 }
  0xd4   : > { %v667_v30 = vpop.f32.mrf.mxu3 }
  0xd5   : > { %v730_v50 = vadd.f32 %v1332_v55, %v694_v48  ;;  %v777_v53 = vmax.f32 %v745_v49, 0.0 }
  0xd6   : > { %v625_v51 = vpop.f32.mrf.mxu1  ;;  %v568_v56 = vpop.f32.mrf.mxu2 }
  0xd7   : > { %v762_v54 = vmax.f32 %v730_v50, 0.0  ;;  %v809_v58 = vpack.c.bf16 %v777_v53, %v777_v53  ;;  %v658_v59 = vadd.f32 %v657_v21, %v568_v56 }
  0xd8   : > { %v531_v61 = vpop.f32.mrf.mxu0 }
  0xd9   : > { %v794_v62 = vpack.c.bf16 %v762_v54, %v762_v54  ;;  %v621_v63 = vadd.f32 %v620_v24, %v531_v61  ;;  %842 = vst.msk [vmem:[%s1342_s24 + $0x50] sm:$0xf] %vm821_vm3, %v809_v58  ;;  %v710_v0 = vmul.f32 %v1327_v52, %v658_v59 }
  0xdb   : > { %827 = vst.msk [vmem:[%s1342_s24 + $0x14] sm:$0xf] %vm821_vm3, %v794_v62  ;;  %v695_v1 = vmul.f32 %v1327_v52, %v621_v63  ;;  %v746_v2 = vadd.f32 %v1332_v55, %v710_v0 }
  0xdc   : > { %v670_v47 = vpop.f32.mrf.mxu3 }
  0xdd   : > { %v731_v3 = vadd.f32 %v1332_v55, %v695_v1  ;;  %v778_v6 = vmax.f32 %v746_v2, 0.0 }
  0xde   : > { %v627_v4 = vpop.f32.mrf.mxu1  ;;  %v571_v8 = vpop.f32.mrf.mxu2 }
  0xdf   : > { %v763_v7 = vmax.f32 %v731_v3, 0.0  ;;  %v810_v9 = vpack.c.bf16 %v778_v6, %v778_v6  ;;  %v661_v10 = vadd.f32 %v660_v38, %v571_v8 }
  0xe0   : > { %v533_v11 = vpop.f32.mrf.mxu0 }
  0xe1   : > { %v795_v12 = vpack.c.bf16 %v763_v7, %v763_v7  ;;  %v623_v13 = vadd.f32 %v622_v37, %v533_v11  ;;  %843 = vst.msk [vmem:[%s1342_s24 + $0x54] sm:$0xf] %vm821_vm3, %v810_v9  ;;  %v711_v15 = vmul.f32 %v1327_v52, %v661_v10 }
  0xe3   : > { %828 = vst.msk [vmem:[%s1342_s24 + $0x18] sm:$0xf] %vm821_vm3, %v795_v12  ;;  %v696_v16 = vmul.f32 %v1327_v52, %v623_v13  ;;  %v747_v17 = vadd.f32 %v1332_v55, %v711_v15 }
  0xe4   : > { %v672_v3 = vpop.f32.mrf.mxu3 }
  0xe5   : > { %v732_v18 = vadd.f32 %v1332_v55, %v696_v16  ;;  %v779_v20 = vmax.f32 %v747_v17, 0.0 }
  0xe6   : > { %v630_v19 = vpop.f32.mrf.mxu1  ;;  %v573_v22 = vpop.f32.mrf.mxu2 }
  0xe7   : > { %v764_v21 = vmax.f32 %v732_v18, 0.0  ;;  %v811_v23 = vpack.c.bf16 %v779_v20, %v779_v20  ;;  %v663_v24 = vadd.f32 %v662_v57, %v573_v22 }
  0xe8   : > { %v536_v25 = vpop.f32.mrf.mxu0 }
  0xe9   : > { %v796_v26 = vpack.c.bf16 %v764_v21, %v764_v21  ;;  %v626_v27 = vadd.f32 %v625_v51, %v536_v25  ;;  %844 = vst.msk [vmem:[%s1342_s24 + $0x58] sm:$0xf] %vm821_vm3, %v811_v23  ;;  %v712_v28 = vmul.f32 %v1327_v52, %v663_v24 }
  0xeb   : > { %829 = vst.msk [vmem:[%s1342_s24 + $0x1c] sm:$0xf] %vm821_vm3, %v796_v26  ;;  %v697_v29 = vmul.f32 %v1327_v52, %v626_v27  ;;  %v748_v31 = vadd.f32 %v1332_v55, %v712_v28 }
  0xec   : > { %v675_v22 = vpop.f32.mrf.mxu3 }
  0xed   : > { %v733_v32 = vadd.f32 %v1332_v55, %v697_v29  ;;  %v780_v34 = vmax.f32 %v748_v31, 0.0 }
  0xee   : > { %v632_v33 = vpop.f32.mrf.mxu1  ;;  %v576_v36 = vpop.f32.mrf.mxu2 }
  0xef   : > { %v765_v35 = vmax.f32 %v733_v32, 0.0  ;;  %v812_v37 = vpack.c.bf16 %v780_v34, %v780_v34  ;;  %v666_v38 = vadd.f32 %v665_v14, %v576_v36 }
  0xf0   : > { %v538_v39 = vpop.f32.mrf.mxu0 }
  0xf1   : > { %v797_v40 = vpack.c.bf16 %v765_v35, %v765_v35  ;;  %v628_v41 = vadd.f32 %v627_v4, %v538_v39  ;;  %845 = vst.msk [vmem:[%s1342_s24 + $0x5c] sm:$0xf] %vm821_vm3, %v812_v37  ;;  %v713_v42 = vmul.f32 %v1327_v52, %v666_v38 }
  0xf3   : > { %830 = vst.msk [vmem:[%s1342_s24 + $0x20] sm:$0xf] %vm821_vm3, %v797_v40  ;;  %v698_v43 = vmul.f32 %v1327_v52, %v628_v41  ;;  %v749_v44 = vadd.f32 %v1332_v55, %v713_v42 }
  0xf4   : > { %v677_v38 = vpop.f32.mrf.mxu3 }
  0xf5   : > { %v734_v45 = vadd.f32 %v1332_v55, %v698_v43  ;;  %v781_v48 = vmax.f32 %v749_v44, 0.0 }
  0xf6   : > { %v635_v46 = vpop.f32.mrf.mxu1  ;;  %v578_v50 = vpop.f32.mrf.mxu2 }
  0xf7   : > { %v766_v49 = vmax.f32 %v734_v45, 0.0  ;;  %v813_v51 = vpack.c.bf16 %v781_v48, %v781_v48  ;;  %v668_v53 = vadd.f32 %v667_v30, %v578_v50 }
  0xf8   : > { %v541_v54 = vpop.f32.mrf.mxu0 }
  0xf9   : > { %v798_v56 = vpack.c.bf16 %v766_v49, %v766_v49  ;;  %v631_v57 = vadd.f32 %v630_v19, %v541_v54  ;;  %846 = vst.msk [vmem:[%s1342_s24 + $0x60] sm:$0xf] %vm821_vm3, %v813_v51  ;;  %v714_v58 = vmul.f32 %v1327_v52, %v668_v53 }
  0xfb   : > { %831 = vst.msk [vmem:[%s1342_s24 + $0x24] sm:$0xf] %vm821_vm3, %v798_v56  ;;  %v699_v59 = vmul.f32 %v1327_v52, %v631_v57  ;;  %v750_v61 = vadd.f32 %v1332_v55, %v714_v58 }
  0xfd   : > { %v735_v62 = vadd.f32 %v1332_v55, %v699_v59  ;;  %v782_v0 = vmax.f32 %v750_v61, 0.0  ;;  %v680_v59 = vpop.f32.mrf.mxu3 }
  0xfe   : > { %v637_v63 = vpop.f32.mrf.mxu1  ;;  %v581_v2 = vpop.f32.mrf.mxu2 }
  0xff   : > { %v767_v1 = vmax.f32 %v735_v62, 0.0  ;;  %v814_v4 = vpack.c.bf16 %v782_v0, %v782_v0  ;;  %v671_v6 = vadd.f32 %v670_v47, %v581_v2 }
 0x100   : > { %v543_v7 = vpop.f32.mrf.mxu0 }
 0x101   : > { %v799_v8 = vpack.c.bf16 %v767_v1, %v767_v1  ;;  %v633_v9 = vadd.f32 %v632_v33, %v543_v7  ;;  %847 = vst.msk [vmem:[%s1342_s24 + $0x64] sm:$0xf] %vm821_vm3, %v814_v4  ;;  %v715_v10 = vmul.f32 %v1327_v52, %v671_v6 }
 0x103   : > { %832 = vst.msk [vmem:[%s1342_s24 + $0x28] sm:$0xf] %vm821_vm3, %v799_v8  ;;  %v700_v11 = vmul.f32 %v1327_v52, %v633_v9  ;;  %v751_v12 = vadd.f32 %v1332_v55, %v715_v10 }
 0x105   : > { %v736_v13 = vadd.f32 %v1332_v55, %v700_v11  ;;  %v783_v15 = vmax.f32 %v751_v12, 0.0 }
 0x106   : > { %v640_v14 = vpop.f32.mrf.mxu1  ;;  %v583_v17 = vpop.f32.mrf.mxu2 }
 0x107   : > { %v768_v16 = vmax.f32 %v736_v13, 0.0  ;;  %v815_v18 = vpack.c.bf16 %v783_v15, %v783_v15  ;;  %v673_v19 = vadd.f32 %v672_v3, %v583_v17 }
 0x108   : > { %v546_v20 = vpop.f32.mrf.mxu0 }
 0x109   : > { %v800_v21 = vpack.c.bf16 %v768_v16, %v768_v16  ;;  %v636_v23 = vadd.f32 %v635_v46, %v546_v20  ;;  %848 = vst.msk [vmem:[%s1342_s24 + $0x68] sm:$0xf] %vm821_vm3, %v815_v18  ;;  %v716_v24 = vmul.f32 %v1327_v52, %v673_v19  ;;  %v682_v18 = vpop.f32.mrf.mxu3 }
 0x10b   : > { %833 = vst.msk [vmem:[%s1342_s24 + $0x2c] sm:$0xf] %vm821_vm3, %v800_v21  ;;  %v701_v25 = vmul.f32 %v1327_v52, %v636_v23  ;;  %v752_v26 = vadd.f32 %v1332_v55, %v716_v24 }
 0x10d   : > { %v737_v27 = vadd.f32 %v1332_v55, %v701_v25  ;;  %v784_v29 = vmax.f32 %v752_v26, 0.0 }
 0x10e   : > { %v642_v28 = vpop.f32.mrf.mxu1  ;;  %v586_v31 = vpop.f32.mrf.mxu2 }
 0x10f   : > { %v769_v30 = vmax.f32 %v737_v27, 0.0  ;;  %v816_v32 = vpack.c.bf16 %v784_v29, %v784_v29  ;;  %v676_v33 = vadd.f32 %v675_v22, %v586_v31 }
 0x110   : > { %v548_v34 = vpop.f32.mrf.mxu0 }
 0x111   : > { %v801_v35 = vpack.c.bf16 %v769_v30, %v769_v30  ;;  %v638_v36 = vadd.f32 %v637_v63, %v548_v34  ;;  %849 = vst.msk [vmem:[%s1342_s24 + $0x6c] sm:$0xf] %vm821_vm3, %v816_v32  ;;  %v717_v37 = vmul.f32 %v1327_v52, %v676_v33 }
 0x113   : > { %834 = vst.msk [vmem:[%s1342_s24 + $0x30] sm:$0xf] %vm821_vm3, %v801_v35  ;;  %v702_v39 = vmul.f32 %v1327_v52, %v638_v36  ;;  %v753_v40 = vadd.f32 %v1332_v55, %v717_v37 }
 0x115   : > { %v738_v41 = vadd.f32 %v1332_v55, %v702_v39  ;;  %v785_v43 = vmax.f32 %v753_v40, 0.0 }
 0x116   : > { %v645_v42 = vpop.f32.mrf.mxu1  ;;  %v588_v46 = vpop.f32.mrf.mxu2 }
 0x117   : > { %v646_v44 = vadd.f32 %v645_v42, %v1337_v60  ;;  %v770_v45 = vmax.f32 %v738_v41, 0.0  ;;  %v817_v47 = vpack.c.bf16 %v785_v43, %v785_v43  ;;  %v678_v49 = vadd.f32 %v677_v38, %v588_v46 }
 0x118   : > { %v551_v50 = vpop.f32.mrf.mxu0 }
 0x119   : > { %v705_v48 = vmul.f32 %v1327_v52, %v646_v44  ;;  %v802_v51 = vpack.c.bf16 %v770_v45, %v770_v45  ;;  %v641_v53 = vadd.f32 %v640_v14, %v551_v50  ;;  %850 = vst.msk [vmem:[%s1342_s24 + $0x70] sm:$0xf] %vm821_vm3, %v817_v47  ;;  %v718_v56 = vmul.f32 %v1327_v52, %v678_v49 }
 0x11b   : > { %v741_v54 = vadd.f32 %v1332_v55, %v705_v48  ;;  %835 = vst.msk [vmem:[%s1342_s24 + $0x34] sm:$0xf] %vm821_vm3, %v802_v51  ;;  %v703_v60 = vmul.f32 %v1327_v52, %v641_v53  ;;  %v754_v58 = vadd.f32 %v1332_v55, %v718_v56 }
 0x11d   : > { %v773_v57 = vmax.f32 %v741_v54, 0.0  ;;  %v739_v61 = vadd.f32 %v1332_v55, %v703_v60  ;;  %v786_v0 = vmax.f32 %v754_v58, 0.0 }
 0x11e   : > { %v647_v62 = vpop.f32.mrf.mxu1  ;;  %v591_v3 = vpop.f32.mrf.mxu2 }
 0x11f   : > { %v805_v63 = vpack.c.bf16 %v773_v57, %v773_v57  ;;  %v648_v1 = vadd.f32 %v647_v62, %v1348_v5  ;;  %v771_v2 = vmax.f32 %v739_v61, 0.0  ;;  %v818_v4 = vpack.c.bf16 %v786_v0, %v786_v0 }
 0x120   : > { %v681_v7 = vadd.f32 %v680_v59, %v591_v3  ;;  %v553_v8 = vpop.f32.mrf.mxu0 }
 0x121   : > { %838 = vst.msk [vmem:[%s1342_s24 + $0x40] sm:$0xf] %vm821_vm3, %v805_v63  ;;  %v706_v6 = vmul.f32 %v1327_v52, %v648_v1  ;;  %v803_v9 = vpack.c.bf16 %v771_v2, %v771_v2  ;;  %v643_v10 = vadd.f32 %v642_v28, %v553_v8 }
 0x122   : > { %851 = vst.msk [vmem:[%s1342_s24 + $0x74] sm:$0xf] %vm821_vm3, %v818_v4  ;;  %v719_v12 = vmul.f32 %v1327_v52, %v681_v7 }
 0x123   : > { %v742_v11 = vadd.f32 %v1332_v55, %v706_v6  ;;  %836 = vst.msk [vmem:[%s1342_s24 + $0x38] sm:$0xf] %vm821_vm3, %v803_v9  ;;  %v704_v5 = vmul.f32 %v1327_v52, %v643_v10 }
 0x124   : > { %v755_v14 = vadd.f32 %v1332_v55, %v719_v12 }
 0x125   : > { %v774_v13 = vmax.f32 %v742_v11, 0.0  ;;  %v740_v15 = vadd.f32 %v1332_v55, %v704_v5 }
 0x126   : > { %v787_v17 = vmax.f32 %v755_v14, 0.0  ;;  %v593_v20 = vpop.f32.mrf.mxu2 }
 0x127   : > { %v806_v16 = vpack.c.bf16 %v774_v13, %v774_v13  ;;  %v772_v19 = vmax.f32 %v740_v15, 0.0  ;;  %v683_v22 = vadd.f32 %v682_v18, %v593_v20 }
 0x128   : > { %v819_v21 = vpack.c.bf16 %v787_v17, %v787_v17 }
 0x129   : > { %839 = vst.msk [vmem:[%s1342_s24 + $0x44] sm:$0xf] %vm821_vm3, %v806_v16  ;;  %v804_v23 = vpack.c.bf16 %v772_v19, %v772_v19  ;;  %v720_v24 = vmul.f32 %v1327_v52, %v683_v22 }
 0x12a   : > { %852 = vst.msk [vmem:[%s1342_s24 + $0x78] sm:$0xf] %vm821_vm3, %v819_v21 }
 0x12b   : > { %837 = vst.msk [vmem:[%s1342_s24 + $0x3c] sm:$0xf] %vm821_vm3, %v804_v23  ;;  %v756_v25 = vadd.f32 %v1332_v55, %v720_v24 }
 0x12d   : > { %v788_v26 = vmax.f32 %v756_v25, 0.0 }
 0x12f   : > { %v820_v27 = vpack.c.bf16 %v788_v26, %v788_v26 }
 0x131   : > { %853 = vst.msk [vmem:[%s1342_s24 + $0x7c] sm:$0xf] %vm821_vm3, %v820_v27 }
 0x132 PF: > { %s14_s15 = sadd.s32 1, %s1170_s15  }
 0x133   : > { %p11_p4 = scmp.ge.s32.totalorder %s14_s15, 4  }
 0x135   :  { %13 = sbr.rel (!%p11_p4) target bundleno = 1 (0x1), region = 66 }

// kernel: sedensenet_forward.11
= control target key start
LH: loop header
LB: loop body
LE: loop exit
PB: predicated region body
PF: predicated region fallthrough
CT: control target
= control target key end

     0   :  { %s686_s6 = smov 0   ;;  %s787_s0 = inlined_call_operand.vmem [shape: bf16[2,9,64,16], index: 0, kind: input, shape index: {}]   ;;  %s788_s1 = inlined_call_operand.vmem [shape: bf16[2,64,16], index: 1, kind: output, shape index: {}]  }
   0x1 LB: > { %s405_s7 = sadd.s32 4294967295, %s674_s6   ;;  %p409_p0 = scmp.ge.s32.totalorder %s674_s6, 1  ;;  %s674_s6 = sphi %s686_s6, %s11_s6  }
   0x2   : > { %p87_p1 = scmp.lt.s32.totalorder %s674_s6, 3 }
   0x4   : > { %p88_p2 = pnand %p409_p0, %p87_p1 }
   0x5   : > { %p107_p3 = scmp.lt.s32.totalorder (!%p88_p2), %s405_s7, 1 }
   0x6   : > { %91 = sbr.rel (%p88_p2) target bundleno = 63 (0x3f), region = 24 }
   0xb   : > { %s790_s7 = smov (!%p107_p3, %s405_s7), 1  ;;  %vm341_vm0 = vcmask 125952  }
   0xc   : > { %s659_s8 = smul.u32 288, %s790_s7  ;;  %s479_s12 = sshll.u32 %s790_s7, 5 }
   0xd   : > { %s752_s15 = scalar_lea.vmem %s788_s1, %s479_s12 }
   0xe   : > { %s700_s11 = scalar_lea.vmem %s787_s0, %s659_s8 }
   0xf   : > { %v481_v0 = vld [vmem:[%s700_s11] sm:$0xff]   ;;  %v624_v17 = vld [vmem:[%s700_s11 + $0x8] sm:$0xff]   ;;  %v625_v54 = vld [vmem:[%s700_s11 + $0x10] sm:$0xff]  }
  0x10   : > { %v627_v1 = vld [vmem:[%s700_s11 + $0x20] sm:$0xff]   ;;  %v482_v3 = vunpack.c.l.bf16 %v481_v0  ;;  %v483_v9 = vunpack.c.h.bf16 %v481_v0  ;;  %v628_v18 = vld [vmem:[%s700_s11 + $0x28] sm:$0xff]   ;;  %v486_v31 = vunpack.c.l.bf16 %v624_v17  ;;  %v487_v48 = vunpack.c.h.bf16 %v624_v17  ;;  %v629_v59 = vld [vmem:[%s700_s11 + $0x30] sm:$0xff]  }
  0x11   : > { %v631_v2 = vld [vmem:[%s700_s11 + $0x40] sm:$0xff]   ;;  %v498_v4 = vunpack.c.l.bf16 %v627_v1  ;;  %v499_v13 = vunpack.c.h.bf16 %v627_v1  ;;  %v632_v23 = vld [vmem:[%s700_s11 + $0x48] sm:$0xff]   ;;  %v502_v32 = vunpack.c.l.bf16 %v628_v18  ;;  %v503_v52 = vunpack.c.h.bf16 %v628_v18  ;;  %v633_v0 = vld [vmem:[%s700_s11 + $0x50] sm:$0xff]  }
  0x12   : > { %v514_v5 = vunpack.c.l.bf16 %v631_v2  ;;  %v635_v6 = vld [vmem:[%s700_s11 + $0x60] sm:$0xff]   ;;  %v515_v21 = vunpack.c.h.bf16 %v631_v2  ;;  %v636_v28 = vld [vmem:[%s700_s11 + $0x68] sm:$0xff]   ;;  %v518_v37 = vunpack.c.l.bf16 %v632_v23  ;;  %v519_v53 = vunpack.c.h.bf16 %v632_v23  ;;  %v637_v1 = vld [vmem:[%s700_s11 + $0x70] sm:$0xff]  }
  0x13   : > { %v639_v7 = vld [vmem:[%s700_s11 + $0x80] sm:$0xff]   ;;  %v150_v14 = vmax.f32 %v482_v3, %v498_v4  ;;  %v530_v15 = vunpack.c.l.bf16 %v635_v6  ;;  %v151_v20 = vmax.f32 %v483_v9, %v499_v13  ;;  %v531_v22 = vunpack.c.h.bf16 %v635_v6  ;;  %v640_v33 = vld [vmem:[%s700_s11 + $0x88] sm:$0xff]  }
  0x14   : > { %v643_v8 = vld [vmem:[%s700_s11 + $0xa0] sm:$0xff]   ;;  %v546_v16 = vunpack.c.l.bf16 %v639_v7  ;;  %v547_v30 = vunpack.c.h.bf16 %v639_v7  ;;  %v152_v40 = vmax.f32 %v486_v31, %v502_v32  ;;  %v534_v41 = vunpack.c.l.bf16 %v636_v28  ;;  %v644_v42 = vld [vmem:[%s700_s11 + $0xa8] sm:$0xff]  }
  0x15   : > { %v647_v10 = vld [vmem:[%s700_s11 + $0xc0] sm:$0xff]   ;;  %v562_v19 = vunpack.c.l.bf16 %v643_v8  ;;  %v175_v24 = vmax.f32 %v150_v14, %v514_v5  ;;  %v176_v29 = vmax.f32 %v151_v20, %v515_v21  ;;  %v563_v35 = vunpack.c.h.bf16 %v643_v8  ;;  %v725_v43 = vld [vmem:[%s700_s11 + $0xc8] sm:$0xff]  }
  0x16   : > { %v710_v11 = vld [vmem:[%s700_s11 + $0xe0] sm:$0xff]   ;;  %v578_v25 = vunpack.c.l.bf16 %v647_v10  ;;  %v579_v36 = vunpack.c.h.bf16 %v647_v10  ;;  %v728_v44 = vld [vmem:[%s700_s11 + $0xe8] sm:$0xff]   ;;  %v550_v47 = vunpack.c.l.bf16 %v640_v33  ;;  %v177_v50 = vmax.f32 %v152_v40, %v518_v37  ;;  %v742_v10 = vld [vmem:[%s700_s11 + $0x90] sm:$0xff]  }
  0x17   : > { %v713_v12 = vld [vmem:[%s700_s11 + $0x100] sm:$0xff]   ;;  %v594_v26 = vunpack.c.l.bf16 %v710_v11  ;;  %v200_v34 = vmax.f32 %v175_v24, %v530_v15  ;;  %v201_v38 = vmax.f32 %v176_v29, %v531_v22  ;;  %v595_v39 = vunpack.c.h.bf16 %v710_v11  ;;  %v732_v51 = vld [vmem:[%s700_s11 + $0x108] sm:$0xff]   ;;  %v653_v37 = vld [vmem:[%s700_s11 + $0xf0] sm:$0xff]  }
  0x18   : > { %v610_v27 = vunpack.c.l.bf16 %v713_v12  ;;  %v611_v46 = vunpack.c.h.bf16 %v713_v12  ;;  %v566_v56 = vunpack.c.l.bf16 %v644_v42  ;;  %v582_v57 = vunpack.c.l.bf16 %v725_v43 }
  0x19   : > { %v225_v45 = vmax.f32 %v200_v34, %v546_v16  ;;  %v226_v49 = vmax.f32 %v201_v38, %v547_v30  ;;  %v598_v58 = vunpack.c.l.bf16 %v728_v44  ;;  %v202_v61 = vmax.f32 %v177_v50, %v534_v41  ;;  %v649_v30 = vld [vmem:[%s700_s11 + $0xd0] sm:$0xff]  }
  0x1a   : > { %v153_v62 = vmax.f32 %v487_v48, %v503_v52  ;;  %v535_v63 = vunpack.c.h.bf16 %v636_v28  ;;  %v614_v3 = vunpack.c.l.bf16 %v732_v51  ;;  %v551_v4 = vunpack.c.h.bf16 %v640_v33  ;;  %v634_v48 = vld [vmem:[%s700_s11 + $0x58] sm:$0xff]   ;;  %v657_v50 = vld [vmem:[%s700_s11 + $0x110] sm:$0xff]  }
  0x1b   : > { %v250_v55 = vmax.f32 %v225_v45, %v562_v19  ;;  %v251_v60 = vmax.f32 %v226_v49, %v563_v35  ;;  %v490_v5 = vunpack.c.l.bf16 %v625_v54  ;;  %v227_v7 = vmax.f32 %v202_v61, %v550_v47  ;;  %v645_v19 = vld [vmem:[%s700_s11 + $0xb0] sm:$0xff]   ;;  %v630_v47 = vld [vmem:[%s700_s11 + $0x38] sm:$0xff]  }
  0x1c   : > { %v178_v8 = vmax.f32 %v153_v62, %v519_v53  ;;  %v506_v9 = vunpack.c.l.bf16 %v629_v59  ;;  %v567_v12 = vunpack.c.h.bf16 %v644_v42  ;;  %v522_v13 = vunpack.c.l.bf16 %v633_v0  ;;  %v626_v42 = vld [vmem:[%s700_s11 + $0x18] sm:$0xff]  }
  0x1d   : > { %v275_v2 = vmax.f32 %v250_v55, %v578_v25  ;;  %v276_v6 = vmax.f32 %v251_v60, %v579_v36  ;;  %v538_v14 = vunpack.c.l.bf16 %v637_v1  ;;  %v252_v16 = vmax.f32 %v227_v7, %v566_v56  ;;  %v642_v62 = vld [vmem:[%s700_s11 + $0x98] sm:$0xff]  }
  0x1e   : > { %v203_v17 = vmax.f32 %v178_v8, %v535_v63  ;;  %v154_v18 = vmax.f32 %v490_v5, %v506_v9  ;;  %v583_v21 = vunpack.c.h.bf16 %v725_v43  ;;  %v599_v22 = vunpack.c.h.bf16 %v728_v44  ;;  %v646_v7 = vld [vmem:[%s700_s11 + $0xb8] sm:$0xff]  }
  0x1f   : > { %v300_v11 = vmax.f32 %v275_v2, %v594_v26  ;;  %v301_v15 = vmax.f32 %v276_v6, %v595_v39  ;;  %v554_v23 = vunpack.c.l.bf16 %v742_v10  ;;  %v277_v25 = vmax.f32 %v252_v16, %v582_v57  ;;  %v638_v57 = vld [vmem:[%s700_s11 + $0x78] sm:$0xff]  }
  0x20   : > { %v228_v26 = vmax.f32 %v203_v17, %v551_v4  ;;  %v179_v28 = vmax.f32 %v154_v18, %v522_v13  ;;  %v491_v31 = vunpack.c.h.bf16 %v625_v54  ;;  %v507_v32 = vunpack.c.h.bf16 %v629_v59 }
  0x21   : > { %v325_v20 = vmax.f32 %v300_v11, %v610_v27  ;;  %v326_v24 = vmax.f32 %v301_v15, %v611_v46  ;;  %v570_v27 = vunpack.c.l.bf16 %v645_v19  ;;  %v302_v34 = vmax.f32 %v277_v25, %v598_v58 }
  0x22   : > { %v253_v35 = vmax.f32 %v228_v26, %v567_v12  ;;  %v204_v36 = vmax.f32 %v179_v28, %v538_v14  ;;  %v615_v38 = vunpack.c.h.bf16 %v732_v51  ;;  %v155_v39 = vmax.f32 %v491_v31, %v507_v32  ;;  %v650_v14 = vld [vmem:[%s700_s11 + $0xd8] sm:$0xff]  }
  0x23   : > { %v333_v29 = vpack.c.bf16 %v325_v20, %v325_v20  ;;  %v334_v33 = vpack.c.bf16 %v326_v24, %v326_v24  ;;  %v523_v40 = vunpack.c.h.bf16 %v633_v0  ;;  %v539_v41 = vunpack.c.h.bf16 %v637_v1 }
  0x24   : > { %v327_v43 = vmax.f32 %v302_v34, %v614_v3  ;;  %v278_v44 = vmax.f32 %v253_v35, %v583_v21  ;;  %v229_v45 = vmax.f32 %v204_v36, %v554_v23  ;;  %v586_v46 = vunpack.c.l.bf16 %v649_v30 }
  0x25   : > { %342 = vst.msk [vmem:[%s752_s15] sm:$0xf] %vm341_vm0, %v333_v29  ;;  %v602_v49 = vunpack.c.l.bf16 %v653_v37  ;;  %v180_v52 = vmax.f32 %v155_v39, %v523_v40  ;;  %v555_v51 = vunpack.c.h.bf16 %v742_v10  ;;  %v494_v56 = vunpack.c.l.bf16 %v626_v42 }
  0x26   : > { %343 = vst.msk [vmem:[%s752_s15 + $0x4] sm:$0xf] %vm341_vm0, %v334_v33  ;;  %v335_v53 = vpack.c.bf16 %v327_v43, %v327_v43  ;;  %v303_v54 = vmax.f32 %v278_v44, %v599_v22  ;;  %v254_v55 = vmax.f32 %v229_v45, %v570_v27  ;;  %v571_v59 = vunpack.c.h.bf16 %v645_v19  ;;  %v654_v22 = vld [vmem:[%s700_s11 + $0xf8] sm:$0xff]  }
  0x27   : > { %v205_v58 = vmax.f32 %v180_v52, %v539_v41  ;;  %v510_v60 = vunpack.c.l.bf16 %v630_v47  ;;  %v526_v61 = vunpack.c.l.bf16 %v634_v48  ;;  %v618_v1 = vunpack.c.l.bf16 %v657_v50  ;;  %v658_v27 = vld [vmem:[%s700_s11 + $0x118] sm:$0xff]  }
  0x28   : > { %344 = vst.msk [vmem:[%s752_s15 + $0x8] sm:$0xf] %vm341_vm0, %v335_v53  ;;  %v328_v63 = vmax.f32 %v303_v54, %v615_v38  ;;  %v279_v0 = vmax.f32 %v254_v55, %v586_v46  ;;  %v587_v2 = vunpack.c.h.bf16 %v649_v30  ;;  %v603_v4 = vunpack.c.h.bf16 %v653_v37 }
  0x29   : > { %v230_v3 = vmax.f32 %v205_v58, %v555_v51  ;;  %v156_v5 = vmax.f32 %v494_v56, %v510_v60  ;;  %v542_v6 = vunpack.c.l.bf16 %v638_v57  ;;  %v558_v10 = vunpack.c.l.bf16 %v642_v62 }
  0x2a   : > { %v336_v8 = vpack.c.bf16 %v328_v63, %v328_v63  ;;  %v304_v9 = vmax.f32 %v279_v0, %v602_v49  ;;  %v495_v11 = vunpack.c.h.bf16 %v626_v42  ;;  %v511_v15 = vunpack.c.h.bf16 %v630_v47 }
  0x2b   : > { %v255_v12 = vmax.f32 %v230_v3, %v571_v59  ;;  %v181_v13 = vmax.f32 %v156_v5, %v526_v61  ;;  %v527_v16 = vunpack.c.h.bf16 %v634_v48  ;;  %v619_v18 = vunpack.c.h.bf16 %v657_v50 }
  0x2c   : > { %345 = vst.msk [vmem:[%s752_s15 + $0xc] sm:$0xf] %vm341_vm0, %v336_v8  ;;  %v329_v17 = vmax.f32 %v304_v9, %v618_v1  ;;  %v574_v19 = vunpack.c.l.bf16 %v646_v7  ;;  %v157_v23 = vmax.f32 %v495_v11, %v511_v15  ;;  %v543_v24 = vunpack.c.h.bf16 %v638_v57 }
  0x2d   : > { %v280_v20 = vmax.f32 %v255_v12, %v587_v2  ;;  %v206_v21 = vmax.f32 %v181_v13, %v542_v6  ;;  %v590_v26 = vunpack.c.l.bf16 %v650_v14  ;;  %v559_v31 = vunpack.c.h.bf16 %v642_v62 }
  0x2e   : > { %v337_v25 = vpack.c.bf16 %v329_v17, %v329_v17  ;;  %v182_v30 = vmax.f32 %v157_v23, %v527_v16  ;;  %v606_v32 = vunpack.c.l.bf16 %v654_v22  ;;  %v575_v36 = vunpack.c.h.bf16 %v646_v7 }
  0x2f   : > { %v305_v28 = vmax.f32 %v280_v20, %v603_v4  ;;  %v231_v29 = vmax.f32 %v206_v21, %v558_v10  ;;  %v622_v37 = vunpack.c.l.bf16 %v658_v27  ;;  %v591_v41 = vunpack.c.h.bf16 %v650_v14 }
  0x30   : > { %346 = vst.msk [vmem:[%s752_s15 + $0x10] sm:$0xf] %vm341_vm0, %v337_v25  ;;  %v207_v35 = vmax.f32 %v182_v30, %v543_v24  ;;  %v607_v44 = vunpack.c.h.bf16 %v654_v22  ;;  %v623_v47 = vunpack.c.h.bf16 %v658_v27 }
  0x31   : > { %v330_v33 = vmax.f32 %v305_v28, %v619_v18  ;;  %v256_v34 = vmax.f32 %v231_v29, %v574_v19 }
  0x32   : > { %v232_v40 = vmax.f32 %v207_v35, %v559_v31 }
  0x33   : > { %v338_v38 = vpack.c.bf16 %v330_v33, %v330_v33  ;;  %v281_v39 = vmax.f32 %v256_v34, %v590_v26 }
  0x34   : > { %v257_v43 = vmax.f32 %v232_v40, %v575_v36 }
  0x35   : > { %347 = vst.msk [vmem:[%s752_s15 + $0x14] sm:$0xf] %vm341_vm0, %v338_v38  ;;  %v306_v42 = vmax.f32 %v281_v39, %v606_v32 }
  0x36   : > { %v282_v46 = vmax.f32 %v257_v43, %v591_v41 }
  0x37   : > { %v331_v45 = vmax.f32 %v306_v42, %v622_v37 }
  0x38   : > { %v307_v49 = vmax.f32 %v282_v46, %v607_v44 }
  0x39   : > { %v339_v48 = vpack.c.bf16 %v331_v45, %v331_v45 }
  0x3a   : > { %v332_v50 = vmax.f32 %v307_v49, %v623_v47 }
  0x3b   : > { %348 = vst.msk [vmem:[%s752_s15 + $0x18] sm:$0xf] %vm341_vm0, %v339_v48 }
  0x3c   : > { %v340_v52 = vpack.c.bf16 %v332_v50, %v332_v50 }
  0x3e   : > { %349 = vst.msk [vmem:[%s752_s15 + $0x1c] sm:$0xf] %vm341_vm0, %v340_v52 }
  0x3f PF: > { %s11_s6 = sadd.s32 1, %s674_s6  }
  0x40   : > { %p8_p4 = scmp.ge.s32.totalorder %s11_s6, 4  }
  0x42   :  { %10 = sbr.rel (!%p8_p4) target bundleno = 1 (0x1), region = 62 }

// kernel: sedensenet_forward.13
= control target key start
LH: loop header
LB: loop body
LE: loop exit
PB: predicated region body
PF: predicated region fallthrough
CT: control target
= control target key end

     0   :  { %s446_s15 = smov 0   ;;  %s483_s0 = inlined_call_operand.vmem [shape: bf16[2,32,48], index: 0, kind: input, shape index: {}]   ;;  %s484_s1 = inlined_call_operand.vmem [shape: f32[1,48], index: 1, kind: input, shape index: {}]   ;;  %s485_s2 = inlined_call_operand.vmem [shape: f32[1,48], index: 2, kind: input, shape index: {}]   ;;  %s486_s3 = inlined_call_operand.vmem [shape: bf16[24,12], index: 3, kind: input, shape index: {}]   ;;  %s487_s4 = inlined_call_operand.vmem [shape: bf16[2,16,12], index: 4, kind: output, shape index: {}]  }
   0x1 LB: > { %s373_s16 = sadd.s32 4294967295, %s418_s15   ;;  %p377_p0 = scmp.ge.s32.totalorder %s418_s15, 1  ;;  %s418_s15 = sphi %s446_s15, %s14_s15  }
   0x2   : > { %p162_p1 = scmp.lt.s32.totalorder %s418_s15, 3 }
   0x4   : > { %p163_p2 = pnand %p377_p0, %p162_p1 }
   0x5   : > { %p188_p3 = scmp.lt.s32.totalorder (!%p163_p2), %s373_s16, 1  ;;  %s420_s25 = smov (!%p163_p2), 104  }
   0x6   : > { %166 = sbr.rel (%p163_p2) target bundleno = 304 (0x130), region = 36 }
   0xb   : > { %s489_s16 = smov (!%p188_p3, %s373_s16), 1  ;;  %v410_v0 = vld [vmem:[%s484_s1] ss:$0 sm:$0xff]  ;;  %v281_v20 = vld [vmem:[%s486_s3 + $0x8] sm:$0xf]  ;;  %vm295_vm0 = vcmask 1043456  }
   0xc   : > { %s389_s17 = sshll.u32 %s489_s16, 4  ;;  %v411_v5 = vld [vmem:[%s485_s2] ss:$0 sm:$0xff]  ;;  %v287_v21 = vunpack.c.l.b16 %v281_v20  ;;  %vm256_vm1 = vcmask 191488   ;;  %vm291_vm2 = vcmask 195584   ;;  %s390_s30 = sshll.u32 %s489_s16, 3 }
   0xd   : > { %s192_s20 = scalar_lea.vmem %s483_s0, %s389_s17  ;;  %v391_v24 = vld [vmem:[%s486_s3] sm:$0xff]  ;;  %s197_s7 = scalar_lea.vmem %s487_s4, %s390_s30  ;;  %vm315_vm3 = vcmask 93184  }
   0xe   : > { %v400_v1 = vld [vmem:[%s192_s20 + $0x8] sm:$0xff]   ;;  %v393_v2 = vld [vmem:[%s192_s20] sm:$0xff]   ;;  %v289_v22 = vpack.c.b16 %v287_v21, %v287_v21 }
   0xf   : > { %v398_v3 = vunpack.c.l.bf16 %v400_v1  ;;  %v399_v4 = vunpack.c.h.bf16 %v400_v1  ;;  %v394_v6 = vunpack.c.l.bf16 %v393_v2  ;;  %v395_v7 = vunpack.c.h.bf16 %v393_v2 }
  0x10   : > { %v297_v23 = vsel %vm295_vm0, %v289_v22, 0 }
  0x11   : > { %v213_v8 = vmul.f32 %v410_v0, %v398_v3  ;;  %v211_v9 = vmul.f32 %v410_v0, %v394_v6  ;;  %v214_v12 = vmul.f32 %v410_v0, %v399_v4  ;;  %v212_v13 = vmul.f32 %v410_v0, %v395_v7  ;;  %305 = vmatpush.bf16.msra.mxu0 %v297_v23 }
  0x13   : > { %v221_v10 = vadd.f32 %v411_v5, %v213_v8  ;;  %v219_v11 = vadd.f32 %v411_v5, %v211_v9  ;;  %v222_v16 = vadd.f32 %v411_v5, %v214_v12  ;;  %v220_v17 = vadd.f32 %v411_v5, %v212_v13 }
  0x15   : > { %v225_v14 = vmax.f32 %v221_v10, 0.0  ;;  %v223_v15 = vmax.f32 %v219_v11, 0.0  ;;  %v226_v18 = vmax.f32 %v222_v16, 0.0  ;;  %v224_v19 = vmax.f32 %v220_v17, 0.0  ;;  %306 = vmatpush.bf16.msra.mxu0 %v391_v24 }
  0x17   : > { %235 = vrot.lane.b32.xlu1 %v225_v14, %s420_s25  ;;  %231 = vrot.lane.b32.xlu0 %v223_v15, %s420_s25 }
  0x1f   : > { %237 = vrot.lane.b32.xlu1 %v226_v18, %s420_s25  ;;  %233 = vrot.lane.b32.xlu0 %v224_v19, %s420_s25 }
  0x89   : > { %v236_v25 = vpop.permute.xlu1 %235  ;;  %v232_v26 = vpop.permute.xlu0 %231 }
  0x8a   : > { %v245_v27 = vadd.f32 %v236_v25, %v225_v14  ;;  %v243_v28 = vadd.f32 %v232_v26, %v223_v15 }
  0x8c   : > { %v249_v29 = vmul.f32 0.5, %v245_v27  ;;  %v247_v30 = vmul.f32 0.5, %v243_v28 }
  0x8e   : > { %v265_v31 = vrot.slane %v249_v29, 4  ;;  %v252_v32 = vrot.slane %v247_v30, 4 }
  0x90   : > { %v267_v33 = vadd.f32 %v265_v31, %v249_v29  ;;  %v254_v34 = vadd.f32 %v252_v32, %v247_v30 }
  0x91   : > { %v238_v35 = vpop.permute.xlu1 %237  ;;  %v234_v36 = vpop.permute.xlu0 %233 }
  0x92   : > { %v268_v37 = vmul.f32 0.5, %v267_v33  ;;  %v255_v38 = vmul.f32 0.5, %v254_v34  ;;  %v246_v39 = vadd.f32 %v238_v35, %v226_v18  ;;  %v244_v40 = vadd.f32 %v234_v36, %v224_v19 }
  0x94   : > { %269 = vst.msk [vmem:[#allocation2 + $0x8] sm:$0xf] %vm256_vm1, %v268_v37  ;;  %v250_v41 = vmul.f32 0.5, %v246_v39  ;;  %v248_v42 = vmul.f32 0.5, %v244_v40 }
  0x95   : > { %257 = vst.msk [vmem:[#allocation2] sm:$0xf] %vm256_vm1, %v255_v38 }
  0x96   : > { %v271_v43 = vrot.slane %v250_v41, 4  ;;  %v259_v44 = vrot.slane %v248_v42, 4 }
  0x98   : > { %v273_v45 = vadd.f32 %v271_v43, %v250_v41  ;;  %v261_v46 = vadd.f32 %v259_v44, %v248_v42 }
  0x9a   : > { %v274_v47 = vmul.f32 0.5, %v273_v45  ;;  %v262_v48 = vmul.f32 0.5, %v261_v46 }
  0x9c   : > { %275 = vst.msk [vmem:[#allocation2 + $0xc] sm:$0xf] %vm256_vm1, %v274_v47 }
  0x9d   : > { %263 = vst.msk [vmem:[#allocation2 + $0x4] sm:$0xf] %vm256_vm1, %v262_v48 }
  0xa3   : > { %v277_v49 = vld [vmem:[#allocation2 + $0x8] sm:$0xff] }
  0xa4   : > { %v276_v50 = vld [vmem:[#allocation2] sm:$0xff] }
  0xa5   : > { %v278_v51 = vpack.c.bf16 %v277_v49, %v276_v50 }
  0xa7   : > { %386 = vmatmul.msk.bf16.vlgmr.msra.gmra.mxu0 %vm291_vm2, %v278_v51 }
 0x124   : > { %v308_v52 = vpop.f32.mrf.mxu0 }
 0x125   : > { %v313_v53 = vpack.c.bf16 %v308_v52, %v308_v52 }
 0x127   : > { %316 = vst.msk [vmem:[%s197_s7] sm:$0xf] %vm315_vm3, %v313_v53 }
 0x12c   : > { %v310_v54 = vpop.f32.mrf.mxu0 }
 0x12d   : > { %v314_v55 = vpack.c.bf16 %v310_v54, %v310_v54 }
 0x12f   : > { %317 = vst.msk [vmem:[%s197_s7 + $0x4] sm:$0xf] %vm315_vm3, %v314_v55 }
 0x130 PF: > { %s14_s15 = sadd.s32 1, %s418_s15  }
 0x131   : > { %p11_p4 = scmp.ge.s32.totalorder %s14_s15, 4  }
 0x133   :  { %13 = sbr.rel (!%p11_p4) target bundleno = 1 (0x1), region = 66 }

// kernel: sedensenet_forward.15
= control target key start
LH: loop header
LB: loop body
LE: loop exit
PB: predicated region body
PF: predicated region fallthrough
CT: control target
= control target key end

     0   :  { %s373_s15 = smov 0   ;;  %s406_s0 = inlined_call_operand.vmem [shape: bf16[2,8,40], index: 0, kind: input, shape index: {}]   ;;  %s407_s1 = inlined_call_operand.vmem [shape: f32[1,40], index: 1, kind: input, shape index: {}]   ;;  %s408_s2 = inlined_call_operand.vmem [shape: f32[1,40], index: 2, kind: input, shape index: {}]   ;;  %s409_s3 = inlined_call_operand.vmem [shape: bf16[20,10], index: 3, kind: input, shape index: {}]   ;;  %s410_s4 = inlined_call_operand.vmem [shape: bf16[2,4,10], index: 4, kind: output, shape index: {}]  }
   0x1 LB: > { %s313_s16 = sadd.s32 4294967295, %s345_s15   ;;  %p317_p0 = scmp.ge.s32.totalorder %s345_s15, 1  ;;  %s345_s15 = sphi %s373_s15, %s14_s15  }
   0x2   : > { %p161_p1 = scmp.lt.s32.totalorder %s345_s15, 3 }
   0x4   : > { %p162_p2 = pnand %p317_p0, %p161_p1 }
   0x5   : > { %p185_p3 = scmp.lt.s32.totalorder (!%p162_p2), %s313_s16, 1  ;;  %s347_s25 = smov (!%p162_p2), 108  }
   0x6   : > { %165 = sbr.rel (%p162_p2) target bundleno = 293 (0x125), region = 36 }
   0xb   : > { %s412_s16 = smov (!%p185_p3, %s313_s16), 1  ;;  %v337_v0 = vld [vmem:[%s407_s1] ss:$0 sm:$0xff]  ;;  %v226_v7 = vld [vmem:[%s409_s3 + $0x8] sm:$0x3]  ;;  %vm240_vm0 = vcmask 1041408  }
   0xc   : > { %s318_s17 = sshll.u32 %s412_s16, 2  ;;  %v338_v3 = vld [vmem:[%s408_s2] ss:$0 sm:$0xff]  ;;  %v232_v8 = vunpack.c.l.b16 %v226_v7  ;;  %vm218_vm1 = vcmask 156672   ;;  %vm220_vm2 = vcmask 160772   ;;  %vm236_vm3 = vcmask 162816  }
   0xd   : > { %s188_s20 = scalar_lea.vmem %s406_s0, %s318_s17  ;;  %v327_v11 = vld [vmem:[%s409_s3] sm:$0xff]  ;;  %s319_s30 = sshll.u32 %s412_s16, 1  ;;  %vm258_vm4 = vcmask 74752  }
   0xe   : > { %v194_v1 = vld [vmem:[%s188_s20] sm:$0xf]  ;;  %v234_v9 = vpack.c.b16 %v232_v8, %v232_v8  ;;  %s192_s7 = scalar_lea.vmem %s410_s4, %s319_s30 }
   0xf   : > { %v195_v2 = vunpack.c.l.bf16 %v194_v1 }
  0x10   : > { %v242_v10 = vsel %vm240_vm0, %v234_v9, 0 }
  0x11   : > { %v200_v4 = vmul.f32 %v337_v0, %v195_v2  ;;  %250 = vmatpush.bf16.msra.mxu0 %v242_v10 }
  0x13   : > { %v205_v5 = vadd.f32 %v338_v3, %v200_v4 }
  0x15   : > { %v206_v6 = vmax.f32 %v205_v5, 0.0  ;;  %251 = vmatpush.bf16.msra.mxu0 %v327_v11 }
  0x17   : > { %208 = vrot.lane.b32.xlu0 %v206_v6, %s347_s25 }
  0x89   : > { %v209_v12 = vpop.permute.xlu0 %208 }
  0x8a   : > { %v211_v13 = vadd.f32 %v209_v12, %v206_v6 }
  0x8c   : > { %v212_v14 = vmul.f32 0.5, %v211_v13 }
  0x8e   : > { %v214_v15 = vrot.slane %v212_v14, 2 }
  0x90   : > { %v216_v16 = vadd.f32 %v214_v15, %v212_v14 }
  0x92   : > { %v217_v17 = vmul.f32 0.5, %v216_v16 }
  0x94   : > { %219 = vst.msk [vmem:[#allocation2] sm:$0x3] %vm218_vm1, %v217_v17 }
  0x95   : > { %221 = vst.msk [vmem:[#allocation2 - $0x2] sm:$0x30] %vm220_vm2, %v217_v17 }
  0x9c   : > { %v222_v18 = vld [vmem:[#allocation2] sm:$0xf] }
  0x9d   : > { %v223_v19 = vpack.c.bf16 %v222_v18, %v222_v18 }
  0x9f   : > { %324 = vmatmul.msk.bf16.vlgmr.msra.gmra.mxu0 %vm236_vm3, %v223_v19 }
 0x11c   : > { %v253_v20 = vpop.f32.mrf.mxu0 }
 0x11d   : > { %v257_v21 = vpack.c.bf16 %v253_v20, %v253_v20 }
 0x11f   : > { %259 = vst.msk [vmem:[%s192_s7] sm:$0x3] %vm258_vm4, %v257_v21 }
 0x124   : > { %v255_v22 = vpop.f32.mrf.mxu0 }
 0x125 PF: > { %s14_s15 = sadd.s32 1, %s345_s15  }
 0x126   : > { %p11_p4 = scmp.ge.s32.totalorder %s14_s15, 4  }
 0x128   :  { %13 = sbr.rel (!%p11_p4) target bundleno = 1 (0x1), region = 66 }

// kernel: sedensenet_forward.12
= control target key start
LH: loop header
LB: loop body
LE: loop exit
PB: predicated region body
PF: predicated region fallthrough
CT: control target
= control target key end

     0   :  { %s2294_s23 = smov 0   ;;  %s3051_s0 = inlined_call_operand.vmem [shape: bf16[2,64,16], index: 0, kind: input, shape index: {}]   ;;  %s3052_s1 = inlined_call_operand.vmem [shape: f32[1,16], index: 1, kind: input, shape index: {}]   ;;  %s3053_s2 = inlined_call_operand.vmem [shape: f32[1,16], index: 2, kind: input, shape index: {}]   ;;  %s3054_s3 = inlined_call_operand.vmem [shape: bf16[16,32], index: 3, kind: input, shape index: {}]   ;;  %s3055_s4 = inlined_call_operand.vmem [shape: f32[1,32], index: 4, kind: input, shape index: {}]   ;;  %s3056_s5 = inlined_call_operand.vmem [shape: f32[1,32], index: 5, kind: input, shape index: {}]   ;;  %s3057_s6 = inlined_call_operand.vmem [shape: bf16[9,32,8], index: 6, kind: input, shape index: {}]   ;;  %s3058_s7 = inlined_call_operand.vmem [shape: bf16[16,1], index: 7, kind: input, shape index: {}]   ;;  %s3059_s8 = inlined_call_operand.vmem [shape: bf16[8,1], index: 8, kind: input, shape index: {}]   ;;  %s3060_s9 = inlined_call_operand.<no memory space> [shape: f32[1,1], index: 9, kind: input, shape index: {}]   ;;  %s3061_s10 = inlined_call_operand.vmem [shape: bf16[1,24], index: 10, kind: input, shape index: {}]   ;;  %s3062_s11 = inlined_call_operand.vmem [shape: f32[1,24], index: 11, kind: input, shape index: {}]   ;;  %s3063_s12 = inlined_call_operand.vmem [shape: bf16[2,64,24], index: 12, kind: output, shape index: {}]  }
   0x1   :  { %v17_v0 = vstv %s3060_s9 }
   0x2   :  { %18 = vst [vmem:[#allocation4] sm:$0x1] %v17_v0 }
   0x3 LB: > { %s1957_s24 = sadd.s32 4294967295, %s2220_s23   ;;  %p1961_p0 = scmp.ge.s32.totalorder %s2220_s23, 1  ;;  %s2220_s23 = sphi %s2294_s23, %s24_s23  }
   0x4   : > { %p364_p1 = scmp.lt.s32.totalorder %s2220_s23, 3 }
   0x6   : > { %p365_p2 = pnand %p1961_p0, %p364_p1 }
   0x7   : > { %p406_p3 = scmp.lt.s32.totalorder (!%p365_p2), %s1957_s24, 1  ;;  %s2224_s16 = smov (!%p365_p2), 112  }
   0x8   : > { %368 = sbr.rel (%p365_p2) target bundleno = 1186 (0x4a2), region = 68 }
   0xd   : > { %v2153_v1 = vld [vmem:[%s3054_s3] sm:$0xff]  ;;  %s3065_s24 = smov (!%p406_p3, %s1957_s24), 1  ;;  %vm477_vm0 = vcmask 130048   ;;  %vm551_vm1 = vcmask 261120   ;;  %v2222_v44 = vmov 0.0   ;;  %v2155_v45 = vld [vmem:[%s3057_s6 + $0x8] sm:$0xff] }
   0xe   : > { %497 = vmatpush.bf16.msra.mxu0 %v2153_v1  ;;  %s2151_s9 = sshll.u32 %s3065_s24, 5  ;;  %v2206_v2 = vld [vmem:[%s3052_s1] ss:$0 sm:$0xff]  ;;  %553 = vst.msk [vmem:[#allocation2 + $0x8] sm:$0xff] %vm551_vm1, %v2222_v44  ;;  %812 = vmatpush.bf16.msra.mxu2 %v2155_v45  ;;  %v2161_v49 = vld [vmem:[%s3057_s6 + $0x38] sm:$0xff]  ;;  %v2160_v54 = vld [vmem:[%s3057_s6 + $0x30] sm:$0xff] }
   0xf   : > { %s2313_s29 = scalar_lea.vmem %s3051_s0, %s2151_s9  ;;  %v2207_v6 = vld [vmem:[%s3053_s2] ss:$0 sm:$0xff]  ;;  %554 = vst.msk [vmem:[#allocation2 + $0x10] sm:$0xff] %vm551_vm1, %v2222_v44  ;;  %v2157_v52 = vld [vmem:[%s3057_s6 + $0x18] sm:$0xff]  ;;  %v2156_v56 = vld [vmem:[%s3057_s6 + $0x10] sm:$0xff]  ;;  %vm851_vm2 = vcmask 1046528   ;;  %s3002_s19 = scalar_lea.vmem %s3063_s12, %s2151_s9 }
  0x10   : > { %v2174_v3 = vld [vmem:[%s2313_s29] sm:$0xff]   ;;  %v2189_v9 = vld [vmem:[%s2313_s29 + $0x8] sm:$0xff]   ;;  %v2190_v23 = vld [vmem:[%s2313_s29 + $0x10] sm:$0xff]   ;;  %552 = vst.msk [vmem:[#allocation2] sm:$0xff] %vm551_vm1, %v2222_v44  ;;  %746 = vmatpush.bf16.msra.mxu1 %v2157_v52  ;;  %2192 = vmatpush.bf16.msra.mxu3 %v2157_v52  ;;  %vm651_vm3 = vsmask.f32 7424 }
  0x11   : > { %v2319_v4 = vunpack.c.l.bf16 %v2174_v3  ;;  %v2321_v5 = vunpack.c.h.bf16 %v2174_v3  ;;  %v2329_v14 = vunpack.c.l.bf16 %v2189_v9  ;;  %v2331_v15 = vunpack.c.h.bf16 %v2189_v9  ;;  %v2191_v33 = vld [vmem:[%s2313_s29 + $0x18] sm:$0xff]   ;;  %555 = vst.msk [vmem:[#allocation2 + $0x18] sm:$0xff] %vm551_vm1, %v2222_v44  ;;  %v2154_v46 = vld [vmem:[%s3057_s6] sm:$0xff]  ;;  %s2225_s24 = smov 16  }
  0x12   : > { %v2337_v25 = vunpack.c.l.bf16 %v2190_v23  ;;  %v2339_v26 = vunpack.c.h.bf16 %v2190_v23  ;;  %v2345_v35 = vunpack.c.l.bf16 %v2191_v33  ;;  %v2347_v36 = vunpack.c.h.bf16 %v2191_v33  ;;  %556 = vst.msk [vmem:[#allocation2 + $0x20] sm:$0xff] %vm551_vm1, %v2222_v44  ;;  %813 = vmatpush.bf16.msra.mxu2 %v2154_v46  ;;  %v2392_v47 = vld [vmem:[%s3055_s4] ss:$0 sm:$0xff]  ;;  %1014 = vmatpush.bf16.msrb.mxu0 %v2161_v49 }
  0x13   : > { %v437_v7 = vmul.f32 %v2206_v2, %v2319_v4  ;;  %v438_v8 = vmul.f32 %v2206_v2, %v2321_v5  ;;  %v439_v17 = vmul.f32 %v2206_v2, %v2329_v14  ;;  %v440_v18 = vmul.f32 %v2206_v2, %v2331_v15  ;;  %557 = vst.msk [vmem:[#allocation2 + $0x28] sm:$0xff] %vm551_vm1, %v2222_v44  ;;  %v2397_v48 = vld [vmem:[%s3056_s5] ss:$0 sm:$0xff] }
  0x14   : > { %v441_v27 = vmul.f32 %v2206_v2, %v2337_v25  ;;  %v442_v28 = vmul.f32 %v2206_v2, %v2339_v26  ;;  %v443_v37 = vmul.f32 %v2206_v2, %v2345_v35  ;;  %v444_v38 = vmul.f32 %v2206_v2, %v2347_v36  ;;  %558 = vst.msk [vmem:[#allocation2 + $0x30] sm:$0xff] %vm551_vm1, %v2222_v44 }
  0x15   : > { %v449_v10 = vadd.f32 %v2207_v6, %v437_v7  ;;  %v450_v11 = vadd.f32 %v2207_v6, %v438_v8  ;;  %v451_v19 = vadd.f32 %v2207_v6, %v439_v17  ;;  %v452_v20 = vadd.f32 %v2207_v6, %v440_v18  ;;  %559 = vst.msk [vmem:[#allocation2 + $0x38] sm:$0xff] %vm551_vm1, %v2222_v44 }
  0x16   : > { %v453_v29 = vadd.f32 %v2207_v6, %v441_v27  ;;  %v454_v30 = vadd.f32 %v2207_v6, %v442_v28  ;;  %v455_v39 = vadd.f32 %v2207_v6, %v443_v37  ;;  %v456_v40 = vadd.f32 %v2207_v6, %v444_v38  ;;  %560 = vst.msk [vmem:[#allocation2 + $0x40] sm:$0xff] %vm551_vm1, %v2222_v44 }
  0x17   : > { %v457_v12 = vmax.f32 %v449_v10, 0.0  ;;  %v458_v13 = vmax.f32 %v450_v11, 0.0  ;;  %v459_v21 = vmax.f32 %v451_v19, 0.0  ;;  %v460_v22 = vmax.f32 %v452_v20, 0.0  ;;  %561 = vst.msk [vmem:[#allocation2 + $0x48] sm:$0xff] %vm551_vm1, %v2222_v44  ;;  %1015 = vmatpush.bf16.msrb.mxu0 %v2160_v54  ;;  %747 = vmatpush.bf16.msra.mxu1 %v2156_v56  ;;  %v577_v58 = vld [vmem:[#allocation2] sm:$0xff] }
  0x18   : > { %v461_v31 = vmax.f32 %v453_v29, 0.0  ;;  %v462_v32 = vmax.f32 %v454_v30, 0.0  ;;  %v463_v41 = vmax.f32 %v455_v39, 0.0  ;;  %v464_v42 = vmax.f32 %v456_v40, 0.0  ;;  %562 = vst.msk [vmem:[#allocation2 + $0x50] sm:$0xff] %vm551_vm1, %v2222_v44  ;;  %2193 = vmatpush.bf16.msra.mxu3 %v2156_v56 }
  0x19   : > { %v465_v16 = vpack.c.bf16 %v458_v13, %v457_v12  ;;  %v466_v24 = vpack.c.bf16 %v460_v22, %v459_v21  ;;  %563 = vst.msk [vmem:[#allocation2 + $0x58] sm:$0xff] %vm551_vm1, %v2222_v44  ;;  %v593_v61 = vpack.c.bf16 %v577_v58, %v577_v58  ;;  %vm1214_vm4 = vcmask 1045504  }
  0x1a   : > { %v467_v34 = vpack.c.bf16 %v462_v32, %v461_v31  ;;  %v468_v43 = vpack.c.bf16 %v464_v42, %v463_v41  ;;  %564 = vst.msk [vmem:[#allocation2 + $0x60] sm:$0xff] %vm551_vm1, %v2222_v44  ;;  %vm1550_vm5 = vcmask 1044480   ;;  %vm1424_vm6 = vsmask.f32 5376 }
  0x1b   : > { %1970 = vmatmul.msk.bf16.vlgmr.msra.gmra.mxu0 %vm477_vm0, %v465_v16  ;;  %565 = vst.msk [vmem:[#allocation2 + $0x68] sm:$0xff] %vm551_vm1, %v2222_v44  ;;  %v631_v1 = vunpack.c.l.b16 %v593_v61  ;;  %vm1063_vm7 = vsmask.f32 6400  ;;  %vm1728_vm8 = vcmask 1043456   ;;  %vm1647_vm9 = vcmask 64512  }
  0x1c   : > { %566 = vst.msk [vmem:[#allocation2 + $0x70] sm:$0xff] %vm551_vm1, %v2222_v44  ;;  %vm1649_vm10 = vcmask 64514   ;;  %vm1651_vm11 = vcmask 58368   ;;  %vm1653_vm12 = vcmask 64516   ;;  %vm1655_vm13 = vcmask 60416  }
  0x1d   : > { %vm1657_vm14 = vcmask 64518   ;;  %vm1659_vm15 = vcmask 62464  }
  0x21   : > { %v589_v54 = vld [vmem:[#allocation2 + $0x60] sm:$0xff] }
  0x22   : > { %v605_v58 = vpack.c.bf16 %v589_v54, %v589_v54 }
  0x2b   : > { %1971 = vmatmul.msk.bf16.gmra.mxu0 %vm477_vm0, %v466_v24 }
  0x3b   : > { %1972 = vmatmul.msk.bf16.gmra.mxu0 %vm477_vm0, %v467_v34 }
  0x4b   : > { %1973 = vmatmul.msk.bf16.gmra.mxu0 %vm477_vm0, %v468_v43 }
  0x98   : > { %v499_v50 = vpop.f32.mrf.mxu0 }
  0x99   : > { %v523_v51 = vmul.f32 %v2392_v47, %v499_v50 }
  0x9b   : > { %v535_v53 = vadd.f32 %v2397_v48, %v523_v51 }
  0x9d   : > { %v543_v55 = vmax.f32 %v535_v53, 0.0 }
  0x9f   : > { %569 = vst.msk [vmem:[#allocation2 + $0xb] sm:$0xff] %vm551_vm1, %v543_v55  ;;  %v590_v55 = vld [vmem:[#allocation2 + $0x68] sm:$0xff] }
  0xa0   : > { %v501_v57 = vpop.f32.mrf.mxu0 }
  0xa1   : > { %v524_v59 = vmul.f32 %v2392_v47, %v501_v57 }
  0xa3   : > { %v536_v60 = vadd.f32 %v2397_v48, %v524_v59 }
  0xa5   : > { %v544_v62 = vmax.f32 %v536_v60, 0.0 }
  0xa6   : > { %v578_v63 = vld [vmem:[#allocation2 + $0x8] sm:$0xff] }
  0xa7   : > { %570 = vst.msk [vmem:[#allocation2 + $0x15] sm:$0xff] %vm551_vm1, %v544_v62  ;;  %v594_v0 = vpack.c.bf16 %v578_v63, %v578_v63 }
  0xa8   : > { %v504_v2 = vpop.f32.mrf.mxu0 }
  0xa9   : > { %v525_v3 = vmul.f32 %v2392_v47, %v504_v2  ;;  %v632_v6 = vunpack.c.l.b16 %v594_v0  ;;  %v2163_v0 = vld [vmem:[%s3057_s6 + $0x48] sm:$0xff]  ;;  %v606_v2 = vpack.c.bf16 %v590_v55, %v590_v55 }
  0xaa   : > { %1165 = vmatpush.bf16.msrb.mxu1 %v2163_v0 }
  0xab   : > { %v537_v7 = vadd.f32 %v2397_v48, %v525_v3  ;;  %v644_v8 = vpack.c.b16 %v632_v6, %v631_v1  ;;  %v2454_v1 = vunpack.c.l.b16 %v605_v58 }
  0xad   : > { %v545_v9 = vmax.f32 %v537_v7, 0.0  ;;  %2001 = vmatmul.msk.bf16.vlgmr.msra.gmra.mxu2 %vm551_vm1, %v644_v8  ;;  %v655_v21 = vshll.u32 %v644_v8, 16  ;;  %v653_v38 = vshrl.u32 %v644_v8, 16  ;;  %v852_v59 = vrot.slane %v644_v8, 1 }
  0xae   : > { %v579_v10 = vld [vmem:[#allocation2 + $0x10] sm:$0xff] }
  0xaf   : > { %571 = vst.msk [vmem:[#allocation2 + $0x1f] sm:$0xff] %vm551_vm1, %v545_v9  ;;  %v595_v11 = vpack.c.bf16 %v579_v10, %v579_v10  ;;  %v657_v31 = vrot.slane %v655_v21, 1  ;;  %v2467_v10 = vunpack.c.l.b16 %v606_v2 }
  0xb0   : > { %v506_v12 = vpop.f32.mrf.mxu0 }
  0xb1   : > { %v526_v13 = vmul.f32 %v2392_v47, %v506_v12  ;;  %v633_v17 = vunpack.c.l.b16 %v595_v11  ;;  %v658_v43 = vor.u32 %v657_v31, %v653_v38 }
  0xb3   : > { %v538_v16 = vadd.f32 %v2397_v48, %v526_v13  ;;  %v2424_v24 = vpack.c.b16 %v633_v17, %v632_v6 }
  0xb5   : > { %v546_v18 = vmax.f32 %v538_v16, 0.0  ;;  %v962_v37 = vrot.slane %v2424_v24, 1  ;;  %v1215_v63 = vrot.slane %v2424_v24, 2 }
  0xb6   : > { %v580_v19 = vld [vmem:[#allocation2 + $0x18] sm:$0xff]  ;;  %v581_v20 = vld [vmem:[#allocation2 + $0x20] sm:$0xff] }
  0xb7   : > { %v596_v22 = vpack.c.bf16 %v580_v19, %v580_v19  ;;  %572 = vst.msk [vmem:[#allocation2 + $0x29] sm:$0xff] %vm551_vm1, %v546_v18  ;;  %v597_v23 = vpack.c.bf16 %v581_v20, %v581_v20  ;;  %v2474_v18 = vpack.c.b16 %v2467_v10, %v2454_v1 }
  0xb8   : > { %v509_v27 = vpop.f32.mrf.mxu0 }
  0xb9   : > { %v634_v28 = vunpack.c.l.b16 %v596_v22  ;;  %v527_v29 = vmul.f32 %v2392_v47, %v509_v27  ;;  %v635_v30 = vunpack.c.l.b16 %v597_v23 }
  0xbb   : > { %v2427_v32 = vpack.c.b16 %v634_v28, %v633_v17  ;;  %v539_v33 = vadd.f32 %v2397_v48, %v527_v29  ;;  %v2430_v34 = vpack.c.b16 %v635_v30, %v634_v28 }
  0xbd   : > { %v547_v39 = vmax.f32 %v539_v33, 0.0  ;;  %2002 = vmatmul.msk.bf16.gmra.mxu2 %vm551_vm1, %v2427_v32  ;;  %v963_v40 = vrot.slane %v2430_v34, 1  ;;  %v660_v41 = vshll.u32 %v2427_v32, 16  ;;  %v664_v42 = vshrl.u32 %v2427_v32, 16  ;;  %v2159_v33 = vld [vmem:[%s3057_s6 + $0x28] sm:$0xff] }
  0xbe   : > { %v582_v45 = vld [vmem:[#allocation2 + $0x28] sm:$0xff]  ;;  %v853_v46 = vrot.slane %v2427_v32, 1  ;;  %v1216_v49 = vrot.slane %v2430_v34, 2  ;;  %v1551_v19 = vrot.slane %v2427_v32, 3  ;;  %904 = vmatpush.bf16.msrb.mxu3 %v2159_v33  ;;  %v1320_v54 = vrot.slane %v2427_v32, 2 }
  0xbf   : > { %573 = vst.msk [vmem:[#allocation2 + $0x33] sm:$0xff] %vm551_vm1, %v547_v39  ;;  %v964_v50 = vsel %vm851_vm2, %v962_v37, %v963_v40  ;;  %v662_v51 = vrot.slane %v660_v41, 1  ;;  %v1426_v52 = vrot.slane %v660_v41, 3  ;;  %v598_v53 = vpack.c.bf16 %v582_v45, %v582_v45 }
  0xc0   : > { %v511_v56 = vpop.f32.mrf.mxu0  ;;  %2039 = vmatmul.msk.bf16.vlgmr.msrb.gmra.mxu0 %vm551_vm1, %v964_v50  ;;  %v1425_v57 = vrot.slane %v664_v42, 2  ;;  %v2457_v3 = vsel %vm851_vm2, %v852_v59, %v853_v46  ;;  %v2465_v8 = vsel %vm1214_vm4, %v1215_v63, %v1216_v49 }
  0xc1   : > { %v528_v60 = vmul.f32 %v2392_v47, %v511_v56  ;;  %v663_v61 = vsel %vm651_vm3, %v658_v43, %v662_v51  ;;  %v636_v62 = vunpack.c.l.b16 %v598_v53  ;;  %v666_v56 = vor.u32 %v664_v42, %v662_v51 }
  0xc2   : > { %1986 = vmatmul.msk.bf16.vlgmr.msra.gmra.mxu1 %vm551_vm1, %v663_v61  ;;  %v1427_v9 = vor.u32 %v1426_v52, %v1425_v57 }
  0xc3   : > { %v540_v6 = vadd.f32 %v2397_v48, %v528_v60  ;;  %v2460_v7 = vpack.c.b16 %v636_v62, %v635_v30 }
  0xc5   : > { %v548_v11 = vmax.f32 %v540_v6, 0.0  ;;  %v668_v12 = vshll.u32 %v2460_v7, 16  ;;  %v672_v13 = vshrl.u32 %v2460_v7, 16  ;;  %v855_v16 = vrot.slane %v2460_v7, 1 }
  0xc6   : > { %v583_v17 = vld [vmem:[#allocation2 + $0x30] sm:$0xff]  ;;  %v1552_v20 = vrot.slane %v2460_v7, 3  ;;  %v1321_v43 = vrot.slane %v2460_v7, 2 }
  0xc7   : > { %574 = vst.msk [vmem:[#allocation2 + $0x3d] sm:$0xff] %vm551_vm1, %v548_v11  ;;  %v599_v21 = vpack.c.bf16 %v583_v17, %v583_v17  ;;  %v1429_v22 = vrot.slane %v668_v12, 3  ;;  %v1428_v23 = vrot.slane %v672_v13, 2  ;;  %v2482_v28 = vsel %vm851_vm2, %v853_v46, %v855_v16 }
  0xc8   : > { %v514_v27 = vpop.f32.mrf.mxu0  ;;  %v2485_v29 = vsel %vm1550_vm5, %v1551_v19, %v1552_v20  ;;  %v670_v50 = vrot.slane %v668_v12, 1  ;;  %v2516_v60 = vsel %vm1214_vm4, %v1320_v54, %v1321_v43 }
  0xc9   : > { %v529_v30 = vmul.f32 %v2392_v47, %v514_v27  ;;  %v637_v31 = vunpack.c.l.b16 %v599_v21  ;;  %v1430_v37 = vor.u32 %v1429_v22, %v1428_v23 }
  0xcb   : > { %v541_v38 = vadd.f32 %v2397_v48, %v529_v30  ;;  %v2492_v39 = vpack.c.b16 %v637_v31, %v636_v62  ;;  %v2495_v41 = vsel %vm1424_vm6, %v1427_v9, %v1430_v37  ;;  %v671_v62 = vsel %vm651_vm3, %v666_v56, %v670_v50 }
  0xcd   : > { %v549_v45 = vmax.f32 %v541_v38, 0.0  ;;  %2003 = vmatmul.msk.bf16.gmra.mxu2 %vm551_vm1, %v2460_v7  ;;  %v965_v46 = vrot.slane %v2492_v39, 1  ;;  %v1218_v53 = vrot.slane %v2492_v39, 2  ;;  %v674_v38 = vor.u32 %v672_v13, %v670_v50  ;;  %v2158_v50 = vld [vmem:[%s3057_s6 + $0x20] sm:$0xff] }
  0xce   : > { %v584_v52 = vld [vmem:[#allocation2 + $0x38] sm:$0xff]  ;;  %905 = vmatpush.bf16.msrb.mxu3 %v2158_v50 }
  0xcf   : > { %575 = vst.msk [vmem:[#allocation2 + $0x47] sm:$0xff] %vm551_vm1, %v549_v45  ;;  %v966_v55 = vsel %vm851_vm2, %v963_v40, %v965_v46  ;;  %v600_v57 = vpack.c.bf16 %v584_v52, %v584_v52  ;;  %v2513_v59 = vsel %vm1214_vm4, %v1216_v49, %v1218_v53  ;;  %v2162_v45 = vld [vmem:[%s3057_s6 + $0x40] sm:$0xff] }
  0xd0   : > { %v516_v58 = vpop.f32.mrf.mxu0  ;;  %2040 = vmatmul.msk.bf16.gmra.mxu0 %vm551_vm1, %v966_v55  ;;  %1166 = vmatpush.bf16.msrb.mxu1 %v2162_v45 }
  0xd1   : > { %v530_v61 = vmul.f32 %v2392_v47, %v516_v58  ;;  %v638_v40 = vunpack.c.l.b16 %v600_v57 }
  0xd2   : > { %1987 = vmatmul.msk.bf16.gmra.mxu1 %vm551_vm1, %v671_v62 }
  0xd3   : > { %v542_v32 = vadd.f32 %v2397_v48, %v530_v61  ;;  %v2522_v42 = vpack.c.b16 %v638_v40, %v637_v31 }
  0xd5   : > { %v550_v51 = vmax.f32 %v542_v32, 0.0  ;;  %v676_v63 = vshll.u32 %v2522_v42, 16  ;;  %v680_v49 = vshrl.u32 %v2522_v42, 16  ;;  %v857_v0 = vrot.slane %v2522_v42, 1 }
  0xd6   : > { %v585_v2 = vld [vmem:[#allocation2 + $0x40] sm:$0xff]  ;;  %v586_v6 = vld [vmem:[#allocation2 + $0x48] sm:$0xff]  ;;  %v1554_v47 = vrot.slane %v2522_v42, 3  ;;  %v1323_v9 = vrot.slane %v2522_v42, 2 }
  0xd7   : > { %576 = vst.msk [vmem:[#allocation2 + $0x51] sm:$0xff] %vm551_vm1, %v550_v51  ;;  %v601_v11 = vpack.c.bf16 %v585_v2, %v585_v2  ;;  %v602_v12 = vpack.c.bf16 %v586_v6, %v586_v6  ;;  %v2531_v48 = vsel %vm851_vm2, %v855_v16, %v857_v0  ;;  %v1432_v17 = vrot.slane %v680_v49, 2 }
  0xd8   : > { %v1433_v19 = vrot.slane %v676_v63, 3  ;;  %v2536_v21 = vsel %vm1550_vm5, %v1552_v20, %v1554_v47  ;;  %v2541_v22 = vsel %vm1214_vm4, %v1321_v43, %v1323_v9  ;;  %v678_v43 = vrot.slane %v676_v63, 1 }
  0xd9   : > { %v639_v23 = vunpack.c.l.b16 %v601_v11  ;;  %v640_v27 = vunpack.c.l.b16 %v602_v12 }
  0xda   : > { %v1434_v30 = vor.u32 %v1433_v19, %v1432_v17  ;;  %v679_v32 = vsel %vm651_vm3, %v674_v38, %v678_v43 }
  0xdb   : > { %v2543_v31 = vpack.c.b16 %v640_v27, %v639_v23  ;;  %v2545_v33 = vpack.c.b16 %v639_v23, %v638_v40  ;;  %v2590_v23 = vpack.c.b16 %v2467_v10, %v2467_v10 }
  0xdc   : > { %v2548_v16 = vsel %vm1424_vm6, %v1430_v37, %v1434_v30 }
  0xdd   : > { %2004 = vmatmul.msk.bf16.gmra.mxu2 %vm551_vm1, %v2522_v42  ;;  %v967_v20 = vrot.slane %v2545_v33, 1  ;;  %v684_v55 = vshll.u32 %v2543_v31, 16  ;;  %v688_v37 = vshrl.u32 %v2543_v31, 16  ;;  %v1220_v56 = vrot.slane %v2545_v33, 2 }
  0xde   : > { %v587_v52 = vld [vmem:[#allocation2 + $0x50] sm:$0xff]  ;;  %v588_v54 = vld [vmem:[#allocation2 + $0x58] sm:$0xff]  ;;  %v859_v57 = vrot.slane %v2543_v31, 1  ;;  %v1556_v13 = vrot.slane %v2543_v31, 3 }
  0xdf   : > { %v968_v58 = vsel %vm851_vm2, %v965_v46, %v967_v20  ;;  %v603_v61 = vpack.c.bf16 %v587_v52, %v587_v52  ;;  %v604_v7 = vpack.c.bf16 %v588_v54, %v588_v54  ;;  %v2569_v62 = vsel %vm1214_vm4, %v1218_v53, %v1220_v56 }
  0xe0   : > { %2041 = vmatmul.msk.bf16.gmra.mxu0 %vm551_vm1, %v968_v58  ;;  %v2572_v40 = vsel %vm851_vm2, %v857_v0, %v859_v57  ;;  %v1436_v63 = vrot.slane %v688_v37, 2  ;;  %v1437_v2 = vrot.slane %v684_v55, 3  ;;  %v686_v11 = vrot.slane %v684_v55, 1 }
  0xe1   : > { %v641_v46 = vunpack.c.l.b16 %v603_v61  ;;  %v642_v51 = vunpack.c.l.b16 %v604_v7  ;;  %v2579_v12 = vsel %vm1550_vm5, %v1554_v47, %v1556_v13  ;;  %v2583_v53 = vpack.c.b16 %v2454_v1, %v2454_v1 }
  0xe2   : > { %1988 = vmatmul.msk.bf16.gmra.mxu1 %vm551_vm1, %v679_v32  ;;  %v1438_v0 = vor.u32 %v1437_v2, %v1436_v63  ;;  %v690_v45 = vor.u32 %v688_v37, %v686_v11  ;;  %v1226_v61 = vrot.slane %v2590_v23, 2  ;;  %v1325_v37 = vrot.slane %v2543_v31, 2 }
  0xe3   : > { %v2576_v6 = vpack.c.b16 %v642_v51, %v641_v46  ;;  %v2586_v19 = vpack.c.b16 %v641_v46, %v640_v27  ;;  %v2593_v38 = vpack.c.b16 %v2454_v1, %v642_v51  ;;  %v863_v54 = vrot.slane %v2583_v53, 1 }
  0xe4   : > { %v2600_v27 = vsel %vm1424_vm6, %v1434_v30, %v1438_v0  ;;  %v700_v42 = vshll.u32 %v2583_v53, 16 }
  0xe5   : > { %v692_v17 = vshll.u32 %v2576_v6, 16  ;;  %v696_v47 = vshrl.u32 %v2576_v6, 16  ;;  %v1222_v58 = vrot.slane %v2586_v19, 2  ;;  %v861_v1 = vrot.slane %v2576_v6, 1 }
  0xe6   : > { %v1224_v10 = vrot.slane %v2593_v38, 2  ;;  %v969_v7 = vrot.slane %v2586_v19, 1 }
  0xe7   : > { %v694_v52 = vrot.slane %v692_v17, 1  ;;  %v2609_v50 = vsel %vm1214_vm4, %v1220_v56, %v1222_v58  ;;  %v1440_v32 = vrot.slane %v696_v47, 2  ;;  %v1441_v46 = vrot.slane %v692_v17, 3 }
  0xe8   : > { %v2612_v30 = vsel %vm851_vm2, %v859_v57, %v861_v1  ;;  %v2617_v51 = vsel %vm1214_vm4, %v1222_v58, %v1224_v10  ;;  %v2624_v2 = vsel %vm851_vm2, %v861_v1, %v863_v54  ;;  %v2629_v56 = vsel %vm1214_vm4, %v1224_v10, %v1226_v61 }
  0xe9   : > { %v695_v55 = vsel %vm651_vm3, %v690_v45, %v694_v52  ;;  %v2619_v63 = vor.u32 %v1441_v46, %v1440_v32  ;;  %v1558_v57 = vrot.slane %v2576_v6, 3  ;;  %v1327_v17 = vrot.slane %v2576_v6, 2 }
  0xea   : > { %1990 = vmatmul.msk.bf16.vlgmr.msra.gmra.mxu3 %vm551_vm1, %v695_v55  ;;  %v970_v45 = vsel %vm851_vm2, %v967_v20, %v969_v7  ;;  %v682_v55 = vor.u32 %v680_v49, %v678_v43  ;;  %v2165_v49 = vld [vmem:[%s3057_s6 + $0x58] sm:$0xff]  ;;  %v698_v43 = vor.u32 %v696_v47, %v694_v52  ;;  %v1076_v10 = vshll.u32 %v2430_v34, 16  ;;  %v2167_v52 = vld [vmem:[%s3057_s6 + $0x68] sm:$0xff] }
  0xeb   : > { %v2643_v58 = vsel %vm1424_vm6, %v1438_v0, %v2619_v63  ;;  %v2649_v1 = vsel %vm1550_vm5, %v1556_v13, %v1558_v57  ;;  %1267 = vmatpush.bf16.msrb.mxu2 %v2165_v49  ;;  %v702_v0 = vrot.slane %v700_v42, 1  ;;  %v1073_v13 = vshrl.u32 %v2430_v34, 16  ;;  %1372 = vmatpush.bf16.msra.mxu3 %v2167_v52 }
  0xec   : > { %v687_v20 = vsel %vm651_vm3, %v682_v55, %v686_v11  ;;  %v1068_v32 = vshll.u32 %v2424_v24, 16  ;;  %v2164_v55 = vld [vmem:[%s3057_s6 + $0x50] sm:$0xff]  ;;  %v971_v34 = vrot.slane %v2593_v38, 1 }
  0xed   : > { %2005 = vmatmul.msk.bf16.gmra.mxu2 %vm551_vm1, %v2543_v31  ;;  %v2635_v31 = vsel %vm1214_vm4, %v1323_v9, %v1325_v37  ;;  %v2654_v9 = vsel %vm1214_vm4, %v1325_v37, %v1327_v17  ;;  %v1065_v37 = vshrl.u32 %v2424_v24, 16  ;;  %v703_v11 = vsel %vm651_vm3, %v698_v43, %v702_v0 }
  0xee   : > { %v1075_v46 = vrot.slane %v1073_v13, 1  ;;  %v972_v42 = vsel %vm851_vm2, %v969_v7, %v971_v34  ;;  %v704_v13 = vshrl.u32 %v2583_v53, 16  ;;  %v1082_v7 = vshrl.u32 %v2492_v39, 16 }
  0xef   : > { %v1067_v47 = vrot.slane %v1065_v37, 1  ;;  %1268 = vmatpush.bf16.msrb.mxu2 %v2164_v55  ;;  %v2171_v37 = vld [vmem:[%s3057_s6 + $0x88] sm:$0xff]  ;;  %v973_v55 = vrot.slane %v2590_v23, 1  ;;  %vm1773_vm3 = vcmask 7168  }
  0xf0   : > { %2042 = vmatmul.msk.bf16.gmra.mxu0 %vm551_vm1, %v970_v45  ;;  %v1078_v45 = vrot.slane %v1076_v10, 2  ;;  %v2169_v10 = vld [vmem:[%s3057_s6 + $0x78] sm:$0xff]  ;;  %1603 = vmatpush.bf16.msra.mxu1 %v2171_v37 }
  0xf1   : > { %1501 = vmatpush.bf16.msra.mxu0 %v2169_v10  ;;  %v1103_v10 = vshll.u32 %v2586_v19, 16 }
  0xf2   : > { %1989 = vmatmul.msk.bf16.gmra.mxu1 %vm551_vm1, %v687_v20  ;;  %v1070_v20 = vrot.slane %v1068_v32, 2  ;;  %v1079_v24 = vor.u32 %v1078_v45, %v1075_v46  ;;  %v1085_v32 = vshll.u32 %v2492_v39, 16  ;;  %v1084_v46 = vrot.slane %v1082_v7, 1 }
  0xf3   : > { %v1105_v37 = vrot.slane %v1103_v10, 2 }
  0xf4   : > { %v1071_v49 = vor.u32 %v1070_v20, %v1067_v47  ;;  %v1087_v45 = vrot.slane %v1085_v32, 2  ;;  %v2168_v47 = vld [vmem:[%s3057_s6 + $0x70] sm:$0xff]  ;;  %v974_v20 = vsel %vm851_vm2, %v971_v34, %v973_v55  ;;  %v1109_v32 = vshrl.u32 %v2593_v38, 16 }
  0xf5   : > { %1502 = vmatpush.bf16.msra.mxu0 %v2168_v47  ;;  %vm567_vm2 = vcmask 254976  }
  0xf6   : > { %v1080_v43 = vsel %vm1063_vm7, %v1071_v49, %v1079_v24  ;;  %v1088_v52 = vor.u32 %v1087_v45, %v1084_v46  ;;  %568 = vst.msk [vmem:[#allocation2 + $0x78] sm:$0x3] %vm567_vm2, %v2222_v44 }
  0xf8   : > { %v1089_v39 = vsel %vm1063_vm7, %v1079_v24, %v1088_v52  ;;  %v1100_v24 = vshrl.u32 %v2586_v19, 16  ;;  %v2166_v19 = vld [vmem:[%s3057_s6 + $0x60] sm:$0xff] }
  0xf9   : > { %1373 = vmatpush.bf16.msra.mxu3 %v2166_v19 }
  0xfa   : > { %1991 = vmatmul.msk.bf16.gmra.mxu3 %vm551_vm1, %v703_v11  ;;  %v706_v11 = vor.u32 %v704_v13, %v702_v0  ;;  %v1091_v0 = vshrl.u32 %v2545_v33, 16 }
  0xfc   : > { %v1093_v49 = vrot.slane %v1091_v0, 1  ;;  %v1121_v0 = vshll.u32 %v2590_v23, 16 }
  0xfd   : > { %2006 = vmatmul.msk.bf16.gmra.mxu2 %vm551_vm1, %v2576_v6 }
 0x100   : > { %2043 = vmatmul.msk.bf16.gmra.mxu0 %vm551_vm1, %v972_v42  ;;  %v1094_v42 = vshll.u32 %v2545_v33, 16  ;;  %v1102_v33 = vrot.slane %v1100_v24, 1 }
 0x102   : > { %2058 = vmatmul.msk.bf16.vlgmr.msrb.gmra.mxu1 %vm551_vm1, %v1080_v43  ;;  %v1096_v43 = vrot.slane %v1094_v42, 2 }
 0x104   : > { %v1097_v34 = vor.u32 %v1096_v43, %v1093_v49 }
 0x106   : > { %v1098_v13 = vsel %vm1063_vm7, %v1088_v52, %v1097_v34 }
 0x10a   : > { %1992 = vmatmul.msk.bf16.gmra.mxu3 %vm551_vm1, %v706_v11 }
 0x10d   : > { %2007 = vmatmul.msk.bf16.gmra.mxu2 %vm551_vm1, %v2583_v53 }
 0x110   : > { %2044 = vmatmul.msk.bf16.gmra.mxu0 %vm551_vm1, %v974_v20 }
 0x112   : > { %2059 = vmatmul.msk.bf16.gmra.mxu1 %vm551_vm1, %v1089_v39  ;;  %v1118_v39 = vshrl.u32 %v2590_v23, 16 }
 0x114   : > { %v1120_v43 = vrot.slane %v1118_v39, 1 }
 0x11a   : > { %2020 = vmatmul.msk.bf16.vlgmr.msrb.gmra.mxu3 %vm551_vm1, %v2457_v3  ;;  %v1106_v3 = vor.u32 %v1105_v37, %v1102_v33 }
 0x11c   : > { %v1107_v7 = vsel %vm1063_vm7, %v1097_v34, %v1106_v3  ;;  %v1123_v34 = vrot.slane %v1121_v0, 2 }
 0x11d   : > { %2077 = vmatmul.msk.bf16.vlgmr.msrb.gmra.mxu2 %vm551_vm1, %v2465_v8 }
 0x120   : > { %2045 = vmatmul.msk.bf16.gmra.mxu0 %vm551_vm1, %v973_v55 }
 0x122   : > { %2060 = vmatmul.msk.bf16.gmra.mxu1 %vm551_vm1, %v1098_v13  ;;  %v1124_v13 = vor.u32 %v1123_v34, %v1120_v43 }
 0x12a   : > { %2021 = vmatmul.msk.bf16.gmra.mxu3 %vm551_vm1, %v2482_v28  ;;  %v1112_v28 = vshll.u32 %v2593_v38, 16 }
 0x12c   : > { %v1114_v46 = vrot.slane %v1112_v28, 2  ;;  %v1445_v28 = vshrl.u32 %v2474_v18, 16 }
 0x12d   : > { %2078 = vmatmul.msk.bf16.gmra.mxu2 %vm551_vm1, %v2513_v59  ;;  %v1111_v59 = vrot.slane %v1109_v32, 1 }
 0x12f   : > { %v1115_v55 = vor.u32 %v1114_v46, %v1111_v59  ;;  %v1447_v46 = vrot.slane %v1445_v28, 2 }
 0x130   : > { %v815_v8 = vpop.f32.mrf.mxu2  ;;  %2115 = vmatmul.msk.bf16.vlgmr.msra.gmra.mxu0 %vm551_vm1, %v2495_v41  ;;  %v2170_v41 = vld [vmem:[%s3057_s6 + $0x80] sm:$0xff] }
 0x131   : > { %1604 = vmatpush.bf16.msra.mxu1 %v2170_v41  ;;  %v1125_v37 = vsel %vm1063_vm7, %v1115_v55, %v1124_v13 }
 0x132   : > { %2061 = vmatmul.msk.bf16.gmra.mxu1 %vm551_vm1, %v1107_v7 }
 0x138   : > { %v817_v11 = vpop.f32.mrf.mxu2 }
 0x13a   : > { %2022 = vmatmul.msk.bf16.gmra.mxu3 %vm551_vm1, %v2531_v48  ;;  %v1116_v48 = vsel %vm1063_vm7, %v1106_v3, %v1115_v55 }
 0x13d   : > { %v2730_v45 = vpop.f32.mrf.mxu0  ;;  %2079 = vmatmul.msk.bf16.gmra.mxu2 %vm551_vm1, %v2569_v62 }
 0x13f   : > { %v749_v52 = vpop.f32.mrf.mxu1 }
 0x140   : > { %v2734_v47 = vadd.f32 %v815_v8, %v749_v52  ;;  %v820_v38 = vpop.f32.mrf.mxu2  ;;  %2116 = vmatmul.msk.bf16.gmra.mxu0 %vm551_vm1, %v2548_v16 }
 0x142   : > { %2062 = vmatmul.msk.bf16.gmra.mxu1 %vm551_vm1, %v1116_v48 }
 0x145   : > { %v2740_v20 = vpop.f32.mrf.mxu0 }
 0x147   : > { %v751_v42 = vpop.f32.mrf.mxu1 }
 0x148   : > { %v2744_v62 = vadd.f32 %v817_v11, %v751_v42  ;;  %v822_v49 = vpop.f32.mrf.mxu2  ;;  %v1448_v11 = vshll.u32 %v2474_v18, 16 }
 0x14a   : > { %2023 = vmatmul.msk.bf16.gmra.mxu3 %vm551_vm1, %v2572_v40  ;;  %v1450_v41 = vrot.slane %v1448_v11, 3 }
 0x14c   : > { %v2785_v55 = vor.u32 %v1450_v41, %v1447_v46 }
 0x14d   : > { %v2748_v16 = vpop.f32.mrf.mxu0  ;;  %2080 = vmatmul.msk.bf16.gmra.mxu2 %vm551_vm1, %v2609_v50 }
 0x14e   : > { %v1452_v48 = vsel %vm1424_vm6, %v2619_v63, %v2785_v55 }
 0x14f   : > { %v754_v24 = vpop.f32.mrf.mxu1 }
 0x150   : > { %v2752_v10 = vadd.f32 %v820_v38, %v754_v24  ;;  %v825_v33 = vpop.f32.mrf.mxu2  ;;  %2117 = vmatmul.msk.bf16.gmra.mxu0 %vm551_vm1, %v2600_v27 }
 0x152   : > { %2063 = vmatmul.msk.bf16.gmra.mxu1 %vm551_vm1, %v1125_v37 }
 0x155   : > { %v2758_v3 = vpop.f32.mrf.mxu0 }
 0x157   : > { %v756_v40 = vpop.f32.mrf.mxu1 }
 0x158   : > { %v2760_v8 = vadd.f32 %v822_v49, %v756_v40  ;;  %v2762_v7 = vpop.f32.mrf.mxu2 }
 0x15a   : > { %2024 = vmatmul.msk.bf16.gmra.mxu3 %vm551_vm1, %v2612_v30 }
 0x15d   : > { %v2766_v50 = vpop.f32.mrf.mxu0  ;;  %2081 = vmatmul.msk.bf16.gmra.mxu2 %vm551_vm1, %v2617_v51 }
 0x15f   : > { %v759_v27 = vpop.f32.mrf.mxu1 }
 0x160   : > { %v2770_v19 = vadd.f32 %v825_v33, %v759_v27  ;;  %v830_v32 = vpop.f32.mrf.mxu2  ;;  %2118 = vmatmul.msk.bf16.gmra.mxu0 %vm551_vm1, %v2643_v58 }
 0x162   : > { %2064 = vmatmul.msk.bf16.gmra.mxu1 %vm551_vm1, %v1124_v13 }
 0x165   : > { %v2777_v59 = vpop.f32.mrf.mxu0 }
 0x167   : > { %v2779_v30 = vpop.f32.mrf.mxu1 }
 0x168   : > { %v2781_v51 = vpop.f32.mrf.mxu2 }
 0x16a   : > { %2025 = vmatmul.msk.bf16.gmra.mxu3 %vm551_vm1, %v2624_v2 }
 0x16d   : > { %v769_v58 = vpop.f32.mrf.mxu3  ;;  %v2787_v52 = vpop.f32.mrf.mxu0  ;;  %2082 = vmatmul.msk.bf16.gmra.mxu2 %vm551_vm1, %v2629_v56 }
 0x16f   : > { %v764_v38 = vpop.f32.mrf.mxu1 }
 0x170   : > { %v2794_v39 = vadd.f32 %v830_v32, %v764_v38  ;;  %v835_v0 = vpop.f32.mrf.mxu2  ;;  %2119 = vmatmul.msk.bf16.gmra.mxu0 %vm551_vm1, %v1452_v48 }
 0x171   : > { %v2797_v42 = vadd.f32 %v835_v0, %v769_v58 }
 0x172   : > { %2134 = vmatmul.msk.bf16.vlgmr.msra.gmra.mxu1 %vm551_vm1, %v2485_v29 }
 0x175   : > { %v771_v2 = vpop.f32.mrf.mxu3  ;;  %v2801_v49 = vpop.f32.mrf.mxu0 }
 0x177   : > { %v2803_v43 = vpop.f32.mrf.mxu1 }
 0x178   : > { %v837_v56 = vpop.f32.mrf.mxu2 }
 0x179   : > { %v2805_v34 = vadd.f32 %v837_v56, %v771_v2 }
 0x17a   : > { %2026 = vmatmul.msk.bf16.gmra.mxu3 %vm551_vm1, %v863_v54 }
 0x17d   : > { %v774_v63 = vpop.f32.mrf.mxu3  ;;  %v2810_v13 = vpop.f32.mrf.mxu0  ;;  %2083 = vmatmul.msk.bf16.gmra.mxu2 %vm551_vm1, %v1226_v61 }
 0x17f   : > { %v1168_v29 = vpop.f32.mrf.mxu1 }
 0x180   : > { %v840_v24 = vpop.f32.mrf.mxu2 }
 0x182   : > { %2135 = vmatmul.msk.bf16.gmra.mxu1 %vm551_vm1, %v2536_v21 }
 0x185   : > { %v775_v33 = vpop.f32.mrf.mxu3  ;;  %v2817_v37 = vpop.f32.mrf.mxu0 }
 0x187   : > { %v1170_v40 = vpop.f32.mrf.mxu1 }
 0x188   : > { %v841_v27 = vpop.f32.mrf.mxu2 }
 0x18a   : > { %2096 = vmatmul.msk.bf16.vlgmr.msra.gmra.mxu3 %vm551_vm1, %v2516_v60 }
 0x18d   : > { %v777_v53 = vpop.f32.mrf.mxu3  ;;  %v1042_v54 = vpop.f32.mrf.mxu0 }
 0x18f   : > { %v1173_v32 = vpop.f32.mrf.mxu1 }
 0x190   : > { %v843_v28 = vpop.f32.mrf.mxu2 }
 0x192   : > { %2136 = vmatmul.msk.bf16.gmra.mxu1 %vm551_vm1, %v2579_v12 }
 0x195   : > { %v778_v23 = vpop.f32.mrf.mxu3  ;;  %v1043_v61 = vpop.f32.mrf.mxu0 }
 0x197   : > { %v1175_v11 = vpop.f32.mrf.mxu1 }
 0x198   : > { %v844_v46 = vpop.f32.mrf.mxu2 }
 0x19a   : > { %2097 = vmatmul.msk.bf16.gmra.mxu3 %vm551_vm1, %v2541_v22 }
 0x19d   : > { %v907_v21 = vpop.f32.mrf.mxu3  ;;  %v1045_v41 = vpop.f32.mrf.mxu0 }
 0x19e   : > { %v938_v58 = vadd.f32 %v907_v21, %v2734_v47 }
 0x19f   : > { %v1178_v38 = vpop.f32.mrf.mxu1 }
 0x1a0   : > { %v1048_v60 = vadd.f32 %v2730_v45, %v938_v58  ;;  %v1270_v48 = vpop.f32.mrf.mxu2 }
 0x1a2   : > { %v1199_v0 = vadd.f32 %v1168_v29, %v1048_v60  ;;  %2137 = vmatmul.msk.bf16.gmra.mxu1 %vm551_vm1, %v2649_v1  ;;  %v1560_v29 = vrot.slane %v2474_v18, 3 }
 0x1a4   : > { %v2829_v12 = vadd.f32 %v1270_v48, %v1199_v0 }
 0x1a5   : > { %v909_v2 = vpop.f32.mrf.mxu3  ;;  %v1046_v56 = vpop.f32.mrf.mxu0 }
 0x1a6   : > { %v939_v63 = vadd.f32 %v909_v2, %v2744_v62 }
 0x1a7   : > { %v1180_v24 = vpop.f32.mrf.mxu1 }
 0x1a8   : > { %v1049_v22 = vadd.f32 %v2740_v20, %v939_v63  ;;  %v1272_v33 = vpop.f32.mrf.mxu2  ;;  %v1561_v20 = vsel %vm1550_vm5, %v1558_v57, %v1560_v29 }
 0x1aa   : > { %v1200_v27 = vadd.f32 %v1170_v40, %v1049_v22  ;;  %2098 = vmatmul.msk.bf16.gmra.mxu3 %vm551_vm1, %v2635_v31 }
 0x1ac   : > { %v2835_v45 = vadd.f32 %v1272_v33, %v1200_v27 }
 0x1ad   : > { %v912_v47 = vpop.f32.mrf.mxu3 }
 0x1ae   : > { %v940_v1 = vadd.f32 %v912_v47, %v2752_v10  ;;  %v833_v47 = vadd.f32 %v2781_v51, %v2803_v43 }
 0x1af   : > { %v1183_v53 = vpop.f32.mrf.mxu1 }
 0x1b0   : > { %v1050_v54 = vadd.f32 %v2748_v16, %v940_v1  ;;  %v1275_v28 = vpop.f32.mrf.mxu2 }
 0x1b2   : > { %v1201_v62 = vadd.f32 %v1173_v32, %v1050_v54  ;;  %2138 = vmatmul.msk.bf16.gmra.mxu1 %vm551_vm1, %v1561_v20 }
 0x1b4   : > { %v2846_v31 = vadd.f32 %v1275_v28, %v1201_v62 }
 0x1b5   : > { %v914_v40 = vpop.f32.mrf.mxu3 }
 0x1b6   : > { %v941_v23 = vadd.f32 %v914_v40, %v2760_v8  ;;  %v828_v8 = vadd.f32 %v2762_v7, %v2779_v30 }
 0x1b7   : > { %v1185_v61 = vpop.f32.mrf.mxu1 }
 0x1b8   : > { %v1051_v10 = vadd.f32 %v2758_v3, %v941_v23  ;;  %v1277_v46 = vpop.f32.mrf.mxu2 }
 0x1ba   : > { %v1202_v16 = vadd.f32 %v1175_v11, %v1051_v10  ;;  %2099 = vmatmul.msk.bf16.gmra.mxu3 %vm551_vm1, %v2654_v9  ;;  %v1329_v11 = vrot.slane %v2474_v18, 2 }
 0x1bc   : > { %v2852_v21 = vadd.f32 %v1277_v46, %v1202_v16 }
 0x1bd   : > { %v917_v41 = vpop.f32.mrf.mxu3 }
 0x1be   : > { %v942_v57 = vadd.f32 %v917_v41, %v2770_v19 }
 0x1bf   : > { %v1188_v32 = vpop.f32.mrf.mxu1 }
 0x1c0   : > { %v1052_v58 = vadd.f32 %v2766_v50, %v942_v57  ;;  %v1280_v60 = vpop.f32.mrf.mxu2  ;;  %v1330_v50 = vsel %vm1214_vm4, %v1327_v17, %v1329_v11 }
 0x1c2   : > { %v1203_v48 = vadd.f32 %v1178_v38, %v1052_v58 }
 0x1c4   : > { %v2858_v0 = vadd.f32 %v1280_v60, %v1203_v48 }
 0x1c5   : > { %v919_v3 = vpop.f32.mrf.mxu3 }
 0x1c6   : > { %v943_v2 = vadd.f32 %v919_v3, %v828_v8  ;;  %v1504_v8 = vpop.f32.mrf.mxu0 }
 0x1c7   : > { %v1190_v9 = vpop.f32.mrf.mxu1 }
 0x1c8   : > { %v1053_v56 = vadd.f32 %v2777_v59, %v943_v2  ;;  %v1282_v63 = vpop.f32.mrf.mxu2 }
 0x1ca   : > { %v1204_v19 = vadd.f32 %v1180_v24, %v1053_v56  ;;  %2100 = vmatmul.msk.bf16.gmra.mxu3 %vm551_vm1, %v1330_v50 }
 0x1cc   : > { %v2868_v7 = vadd.f32 %v1282_v63, %v1204_v19 }
 0x1cd   : > { %v922_v30 = vpop.f32.mrf.mxu3 }
 0x1ce   : > { %v944_v38 = vadd.f32 %v922_v30, %v2794_v39  ;;  %v1506_v50 = vpop.f32.mrf.mxu0 }
 0x1cf   : > { %v1193_v22 = vpop.f32.mrf.mxu1 }
 0x1d0   : > { %v1054_v33 = vadd.f32 %v2787_v52, %v944_v38  ;;  %v1285_v27 = vpop.f32.mrf.mxu2 }
 0x1d2   : > { %v1205_v59 = vadd.f32 %v1183_v53, %v1054_v33 }
 0x1d4   : > { %v2874_v1 = vadd.f32 %v1285_v27, %v1205_v59 }
 0x1d5   : > { %v924_v6 = vpop.f32.mrf.mxu3 }
 0x1d6   : > { %v945_v17 = vadd.f32 %v924_v6, %v833_v47  ;;  %v1509_v33 = vpop.f32.mrf.mxu0 }
 0x1d7   : > { %v1194_v24 = vpop.f32.mrf.mxu1 }
 0x1d8   : > { %v1055_v54 = vadd.f32 %v2801_v49, %v945_v17  ;;  %v1287_v28 = vpop.f32.mrf.mxu2  ;;  %v1724_v49 = vld [vmem:[%s3059_s8] sm:$0xf] }
 0x1d9   : > { %v1730_v41 = vsel %vm1728_vm8, %v1724_v49, 0  ;;  %vm1893_vm8 = vcmask 191616  }
 0x1da   : > { %v1206_v20 = vadd.f32 %v1185_v61, %v1055_v54  ;;  %1739 = vmatpush.bf16.msra.mxu2 %v1730_v41 }
 0x1dc   : > { %v2877_v62 = vadd.f32 %v1287_v28, %v1206_v20  ;;  %v1676_v20 = vsel %vm477_vm0, %v2319_v4, 0.0 }
 0x1dd   : > { %v927_v39 = vpop.f32.mrf.mxu3 }
 0x1de   : > { %v946_v40 = vadd.f32 %v927_v39, %v2797_v42  ;;  %v2172_v42 = vld [vmem:[%s3058_s7] sm:$0xff]  ;;  %v1511_v24 = vpop.f32.mrf.mxu0  ;;  %v1677_v39 = vsel %vm477_vm0, %v2321_v5, 0.0 }
 0x1df   : > { %v1196_v52 = vpop.f32.mrf.mxu1  ;;  %1761 = vmatpush.bf16.msrb.mxu3 %v2172_v42 }
 0x1e0   : > { %v1056_v53 = vadd.f32 %v2810_v13, %v946_v40  ;;  %v1290_v23 = vpop.f32.mrf.mxu2  ;;  %v1678_v52 = vadd.f32 %v1677_v39, %v1676_v20 }
 0x1e2   : > { %v1207_v10 = vadd.f32 %v1188_v32, %v1056_v53  ;;  %v1679_v53 = vsel %vm477_vm0, %v2329_v14, 0.0 }
 0x1e4   : > { %v2881_v51 = vadd.f32 %v1290_v23, %v1207_v10  ;;  %v1680_v10 = vadd.f32 %v1679_v53, %v1678_v52 }
 0x1e5   : > { %v929_v43 = vpop.f32.mrf.mxu3 }
 0x1e6   : > { %v947_v46 = vadd.f32 %v929_v43, %v2805_v34  ;;  %v1514_v23 = vpop.f32.mrf.mxu0 }
 0x1e7   : > { %v1197_v16 = vpop.f32.mrf.mxu1 }
 0x1e8   : > { %v1057_v61 = vadd.f32 %v2817_v37, %v947_v46  ;;  %v1292_v13 = vpop.f32.mrf.mxu2  ;;  %v1681_v46 = vsel %vm477_vm0, %v2331_v15, 0.0 }
 0x1e9   : > { %v1682_v42 = vadd.f32 %v1681_v46, %v1680_v10 }
 0x1ea   : > { %v1208_v57 = vadd.f32 %v1190_v9, %v1057_v61 }
 0x1ec   : > { %v2891_v32 = vadd.f32 %v1292_v13, %v1208_v57  ;;  %v1683_v13 = vsel %vm477_vm0, %v2337_v25, 0.0 }
 0x1ed   : > { %v932_v34 = vpop.f32.mrf.mxu3  ;;  %v1684_v57 = vadd.f32 %v1683_v13, %v1682_v42 }
 0x1ee   : > { %v1685_v34 = vsel %vm477_vm0, %v2339_v26, 0.0 }
 0x1ef   : > { %v1606_v2 = vpop.f32.mrf.mxu1 }
 0x1f0   : > { %v1295_v58 = vpop.f32.mrf.mxu2 }
 0x1f1   : > { %v1516_v58 = vpop.f32.mrf.mxu0 }
 0x1f5   : > { %v933_v60 = vpop.f32.mrf.mxu3 }
 0x1f7   : > { %v1608_v30 = vpop.f32.mrf.mxu1 }
 0x1f8   : > { %v1296_v48 = vpop.f32.mrf.mxu2 }
 0x1fd   : > { %v935_v3 = vpop.f32.mrf.mxu3 }
 0x1ff   : > { %v1611_v27 = vpop.f32.mrf.mxu1 }
 0x200   : > { %v1298_v56 = vpop.f32.mrf.mxu2 }
 0x201   : > { %v591_v56 = vld [vmem:[#allocation2 + $0x70] sm:$0xff] }
 0x205   : > { %v936_v63 = vpop.f32.mrf.mxu3 }
 0x207   : > { %v1613_v54 = vpop.f32.mrf.mxu1 }
 0x208   : > { %v1299_v19 = vpop.f32.mrf.mxu2 }
 0x20d   : > { %v1375_v37 = vpop.f32.mrf.mxu3 }
 0x20e   : > { %v1406_v38 = vadd.f32 %v1375_v37, %v2829_v12 }
 0x20f   : > { %v1616_v16 = vpop.f32.mrf.mxu1 }
 0x210   : > { %v1535_v22 = vadd.f32 %v1504_v8, %v1406_v38  ;;  %v1686_v8 = vadd.f32 %v1685_v34, %v1684_v57 }
 0x212   : > { %v1637_v9 = vadd.f32 %v1606_v2, %v1535_v22  ;;  %v1687_v2 = vsel %vm477_vm0, %v2345_v35, 0.0  ;;  %v1519_v22 = vpop.f32.mrf.mxu0 }
 0x213   : > { %v1688_v19 = vadd.f32 %v1687_v2, %v1686_v8 }
 0x214   : > { %1648 = vst.msk [vmem:[#allocation3] sm:$0xff] %vm1647_vm9, %v1637_v9 }
 0x215   : > { %v1377_v59 = vpop.f32.mrf.mxu3 }
 0x216   : > { %v1407_v47 = vadd.f32 %v1377_v59, %v2835_v45 }
 0x217   : > { %v1618_v48 = vpop.f32.mrf.mxu1 }
 0x218   : > { %v1536_v6 = vadd.f32 %v1506_v50, %v1407_v47  ;;  %v607_v50 = vpack.c.bf16 %v591_v56, %v591_v56 }
 0x21a   : > { %v1638_v17 = vadd.f32 %v1608_v30, %v1536_v6  ;;  %v1689_v30 = vsel %vm477_vm0, %v2347_v36, 0.0  ;;  %v2923_v37 = vunpack.c.l.b16 %v607_v50 }
 0x21b   : > { %v1690_v9 = vadd.f32 %v1689_v30, %v1688_v19 }
 0x21c   : > { %1650 = vst.msk [vmem:[#allocation3 + $0x6] sm:$0xfc] %vm1649_vm10, %v1638_v17 }
 0x21d   : > { %v1380_v28 = vpop.f32.mrf.mxu3 }
 0x21e   : > { %v1408_v12 = vadd.f32 %v1380_v28, %v2846_v31 }
 0x21f   : > { %v1621_v59 = vpop.f32.mrf.mxu1 }
 0x220   : > { %v1537_v40 = vadd.f32 %v1509_v33, %v1408_v12  ;;  %v1319_v33 = vpack.c.b16 %v2923_v37, %v2923_v37  ;;  %v1521_v12 = vpop.f32.mrf.mxu0 }
 0x222   : > { %v1639_v45 = vadd.f32 %v1611_v27, %v1537_v40  ;;  %v1331_v47 = vrot.slane %v1319_v33, 2 }
 0x224   : > { %1652 = vst.msk [vmem:[#allocation3 + $0xe] sm:$0x3] %vm1651_vm11, %v1639_v45  ;;  %v1332_v44 = vsel %vm1214_vm4, %v1329_v11, %v1331_v47 }
 0x225   : > { %1654 = vst.msk [vmem:[#allocation3 + $0xc] sm:$0xf0] %vm1653_vm12, %v1639_v45  ;;  %v1382_v31 = vpop.f32.mrf.mxu3  ;;  %2101 = vmatmul.msk.bf16.gmra.mxu3 %vm551_vm1, %v1332_v44 }
 0x226   : > { %v1409_v43 = vadd.f32 %v1382_v31, %v2852_v21 }
 0x227   : > { %v1623_v20 = vpop.f32.mrf.mxu1 }
 0x228   : > { %v1538_v49 = vadd.f32 %v1511_v24, %v1409_v43  ;;  %v1524_v11 = vpop.f32.mrf.mxu0 }
 0x22a   : > { %v1640_v61 = vadd.f32 %v1613_v54, %v1538_v49 }
 0x22c   : > { %1656 = vst.msk [vmem:[#allocation3 + $0x14] sm:$0xf] %vm1655_vm13, %v1640_v61 }
 0x22d   : > { %1658 = vst.msk [vmem:[#allocation3 + $0x12] sm:$0xc0] %vm1657_vm14, %v1640_v61  ;;  %v1385_v41 = vpop.f32.mrf.mxu3  ;;  %v2943_v61 = vld [vmem:[#allocation3] sm:$0xff] }
 0x22e   : > { %v1410_v21 = vadd.f32 %v1385_v41, %v2858_v0 }
 0x22f   : > { %v1626_v43 = vpop.f32.mrf.mxu1 }
 0x230   : > { %v1539_v60 = vadd.f32 %v1514_v23, %v1410_v21  ;;  %v1526_v21 = vpop.f32.mrf.mxu0 }
 0x232   : > { %v1641_v3 = vadd.f32 %v1616_v16, %v1539_v60  ;;  %v1698_v60 = vsel %vm1647_vm9, %v2943_v61, 0.0 }
 0x233   : > { %v2945_v13 = vld [vmem:[#allocation3 + $0x10] sm:$0xff] }
 0x234   : > { %1660 = vst.msk [vmem:[#allocation3 + $0x1a] sm:$0x3f] %vm1659_vm15, %v1641_v3 }
 0x235   : > { %v1387_v63 = vpop.f32.mrf.mxu3  ;;  %2102 = vmatmul.msk.bf16.gmra.mxu3 %vm551_vm1, %v1331_v47 }
 0x236   : > { %v1411_v0 = vadd.f32 %v1387_v63, %v2868_v7  ;;  %v1691_v7 = vrot.slane %v1690_v9, 4 }
 0x237   : > { %v1628_v8 = vpop.f32.mrf.mxu1 }
 0x238   : > { %v1540_v38 = vadd.f32 %v1516_v58, %v1411_v0  ;;  %v1692_v54 = vadd.f32 %v1691_v7, %v1690_v9 }
 0x23a   : > { %v1642_v27 = vadd.f32 %v1618_v48, %v1540_v38  ;;  %v1693_v52 = vrot.slane %v1692_v54, 2  ;;  %v1701_v48 = vsel %vm1647_vm9, %v2945_v13, 0.0 }
 0x23b   : > { %v2950_v34 = vld [vmem:[#allocation3 + $0x18] sm:$0xff] }
 0x23c   : > { %1661 = vst.msk [vmem:[#allocation3 + $0x20] sm:$0xff] %vm1647_vm9, %v1642_v27  ;;  %v1694_v23 = vadd.f32 %v1693_v52, %v1692_v54  ;;  %v1703_v63 = vsel %vm1647_vm9, %v2950_v34, 0.0  ;;  %v1771_v52 = vld [vmem:[%s3061_s10] sm:$0x1] }
 0x23d   : > { %v1390_v6 = vpop.f32.mrf.mxu3 }
 0x23e   : > { %v1412_v17 = vadd.f32 %v1390_v6, %v2874_v1  ;;  %v1695_v10 = vrot.slane %v1694_v23, 1 }
 0x240   : > { %v1541_v24 = vadd.f32 %v1519_v22, %v1412_v17  ;;  %v1696_v49 = vadd.f32 %v1695_v10, %v1694_v23 }
 0x242   : > { %v1643_v28 = vadd.f32 %v1621_v59, %v1541_v24  ;;  %v1697_v41 = vmul.f32 0.015625, %v1696_v49 }
 0x243   : > { %v2956_v3 = vld [vmem:[#allocation3 + $0x20] sm:$0xff] }
 0x244   : > { %1662 = vst.msk [vmem:[#allocation3 + $0x26] sm:$0xfc] %vm1649_vm10, %v1643_v28  ;;  %v1705_v0 = vsel %vm1647_vm9, %v2956_v3, 0.0 }
 0x245   : > { %v1392_v39 = vpop.f32.mrf.mxu3 }
 0x246   : > { %v1413_v40 = vadd.f32 %v1392_v39, %v2877_v62  ;;  %v2939_v62 = vld [vmem:[#allocation3 + $0x8] sm:$0xff] }
 0x247   : > { %v1699_v57 = vsel %vm1647_vm9, %v2939_v62, 0.0 }
 0x248   : > { %v1542_v45 = vadd.f32 %v1521_v12, %v1413_v40  ;;  %v1700_v2 = vadd.f32 %v1699_v57, %v1698_v60 }
 0x24a   : > { %v1644_v53 = vadd.f32 %v1623_v20, %v1542_v45  ;;  %v1702_v19 = vadd.f32 %v1701_v48, %v1700_v2  ;;  %v2223_v45 = vmov 0  }
 0x24c   : > { %1663 = vst.msk [vmem:[#allocation3 + $0x2e] sm:$0x3] %vm1651_vm11, %v1644_v53  ;;  %v1704_v38 = vadd.f32 %v1703_v63, %v1702_v19 }
 0x24d   : > { %1664 = vst.msk [vmem:[#allocation3 + $0x2c] sm:$0xf0] %vm1653_vm12, %v1644_v53  ;;  %v1395_v1 = vpop.f32.mrf.mxu3 }
 0x24e   : > { %v1414_v31 = vadd.f32 %v1395_v1, %v2881_v51  ;;  %v1706_v33 = vadd.f32 %v1705_v0, %v1704_v38 }
 0x250   : > { %v1543_v46 = vadd.f32 %v1524_v11, %v1414_v31 }
 0x252   : > { %v1645_v16 = vadd.f32 %v1626_v43, %v1543_v46 }
 0x253   : > { %v2960_v50 = vld [vmem:[#allocation3 + $0x28] sm:$0xff] }
 0x254   : > { %1665 = vst.msk [vmem:[#allocation3 + $0x34] sm:$0xf] %vm1655_vm13, %v1645_v16  ;;  %v1707_v22 = vsel %vm1647_vm9, %v2960_v50, 0.0 }
 0x255   : > { %1666 = vst.msk [vmem:[#allocation3 + $0x32] sm:$0xc0] %vm1657_vm14, %v1645_v16  ;;  %v1397_v42 = vpop.f32.mrf.mxu3  ;;  %v1708_v27 = vadd.f32 %v1707_v22, %v1706_v33  ;;  %v1767_v16 = vld [vmem:[#allocation4] sm:$0x1] }
 0x256   : > { %v1415_v51 = vadd.f32 %v1397_v42, %v2891_v32  ;;  %v1720_v32 = vpack.c.bf16 %v1697_v41, %v1697_v41 }
 0x258   : > { %v1544_v58 = vadd.f32 %v1526_v21, %v1415_v51  ;;  %2146 = vmatmul.msk.bf16.vlgmr.msrb.gmra.mxu3 %vm477_vm0, %v1720_v32  ;;  %vm1777_vm0 = vcmask 1040384   ;;  %v592_v21 = vld [vmem:[#allocation2 + $0x78] sm:$0x3] }
 0x259   : > { %v1779_v53 = vsel %vm1777_vm0, 65535, %v2223_v45 }
 0x25a   : > { %v1646_v56 = vadd.f32 %v1628_v8, %v1544_v58  ;;  %v1781_v23 = vand.u32 %v1779_v53, %v1771_v52  ;;  %v608_v58 = vpack.c.bf16 %v592_v21, %v592_v21  ;;  %v1772_v8 = vld [vmem:[%s3062_s11] sm:$0x1] }
 0x25b   : > { %v2965_v30 = vld [vmem:[#allocation3 + $0x30] sm:$0xff] }
 0x25c   : > { %1667 = vst.msk [vmem:[#allocation3 + $0x3a] sm:$0x3f] %vm1659_vm15, %v1646_v56  ;;  %v1709_v9 = vsel %vm1647_vm9, %v2965_v30, 0.0  ;;  %1790 = vmatpush.bf16.msrb.mxu2 %v1781_v23  ;;  %v1422_v60 = vunpack.c.l.b16 %v608_v58 }
 0x25d   : > { %v1710_v47 = vadd.f32 %v1709_v9, %v1708_v27 }
 0x25e   : > { %v1423_v48 = vpack.c.b16 %v1422_v60, %v2923_v37 }
 0x260   : > { %v1454_v32 = vshrl.u32 %v1423_v48, 16  ;;  %v1457_v63 = vshll.u32 %v1423_v48, 16  ;;  %v1562_v19 = vrot.slane %v1423_v48, 3 }
 0x262   : > { %v1456_v38 = vrot.slane %v1454_v32, 2  ;;  %v1459_v22 = vrot.slane %v1457_v63, 3  ;;  %v1563_v33 = vsel %vm1550_vm5, %v1560_v29, %v1562_v19 }
 0x263   : > { %v2972_v59 = vld [vmem:[#allocation3 + $0x38] sm:$0xff]  ;;  %2139 = vmatmul.msk.bf16.gmra.mxu1 %vm551_vm1, %v1563_v33 }
 0x264   : > { %v1711_v6 = vsel %vm1647_vm9, %v2972_v59, 0.0  ;;  %v1460_v37 = vor.u32 %v1459_v22, %v1456_v38 }
 0x265   : > { %v1712_v44 = vadd.f32 %v1711_v6, %v1710_v47 }
 0x266   : > { %v1461_v9 = vsel %vm1424_vm6, %v2785_v55, %v1460_v37 }
 0x267   : > { %v1713_v7 = vrot.slane %v1712_v44, 4  ;;  %2120 = vmatmul.msk.bf16.gmra.mxu0 %vm551_vm1, %v1461_v9 }
 0x269   : > { %v1714_v17 = vadd.f32 %v1713_v7, %v1712_v44 }
 0x26b   : > { %v1715_v24 = vrot.slane %v1714_v17, 2 }
 0x26d   : > { %v1716_v54 = vadd.f32 %v1715_v24, %v1714_v17 }
 0x26f   : > { %v1717_v28 = vrot.slane %v1716_v54, 1 }
 0x271   : > { %v1718_v12 = vadd.f32 %v1717_v28, %v1716_v54 }
 0x273   : > { %v1719_v20 = vmul.f32 0.015625, %v1718_v12  ;;  %2140 = vmatmul.msk.bf16.gmra.mxu1 %vm551_vm1, %v1562_v19 }
 0x275   : > { %v1723_v39 = vpack.c.bf16 %v1719_v20, %v1719_v20 }
 0x277   : > { %2141 = vmatmul.msk.bf16.vlgmr.msra.gmra.mxu2 %vm1647_vm9, %v1723_v39  ;;  %2121 = vmatmul.msk.bf16.gmra.mxu0 %vm551_vm1, %v1460_v37  ;;  %vm1832_vm1 = vcmask 125952  }
 0x2a8   : > { %v1400_v40 = vpop.f32.mrf.mxu3 }
 0x2b0   : > { %v1401_v11 = vpop.f32.mrf.mxu3 }
 0x2b8   : > { %v1403_v1 = vpop.f32.mrf.mxu3 }
 0x2c0   : > { %v1404_v31 = vpop.f32.mrf.mxu3 }
 0x2db   : > { %v1763_v10 = vpop.f32.mrf.mxu3 }
 0x2e3   : > { %v1765_v43 = vpop.f32.mrf.mxu3 }
 0x2fa   : > { %v1741_v46 = vpop.f32.mrf.mxu2 }
 0x2fb   : > { %v1764_v49 = vadd.f32 %v1763_v10, %v1741_v46 }
 0x2fd   : > { %v1768_v42 = vadd.f32 %v1767_v16, %v1764_v49 }
 0x2ff   : > { %v1769_v51 = vmax.f32 %v1768_v42, 0.0 }
 0x301   : > { %v1770_v41 = vpack.c.bf16 %v1769_v51, %v1769_v51 }
 0x302   : > { %v1743_v57 = vpop.f32.mrf.mxu2 }
 0x303   : > { %2147 = vmatmul.msk.bf16.vlgmr.msrb.gmra.mxu2 %vm1773_vm3, %v1770_v41 }
 0x386   : > { %v1792_v2 = vpop.f32.mrf.mxu2 }
 0x387   : > { %v1793_v56 = vadd.f32 %v1792_v2, %v1772_v8 }
 0x389   : > { %v2148_v0 = vmul.f32 -1.442695, %v1793_v56 }
 0x38b   : > { %2210 = vpow2.f32 %v2148_v0 }
 0x38e   : > { %v1794_v27 = vpop.f32.mrf.mxu2 }
 0x391   : > { %v2211_v47 = vpop.eup %2210 }
 0x392   : > { %v1799_v6 = vadd.f32 1.0, %v2211_v47 }
 0x394   : > { %2212 = vrcp.f32 %v1799_v6  ;;  %v1811_v17 = vand.u32 2147483648, %v1799_v6  ;;  %v1809_v24 = vand.u32 2147483647, %v1799_v6  ;;  %vm1805_vm5 = vweird.f32 %v1799_v6 }
 0x396   : > { %v1812_v55 = vor.u32 1.1754944e-38, %v1811_v17  ;;  %vm1810_vm7 = vcmp.eq.f32.partialorder %v1809_v24, 8.507059e+37 }
 0x39a   : > { %v2213_v44 = vpop.eup %2212 }
 0x39b   : > { %v1801_v7 = vmul.f32 %v2213_v44, %v1799_v6  ;;  %vm1806_vm4 = vweird.f32 %v2213_v44 }
 0x39c   : > { %vm1807_vm6 = vmor %vm1805_vm5, %vm1806_vm4 }
 0x39d   : > { %v1802_v18 = vsub.f32 1.0, %v1801_v7 }
 0x39f   : > { %v1803_v29 = vmul.f32 %v2213_v44, %v1802_v18 }
 0x3a1   : > { %v1804_v54 = vadd.f32 %v2213_v44, %v1803_v29 }
 0x3a3   : > { %v1808_v28 = vsel %vm1807_vm6, %v2213_v44, %v1804_v54 }
 0x3a4   : > { %v1813_v12 = vsel %vm1810_vm7, %v1812_v55, %v1808_v28 }
 0x3a5   : > { %v1815_v20 = vperm.slane %v1813_v12, 0 }
 0x3a7   : > { %1842 = vrot.lane.b32.xlu0 %v1815_v20, %s2224_s16  ;;  %v1819_v39 = vmul.f32 %v2331_v15, %v1815_v20  ;;  %v1820_v40 = vmul.f32 %v2337_v25, %v1815_v20  ;;  %v1823_v52 = vmul.f32 %v2347_v36, %v1815_v20  ;;  %v1817_v45 = vmul.f32 %v2321_v5, %v1815_v20 }
 0x3a8   : > { %v1816_v53 = vmul.f32 %v2319_v4, %v1815_v20  ;;  %v1818_v15 = vmul.f32 %v2329_v14, %v1815_v20  ;;  %v1821_v23 = vmul.f32 %v2339_v26, %v1815_v20  ;;  %v1822_v1 = vmul.f32 %v2345_v35, %v1815_v20  ;;  %v1631_v26 = vpop.f32.mrf.mxu1  ;;  %v1529_v35 = vpop.f32.mrf.mxu0 }
 0x3a9   : > { %v1827_v25 = vpack.c.bf16 %v1819_v39, %v1819_v39  ;;  %v1828_v5 = vpack.c.bf16 %v1820_v40, %v1820_v40  ;;  %v1831_v36 = vpack.c.bf16 %v1823_v52, %v1823_v52  ;;  %v1825_v11 = vpack.c.bf16 %v1817_v45, %v1817_v45 }
 0x3aa   : > { %v1824_v31 = vpack.c.bf16 %v1816_v53, %v1816_v53  ;;  %v1826_v4 = vpack.c.bf16 %v1818_v15, %v1818_v15  ;;  %v1829_v14 = vpack.c.bf16 %v1821_v23, %v1821_v23  ;;  %v1830_v10 = vpack.c.bf16 %v1822_v1, %v1822_v1 }
 0x3ab   : > { %1836 = vst.msk [vmem:[%s3002_s19 + $0xc] sm:$0xf] %vm1832_vm1, %v1827_v25 }
 0x3ac   : > { %1837 = vst.msk [vmem:[%s3002_s19 + $0x10] sm:$0xf] %vm1832_vm1, %v1828_v5 }
 0x3ad   : > { %1840 = vst.msk [vmem:[%s3002_s19 + $0x1c] sm:$0xf] %vm1832_vm1, %v1831_v36 }
 0x3ae   : > { %1834 = vst.msk [vmem:[%s3002_s19 + $0x4] sm:$0xf] %vm1832_vm1, %v1825_v11 }
 0x3af   : > { %1833 = vst.msk [vmem:[%s3002_s19] sm:$0xf] %vm1832_vm1, %v1824_v31 }
 0x3b0   : > { %1835 = vst.msk [vmem:[%s3002_s19 + $0x8] sm:$0xf] %vm1832_vm1, %v1826_v4  ;;  %v1632_v43 = vpop.f32.mrf.mxu1  ;;  %v1530_v46 = vpop.f32.mrf.mxu0 }
 0x3b1   : > { %1838 = vst.msk [vmem:[%s3002_s19 + $0x14] sm:$0xf] %vm1832_vm1, %v1829_v14 }
 0x3b2   : > { %1839 = vst.msk [vmem:[%s3002_s19 + $0x18] sm:$0xf] %vm1832_vm1, %v1830_v10 }
 0x3b8   : > { %v1634_v16 = vpop.f32.mrf.mxu1  ;;  %v1532_v57 = vpop.f32.mrf.mxu0 }
 0x3c0   : > { %v1635_v48 = vpop.f32.mrf.mxu1 }
 0x419   : > { %v1843_v49 = vpop.permute.xlu0 %1842 }
 0x41a   : > { %v1848_v42 = vmul.f32 %v1843_v49, %v2950_v34  ;;  %v1846_v51 = vmul.f32 %v1843_v49, %v2939_v62  ;;  %v1845_v41 = vmul.f32 %v1843_v49, %v2943_v61  ;;  %v1849_v8 = vmul.f32 %v1843_v49, %v2956_v3  ;;  %v1533_v34 = vpop.f32.mrf.mxu0 }
 0x41b   : > { %v1847_v2 = vmul.f32 %v1843_v49, %v2945_v13  ;;  %v1850_v56 = vmul.f32 %v1843_v49, %v2960_v50  ;;  %v1852_v63 = vmul.f32 %v1843_v49, %v2972_v59  ;;  %v1851_v3 = vmul.f32 %v1843_v49, %v2965_v30 }
 0x41c   : > { %v1856_v21 = vpack.c.bf16 %v1848_v42, %v1848_v42  ;;  %v1854_v58 = vpack.c.bf16 %v1846_v51, %v1846_v51  ;;  %v1853_v60 = vpack.c.bf16 %v1845_v41, %v1845_v41  ;;  %v1857_v62 = vpack.c.bf16 %v1849_v8, %v1849_v8 }
 0x41d   : > { %v1855_v61 = vpack.c.bf16 %v1847_v2, %v1847_v2  ;;  %v1858_v32 = vpack.c.bf16 %v1850_v56, %v1850_v56  ;;  %v1860_v19 = vpack.c.bf16 %v1852_v63, %v1852_v63  ;;  %v1859_v13 = vpack.c.bf16 %v1851_v3, %v1851_v3 }
 0x41e   : > { %1875 = vrot.lane.b32.xlu2 %v1856_v21, %s2225_s24  ;;  %1871 = vrot.lane.b32.xlu1 %v1854_v58, %s2225_s24 }
 0x41f   : > { %1869 = vrot.lane.b32.xlu0 %v1853_v60, %s2225_s24 }
 0x426   : > { %1877 = vrot.lane.b32.xlu2 %v1857_v62, %s2225_s24  ;;  %1873 = vrot.lane.b32.xlu1 %v1855_v61, %s2225_s24 }
 0x427   : > { %1879 = vrot.lane.b32.xlu0 %v1858_v32, %s2225_s24 }
 0x42e   : > { %1883 = vrot.lane.b32.xlu2 %v1860_v19, %s2225_s24  ;;  %1881 = vrot.lane.b32.xlu1 %v1859_v13, %s2225_s24 }
 0x478   : > { %v1876_v50 = vpop.permute.xlu2 %1875 }
 0x479   : > { %1897 = vst.msk [vmem:[%s3002_s19 + $0xc] sm:$0xf] %vm1893_vm8, %v1876_v50 }
 0x480   : > { %v1878_v0 = vpop.permute.xlu2 %1877 }
 0x481   : > { %1898 = vst.msk [vmem:[%s3002_s19 + $0x10] sm:$0xf] %vm1893_vm8, %v1878_v0 }
 0x488   : > { %v1884_v38 = vpop.permute.xlu2 %1883 }
 0x489   : > { %1901 = vst.msk [vmem:[%s3002_s19 + $0x1c] sm:$0xf] %vm1893_vm8, %v1884_v38 }
 0x490   : > { %v1872_v59 = vpop.permute.xlu1 %1871 }
 0x491   : > { %1895 = vst.msk [vmem:[%s3002_s19 + $0x4] sm:$0xf] %vm1893_vm8, %v1872_v59  ;;  %v1870_v30 = vpop.permute.xlu0 %1869 }
 0x492   : > { %1894 = vst.msk [vmem:[%s3002_s19] sm:$0xf] %vm1893_vm8, %v1870_v30 }
 0x498   : > { %v1874_v22 = vpop.permute.xlu1 %1873 }
 0x499   : > { %1896 = vst.msk [vmem:[%s3002_s19 + $0x8] sm:$0xf] %vm1893_vm8, %v1874_v22  ;;  %v1880_v33 = vpop.permute.xlu0 %1879 }
 0x49a   : > { %1899 = vst.msk [vmem:[%s3002_s19 + $0x14] sm:$0xf] %vm1893_vm8, %v1880_v33 }
 0x4a0   : > { %v1882_v37 = vpop.permute.xlu1 %1881 }
 0x4a1   : > { %1900 = vst.msk [vmem:[%s3002_s19 + $0x18] sm:$0xf] %vm1893_vm8, %v1882_v37 }
 0x4a2 PF: > { %s24_s23 = sadd.s32 1, %s2220_s23  }
 0x4a3   : > { %p21_p4 = scmp.ge.s32.totalorder %s24_s23, 4  }
 0x4a5   :  { %23 = sbr.rel (!%p21_p4) target bundleno = 3 (0x3), region = 106 }

// kernel: sedensenet_forward.14
= control target key start
LH: loop header
LB: loop body
LE: loop exit
PB: predicated region body
PF: predicated region fallthrough
CT: control target
= control target key end

     0   :  { %s1554_s23 = smov 0   ;;  %s1793_s0 = inlined_call_operand.vmem [shape: bf16[2,16,12], index: 0, kind: input, shape index: {}]   ;;  %s1794_s1 = inlined_call_operand.vmem [shape: f32[1,12], index: 1, kind: input, shape index: {}]   ;;  %s1795_s2 = inlined_call_operand.vmem [shape: f32[1,12], index: 2, kind: input, shape index: {}]   ;;  %s1796_s3 = inlined_call_operand.vmem [shape: bf16[12,32], index: 3, kind: input, shape index: {}]   ;;  %s1797_s4 = inlined_call_operand.vmem [shape: f32[1,32], index: 4, kind: input, shape index: {}]   ;;  %s1798_s5 = inlined_call_operand.vmem [shape: f32[1,32], index: 5, kind: input, shape index: {}]   ;;  %s1799_s6 = inlined_call_operand.vmem [shape: bf16[9,32,8], index: 6, kind: input, shape index: {}]   ;;  %s1800_s7 = inlined_call_operand.vmem [shape: bf16[12,1], index: 7, kind: input, shape index: {}]   ;;  %s1801_s8 = inlined_call_operand.vmem [shape: bf16[8,1], index: 8, kind: input, shape index: {}]   ;;  %s1802_s9 = inlined_call_operand.<no memory space> [shape: f32[1,1], index: 9, kind: input, shape index: {}]   ;;  %s1803_s10 = inlined_call_operand.vmem [shape: bf16[1,20], index: 10, kind: input, shape index: {}]   ;;  %s1804_s11 = inlined_call_operand.vmem [shape: f32[1,20], index: 11, kind: input, shape index: {}]   ;;  %s1805_s12 = inlined_call_operand.vmem [shape: bf16[2,16,20], index: 12, kind: output, shape index: {}]  }
   0x1   :  { %v17_v0 = vstv %s1802_s9 }
   0x2   :  { %18 = vst [vmem:[#allocation4] sm:$0x1] %v17_v0 }
   0x3 LB: > { %s1271_s24 = sadd.s32 4294967295, %s1480_s23   ;;  %p1275_p0 = scmp.ge.s32.totalorder %s1480_s23, 1  ;;  %s1480_s23 = sphi %s1554_s23, %s24_s23  }
   0x4   : > { %p364_p1 = scmp.lt.s32.totalorder %s1480_s23, 3 }
   0x6   : > { %p365_p2 = pnand %p1275_p0, %p364_p1 }
   0x7   : > { %p406_p3 = scmp.lt.s32.totalorder (!%p365_p2), %s1271_s24, 1  ;;  %s1484_s20 = smov (!%p365_p2), 116  }
   0x8   : > { %368 = sbr.rel (%p365_p2) target bundleno = 972 (0x3cc), region = 68  ;;  %s1485_s26 = smov (!%p365_p2), 12  }
   0xd   : > { %v1282_v1 = vld [vmem:[%s1796_s3] sm:$0xf]  ;;  %v1428_v2 = vld [vmem:[%s1796_s3] sm:$0x30]  ;;  %vm447_vm0 = vcmask 1045504   ;;  %s1807_s24 = smov (!%p406_p3, %s1271_s24), 1 }
   0xe   : > { %v1283_v3 = vor.u32 %v1428_v2, %v1282_v1  ;;  %v1432_v4 = vld [vmem:[%s1799_s6 + $0x18] sm:$0xff]  ;;  %s1426_s30 = sshll.u32 %s1807_s24, 3  ;;  %v1466_v6 = vld [vmem:[%s1794_s1] ss:$0 sm:$0xff]  ;;  %vm443_vm1 = vcmask 97280   ;;  %vm479_vm2 = vcmask 261120  }
   0xf   : > { %1452 = vmatpush.bf16.msra.mxu2 %v1432_v4  ;;  %s410_s15 = scalar_lea.vmem %s1793_s0, %s1426_s30  ;;  %581 = vmatpush.bf16.msra.mxu1 %v1432_v4  ;;  %v1467_v10 = vld [vmem:[%s1795_s2] ss:$0 sm:$0xff]  ;;  %v1482_v18 = vmov 0.0   ;;  %v1431_v24 = vld [vmem:[%s1799_s6 + $0x10] sm:$0xff]  ;;  %v1430_v28 = vld [vmem:[%s1799_s6 + $0x8] sm:$0xff]  ;;  %vm486_vm3 = vcmask 254976   ;;  %s415_s25 = scalar_lea.vmem %s1805_s12, %s1426_s30 }
  0x10   : > { %v449_v5 = vsel %vm447_vm0, %v1283_v3, 0  ;;  %v1449_v7 = vld [vmem:[%s410_s15] sm:$0xff]   ;;  %484 = vst.msk [vmem:[#allocation2 + $0x20] sm:$0xff] %vm479_vm2, %v1482_v18  ;;  %v1434_v30 = vld [vmem:[%s1799_s6 + $0x28] sm:$0xff]  ;;  %v1436_v31 = vld [vmem:[%s1799_s6 + $0x38] sm:$0xff]  ;;  %vm488_vm4 = vcmask 257024  }
  0x11   : > { %458 = vmatpush.bf16.msra.mxu0 %v449_v5  ;;  %v1583_v8 = vunpack.c.l.bf16 %v1449_v7  ;;  %v1585_v9 = vunpack.c.h.bf16 %v1449_v7  ;;  %480 = vst.msk [vmem:[#allocation2] sm:$0xff] %vm479_vm2, %v1482_v18  ;;  %v1429_v29 = vld [vmem:[%s1799_s6] sm:$0xff]  ;;  %673 = vmatpush.bf16.msra.mxu3 %v1434_v30  ;;  %v1435_v33 = vld [vmem:[%s1799_s6 + $0x30] sm:$0xff]  ;;  %v1438_v39 = vld [vmem:[%s1799_s6 + $0x48] sm:$0xff]  ;;  %vm490_vm5 = vcmask 261124   ;;  %vm640_vm6 = vcmask 1046528  }
  0x12   : > { %481 = vst.msk [vmem:[#allocation2 + $0x8] sm:$0xff] %vm479_vm2, %v1482_v18  ;;  %v1433_v32 = vld [vmem:[%s1799_s6 + $0x20] sm:$0xff]  ;;  %v1440_v58 = vld [vmem:[%s1799_s6 + $0x58] sm:$0xff]  ;;  %v1442_v61 = vld [vmem:[%s1799_s6 + $0x68] sm:$0xff]  ;;  %vm699_vm7 = vcmask 1044480   ;;  %vm1100_vm11 = vcmask 1043456  }
  0x13   : > { %v425_v11 = vmul.f32 %v1466_v6, %v1583_v8  ;;  %v426_v12 = vmul.f32 %v1466_v6, %v1585_v9  ;;  %482 = vst.msk [vmem:[#allocation2 + $0x10] sm:$0xff] %vm479_vm2, %v1482_v18  ;;  %1453 = vmatpush.bf16.msra.mxu2 %v1431_v24  ;;  %582 = vmatpush.bf16.msra.mxu1 %v1431_v24  ;;  %v1468_v34 = vld [vmem:[%s1797_s4] ss:$0 sm:$0xff]  ;;  %vm530_vm8 = vsmask.f32 7424  ;;  %vm1059_vm12 = vcmask 60416  }
  0x14   : > { %483 = vst.msk [vmem:[#allocation2 + $0x18] sm:$0xff] %vm479_vm2, %v1482_v18  ;;  %v1469_v35 = vld [vmem:[%s1798_s5] ss:$0 sm:$0xff]  ;;  %vm755_vm9 = vsmask.f32 4352  ;;  %vm1061_vm13 = vcmask 64518  }
  0x15   : > { %v431_v13 = vadd.f32 %v1467_v10, %v425_v11  ;;  %v432_v14 = vadd.f32 %v1467_v10, %v426_v12  ;;  %485 = vst.msk [vmem:[#allocation2 + $0x28] sm:$0xff] %vm479_vm2, %v1482_v18  ;;  %732 = vmatpush.bf16.msrb.mxu0 %v1436_v31  ;;  %674 = vmatpush.bf16.msra.mxu3 %v1433_v32  ;;  %v1437_v53 = vld [vmem:[%s1799_s6 + $0x40] sm:$0xff]  ;;  %vm934_vm10 = vsmask.f32 5376  ;;  %vm1063_vm14 = vcmask 58368  }
  0x16   : > { %487 = vst.msk [vmem:[#allocation2 + $0x30] sm:$0x3] %vm486_vm3, %v1482_v18  ;;  %v1441_v32 = vld [vmem:[%s1799_s6 + $0x60] sm:$0xff]  ;;  %vm1065_vm15 = vcmask 64516   ;;  %vm1147_vm3 = vcmask 7168  }
  0x17   : > { %v433_v15 = vmax.f32 %v431_v13, 0.0  ;;  %v434_v16 = vmax.f32 %v432_v14, 0.0  ;;  %v498_v19 = vld [vmem:[#allocation2 + $0x20] sm:$0xff]  ;;  %620 = vmatpush.bf16.msrb.mxu2 %v1430_v28  ;;  %799 = vmatpush.bf16.msrb.mxu1 %v1438_v39 }
  0x18   : > { %v505_v20 = vpack.c.bf16 %v498_v19, %v498_v19 }
  0x19   : > { %v435_v17 = vpack.c.bf16 %v434_v16, %v433_v15  ;;  %733 = vmatpush.bf16.msrb.mxu0 %v1435_v33  ;;  %908 = vmatpush.bf16.msrb.mxu3 %v1442_v61  ;;  %v1443_v33 = vld [vmem:[%s1799_s6 + $0x70] sm:$0xff] }
  0x1a   : > { %v1599_v21 = vunpack.c.l.b16 %v505_v20 }
  0x1b   : > { %1284 = vmatmul.msk.bf16.vlgmr.msra.gmra.mxu0 %vm443_vm1, %v435_v17  ;;  %621 = vmatpush.bf16.msrb.mxu2 %v1429_v29  ;;  %v1446_v29 = vld [vmem:[%s1799_s6 + $0x88] sm:$0xff] }
  0x1c   : > { %v1603_v22 = vpack.c.b16 %v1599_v21, %v1599_v21  ;;  %v499_v51 = vld [vmem:[#allocation2 + $0x28] sm:$0xff]  ;;  %800 = vmatpush.bf16.msrb.mxu1 %v1437_v53 }
  0x1d   : > { %v500_v52 = vld [vmem:[#allocation2 + $0x30] sm:$0x3]  ;;  %v506_v55 = vpack.c.bf16 %v499_v51, %v499_v51  ;;  %909 = vmatpush.bf16.msrb.mxu3 %v1441_v32 }
  0x1e   : > { %v547_v23 = vshll.u32 %v1603_v22, 16  ;;  %v551_v26 = vshrl.u32 %v1603_v22, 16  ;;  %v507_v56 = vpack.c.bf16 %v500_v52, %v500_v52 }
  0x1f   : > { %v1655_v1 = vunpack.c.l.b16 %v506_v55 }
  0x20   : > { %v1609_v25 = vrot.slane %v547_v23, 1  ;;  %v932_v2 = vunpack.c.l.b16 %v507_v56  ;;  %v1444_v23 = vld [vmem:[%s1799_s6 + $0x78] sm:$0xff] }
  0x21   : > { %986 = vmatpush.bf16.msra.mxu0 %v1444_v23 }
  0x22   : > { %v553_v27 = vor.u32 %v551_v26, %v1609_v25  ;;  %v1662_v11 = vpack.c.b16 %v932_v2, %v1655_v1 }
  0x24   : > { %1299 = vmatmul.msk.bf16.vlgmr.msra.gmra.mxu2 %vm479_vm2, %v553_v27  ;;  %v1439_v27 = vld [vmem:[%s1799_s6 + $0x50] sm:$0xff]  ;;  %v1012_v28 = vrot.slane %v1662_v11, 3 }
  0x25   : > { %852 = vmatpush.bf16.msra.mxu2 %v1440_v58  ;;  %987 = vmatpush.bf16.msra.mxu0 %v1443_v33 }
  0x29   : > { %853 = vmatpush.bf16.msra.mxu2 %v1439_v27 }
  0x98   : > { %v460_v36 = vpop.f32.mrf.mxu0 }
  0x99   : > { %v469_v37 = vmul.f32 %v1468_v34, %v460_v36  ;;  %v644_v36 = vrot.slane %v1603_v22, 1 }
  0x9b   : > { %v475_v38 = vadd.f32 %v1469_v35, %v469_v37 }
  0x9d   : > { %v477_v40 = vmax.f32 %v475_v38, 0.0 }
  0x9f   : > { %489 = vst.msk [vmem:[#allocation2 + $0x7] sm:$0xf] %vm488_vm4, %v477_v40 }
  0xa0   : > { %v462_v41 = vpop.f32.mrf.mxu0  ;;  %491 = vst.msk [vmem:[#allocation2 + $0x9] sm:$0xf0] %vm490_vm5, %v477_v40 }
  0xa1   : > { %v470_v42 = vmul.f32 %v1468_v34, %v462_v41 }
  0xa3   : > { %v476_v43 = vadd.f32 %v1469_v35, %v470_v42  ;;  %v698_v35 = vpack.c.b16 %v1655_v1, %v1599_v21 }
  0xa5   : > { %v478_v44 = vmax.f32 %v476_v43, 0.0  ;;  %v703_v37 = vrot.slane %v698_v35, 3  ;;  %v764_v52 = vshrl.u32 %v698_v35, 16  ;;  %v767_v53 = vshll.u32 %v698_v35, 16 }
  0xa6   : > { %v494_v45 = vld [vmem:[#allocation2] sm:$0xff] }
  0xa7   : > { %492 = vst.msk [vmem:[#allocation2 + $0x13] sm:$0xf] %vm488_vm4, %v478_v44  ;;  %v495_v46 = vld [vmem:[#allocation2 + $0x8] sm:$0xff]  ;;  %v501_v47 = vpack.c.bf16 %v494_v45, %v494_v45  ;;  %v766_v58 = vrot.slane %v764_v52, 3  ;;  %v1419_v52 = vld [vmem:[%s1800_s7] sm:$0xf] }
  0xa8   : > { %493 = vst.msk [vmem:[#allocation2 + $0x15] sm:$0xf0] %vm490_vm5, %v478_v44  ;;  %v502_v48 = vpack.c.bf16 %v495_v46, %v495_v46 }
  0xa9   : > { %v522_v49 = vunpack.c.l.b16 %v501_v47 }
  0xaa   : > { %v523_v50 = vunpack.c.l.b16 %v502_v48 }
  0xac   : > { %v1644_v54 = vpack.c.b16 %v523_v50, %v522_v49 }
  0xae   : > { %1308 = vmatmul.msk.bf16.vlgmr.msrb.gmra.mxu2 %vm479_vm2, %v1644_v54  ;;  %v496_v57 = vld [vmem:[#allocation2 + $0x10] sm:$0xff]  ;;  %v534_v63 = vshll.u32 %v1644_v54, 16  ;;  %v641_v6 = vrot.slane %v1644_v54, 1  ;;  %v700_v7 = vrot.slane %v1644_v54, 3  ;;  %v532_v14 = vshrl.u32 %v1644_v54, 16 }
  0xaf   : > { %v497_v59 = vld [vmem:[#allocation2 + $0x18] sm:$0xff]  ;;  %v503_v60 = vpack.c.bf16 %v496_v57, %v496_v57 }
  0xb0   : > { %v504_v62 = vpack.c.bf16 %v497_v59, %v497_v59  ;;  %v536_v5 = vrot.slane %v534_v63, 1  ;;  %v756_v45 = vrot.slane %v532_v14, 3  ;;  %v757_v46 = vrot.slane %v534_v63, 4 }
  0xb1   : > { %v524_v0 = vunpack.c.l.b16 %v503_v60  ;;  %v769_v59 = vrot.slane %v767_v53, 4  ;;  %v1071_v53 = vsel %vm443_vm1, %v1583_v8, 0.0 }
  0xb2   : > { %v525_v3 = vunpack.c.l.b16 %v504_v62  ;;  %v537_v19 = vor.u32 %v536_v5, %v532_v14  ;;  %v758_v48 = vor.u32 %v757_v46, %v756_v45  ;;  %v951_v5 = vshrl.u32 %v1662_v11, 16 }
  0xb3   : > { %v1659_v10 = vpack.c.b16 %v524_v0, %v523_v50 }
  0xb4   : > { %v528_v4 = vpack.c.b16 %v525_v3, %v524_v0  ;;  %v1666_v16 = vpack.c.b16 %v1599_v21, %v525_v3  ;;  %v1445_v21 = vld [vmem:[%s1799_s6 + $0x80] sm:$0xff]  ;;  %v770_v0 = vor.u32 %v769_v59, %v766_v58 }
  0xb5   : > { %v1009_v24 = vrot.slane %v1659_v10, 3  ;;  %v938_v49 = vshll.u32 %v1659_v10, 16  ;;  %v876_v60 = vrot.slane %v1659_v10, 2 }
  0xb6   : > { %v642_v12 = vrot.slane %v528_v4, 1  ;;  %v701_v13 = vrot.slane %v528_v4, 3  ;;  %v539_v15 = vshll.u32 %v528_v4, 16  ;;  %v1010_v30 = vrot.slane %v1666_v16, 3 }
  0xb7   : > { %v543_v38 = vshrl.u32 %v528_v4, 16  ;;  %v942_v50 = vshrl.u32 %v1666_v16, 16  ;;  %v945_v51 = vshll.u32 %v1666_v16, 16  ;;  %v940_v55 = vrot.slane %v938_v49, 3 }
  0xb8   : > { %v643_v17 = vsel %vm640_vm6, %v641_v6, %v642_v12  ;;  %v702_v18 = vsel %vm699_vm7, %v700_v7, %v701_v13  ;;  %v541_v20 = vrot.slane %v539_v15, 1  ;;  %v1687_v31 = vsel %vm699_vm7, %v1009_v24, %v1010_v30 }
  0xb9   : > { %1323 = vmatmul.msk.bf16.vlgmr.msra.gmra.mxu3 %vm479_vm2, %v643_v17  ;;  %1338 = vmatmul.msk.bf16.vlgmr.msrb.gmra.mxu0 %vm479_vm2, %v702_v18  ;;  %v1699_v34 = vsel %vm699_vm7, %v1010_v30, %v1012_v28  ;;  %v645_v40 = vsel %vm640_vm6, %v642_v12, %v644_v36  ;;  %v704_v41 = vsel %vm699_vm7, %v701_v13, %v703_v37  ;;  %v759_v43 = vrot.slane %v543_v38, 3 }
  0xba   : > { %v542_v26 = vsel %vm530_vm8, %v537_v19, %v541_v20  ;;  %v545_v39 = vor.u32 %v543_v38, %v541_v20  ;;  %v760_v44 = vrot.slane %v539_v15, 4  ;;  %v944_v56 = vrot.slane %v942_v50, 2 }
  0xbb   : > { %1297 = vmatmul.msk.bf16.vlgmr.msra.gmra.mxu1 %vm479_vm2, %v542_v26  ;;  %v947_v57 = vrot.slane %v945_v51, 3  ;;  %v877_v61 = vrot.slane %v1666_v16, 2  ;;  %v954_v6 = vshll.u32 %v1662_v11, 16  ;;  %v824_v7 = vpack.c.b16 %v1655_v1, %v1655_v1  ;;  %v1096_v51 = vld [vmem:[%s1801_s8] sm:$0xf] }
  0xbc   : > { %1041 = vmatpush.bf16.msra.mxu1 %v1446_v29  ;;  %v550_v42 = vsel %vm530_vm8, %v545_v39, %v1609_v25  ;;  %v761_v47 = vor.u32 %v760_v44, %v759_v43  ;;  %vm1194_vm8 = vcmask 93184  }
  0xbd   : > { %v948_v63 = vor.u32 %v947_v57, %v944_v56  ;;  %v878_v2 = vsel %vm447_vm0, %v876_v60, %v877_v61  ;;  %v956_v12 = vrot.slane %v954_v6, 3  ;;  %v879_v13 = vrot.slane %v824_v7, 2  ;;  %v1447_v56 = vld [vmem:[%s1800_s7] sm:$0x30] }
  0xbe   : > { %1309 = vmatmul.msk.bf16.gmra.mxu2 %vm479_vm2, %v528_v4  ;;  %v762_v25 = vsel %vm755_vm9, %v758_v48, %v761_v47  ;;  %v771_v4 = vsel %vm755_vm9, %v761_v47, %v770_v0  ;;  %v1420_v58 = vor.u32 %v1447_v56, %v1419_v52  ;;  %vm1213_vm9 = vcmask 158816  }
  0xbf   : > { %v880_v15 = vsel %vm447_vm0, %v877_v61, %v879_v13 }
  0xc0   : > { %1042 = vmatpush.bf16.msra.mxu1 %v1445_v21  ;;  %v1126_v61 = vsel %vm447_vm0, %v1420_v58, 0  ;;  %vm1151_vm0 = vcmask 1040384  }
  0xc1   : > { %1135 = vmatpush.bf16.msra.mxu3 %v1126_v61 }
  0xc9   : > { %1324 = vmatmul.msk.bf16.gmra.mxu3 %vm479_vm2, %v645_v40  ;;  %1339 = vmatmul.msk.bf16.gmra.mxu0 %vm479_vm2, %v704_v41 }
  0xcb   : > { %1298 = vmatmul.msk.bf16.gmra.mxu1 %vm479_vm2, %v550_v42 }
  0xce   : > { %1310 = vmatmul.msk.bf16.gmra.mxu2 %vm479_vm2, %v1603_v22  ;;  %v935_v22 = vshrl.u32 %v1659_v10, 16 }
  0xd0   : > { %v937_v54 = vrot.slane %v935_v22, 2 }
  0xd2   : > { %v941_v62 = vor.u32 %v940_v55, %v937_v54  ;;  %v1072_v54 = vsel %vm443_vm1, %v1585_v9, 0.0  ;;  %v1102_v55 = vsel %vm1100_vm11, %v1096_v51, 0 }
  0xd3   : > { %1111 = vmatpush.bf16.msrb.mxu2 %v1102_v55  ;;  %v1073_v59 = vadd.f32 %v1072_v54, %v1071_v53 }
  0xd4   : > { %v949_v3 = vsel %vm934_vm10, %v941_v62, %v948_v63 }
  0xd9   : > { %1325 = vmatmul.msk.bf16.gmra.mxu3 %vm479_vm2, %v644_v36  ;;  %1340 = vmatmul.msk.bf16.gmra.mxu0 %vm479_vm2, %v703_v37 }
  0xdb   : > { %1353 = vmatmul.msk.bf16.vlgmr.msrb.gmra.mxu1 %vm479_vm2, %v762_v25 }
  0xde   : > { %1368 = vmatmul.msk.bf16.vlgmr.msra.gmra.mxu2 %vm479_vm2, %v1659_v10  ;;  %v953_v10 = vrot.slane %v951_v5, 2 }
  0xe0   : > { %v957_v14 = vor.u32 %v956_v12, %v953_v10 }
  0xe2   : > { %v958_v17 = vsel %vm934_vm10, %v948_v63, %v957_v14  ;;  %v1074_v63 = vrot.slane %v1073_v59, 4 }
  0xe9   : > { %1383 = vmatmul.msk.bf16.vlgmr.msrb.gmra.mxu3 %vm479_vm2, %v878_v2  ;;  %1398 = vmatmul.msk.bf16.vlgmr.msra.gmra.mxu0 %vm479_vm2, %v949_v3  ;;  %v1075_v3 = vadd.f32 %v1074_v63, %v1073_v59 }
  0xeb   : > { %1354 = vmatmul.msk.bf16.gmra.mxu1 %vm479_vm2, %v771_v4  ;;  %v1076_v6 = vrot.slane %v1075_v3, 2 }
  0xed   : > { %v1077_v12 = vadd.f32 %v1076_v6, %v1075_v3 }
  0xee   : > { %1369 = vmatmul.msk.bf16.gmra.mxu2 %vm479_vm2, %v1666_v16  ;;  %v593_v16 = vpop.f32.mrf.mxu2 }
  0xf6   : > { %v594_v18 = vpop.f32.mrf.mxu2 }
  0xf9   : > { %1384 = vmatmul.msk.bf16.gmra.mxu3 %vm479_vm2, %v880_v15  ;;  %1399 = vmatmul.msk.bf16.gmra.mxu0 %vm479_vm2, %v958_v17  ;;  %v1078_v15 = vrot.slane %v1077_v12, 1 }
  0xfb   : > { %1355 = vmatmul.msk.bf16.gmra.mxu1 %vm479_vm2, %v770_v0 }
  0xfe   : > { %1370 = vmatmul.msk.bf16.gmra.mxu2 %vm479_vm2, %v824_v7 }
 0x109   : > { %1385 = vmatmul.msk.bf16.gmra.mxu3 %vm479_vm2, %v879_v13  ;;  %1400 = vmatmul.msk.bf16.gmra.mxu0 %vm479_vm2, %v957_v14 }
 0x10b   : > { %1413 = vmatmul.msk.bf16.vlgmr.msra.gmra.mxu1 %vm479_vm2, %v1687_v31 }
 0x11b   : > { %1414 = vmatmul.msk.bf16.gmra.mxu1 %vm479_vm2, %v1699_v34 }
 0x12b   : > { %1415 = vmatmul.msk.bf16.gmra.mxu1 %vm479_vm2, %v1012_v28  ;;  %vm1081_vm2 = vcmask 64512  }
 0x131   : > { %v623_v1 = vpop.f32.mrf.mxu2 }
 0x136   : > { %v735_v19 = vpop.f32.mrf.mxu0 }
 0x138   : > { %v584_v20 = vpop.f32.mrf.mxu1 }
 0x139   : > { %v624_v23 = vadd.f32 %v623_v1, %v584_v20  ;;  %v625_v24 = vpop.f32.mrf.mxu2 }
 0x13c   : > { %v676_v26 = vpop.f32.mrf.mxu3 }
 0x13d   : > { %v688_v27 = vadd.f32 %v676_v26, %v624_v23 }
 0x13e   : > { %v737_v29 = vpop.f32.mrf.mxu0 }
 0x13f   : > { %v747_v30 = vadd.f32 %v735_v19, %v688_v27  ;;  %v1079_v19 = vadd.f32 %v1078_v15, %v1077_v12 }
 0x140   : > { %v586_v32 = vpop.f32.mrf.mxu1 }
 0x141   : > { %v626_v33 = vadd.f32 %v625_v24, %v586_v32  ;;  %v628_v35 = vpop.f32.mrf.mxu2  ;;  %v1080_v24 = vmul.f32 0.0625, %v1079_v19 }
 0x144   : > { %v678_v31 = vpop.f32.mrf.mxu3 }
 0x145   : > { %v689_v36 = vadd.f32 %v678_v31, %v626_v33 }
 0x146   : > { %v740_v37 = vpop.f32.mrf.mxu0 }
 0x147   : > { %v748_v34 = vadd.f32 %v737_v29, %v689_v36  ;;  %v1092_v29 = vpack.c.bf16 %v1080_v24, %v1080_v24 }
 0x148   : > { %v589_v38 = vpop.f32.mrf.mxu1 }
 0x149   : > { %v629_v11 = vadd.f32 %v628_v35, %v589_v38  ;;  %v630_v39 = vpop.f32.mrf.mxu2  ;;  %1421 = vmatmul.msk.bf16.vlgmr.msra.gmra.mxu3 %vm443_vm1, %v1092_v29  ;;  %vm1067_vm1 = vcmask 62466  }
 0x14c   : > { %v681_v28 = vpop.f32.mrf.mxu3 }
 0x14d   : > { %v690_v40 = vadd.f32 %v681_v28, %v629_v11 }
 0x14e   : > { %v742_v41 = vpop.f32.mrf.mxu0 }
 0x14f   : > { %v1755_v42 = vadd.f32 %v740_v37, %v690_v40 }
 0x150   : > { %v591_v21 = vpop.f32.mrf.mxu1 }
 0x151   : > { %v632_v43 = vpop.f32.mrf.mxu2 }
 0x154   : > { %v683_v44 = vpop.f32.mrf.mxu3 }
 0x156   : > { %v744_v45 = vpop.f32.mrf.mxu0 }
 0x157   : > { %v1145_v45 = vld [vmem:[%s1803_s10] sm:$0x1] }
 0x158   : > { %v802_v46 = vpop.f32.mrf.mxu1 }
 0x159   : > { %v633_v47 = vpop.f32.mrf.mxu2  ;;  %v814_v18 = vadd.f32 %v802_v46, %v747_v30 }
 0x15a   : > { %v1483_v47 = vmov 0  }
 0x15c   : > { %v685_v48 = vpop.f32.mrf.mxu3 }
 0x15d   : > { %v1153_v48 = vsel %vm1151_vm0, 65535, %v1483_v47 }
 0x15e   : > { %v745_v25 = vpop.f32.mrf.mxu0 }
 0x160   : > { %v804_v22 = vpop.f32.mrf.mxu1 }
 0x161   : > { %v855_v49 = vpop.f32.mrf.mxu2  ;;  %v815_v33 = vadd.f32 %v804_v22, %v748_v34 }
 0x162   : > { %v867_v20 = vadd.f32 %v855_v49, %v814_v18 }
 0x164   : > { %v686_v50 = vpop.f32.mrf.mxu3 }
 0x166   : > { %v989_v57 = vpop.f32.mrf.mxu0 }
 0x168   : > { %v807_v60 = vpop.f32.mrf.mxu1 }
 0x169   : > { %v857_v62 = vpop.f32.mrf.mxu2  ;;  %v816_v28 = vadd.f32 %v807_v60, %v1755_v42  ;;  %v1155_v42 = vand.u32 %v1153_v48, %v1145_v45 }
 0x16a   : > { %v868_v36 = vadd.f32 %v857_v62, %v815_v33 }
 0x16b   : > { %1164 = vmatpush.bf16.msrb.mxu0 %v1155_v42 }
 0x16c   : > { %v911_v0 = vpop.f32.mrf.mxu3 }
 0x16d   : > { %v923_v26 = vadd.f32 %v911_v0, %v867_v20 }
 0x16e   : > { %v991_v2 = vpop.f32.mrf.mxu0 }
 0x16f   : > { %v1001_v35 = vadd.f32 %v989_v57, %v923_v26 }
 0x170   : > { %v809_v4 = vpop.f32.mrf.mxu1 }
 0x171   : > { %v860_v5 = vpop.f32.mrf.mxu2 }
 0x172   : > { %v869_v21 = vadd.f32 %v860_v5, %v816_v28  ;;  %v1141_v5 = vld [vmem:[#allocation4] sm:$0x1] }
 0x174   : > { %v913_v7 = vpop.f32.mrf.mxu3 }
 0x175   : > { %v924_v30 = vadd.f32 %v913_v7, %v868_v36 }
 0x176   : > { %v994_v10 = vpop.f32.mrf.mxu0 }
 0x177   : > { %v1002_v40 = vadd.f32 %v991_v2, %v924_v30 }
 0x178   : > { %v811_v13 = vpop.f32.mrf.mxu1 }
 0x179   : > { %v862_v14 = vpop.f32.mrf.mxu2 }
 0x17a   : > { %v1146_v14 = vld [vmem:[%s1804_s11] sm:$0x1] }
 0x17c   : > { %v916_v17 = vpop.f32.mrf.mxu3 }
 0x17d   : > { %v925_v34 = vadd.f32 %v916_v17, %v869_v21 }
 0x17e   : > { %v996_v16 = vpop.f32.mrf.mxu0 }
 0x17f   : > { %v1003_v46 = vadd.f32 %v994_v10, %v925_v34 }
 0x180   : > { %v812_v1 = vpop.f32.mrf.mxu1 }
 0x181   : > { %v864_v23 = vpop.f32.mrf.mxu2 }
 0x184   : > { %v918_v27 = vpop.f32.mrf.mxu3 }
 0x186   : > { %v998_v32 = vpop.f32.mrf.mxu0 }
 0x188   : > { %v1044_v31 = vpop.f32.mrf.mxu1 }
 0x189   : > { %v1056_v37 = vadd.f32 %v1044_v31, %v1001_v35  ;;  %v865_v38 = vpop.f32.mrf.mxu2 }
 0x18b   : > { %1060 = vst.msk [vmem:[#allocation3] sm:$0xf] %vm1059_vm12, %v1056_v37 }
 0x18c   : > { %1062 = vst.msk [vmem:[#allocation3 - $0x2] sm:$0xc0] %vm1061_vm13, %v1056_v37  ;;  %v920_v11 = vpop.f32.mrf.mxu3 }
 0x18e   : > { %v999_v39 = vpop.f32.mrf.mxu0 }
 0x190   : > { %v1046_v41 = vpop.f32.mrf.mxu1 }
 0x191   : > { %v1057_v43 = vadd.f32 %v1046_v41, %v1002_v40 }
 0x193   : > { %1064 = vst.msk [vmem:[#allocation3 + $0x6] sm:$0x3] %vm1063_vm14, %v1057_v43 }
 0x194   : > { %1066 = vst.msk [vmem:[#allocation3 + $0x4] sm:$0xf0] %vm1065_vm15, %v1057_v43  ;;  %v921_v44 = vpop.f32.mrf.mxu3 }
 0x198   : > { %v1049_v25 = vpop.f32.mrf.mxu1 }
 0x199   : > { %v1058_v22 = vadd.f32 %v1049_v25, %v1003_v46 }
 0x19a   : > { %v1776_v50 = vld [vmem:[#allocation3] sm:$0xff] }
 0x19b   : > { %1068 = vst.msk [vmem:[#allocation3 + $0xa] sm:$0x3c] %vm1067_vm1, %v1058_v22  ;;  %v1082_v52 = vsel %vm1081_vm2, %v1776_v50, 0.0 }
 0x1a0   : > { %v1051_v49 = vpop.f32.mrf.mxu1 }
 0x1a2   : > { %v1070_v51 = vld [vmem:[#allocation3 + $0x8] sm:$0xff] }
 0x1a3   : > { %v1083_v53 = vsel %vm1081_vm2, %v1070_v51, 0.0 }
 0x1a4   : > { %v1084_v54 = vadd.f32 %v1083_v53, %v1082_v52 }
 0x1a6   : > { %v1085_v55 = vrot.slane %v1084_v54, 4 }
 0x1a8   : > { %v1086_v56 = vadd.f32 %v1085_v55, %v1084_v54  ;;  %v1053_v57 = vpop.f32.mrf.mxu1 }
 0x1aa   : > { %v1087_v58 = vrot.slane %v1086_v56, 2 }
 0x1ac   : > { %v1088_v59 = vadd.f32 %v1087_v58, %v1086_v56 }
 0x1ae   : > { %v1089_v60 = vrot.slane %v1088_v59, 1 }
 0x1b0   : > { %v1090_v61 = vadd.f32 %v1089_v60, %v1088_v59  ;;  %v1054_v62 = vpop.f32.mrf.mxu1 }
 0x1b2   : > { %v1091_v63 = vmul.f32 0.0625, %v1090_v61 }
 0x1b4   : > { %v1095_v0 = vpack.c.bf16 %v1091_v63, %v1091_v63 }
 0x1b6   : > { %1416 = vmatmul.msk.bf16.vlgmr.msrb.gmra.mxu2 %vm1081_vm2, %v1095_v0 }
 0x1cc   : > { %v1137_v2 = vpop.f32.mrf.mxu3 }
 0x1d4   : > { %v1139_v3 = vpop.f32.mrf.mxu3 }
 0x239   : > { %v1113_v4 = vpop.f32.mrf.mxu2 }
 0x23a   : > { %v1138_v6 = vadd.f32 %v1137_v2, %v1113_v4 }
 0x23c   : > { %v1142_v7 = vadd.f32 %v1141_v5, %v1138_v6 }
 0x23e   : > { %v1143_v10 = vmax.f32 %v1142_v7, 0.0 }
 0x240   : > { %v1144_v12 = vpack.c.bf16 %v1143_v10, %v1143_v10 }
 0x241   : > { %v1115_v13 = vpop.f32.mrf.mxu2 }
 0x242   : > { %1422 = vmatmul.msk.bf16.vlgmr.msrb.gmra.mxu0 %vm1147_vm3, %v1144_v12 }
 0x2bf   : > { %v1166_v15 = vpop.f32.mrf.mxu0 }
 0x2c0   : > { %v1167_v17 = vadd.f32 %v1166_v15, %v1146_v14 }
 0x2c2   : > { %v1423_v16 = vmul.f32 -1.442695, %v1167_v17 }
 0x2c4   : > { %1470 = vpow2.f32 %v1423_v16 }
 0x2c7   : > { %v1168_v18 = vpop.f32.mrf.mxu0 }
 0x2ca   : > { %v1471_v1 = vpop.eup %1470 }
 0x2cb   : > { %v1173_v19 = vadd.f32 1.0, %v1471_v1 }
 0x2cd   : > { %1472 = vrcp.f32 %v1173_v19  ;;  %v1185_v26 = vand.u32 2147483648, %v1173_v19  ;;  %v1183_v29 = vand.u32 2147483647, %v1173_v19  ;;  %vm1179_vm5 = vweird.f32 %v1173_v19 }
 0x2cf   : > { %v1186_v33 = vor.u32 1.1754944e-38, %v1185_v26  ;;  %vm1184_vm7 = vcmp.eq.f32.partialorder %v1183_v29, 8.507059e+37 }
 0x2d3   : > { %v1473_v20 = vpop.eup %1472 }
 0x2d4   : > { %v1175_v23 = vmul.f32 %v1473_v20, %v1173_v19  ;;  %vm1180_vm4 = vweird.f32 %v1473_v20 }
 0x2d5   : > { %vm1181_vm6 = vmor %vm1179_vm5, %vm1180_vm4 }
 0x2d6   : > { %v1176_v24 = vsub.f32 1.0, %v1175_v23 }
 0x2d8   : > { %v1177_v27 = vmul.f32 %v1473_v20, %v1176_v24 }
 0x2da   : > { %v1178_v32 = vadd.f32 %v1473_v20, %v1177_v27 }
 0x2dc   : > { %v1182_v35 = vsel %vm1181_vm6, %v1473_v20, %v1178_v32 }
 0x2dd   : > { %v1187_v31 = vsel %vm1184_vm7, %v1186_v33, %v1182_v35 }
 0x2de   : > { %v1189_v36 = vperm.slane %v1187_v31, 0 }
 0x2e0   : > { %1198 = vrot.lane.b32.xlu0 %v1189_v36, %s1484_s20  ;;  %v1190_v37 = vmul.f32 %v1583_v8, %v1189_v36  ;;  %v1191_v38 = vmul.f32 %v1585_v9, %v1189_v36 }
 0x2e2   : > { %v1192_v30 = vpack.c.bf16 %v1190_v37, %v1190_v37  ;;  %v1193_v11 = vpack.c.bf16 %v1191_v38, %v1191_v38 }
 0x2e4   : > { %1196 = vst.msk [vmem:[%s415_s25 + $0x4] sm:$0xf] %vm1194_vm8, %v1193_v11 }
 0x2e5   : > { %1195 = vst.msk [vmem:[%s415_s25] sm:$0xf] %vm1194_vm8, %v1192_v30 }
 0x352   : > { %v1199_v39 = vpop.permute.xlu0 %1198 }
 0x353   : > { %v1201_v28 = vmul.f32 %v1199_v39, %v1776_v50  ;;  %v1202_v40 = vmul.f32 %v1199_v39, %v1070_v51 }
 0x355   : > { %v1203_v41 = vpack.c.bf16 %v1201_v28, %v1201_v28  ;;  %v1204_v21 = vpack.c.bf16 %v1202_v40, %v1202_v40 }
 0x357   : > { %1209 = vrot.lane.b32.xlu1 %v1204_v21, %s1485_s26  ;;  %1207 = vrot.lane.b32.xlu0 %v1203_v41, %s1485_s26 }
 0x3c9   : > { %v1210_v8 = vpop.permute.xlu1 %1209  ;;  %v1208_v9 = vpop.permute.xlu0 %1207 }
 0x3ca   : > { %1215 = vst.msk [vmem:[%s415_s25 + $0x4] sm:$0xf] %vm1213_vm9, %v1210_v8 }
 0x3cb   : > { %1214 = vst.msk [vmem:[%s415_s25] sm:$0xf] %vm1213_vm9, %v1208_v9 }
 0x3cc PF: > { %s24_s23 = sadd.s32 1, %s1480_s23  }
 0x3cd   : > { %p21_p4 = scmp.ge.s32.totalorder %s24_s23, 4  }
 0x3cf   :  { %23 = sbr.rel (!%p21_p4) target bundleno = 3 (0x3), region = 106 }

// kernel: sedensenet_forward.16
= control target key start
LH: loop header
LB: loop body
LE: loop exit
PB: predicated region body
PF: predicated region fallthrough
CT: control target
= control target key end

     0   :  { %s1297_s23 = smov 0   ;;  %s1436_s0 = inlined_call_operand.vmem [shape: bf16[2,4,10], index: 0, kind: input, shape index: {}]   ;;  %s1437_s1 = inlined_call_operand.vmem [shape: f32[1,10], index: 1, kind: input, shape index: {}]   ;;  %s1438_s2 = inlined_call_operand.vmem [shape: f32[1,10], index: 2, kind: input, shape index: {}]   ;;  %s1439_s3 = inlined_call_operand.vmem [shape: bf16[10,32], index: 3, kind: input, shape index: {}]   ;;  %s1440_s4 = inlined_call_operand.vmem [shape: f32[1,32], index: 4, kind: input, shape index: {}]   ;;  %s1441_s5 = inlined_call_operand.vmem [shape: f32[1,32], index: 5, kind: input, shape index: {}]   ;;  %s1442_s6 = inlined_call_operand.vmem [shape: bf16[9,32,8], index: 6, kind: input, shape index: {}]   ;;  %s1443_s7 = inlined_call_operand.vmem [shape: bf16[10,1], index: 7, kind: input, shape index: {}]   ;;  %s1444_s8 = inlined_call_operand.vmem [shape: bf16[8,1], index: 8, kind: input, shape index: {}]   ;;  %s1445_s9 = inlined_call_operand.<no memory space> [shape: f32[1,1], index: 9, kind: input, shape index: {}]   ;;  %s1446_s10 = inlined_call_operand.vmem [shape: bf16[1,18], index: 10, kind: input, shape index: {}]   ;;  %s1447_s11 = inlined_call_operand.vmem [shape: f32[1,18], index: 11, kind: input, shape index: {}]   ;;  %s1448_s12 = inlined_call_operand.vmem [shape: bf16[2,4,18], index: 12, kind: output, shape index: {}]  }
   0x1   :  { %v17_v0 = vstv %s1445_s9 }
   0x2   :  { %18 = vst [vmem:[#allocation4] sm:$0x1] %v17_v0 }
   0x3 LB: > { %s1042_s24 = sadd.s32 4294967295, %s1223_s23   ;;  %p1046_p0 = scmp.ge.s32.totalorder %s1223_s23, 1  ;;  %s1223_s23 = sphi %s1297_s23, %s24_s23  }
   0x4   : > { %p363_p1 = scmp.lt.s32.totalorder %s1223_s23, 3 }
   0x6   : > { %p364_p2 = pnand %p1046_p0, %p363_p1 }
   0x7   : > { %p403_p3 = scmp.lt.s32.totalorder (!%p364_p2), %s1042_s24, 1  ;;  %s1227_s20 = smov (!%p364_p2), 118  }
   0x8   : > { %367 = sbr.rel (%p364_p2) target bundleno = 903 (0x387), region = 68  ;;  %s1228_s26 = smov (!%p364_p2), 10  }
   0xd   : > { %v1051_v1 = vld [vmem:[%s1439_s3] sm:$0xf]  ;;  %v1177_v2 = vld [vmem:[%s1439_s3] sm:$0x10]  ;;  %vm437_vm0 = vcmask 1044480   ;;  %s1450_s24 = smov (!%p403_p3, %s1042_s24), 1 }
   0xe   : > { %v1052_v3 = vor.u32 %v1177_v2, %v1051_v1  ;;  %s1047_s28 = sshll.u32 %s1450_s24, 1  ;;  %v1209_v5 = vld [vmem:[%s1437_s1] ss:$0 sm:$0xff]  ;;  %vm433_vm1 = vcmask 80896   ;;  %vm465_vm2 = vcmask 261120   ;;  %v1225_v13 = vmov 0.0  }
   0xf   : > { %s406_s13 = scalar_lea.vmem %s1436_s0, %s1047_s28  ;;  %v1210_v8 = vld [vmem:[%s1438_s2] ss:$0 sm:$0xff]  ;;  %466 = vst.msk [vmem:[#allocation2] sm:$0xff] %vm465_vm2, %v1225_v13  ;;  %vm469_vm3 = vcmask 254976   ;;  %v1179_v14 = vld [vmem:[%s1442_s6 + $0x8] sm:$0xff]  ;;  %v1185_v16 = vld [vmem:[%s1442_s6 + $0x38] sm:$0xff]  ;;  %s410_s25 = scalar_lea.vmem %s1448_s12, %s1047_s28 }
  0x10   : > { %v439_v4 = vsel %vm437_vm0, %v1052_v3, 0  ;;  %v412_v6 = vld [vmem:[%s406_s13] sm:$0x3]  ;;  %467 = vst.msk [vmem:[#allocation2 + $0x8] sm:$0xff] %vm465_vm2, %v1225_v13  ;;  %v1183_v15 = vld [vmem:[%s1442_s6 + $0x28] sm:$0xff]  ;;  %v1181_v17 = vld [vmem:[%s1442_s6 + $0x18] sm:$0xff]  ;;  %560 = vmatpush.bf16.msra.mxu2 %v1179_v14 }
  0x11   : > { %448 = vmatpush.bf16.msra.mxu0 %v439_v4  ;;  %v1323_v7 = vunpack.c.l.bf16 %v412_v6  ;;  %468 = vst.msk [vmem:[#allocation2 + $0x10] sm:$0xff] %vm465_vm2, %v1225_v13  ;;  %597 = vmatpush.bf16.msra.mxu3 %v1183_v15  ;;  %v1178_v18 = vld [vmem:[%s1442_s6] sm:$0xff]  ;;  %v1184_v20 = vld [vmem:[%s1442_s6 + $0x30] sm:$0xff]  ;;  %v1187_v23 = vld [vmem:[%s1442_s6 + $0x48] sm:$0xff]  ;;  %vm472_vm4 = vcmask 257026   ;;  %vm572_vm5 = vcmask 1046528  }
  0x12   : > { %470 = vst.msk [vmem:[#allocation2 + $0x18] sm:$0x3] %vm469_vm3, %v1225_v13  ;;  %533 = vmatpush.bf16.msra.mxu1 %v1181_v17  ;;  %v1182_v19 = vld [vmem:[%s1442_s6 + $0x20] sm:$0xff]  ;;  %v1180_v21 = vld [vmem:[%s1442_s6 + $0x10] sm:$0xff]  ;;  %v1189_v24 = vld [vmem:[%s1442_s6 + $0x58] sm:$0xff]  ;;  %vm610_vm6 = vcmask 1045504  }
  0x13   : > { %v418_v9 = vmul.f32 %v1209_v5, %v1323_v7  ;;  %v1211_v22 = vld [vmem:[%s1440_s4] ss:$0 sm:$0xff]  ;;  %v1191_v25 = vld [vmem:[%s1442_s6 + $0x68] sm:$0xff]  ;;  %v1193_v26 = vld [vmem:[%s1442_s6 + $0x78] sm:$0xff]  ;;  %vm499_vm7 = vsmask.f32 7424 }
  0x14   : > { %561 = vmatpush.bf16.msra.mxu2 %v1178_v18  ;;  %v1212_v27 = vld [vmem:[%s1441_s5] ss:$0 sm:$0xff]  ;;  %v1188_v28 = vld [vmem:[%s1442_s6 + $0x50] sm:$0xff]  ;;  %v1195_v0 = vld [vmem:[%s1442_s6 + $0x88] sm:$0xff]  ;;  %vm648_vm8 = vsmask.f32 5376 }
  0x15   : > { %v423_v10 = vadd.f32 %v1210_v8, %v418_v9  ;;  %635 = vmatpush.bf16.msrb.mxu0 %v1185_v16  ;;  %598 = vmatpush.bf16.msra.mxu3 %v1182_v19  ;;  %v1186_v29 = vld [vmem:[%s1442_s6 + $0x40] sm:$0xff]  ;;  %v1192_v36 = vld [vmem:[%s1442_s6 + $0x70] sm:$0xff]  ;;  %vm850_vm9 = vcmask 76800   ;;  %vm877_vm10 = vcmask 1043456   ;;  %vm845_vm11 = vcmask 58368  }
  0x16   : > { %534 = vmatpush.bf16.msra.mxu1 %v1180_v21  ;;  %v1190_v35 = vld [vmem:[%s1442_s6 + $0x60] sm:$0xff]  ;;  %vm847_vm12 = vcmask 62468   ;;  %vm859_vm13 = vcmask 60416   ;;  %vm873_vm14 = vcmask 64512   ;;  %vm928_vm15 = vcmask 1040384  }
  0x17   : > { %v424_v11 = vmax.f32 %v423_v10, 0.0  ;;  %v1194_v4 = vld [vmem:[%s1442_s6 + $0x80] sm:$0xff] }
  0x18   : > { %717 = vmatpush.bf16.msrb.mxu2 %v1189_v24  ;;  %v476_v34 = vld [vmem:[#allocation2 + $0x10] sm:$0xff] }
  0x19   : > { %v425_v12 = vpack.c.bf16 %v424_v11, %v424_v11  ;;  %636 = vmatpush.bf16.msrb.mxu0 %v1184_v20  ;;  %752 = vmatpush.bf16.msrb.mxu3 %v1191_v25  ;;  %v480_v38 = vpack.c.bf16 %v476_v34, %v476_v34  ;;  %v477_v47 = vld [vmem:[#allocation2 + $0x18] sm:$0x3] }
  0x1a   : > { %679 = vmatpush.bf16.msrb.mxu1 %v1187_v23  ;;  %v481_v55 = vpack.c.bf16 %v477_v47, %v477_v47 }
  0x1b   : > { %1053 = vmatmul.msk.bf16.vlgmr.msra.gmra.mxu0 %vm433_vm1, %v425_v12  ;;  %v496_v39 = vunpack.c.l.b16 %v480_v38 }
  0x1c   : > { %718 = vmatpush.bf16.msrb.mxu2 %v1188_v28  ;;  %v766_v63 = vunpack.c.l.b16 %v481_v55  ;;  %v851_v28 = vsel %vm850_vm9, %v1323_v7, 0.0 }
  0x1d   : > { %800 = vmatpush.bf16.msra.mxu0 %v1193_v26  ;;  %753 = vmatpush.bf16.msrb.mxu3 %v1190_v35  ;;  %v498_v44 = vpack.c.b16 %v496_v39, %v496_v39 }
  0x1e   : > { %680 = vmatpush.bf16.msrb.mxu1 %v1186_v29  ;;  %v767_v3 = vpack.c.b16 %v766_v63, %v766_v63 }
  0x1f   : > { %v574_v49 = vrot.slane %v498_v44, 1  ;;  %v612_v50 = vrot.slane %v498_v44, 2  ;;  %v508_v51 = vshll.u32 %v498_v44, 16  ;;  %v652_v5 = vshrl.u32 %v498_v44, 16 }
  0x20   : > { %v775_v8 = vshll.u32 %v767_v3, 16  ;;  %v694_v10 = vrot.slane %v498_v44, 3  ;;  %v814_v24 = vrot.slane %v767_v3, 1 }
  0x21   : > { %801 = vmatpush.bf16.msra.mxu0 %v1192_v36  ;;  %v510_v56 = vrot.slane %v508_v51, 1  ;;  %v654_v12 = vrot.slane %v652_v5, 2  ;;  %v655_v13 = vrot.slane %v508_v51, 3  ;;  %v872_v36 = vld [vmem:[%s1444_s8] sm:$0xf] }
  0x22   : > { %v777_v15 = vrot.slane %v775_v8, 1 }
  0x23   : > { %v656_v21 = vor.u32 %v655_v13, %v654_v12 }
  0x98   : > { %v450_v30 = vpop.f32.mrf.mxu0 }
  0x99   : > { %v458_v31 = vmul.f32 %v1211_v22, %v450_v30 }
  0x9b   : > { %v463_v32 = vadd.f32 %v1212_v27, %v458_v31  ;;  %v852_v31 = vrot.slane %v851_v28, 4 }
  0x9d   : > { %v464_v33 = vmax.f32 %v463_v32, 0.0  ;;  %v853_v34 = vadd.f32 %v852_v31, %v851_v28 }
  0x9f   : > { %471 = vst.msk [vmem:[#allocation2 + $0x5] sm:$0x3] %vm469_vm3, %v464_v33 }
  0xa0   : > { %473 = vst.msk [vmem:[#allocation2 + $0x7] sm:$0xc] %vm472_vm4, %v464_v33  ;;  %v452_v37 = vpop.f32.mrf.mxu0 }
  0xa1   : > { %v1170_v37 = vld [vmem:[%s1443_s7] sm:$0xf] }
  0xa6   : > { %v474_v40 = vld [vmem:[#allocation2] sm:$0xff] }
  0xa7   : > { %v475_v41 = vld [vmem:[#allocation2 + $0x8] sm:$0xff]  ;;  %v478_v42 = vpack.c.bf16 %v474_v40, %v474_v40  ;;  %v1196_v40 = vld [vmem:[%s1443_s7] sm:$0x10] }
  0xa8   : > { %v479_v43 = vpack.c.bf16 %v475_v41, %v475_v41  ;;  %v854_v41 = vrot.slane %v853_v34, 2 }
  0xa9   : > { %v494_v45 = vunpack.c.l.b16 %v478_v42 }
  0xaa   : > { %v495_v46 = vunpack.c.l.b16 %v479_v43  ;;  %v1171_v43 = vor.u32 %v1196_v40, %v1170_v37  ;;  %v855_v44 = vadd.f32 %v854_v41, %v853_v34 }
  0xac   : > { %v497_v48 = vpack.c.b16 %v495_v46, %v494_v45  ;;  %v730_v57 = vpack.c.b16 %v496_v39, %v495_v46  ;;  %v879_v39 = vsel %vm877_vm10, %v872_v36, 0  ;;  %v903_v46 = vsel %vm437_vm0, %v1171_v43, 0 }
  0xae   : > { %1075 = vmatmul.msk.bf16.vlgmr.msra.gmra.mxu2 %vm465_vm2, %v497_v48  ;;  %v573_v52 = vrot.slane %v497_v48, 1  ;;  %v611_v53 = vrot.slane %v497_v48, 2  ;;  %v503_v54 = vshll.u32 %v497_v48, 16  ;;  %v501_v60 = vshrl.u32 %v497_v48, 16 }
  0xaf   : > { %v770_v2 = vshll.u32 %v730_v57, 16  ;;  %v693_v9 = vrot.slane %v497_v48, 3  ;;  %v768_v11 = vshrl.u32 %v730_v57, 16  ;;  %v813_v23 = vrot.slane %v730_v57, 1  ;;  %888 = vmatpush.bf16.msra.mxu2 %v879_v39 }
  0xb0   : > { %v575_v58 = vsel %vm572_vm5, %v573_v52, %v574_v49  ;;  %v613_v59 = vsel %vm610_vm6, %v611_v53, %v612_v50  ;;  %v505_v61 = vrot.slane %v503_v54, 1  ;;  %v649_v16 = vrot.slane %v501_v60, 2 }
  0xb1   : > { %1088 = vmatmul.msk.bf16.vlgmr.msra.gmra.mxu3 %vm465_vm2, %v575_v58  ;;  %1101 = vmatmul.msk.bf16.vlgmr.msrb.gmra.mxu0 %vm465_vm2, %v613_v59  ;;  %v772_v6 = vrot.slane %v770_v2, 1  ;;  %v650_v17 = vrot.slane %v503_v54, 3  ;;  %v695_v18 = vsel %vm437_vm0, %v693_v9, %v694_v10  ;;  %v815_v25 = vsel %vm572_vm5, %v813_v23, %v814_v24 }
  0xb2   : > { %v506_v62 = vor.u32 %v505_v61, %v501_v60  ;;  %912 = vmatpush.bf16.msra.mxu3 %v903_v46  ;;  %v856_v48 = vrot.slane %v855_v44, 1  ;;  %vm924_vm0 = vcmask 7168   ;;  %vm969_vm5 = vcmask 74752  }
  0xb3   : > { %v773_v14 = vor.u32 %v772_v6, %v768_v11  ;;  %v651_v20 = vor.u32 %v650_v17, %v649_v16  ;;  %vm979_vm6 = vcmask 1041408  }
  0xb4   : > { %v511_v1 = vsel %vm499_vm7, %v506_v62, %v510_v56  ;;  %v857_v50 = vadd.f32 %v856_v48, %v855_v44 }
  0xb5   : > { %1066 = vmatmul.msk.bf16.vlgmr.msra.gmra.mxu1 %vm465_vm2, %v511_v1  ;;  %v778_v19 = vsel %vm499_vm7, %v773_v14, %v777_v15  ;;  %v657_v22 = vsel %vm648_vm8, %v651_v20, %v656_v21  ;;  %v922_v14 = vld [vmem:[%s1446_s10] sm:$0x1]  ;;  %v1226_v15 = vmov 0   ;;  %v918_v21 = vld [vmem:[#allocation4] sm:$0x1]  ;;  %vm987_vm7 = vcmask 140368  }
  0xb6   : > { %837 = vmatpush.bf16.msra.mxu1 %v1195_v0  ;;  %v858_v53 = vmul.f32 0.25, %v857_v50  ;;  %v930_v16 = vsel %vm928_vm15, 65535, %v1226_v15 }
  0xb7   : > { %v932_v17 = vand.u32 %v930_v16, %v922_v14 }
  0xb8   : > { %v868_v56 = vpack.c.bf16 %v858_v53, %v858_v53 }
  0xb9   : > { %941 = vmatpush.bf16.msrb.mxu0 %v932_v17 }
  0xba   : > { %838 = vmatpush.bf16.msra.mxu1 %v1194_v4 }
  0xbe   : > { %1127 = vmatmul.msk.bf16.vlgmr.msrb.gmra.mxu2 %vm465_vm2, %v695_v18 }
  0xc1   : > { %1140 = vmatmul.msk.bf16.vlgmr.msrb.gmra.mxu3 %vm465_vm2, %v730_v57  ;;  %1153 = vmatmul.msk.bf16.vlgmr.msra.gmra.mxu0 %vm465_vm2, %v778_v19 }
  0xc5   : > { %1114 = vmatmul.msk.bf16.vlgmr.msrb.gmra.mxu1 %vm465_vm2, %v657_v22 }
  0xd1   : > { %1172 = vmatmul.msk.bf16.vlgmr.msra.gmra.mxu3 %vm433_vm1, %v868_v56 }
  0xd5   : > { %1166 = vmatmul.msk.bf16.vlgmr.msra.gmra.mxu1 %vm465_vm2, %v815_v25 }
 0x12e   : > { %v638_v26 = vpop.f32.mrf.mxu0 }
 0x131   : > { %v563_v27 = vpop.f32.mrf.mxu2 }
 0x132   : > { %v536_v29 = vpop.f32.mrf.mxu1 }
 0x133   : > { %v564_v38 = vadd.f32 %v563_v27, %v536_v29  ;;  %v923_v27 = vld [vmem:[%s1447_s11] sm:$0x1] }
 0x134   : > { %v600_v30 = vpop.f32.mrf.mxu3 }
 0x135   : > { %v604_v47 = vadd.f32 %v600_v30, %v564_v38 }
 0x136   : > { %v640_v32 = vpop.f32.mrf.mxu0 }
 0x137   : > { %v642_v52 = vadd.f32 %v638_v26, %v604_v47 }
 0x139   : > { %v565_v33 = vpop.f32.mrf.mxu2 }
 0x13a   : > { %v538_v35 = vpop.f32.mrf.mxu1 }
 0x13c   : > { %v602_v42 = vpop.f32.mrf.mxu3 }
 0x13e   : > { %v803_v45 = vpop.f32.mrf.mxu0 }
 0x141   : > { %v720_v49 = vpop.f32.mrf.mxu2 }
 0x142   : > { %v682_v51 = vpop.f32.mrf.mxu1 }
 0x143   : > { %v686_v55 = vadd.f32 %v682_v51, %v642_v52 }
 0x144   : > { %v755_v54 = vpop.f32.mrf.mxu3 }
 0x145   : > { %v724_v58 = vadd.f32 %v720_v49, %v686_v55 }
 0x146   : > { %v805_v57 = vpop.f32.mrf.mxu0 }
 0x147   : > { %v759_v62 = vadd.f32 %v755_v54, %v724_v58 }
 0x149   : > { %v722_v59 = vpop.f32.mrf.mxu2  ;;  %v807_v63 = vadd.f32 %v803_v45, %v759_v62 }
 0x14a   : > { %v684_v60 = vpop.f32.mrf.mxu1 }
 0x14c   : > { %v757_v61 = vpop.f32.mrf.mxu3 }
 0x152   : > { %v840_v0 = vpop.f32.mrf.mxu1 }
 0x153   : > { %v844_v1 = vadd.f32 %v840_v0, %v807_v63 }
 0x154   : > { %v914_v18 = vpop.f32.mrf.mxu3 }
 0x155   : > { %846 = vst.msk [vmem:[#allocation3] sm:$0x3] %vm845_vm11, %v844_v1 }
 0x156   : > { %848 = vst.msk [vmem:[#allocation3 - $0x2] sm:$0x30] %vm847_vm12, %v844_v1 }
 0x15a   : > { %v842_v2 = vpop.f32.mrf.mxu1 }
 0x15c   : > { %v916_v19 = vpop.f32.mrf.mxu3 }
 0x15d   : > { %v849_v3 = vld [vmem:[#allocation3] sm:$0xf] }
 0x15e   : > { %v860_v4 = vsel %vm859_vm13, %v849_v3, 0.0 }
 0x15f   : > { %v861_v5 = vrot.slane %v860_v4, 4 }
 0x161   : > { %v862_v6 = vadd.f32 %v861_v5, %v860_v4 }
 0x163   : > { %v863_v8 = vrot.slane %v862_v6, 2 }
 0x165   : > { %v864_v9 = vadd.f32 %v863_v8, %v862_v6 }
 0x167   : > { %v865_v10 = vrot.slane %v864_v9, 1 }
 0x169   : > { %v866_v11 = vadd.f32 %v865_v10, %v864_v9 }
 0x16b   : > { %v867_v12 = vmul.f32 0.25, %v866_v11 }
 0x16d   : > { %v871_v13 = vpack.c.bf16 %v867_v12, %v867_v12 }
 0x16f   : > { %1167 = vmatmul.msk.bf16.vlgmr.msra.gmra.mxu2 %vm873_vm14, %v871_v13 }
 0x1f2   : > { %v890_v20 = vpop.f32.mrf.mxu2 }
 0x1f3   : > { %v915_v22 = vadd.f32 %v914_v18, %v890_v20 }
 0x1f5   : > { %v919_v23 = vadd.f32 %v918_v21, %v915_v22 }
 0x1f7   : > { %v920_v24 = vmax.f32 %v919_v23, 0.0 }
 0x1f9   : > { %v921_v25 = vpack.c.bf16 %v920_v24, %v920_v24 }
 0x1fa   : > { %v892_v26 = vpop.f32.mrf.mxu2 }
 0x1fb   : > { %1173 = vmatmul.msk.bf16.vlgmr.msrb.gmra.mxu0 %vm924_vm0, %v921_v25 }
 0x278   : > { %v943_v28 = vpop.f32.mrf.mxu0 }
 0x279   : > { %v944_v29 = vadd.f32 %v943_v28, %v923_v27 }
 0x27b   : > { %v1174_v30 = vmul.f32 -1.442695, %v944_v29 }
 0x27d   : > { %1213 = vpow2.f32 %v1174_v30 }
 0x280   : > { %v945_v31 = vpop.f32.mrf.mxu0 }
 0x283   : > { %v1214_v32 = vpop.eup %1213 }
 0x284   : > { %v950_v33 = vadd.f32 1.0, %v1214_v32 }
 0x286   : > { %1215 = vrcp.f32 %v950_v33  ;;  %v962_v37 = vand.u32 2147483648, %v950_v33  ;;  %v960_v39 = vand.u32 2147483647, %v950_v33  ;;  %vm956_vm2 = vweird.f32 %v950_v33 }
 0x288   : > { %v963_v41 = vor.u32 1.1754944e-38, %v962_v37  ;;  %vm961_vm4 = vcmp.eq.f32.partialorder %v960_v39, 8.507059e+37 }
 0x28c   : > { %v1216_v34 = vpop.eup %1215 }
 0x28d   : > { %v952_v35 = vmul.f32 %v1216_v34, %v950_v33  ;;  %vm957_vm1 = vweird.f32 %v1216_v34 }
 0x28e   : > { %vm958_vm3 = vmor %vm956_vm2, %vm957_vm1 }
 0x28f   : > { %v953_v36 = vsub.f32 1.0, %v952_v35 }
 0x291   : > { %v954_v38 = vmul.f32 %v1216_v34, %v953_v36 }
 0x293   : > { %v955_v40 = vadd.f32 %v1216_v34, %v954_v38 }
 0x295   : > { %v959_v42 = vsel %vm958_vm3, %v1216_v34, %v955_v40 }
 0x296   : > { %v964_v43 = vsel %vm961_vm4, %v963_v41, %v959_v42 }
 0x297   : > { %v966_v44 = vperm.slane %v964_v43, 0 }
 0x299   : > { %972 = vrot.lane.b32.xlu0 %v966_v44, %s1227_s20  ;;  %v967_v45 = vmul.f32 %v966_v44, %v1323_v7 }
 0x29b   : > { %v968_v46 = vpack.c.bf16 %v967_v45, %v967_v45 }
 0x29d   : > { %970 = vst.msk [vmem:[%s410_s25] sm:$0x3] %vm969_vm5, %v968_v46 }
 0x30b   : > { %v973_v47 = vpop.permute.xlu0 %972 }
 0x30c   : > { %v975_v48 = vmul.f32 %v973_v47, %v849_v3 }
 0x30e   : > { %v976_v49 = vpack.c.bf16 %v975_v48, %v975_v48 }
 0x310   : > { %v978_v50 = vrot.slane %v976_v49, 2 }
 0x312   : > { %v982_v51 = vsel %vm979_vm6, %v976_v49, %v978_v50 }
 0x313   : > { %984 = vrot.lane.b32.xlu0 %v982_v51, %s1228_s26 }
 0x385   : > { %v985_v52 = vpop.permute.xlu0 %984 }
 0x386   : > { %988 = vst.msk [vmem:[%s410_s25] sm:$0x3] %vm987_vm7, %v985_v52 }
 0x387 PF: > { %s24_s23 = sadd.s32 1, %s1223_s23  }
 0x388   : > { %p21_p4 = scmp.ge.s32.totalorder %s24_s23, 4  }
 0x38a   :  { %23 = sbr.rel (!%p21_p4) target bundleno = 3 (0x3), region = 106 }

// kernel: sedensenet_forward.17
= control target key start
LH: loop header
LB: loop body
LE: loop exit
PB: predicated region body
PF: predicated region fallthrough
CT: control target
= control target key end

     0   :  { %s361_s15 = smov 0   ;;  %s394_s0 = inlined_call_operand.vmem [shape: bf16[2,2,36], index: 0, kind: input, shape index: {}]   ;;  %s395_s1 = inlined_call_operand.vmem [shape: f32[1,36], index: 1, kind: input, shape index: {}]   ;;  %s396_s2 = inlined_call_operand.vmem [shape: f32[1,36], index: 2, kind: input, shape index: {}]   ;;  %s397_s3 = inlined_call_operand.vmem [shape: bf16[18,9], index: 3, kind: input, shape index: {}]   ;;  %s398_s4 = inlined_call_operand.vmem [shape: bf16[2,1,9], index: 4, kind: output, shape index: {}]  }
   0x1 LB: > { %s302_s16 = sadd.s32 4294967295, %s333_s15   ;;  %p306_p0 = scmp.ge.s32.totalorder %s333_s15, 1  ;;  %s333_s15 = sphi %s361_s15, %s14_s15  }
   0x2   : > { %p160_p1 = scmp.lt.s32.totalorder %s333_s15, 3 }
   0x4   : > { %p161_p2 = pnand %p306_p0, %p160_p1 }
   0x5   : > { %p182_p3 = scmp.lt.s32.totalorder (!%p161_p2), %s302_s16, 1  ;;  %s335_s24 = smov (!%p161_p2), 110  }
   0x6   : > { %164 = sbr.rel (%p161_p2) target bundleno = 291 (0x123), region = 36 }
   0xb   : > { %s400_s16 = smov (!%p182_p3, %s302_s16), 1  ;;  %v325_v0 = vld [vmem:[%s395_s1] ss:$0 sm:$0xff]  ;;  %v220_v7 = vld [vmem:[%s397_s3 + $0x8] sm:$0x1]  ;;  %vm234_vm0 = vcmask 1040384  }
   0xc   : > { %s184_s19 = scalar_lea.vmem %s394_s0, %s400_s16  ;;  %v326_v3 = vld [vmem:[%s396_s2] ss:$0 sm:$0xff]  ;;  %v226_v8 = vunpack.c.l.b16 %v220_v7  ;;  %vm214_vm1 = vcmask 139264   ;;  %vm230_vm2 = vcmask 146432   ;;  %s187_s5 = scalar_lea.vmem %s398_s4, %s400_s16  ;;  %vm252_vm3 = vcmask 65536  }
   0xd   : > { %v189_v1 = vld [vmem:[%s184_s19] sm:$0x1]  ;;  %vm253_vm4 = vsmask.f32 256 }
   0xe   : > { %v190_v2 = vunpack.c.l.bf16 %v189_v1  ;;  %v228_v9 = vpack.c.b16 %v226_v8, %v226_v8  ;;  %v315_v11 = vld [vmem:[%s397_s3] sm:$0xff]  ;;  %vm254_vm5 = vmand %vm252_vm3, %vm253_vm4 }
   0xf   : > { %v255_v21 = vld [vmem:[%s187_s5] sm:$0x1] }
  0x10   : > { %v195_v4 = vmul.f32 %v325_v0, %v190_v2  ;;  %v236_v10 = vsel %vm234_vm0, %v228_v9, 0 }
  0x11   : > { %244 = vmatpush.bf16.msra.mxu0 %v236_v10 }
  0x12   : > { %v200_v5 = vadd.f32 %v326_v3, %v195_v4 }
  0x14   : > { %v201_v6 = vmax.f32 %v200_v5, 0.0 }
  0x15   : > { %245 = vmatpush.bf16.msra.mxu0 %v315_v11 }
  0x16   : > { %203 = vrot.lane.b32.xlu0 %v201_v6, %s335_s24 }
  0x88   : > { %v204_v12 = vpop.permute.xlu0 %203 }
  0x89   : > { %v206_v13 = vadd.f32 %v204_v12, %v201_v6 }
  0x8b   : > { %v207_v14 = vmul.f32 0.5, %v206_v13 }
  0x8d   : > { %v307_v15 = vrot.slane %v207_v14, 9 }
  0x8f   : > { %v212_v16 = vadd.f32 %v307_v15, %v207_v14 }
  0x91   : > { %v213_v17 = vmul.f32 0.5, %v212_v16 }
  0x93   : > { %215 = vst.msk [vmem:[#allocation2] sm:$0x1] %vm214_vm1, %v213_v17 }
  0x9a   : > { %v216_v18 = vld [vmem:[#allocation2] sm:$0x1] }
  0x9b   : > { %v217_v19 = vpack.c.bf16 %v216_v18, %v216_v18 }
  0x9d   : > { %312 = vmatmul.msk.bf16.vlgmr.msra.gmra.mxu0 %vm230_vm2, %v217_v19 }
 0x11a   : > { %v247_v20 = vpop.f32.mrf.mxu0 }
 0x11b   : > { %v251_v22 = vpack.c.bf16 %v247_v20, %v247_v20 }
 0x11d   : > { %v256_v23 = vsel %vm254_vm5, %v251_v22, %v255_v21 }
 0x11e   : > { %257 = vst [vmem:[%s187_s5] sm:$0x1] %v256_v23 }
 0x122   : > { %v249_v24 = vpop.f32.mrf.mxu0 }
 0x123 PF: > { %s14_s15 = sadd.s32 1, %s333_s15  }
 0x124   : > { %p11_p4 = scmp.ge.s32.totalorder %s14_s15, 4  }
 0x126   :  { %13 = sbr.rel (!%p11_p4) target bundleno = 1 (0x1), region = 66 }

// kernel: sedensenet_forward.19
= control target key start
LH: loop header
LB: loop body
LE: loop exit
PB: predicated region body
PF: predicated region fallthrough
CT: control target
= control target key end

     0   :  { %vm74_vm0 = vcmask 1040384   ;;  %v148_v2 = vmov 0   ;;  %s204_s0 = inlined_call_operand.vmem [shape: bf16[2,1,17], index: 0, kind: input, shape index: {}]   ;;  %s205_s1 = inlined_call_operand.vmem [shape: f32[1,17], index: 1, kind: input, shape index: {}]   ;;  %s206_s2 = inlined_call_operand.vmem [shape: f32[1,17], index: 2, kind: input, shape index: {}]   ;;  %s207_s3 = inlined_call_operand.vmem [shape: bf16[17,10], index: 3, kind: input, shape index: {}]   ;;  %s208_s4 = inlined_call_operand.vmem [shape: f32[1,10], index: 4, kind: input, shape index: {}]   ;;  %s209_s5 = inlined_call_operand.hbm [shape: f32[2,10], index: 5, kind: output, shape index: {}]  }
   0x1   :  { %v48_v0 = vld [vmem:[%s207_s3 + $0x8] sm:$0x1]  ;;  %v76_v3 = vsel %vm74_vm0, 65535, %v148_v2  ;;  %v22_v4 = vld [vmem:[%s204_s0] sm:$0x1] }
   0x2   :  { %v66_v1 = vunpack.c.l.b16 %v48_v0  ;;  %v23_v5 = vld [vmem:[%s204_s0 + $0x1] sm:$0x1]  ;;  %v24_v6 = vunpack.c.l.bf16 %v22_v4  ;;  %v119_v8 = vld [vmem:[%s205_s1] ss:$0 sm:$0xff] }
   0x3   :  { %v25_v7 = vunpack.c.l.bf16 %v23_v5  ;;  %v120_v10 = vld [vmem:[%s206_s2] ss:$0 sm:$0xff]  ;;  %v31_v11 = vrot.slane %v119_v8, 1 }
   0x4   :  { %v68_v9 = vpack.c.b16 %v66_v1, %v66_v1  ;;  %v34_v12 = vmul.f32 %v119_v8, %v24_v6 }
   0x5   :  { %10 = vsyncpa [#allocation3], 0  ;;  %v39_v14 = vrot.slane %v120_v10, 1  ;;  %v35_v15 = vmul.f32 %v31_v11, %v25_v7  ;;  %v116_v17 = vld [vmem:[%s207_s3] sm:$0xff]  ;;  %vm58_vm1 = vcmask 1041409   ;;  %vm70_vm2 = vcmask 138240  }
   0x6   :  { %v78_v13 = vand.u32 %v76_v3, %v68_v9  ;;  %v42_v16 = vadd.f32 %v120_v10, %v34_v12  ;;  %v121_v26 = vld [vmem:[%s208_s4] ss:$0 sm:$0xff]  ;;  %s149_s29 = smov [#allocation2]   ;;  %s102_s7 = sshll.u32 %s209_s5, 4  ;;  %vm93_vm3 = vcmask 74752   ;;  %s103_s7 = int_to_ptr.hbm [resolvable:$true] %s102_s7 }
   0x7   :  { %v43_v18 = vadd.f32 %v39_v14, %v35_v15  ;;  %s100_s30 = sshll.u32 %s149_s29, 4  ;;  %s101_s30 = int_to_ptr.vmem [resolvable:$true] %s100_s30 }
   0x8   :  { %86 = vmatpush.bf16.msra.mxu0 %v78_v13  ;;  %v44_v19 = vpack.c.bf16 %v42_v16, %v42_v16 }
   0x9   :  { %v45_v20 = vpack.c.bf16 %v43_v18, %v43_v18 }
   0xa   :  { %v55_v21 = vunpack.c.l.b16 %v44_v19 }
   0xb   :  { %v56_v22 = vunpack.c.l.b16 %v45_v20 }
   0xc   :  { %87 = vmatpush.bf16.msra.mxu0 %v116_v17 }
   0xd   :  { %v57_v23 = vrot.slane %v56_v22, 7 }
   0xf   :  { %v59_v24 = vsel %vm58_vm1, %v57_v23, %v55_v21 }
  0x10   :  { %v60_v25 = vpack.c.b16 %v59_v24, %v59_v24 }
  0x12   :  { %115 = vmatmul.msk.bf16.vlgmr.msra.gmra.mxu0 %vm70_vm2, %v60_v25 }
  0x8f   :  { %v89_v27 = vpop.f32.mrf.mxu0 }
  0x90   :  { %v90_v28 = vadd.f32 %v121_v26, %v89_v27 }
  0x92   :  { %94 = vst.msk [vmem:[#allocation2] sm:$0x3] %vm93_vm3, %v90_v28 }
  0x93   :  { %105 = dma.vmem_to_hbm [thread:$0]  %s101_s30, 32, %s103_s7, [#allocation3]  }
  0x97   :  { %v91_v29 = vpop.f32.mrf.mxu0 }
  0x98   :  { %146 = dma.done.wait [#allocation3], 32  }
  0x99   :  { %147 = vsyncadd [#allocation3], 4294967264 }
  0x9a   :  { %110 = vsyncpa [#allocation3], 1 }

// kernel: sedensenet_forward.18
= control target key start
LH: loop header
LB: loop body
LE: loop exit
PB: predicated region body
PF: predicated region fallthrough
CT: control target
= control target key end

     0   :  { %s1217_s23 = smov 0   ;;  %s1356_s0 = inlined_call_operand.vmem [shape: bf16[2,1,9], index: 0, kind: input, shape index: {}]   ;;  %s1357_s1 = inlined_call_operand.vmem [shape: f32[1,9], index: 1, kind: input, shape index: {}]   ;;  %s1358_s2 = inlined_call_operand.vmem [shape: f32[1,9], index: 2, kind: input, shape index: {}]   ;;  %s1359_s3 = inlined_call_operand.vmem [shape: bf16[9,32], index: 3, kind: input, shape index: {}]   ;;  %s1360_s4 = inlined_call_operand.vmem [shape: f32[1,32], index: 4, kind: input, shape index: {}]   ;;  %s1361_s5 = inlined_call_operand.vmem [shape: f32[1,32], index: 5, kind: input, shape index: {}]   ;;  %s1362_s6 = inlined_call_operand.vmem [shape: bf16[9,32,8], index: 6, kind: input, shape index: {}]   ;;  %s1363_s7 = inlined_call_operand.vmem [shape: bf16[9,1], index: 7, kind: input, shape index: {}]   ;;  %s1364_s8 = inlined_call_operand.vmem [shape: bf16[8,1], index: 8, kind: input, shape index: {}]   ;;  %s1365_s9 = inlined_call_operand.<no memory space> [shape: f32[1,1], index: 9, kind: input, shape index: {}]   ;;  %s1366_s10 = inlined_call_operand.vmem [shape: bf16[1,17], index: 10, kind: input, shape index: {}]   ;;  %s1367_s11 = inlined_call_operand.vmem [shape: f32[1,17], index: 11, kind: input, shape index: {}]   ;;  %s1368_s12 = inlined_call_operand.vmem [shape: bf16[2,1,17], index: 12, kind: output, shape index: {}]  }
   0x1   :  { %v17_v0 = vstv %s1365_s9 }
   0x2   :  { %18 = vst [vmem:[#allocation4] sm:$0x1] %v17_v0 }
   0x3 LB: > { %s966_s24 = sadd.s32 4294967295, %s1142_s23   ;;  %p970_p0 = scmp.ge.s32.totalorder %s1142_s23, 1  ;;  %s1142_s23 = sphi %s1217_s23, %s24_s23  }
   0x4   : > { %p362_p1 = scmp.lt.s32.totalorder %s1142_s23, 3 }
   0x6   : > { %p363_p2 = pnand %p970_p0, %p362_p1 }
   0x7   : > { %p400_p3 = scmp.lt.s32.totalorder (!%p363_p2), %s966_s24, 1  ;;  %s1147_s19 = smov (!%p363_p2), 119  }
   0x8   : > { %366 = sbr.rel (%p363_p2) target bundleno = 884 (0x374), region = 68 }
   0xd   : > { %v973_v1 = vld [vmem:[%s1359_s3] sm:$0xf]  ;;  %v1099_v2 = vld [vmem:[%s1359_s3] sm:$0x10]  ;;  %vm426_vm0 = vcmask 1043456   ;;  %vm427_vm1 = vcmask 1044480  }
   0xe   : > { %v974_v3 = vor.u32 %v1099_v2, %v973_v1  ;;  %v1144_v4 = vmov 65535   ;;  %s1370_s24 = smov (!%p400_p3, %s966_s24), 1  ;;  %v409_v9 = vld [vmem:[%s1357_s1] sm:$0x1]  ;;  %vm422_vm2 = vcmask 72704   ;;  %vm451_vm3 = vcmask 261120  }
   0xf   : > { %v428_v5 = vsel %vm426_vm0, 4294967295, %v1144_v4  ;;  %s402_s30 = scalar_lea.vmem %s1356_s0, %s1370_s24  ;;  %v411_v11 = vld [vmem:[%s1358_s2] sm:$0x1]  ;;  %v1145_v16 = vmov 0.0   ;;  %vm454_vm4 = vcmask 253952   ;;  %v1101_v17 = vld [vmem:[%s1362_s6 + $0x8] sm:$0xff]  ;;  %s405_s18 = scalar_lea.vmem %s1368_s12, %s1370_s24 }
  0x10   : > { %v1232_v6 = vsel %vm427_vm1, %v428_v5, 0  ;;  %v407_v8 = vld [vmem:[%s402_s30] sm:$0x1]  ;;  %452 = vst.msk [vmem:[#allocation2] sm:$0xff] %vm451_vm3, %v1145_v16  ;;  %v1105_v18 = vld [vmem:[%s1362_s6 + $0x28] sm:$0xff]  ;;  %v1103_v19 = vld [vmem:[%s1362_s6 + $0x18] sm:$0xff]  ;;  %532 = vmatpush.bf16.msra.mxu2 %v1101_v17 }
  0x11   : > { %v431_v7 = vand.u32 %v974_v3, %v1232_v6  ;;  %v1244_v10 = vunpack.c.l.bf16 %v407_v8  ;;  %453 = vst.msk [vmem:[#allocation2 + $0x8] sm:$0xff] %vm451_vm3, %v1145_v16  ;;  %v1107_v20 = vld [vmem:[%s1362_s6 + $0x38] sm:$0xff]  ;;  %566 = vmatpush.bf16.msra.mxu3 %v1105_v18  ;;  %v1100_v21 = vld [vmem:[%s1362_s6] sm:$0xff]  ;;  %505 = vmatpush.bf16.msra.mxu1 %v1103_v19  ;;  %v1102_v23 = vld [vmem:[%s1362_s6 + $0x10] sm:$0xff]  ;;  %vm792_vm5 = vcmask 57344   ;;  %vm802_vm6 = vcmask 64512  }
  0x12   : > { %455 = vst.msk [vmem:[#allocation2 + $0x10] sm:$0x1] %vm454_vm4, %v1145_v16  ;;  %v1104_v22 = vld [vmem:[%s1362_s6 + $0x20] sm:$0xff]  ;;  %v1106_v24 = vld [vmem:[%s1362_s6 + $0x30] sm:$0xff]  ;;  %v1109_v25 = vld [vmem:[%s1362_s6 + $0x48] sm:$0xff]  ;;  %vm856_vm7 = vcmask 1040384  }
  0x13   : > { %440 = vmatpush.bf16.msra.mxu0 %v431_v7  ;;  %v410_v12 = vmul.f32 %v409_v9, %v1244_v10  ;;  %v1111_v26 = vld [vmem:[%s1362_s6 + $0x58] sm:$0xff]  ;;  %v1113_v27 = vld [vmem:[%s1362_s6 + $0x68] sm:$0xff]  ;;  %v1110_v28 = vld [vmem:[%s1362_s6 + $0x50] sm:$0xff]  ;;  %v797_v16 = vpack.c.bf16 %v1244_v10, %v1244_v10  ;;  %vm852_vm8 = vcmask 7168   ;;  %vm896_vm13 = vcmask 65536   ;;  %s1148_s24 = smov 9  }
  0x14   : > { %533 = vmatpush.bf16.msra.mxu2 %v1100_v21  ;;  %v1108_v29 = vld [vmem:[%s1362_s6 + $0x40] sm:$0xff]  ;;  %v1115_v30 = vld [vmem:[%s1362_s6 + $0x78] sm:$0xff]  ;;  %v1114_v38 = vld [vmem:[%s1362_s6 + $0x70] sm:$0xff]  ;;  %vm897_vm14 = vsmask.f32 256 }
  0x15   : > { %v412_v13 = vadd.f32 %v411_v11, %v410_v12  ;;  %567 = vmatpush.bf16.msra.mxu3 %v1104_v22  ;;  %506 = vmatpush.bf16.msra.mxu1 %v1102_v23  ;;  %v446_v31 = vld [vmem:[%s1360_s4] sm:$0x1]  ;;  %v1118_v43 = vld [vmem:[%s1363_s7] sm:$0x10]  ;;  %v1117_v57 = vld [vmem:[%s1362_s6 + $0x88] sm:$0xff] }
  0x16   : > { %v1112_v32 = vld [vmem:[%s1362_s6 + $0x60] sm:$0xff]  ;;  %vm898_vm15 = vmand %vm896_vm13, %vm897_vm14 }
  0x17   : > { %v413_v14 = vmax.f32 %v412_v13, 0.0  ;;  %603 = vmatpush.bf16.msrb.mxu0 %v1107_v20  ;;  %v448_v34 = vld [vmem:[%s1361_s5] sm:$0x1] }
  0x18   : > { %675 = vmatpush.bf16.msrb.mxu2 %v1111_v26  ;;  %v458_v40 = vld [vmem:[#allocation2 + $0x8] sm:$0xff]  ;;  %v1092_v42 = vld [vmem:[%s1363_s7] sm:$0xf] }
  0x19   : > { %v414_v15 = vpack.c.bf16 %v413_v14, %v413_v14  ;;  %638 = vmatpush.bf16.msrb.mxu1 %v1109_v25  ;;  %710 = vmatpush.bf16.msrb.mxu3 %v1113_v27  ;;  %v461_v41 = vpack.c.bf16 %v458_v40, %v458_v40  ;;  %v1093_v47 = vor.u32 %v1118_v43, %v1092_v42  ;;  %v1116_v60 = vld [vmem:[%s1362_s6 + $0x80] sm:$0xff]  ;;  %v459_v5 = vld [vmem:[#allocation2 + $0x10] sm:$0x1]  ;;  %v1146_v42 = vmov 0  }
  0x1a   : > { %v801_v9 = vld [vmem:[%s1364_s8] sm:$0xf]  ;;  %v858_v43 = vsel %vm856_vm7, 65535, %v1146_v42 }
  0x1b   : > { %975 = vmatmul.msk.bf16.vlgmr.msra.gmra.mxu0 %vm422_vm2, %v414_v15  ;;  %v475_v46 = vunpack.c.l.b16 %v461_v41  ;;  %v831_v50 = vand.u32 %v1093_v47, %v1232_v6  ;;  %v462_v6 = vpack.c.bf16 %v459_v5, %v459_v5  ;;  %v807_v11 = vsel %vm426_vm0, %v801_v9, 0  ;;  %v850_v41 = vld [vmem:[%s1366_s10] sm:$0x1] }
  0x1c   : > { %604 = vmatpush.bf16.msrb.mxu0 %v1106_v24  ;;  %676 = vmatpush.bf16.msrb.mxu2 %v1110_v28  ;;  %vm917_vm0 = vcmask 131144  }
  0x1d   : > { %639 = vmatpush.bf16.msrb.mxu1 %v1108_v29  ;;  %711 = vmatpush.bf16.msrb.mxu3 %v1112_v32  ;;  %v761_v7 = vunpack.c.l.b16 %v462_v6  ;;  %vm918_vm1 = vmand %vm917_vm0, %vm897_vm14 }
  0x1f   : > { %v762_v8 = vpack.c.b16 %v761_v7, %v475_v46 }
  0x20   : > { %747 = vmatpush.bf16.msra.mxu0 %v1115_v30 }
  0x24   : > { %748 = vmatpush.bf16.msra.mxu0 %v1114_v38 }
  0x98   : > { %v442_v33 = vpop.f32.mrf.mxu0 }
  0x99   : > { %v447_v35 = vmul.f32 %v446_v31, %v442_v33 }
  0x9b   : > { %v449_v36 = vadd.f32 %v448_v34, %v447_v35 }
  0x9d   : > { %v450_v37 = vmax.f32 %v449_v36, 0.0 }
  0x9f   : > { %456 = vst.msk [vmem:[#allocation2 + $0x4] sm:$0x1] %vm454_vm4, %v450_v37 }
  0xa0   : > { %v444_v39 = vpop.f32.mrf.mxu0 }
  0xa6   : > { %v457_v44 = vld [vmem:[#allocation2] sm:$0xff] }
  0xa7   : > { %v460_v45 = vpack.c.bf16 %v457_v44, %v457_v44  ;;  %v860_v44 = vand.u32 %v858_v43, %v850_v41 }
  0xa9   : > { %v474_v48 = vunpack.c.l.b16 %v460_v45 }
  0xab   : > { %v476_v49 = vpack.c.b16 %v475_v46, %v474_v48  ;;  %v846_v48 = vld [vmem:[#allocation4] sm:$0x1] }
  0xad   : > { %997 = vmatmul.msk.bf16.vlgmr.msra.gmra.mxu2 %vm451_vm3, %v476_v49  ;;  %v544_v51 = vrot.slane %v476_v49, 1  ;;  %v478_v52 = vshrl.u32 %v476_v49, 16  ;;  %v480_v53 = vshll.u32 %v476_v49, 16  ;;  %v688_v0 = vrot.slane %v476_v49, 3 }
  0xae   : > { %v616_v3 = vrot.slane %v476_v49, 2  ;;  %816 = vmatpush.bf16.msra.mxu2 %v807_v11 }
  0xaf   : > { %1010 = vmatmul.msk.bf16.vlgmr.msra.gmra.mxu3 %vm451_vm3, %v544_v51  ;;  %v482_v54 = vrot.slane %v480_v53, 1  ;;  %v579_v55 = vrot.slane %v478_v52, 1  ;;  %v580_v56 = vrot.slane %v480_v53, 2  ;;  %v651_v61 = vrot.slane %v478_v52, 2 }
  0xb0   : > { %840 = vmatpush.bf16.msra.mxu3 %v831_v50  ;;  %v652_v62 = vrot.slane %v480_v53, 3  ;;  %v723_v1 = vrot.slane %v478_v52, 3  ;;  %v724_v2 = vrot.slane %v480_v53, 4 }
  0xb1   : > { %v483_v58 = vor.u32 %v482_v54, %v478_v52  ;;  %v581_v59 = vor.u32 %v580_v56, %v579_v55  ;;  %v851_v54 = vld [vmem:[%s1367_s11] sm:$0x1] }
  0xb2   : > { %v653_v63 = vor.u32 %v652_v62, %v651_v61  ;;  %v725_v4 = vor.u32 %v724_v2, %v723_v1 }
  0xb3   : > { %988 = vmatmul.msk.bf16.vlgmr.msra.gmra.mxu1 %vm451_vm3, %v483_v58  ;;  %1023 = vmatmul.msk.bf16.vlgmr.msrb.gmra.mxu0 %vm451_vm3, %v581_v59 }
  0xb4   : > { %784 = vmatpush.bf16.msra.mxu1 %v1117_v57  ;;  %869 = vmatpush.bf16.msrb.mxu0 %v860_v44 }
  0xb8   : > { %785 = vmatpush.bf16.msra.mxu1 %v1116_v60 }
  0xbd   : > { %1049 = vmatmul.msk.bf16.vlgmr.msrb.gmra.mxu2 %vm451_vm3, %v653_v63 }
  0xbf   : > { %1062 = vmatmul.msk.bf16.vlgmr.msrb.gmra.mxu3 %vm451_vm3, %v688_v0 }
  0xc3   : > { %1036 = vmatmul.msk.bf16.vlgmr.msrb.gmra.mxu1 %vm451_vm3, %v616_v3  ;;  %1075 = vmatmul.msk.bf16.vlgmr.msra.gmra.mxu0 %vm451_vm3, %v725_v4 }
  0xcf   : > { %1094 = vmatmul.msk.bf16.vlgmr.msra.gmra.mxu3 %vm422_vm2, %v797_v16 }
  0xd3   : > { %1088 = vmatmul.msk.bf16.vlgmr.msra.gmra.mxu1 %vm451_vm3, %v762_v8  ;;  %v899_v8 = vld [vmem:[%s405_s18] sm:$0x1] }
 0x130   : > { %v508_v12 = vpop.f32.mrf.mxu1  ;;  %v535_v13 = vpop.f32.mrf.mxu2 }
 0x131   : > { %v606_v14 = vpop.f32.mrf.mxu0  ;;  %v536_v19 = vadd.f32 %v535_v13, %v508_v12 }
 0x132   : > { %v569_v15 = vpop.f32.mrf.mxu3 }
 0x133   : > { %v573_v22 = vadd.f32 %v569_v15, %v536_v19 }
 0x135   : > { %v610_v25 = vadd.f32 %v606_v14, %v573_v22 }
 0x138   : > { %v510_v17 = vpop.f32.mrf.mxu1  ;;  %v537_v18 = vpop.f32.mrf.mxu2 }
 0x139   : > { %v608_v20 = vpop.f32.mrf.mxu0 }
 0x13a   : > { %v571_v21 = vpop.f32.mrf.mxu3 }
 0x140   : > { %v641_v23 = vpop.f32.mrf.mxu1  ;;  %v678_v24 = vpop.f32.mrf.mxu2 }
 0x141   : > { %v750_v26 = vpop.f32.mrf.mxu0  ;;  %v645_v28 = vadd.f32 %v641_v23, %v610_v25 }
 0x142   : > { %v713_v27 = vpop.f32.mrf.mxu3 }
 0x143   : > { %v682_v29 = vadd.f32 %v678_v24, %v645_v28 }
 0x145   : > { %v717_v34 = vadd.f32 %v713_v27, %v682_v29 }
 0x147   : > { %v754_v35 = vadd.f32 %v750_v26, %v717_v34 }
 0x148   : > { %v643_v30 = vpop.f32.mrf.mxu1  ;;  %v680_v31 = vpop.f32.mrf.mxu2 }
 0x149   : > { %v752_v32 = vpop.f32.mrf.mxu0 }
 0x14a   : > { %v715_v33 = vpop.f32.mrf.mxu3 }
 0x150   : > { %v787_v36 = vpop.f32.mrf.mxu1 }
 0x151   : > { %v791_v37 = vadd.f32 %v787_v36, %v754_v35 }
 0x152   : > { %v842_v45 = vpop.f32.mrf.mxu3 }
 0x153   : > { %793 = vst.msk [vmem:[#allocation3] sm:$0x1] %vm792_vm5, %v791_v37 }
 0x158   : > { %v789_v38 = vpop.f32.mrf.mxu1 }
 0x15a   : > { %v794_v39 = vld [vmem:[#allocation3] sm:$0x1]  ;;  %v844_v46 = vpop.f32.mrf.mxu3 }
 0x15b   : > { %v800_v40 = vpack.c.bf16 %v794_v39, %v794_v39 }
 0x15d   : > { %1089 = vmatmul.msk.bf16.vlgmr.msra.gmra.mxu2 %vm802_vm6, %v800_v40 }
 0x1e0   : > { %v818_v47 = vpop.f32.mrf.mxu2 }
 0x1e1   : > { %v843_v49 = vadd.f32 %v842_v45, %v818_v47 }
 0x1e3   : > { %v847_v50 = vadd.f32 %v846_v48, %v843_v49 }
 0x1e5   : > { %v848_v51 = vmax.f32 %v847_v50, 0.0 }
 0x1e7   : > { %v849_v52 = vpack.c.bf16 %v848_v51, %v848_v51 }
 0x1e8   : > { %v820_v53 = vpop.f32.mrf.mxu2 }
 0x1e9   : > { %1095 = vmatmul.msk.bf16.vlgmr.msrb.gmra.mxu0 %vm852_vm8, %v849_v52 }
 0x266   : > { %v871_v55 = vpop.f32.mrf.mxu0 }
 0x267   : > { %v872_v56 = vadd.f32 %v871_v55, %v851_v54 }
 0x269   : > { %v1096_v57 = vmul.f32 -1.442695, %v872_v56 }
 0x26b   : > { %1132 = vpow2.f32 %v1096_v57 }
 0x26e   : > { %v873_v58 = vpop.f32.mrf.mxu0 }
 0x271   : > { %v1133_v59 = vpop.eup %1132 }
 0x272   : > { %v878_v60 = vadd.f32 1.0, %v1133_v59 }
 0x274   : > { %1134 = vrcp.f32 %v878_v60  ;;  %v890_v0 = vand.u32 2147483648, %v878_v60  ;;  %v888_v2 = vand.u32 2147483647, %v878_v60  ;;  %vm884_vm10 = vweird.f32 %v878_v60 }
 0x276   : > { %v891_v4 = vor.u32 1.1754944e-38, %v890_v0  ;;  %vm889_vm12 = vcmp.eq.f32.partialorder %v888_v2, 8.507059e+37 }
 0x27a   : > { %v1135_v61 = vpop.eup %1134 }
 0x27b   : > { %v880_v62 = vmul.f32 %v1135_v61, %v878_v60  ;;  %vm885_vm9 = vweird.f32 %v1135_v61 }
 0x27c   : > { %vm886_vm11 = vmor %vm884_vm10, %vm885_vm9 }
 0x27d   : > { %v881_v63 = vsub.f32 1.0, %v880_v62 }
 0x27f   : > { %v882_v1 = vmul.f32 %v1135_v61, %v881_v63 }
 0x281   : > { %v883_v3 = vadd.f32 %v1135_v61, %v882_v1 }
 0x283   : > { %v887_v5 = vsel %vm886_vm11, %v1135_v61, %v883_v3 }
 0x284   : > { %v892_v6 = vsel %vm889_vm12, %v891_v4, %v887_v5 }
 0x285   : > { %903 = vrot.lane.b32.xlu0 %v892_v6, %s1147_s19  ;;  %v894_v7 = vmul.f32 %v892_v6, %v1244_v10 }
 0x287   : > { %v895_v9 = vpack.c.bf16 %v894_v7, %v894_v7 }
 0x289   : > { %v900_v11 = vsel %vm898_vm15, %v895_v9, %v899_v8 }
 0x28a   : > { %901 = vst [vmem:[%s405_s18] sm:$0x1] %v900_v11 }
 0x291   : > { %v919_v18 = vld [vmem:[%s405_s18] sm:$0x1] }
 0x2f7   : > { %v904_v12 = vpop.permute.xlu0 %903 }
 0x2f8   : > { %v906_v13 = vmul.f32 %v904_v12, %v794_v39 }
 0x2fa   : > { %v907_v14 = vpack.c.bf16 %v906_v13, %v906_v13 }
 0x2fc   : > { %v909_v15 = vrot.slane %v907_v14, 3 }
 0x2fe   : > { %v912_v16 = vsel %vm856_vm7, %v907_v14, %v909_v15 }
 0x2ff   : > { %914 = vrot.lane.b32.xlu0 %v912_v16, %s1148_s24 }
 0x371   : > { %v915_v17 = vpop.permute.xlu0 %914 }
 0x372   : > { %v920_v10 = vsel %vm918_vm1, %v915_v17, %v919_v18 }
 0x373   : > { %921 = vst [vmem:[%s405_s18] sm:$0x1] %v920_v10 }
 0x374 PF: > { %s24_s23 = sadd.s32 1, %s1142_s23  }
 0x375   : > { %p21_p4 = scmp.ge.s32.totalorder %s24_s23, 4  }
 0x377   :  { %23 = sbr.rel (!%p21_p4) target bundleno = 3 (0x3), region = 106 }

</bundles_post_ra>
